<compile_context>
chip_gen: v7x
topology: tpu7x:2x2x1
jax: 0.10.0
libtpu: 0.0.40
codegen_flags: <defaults>
</compile_context>

<pallas_src>
import numpy as np

import jax
import jax.numpy as jnp
from jax.experimental import pallas as pl
from jax.experimental.pallas import tpu as pltpu


B_TILE = 8    # samples per grid step (M for fc = 8, conv1 M = 256, conv2 M = 128)
R1 = 32       # per-sample rows, stage 1: 13 even + pad + 13 odd conv1 rows + pad
R2 = 16       # per-sample rows, stage 2 (pool1/conv2/pool2)
KIN = 84      # conv1 input lanes: 3 stacked 28-wide image rows
C1 = 512      # conv1 output lanes: w*16 + co, w padded 26 -> 32
C2 = 384      # conv2 output lanes: wo*32 + co, wo padded 11 -> 12


def _shift_up(x, k, axis):
    """result[i] = x[i + k] (cyclic; wrap only touches unused tail rows/lanes)."""
    size = x.shape[axis]
    return pltpu.roll(x, shift=(size - k) % size, axis=axis)


# ---------------------------------------------------------------------------
# Fused forward kernel: B_TILE samples per grid step, everything VMEM-resident
# ---------------------------------------------------------------------------
def _cnn_fused_kernel(xc_ref, w1_ref, b1_ref, w2_ref, b2_ref,
                      wf1_ref, bf1_ref, wf2_ref, bf2_ref, o_ref):
    f32, bf16 = jnp.float32, jnp.bfloat16
    B = o_ref.shape[0]

    # ---- conv1: single K=84 bf16 matmul (M = B*32) + bias + ReLU ----------
    a1 = jnp.dot(xc_ref[...], w1_ref[...], preferred_element_type=f32)
    a1 = jnp.maximum(a1 + b1_ref[...], 0.0)                       # (B*32, 512)

    # ---- pool1 H: even conv rows sit in rows 0..15, odd rows in 16..31 ----
    v1 = a1.reshape(B, R1, C1)
    p1 = jnp.maximum(v1[:, 0:R2, :], v1[:, R2:R1, :]).reshape(B * R2, C1)
    # ---- pool1 W: non-decimated 16-lane shifted max (decimation is folded
    #      into w2's Toeplitz rows) -----------------------------------------
    p1 = jnp.maximum(p1, _shift_up(p1, 16, axis=1)).astype(bf16)  # (B*16, 512)

    # ---- conv2: one K=512 matmul per kernel row + roll-accumulate ---------
    y0 = jnp.dot(p1, w2_ref[0], preferred_element_type=f32)
    y1 = jnp.dot(p1, w2_ref[1], preferred_element_type=f32)
    y2 = jnp.dot(p1, w2_ref[2], preferred_element_type=f32)
    a2 = y0 + _shift_up(y1, 1, axis=0) + _shift_up(y2, 2, axis=0)
    a2 = jnp.maximum(a2 + b2_ref[...], 0.0)                       # (B*16, 384)

    # ---- pool2: non-decimated in H and W (selection folded into fc1 wts) --
    a2 = jnp.maximum(a2, _shift_up(a2, 1, axis=0))
    p2 = jnp.maximum(a2, _shift_up(a2, 32, axis=1))               # (B*16, 384)

    # ---- fc1: gather the 5 valid pooled rows per sample, ONE fused matmul -
    v2 = p2.reshape(B, R2, C2)
    p2cat = jnp.concatenate(
        [v2[:, 0], v2[:, 2], v2[:, 4], v2[:, 6], v2[:, 8]],
        axis=1).astype(bf16)                                      # (B, 1920)
    z1 = jnp.dot(p2cat, wf1_ref[...], preferred_element_type=f32)
    z1 = jnp.maximum(z1 + bf1_ref[...], 0.0)                      # (B, 128)

    # ---- fc2 (zero-padded to 128 lane-dense outputs; sliced to 10 outside) -
    z2 = jnp.dot(z1.astype(bf16), wf2_ref[...], preferred_element_type=f32)
    o_ref[...] = z2 + bf2_ref[...]                                # (B, 128)


# ---------------------------------------------------------------------------
# One-time weight preparation (all layout work hoisted out of the hot path)
# ---------------------------------------------------------------------------
def prepare_params(params):
    w1 = np.asarray(params["w1"], np.float32)       # (16, 1, 3, 3)
    b1 = np.asarray(params["b1"], np.float32)       # (16,)
    w2 = np.asarray(params["w2"], np.float32)       # (32, 16, 3, 3)
    b2 = np.asarray(params["b2"], np.float32)       # (32,)
    fw1 = np.asarray(params["w_fc1"], np.float32)   # (128, 800)
    fb1 = np.asarray(params["b_fc1"], np.float32)   # (128,)
    fw2 = np.asarray(params["w_fc2"], np.float32)   # (10, 128)
    fb2 = np.asarray(params["b_fc2"], np.float32)   # (10,)

    # conv1 Toeplitz with the 3 kernel rows stacked on K:
    #   w1c[i*28 + (w + j), w*16 + co] = w1[co, 0, i, j]
    w1c = np.zeros((KIN, C1), np.float32)
    for i in range(3):
        for j in range(3):
            for w in range(26):
                w1c[i * 28 + w + j, w * 16:(w + 1) * 16] = w1[:, 0, i, j]
    b1r = np.zeros((1, C1), np.float32)
    b1r[0, :26 * 16] = np.tile(b1, 26)

    # conv2 Toeplitz per kernel row on the non-decimated pool1 layout
    # (valid pool1 lanes at 2*pw*16 + ci):
    #   w2t[i, 2*(wo+j)*16 + ci, wo*32 + co] = w2[co, ci, i, j]
    w2t = np.zeros((3, C1, C2), np.float32)
    for i in range(3):
        for j in range(3):
            for wo in range(11):
                r0 = 2 * (wo + j) * 16
                w2t[i, r0:r0 + 16, wo * 32:(wo + 1) * 32] = w2[:, :, i, j].T
    b2r = np.zeros((1, C2), np.float32)
    b2r[0, :11 * 32] = np.tile(b2, 11)

    # fc1 with PyTorch's NCHW flatten and the pool2 lane selection folded in:
    #   wf1c[q*384 + 2*qw*32 + co, n] = fc1_w[n, co*25 + q*5 + qw]
    fw1r = fw1.reshape(128, 32, 5, 5)               # [n, co, qh, qw]
    wf1c = np.zeros((5 * C2, 128), np.float32)
    for q in range(5):
        for qw in range(5):
            r0 = q * C2 + 2 * qw * 32
            wf1c[r0:r0 + 32, :] = fw1r[:, :, q, qw].T
    bf1r = fb1[None, :]                             # (1, 128)

    # fc2, pre-transposed and zero-padded to 128 lane-dense output columns
    wf2c = np.zeros((128, 128), np.float32)
    wf2c[:, :10] = fw2.T
    bf2r = np.zeros((1, 128), np.float32)
    bf2r[0, :10] = fb2

    return {
        "w1c": jnp.asarray(w1c, jnp.bfloat16),
        "b1r": jnp.asarray(b1r, jnp.float32),
        "w2t": jnp.asarray(w2t, jnp.bfloat16),
        "b2r": jnp.asarray(b2r, jnp.float32),
        "wf1c": jnp.asarray(wf1c, jnp.bfloat16),
        "bf1r": jnp.asarray(bf1r, jnp.float32),
        "wf2c": jnp.asarray(wf2c, jnp.bfloat16),
        "bf2r": jnp.asarray(bf2r, jnp.float32),
    }


def _const_spec(a):
    return pl.BlockSpec(a.shape, lambda b, _z=(0,) * a.ndim: _z)


def _build_conv1_input(x_nchw, n_pad):
    """Stack the 3 image rows of every conv1 window on lanes; even output rows
    go to per-sample rows 0..12, odd output rows to rows 16..28 (rest zero)."""
    n = x_nchw.shape[0]
    x2 = x_nchw.reshape(n, 28, 28).astype(jnp.float32)
    if n_pad > n:
        x2 = jnp.pad(x2, ((0, n_pad - n), (0, 0), (0, 0)))
    even = jnp.concatenate([x2[:, 0:26:2], x2[:, 1:27:2], x2[:, 2:28:2]], axis=2)
    odd = jnp.concatenate([x2[:, 1:27:2], x2[:, 2:28:2], x2[:, 3:28:2]], axis=2)
    zpad = jnp.zeros((n_pad, 3, KIN), jnp.float32)
    xc = jnp.concatenate([even, zpad, odd, zpad], axis=1)   # (n_pad, 32, 84)
    return xc.reshape(n_pad * R1, KIN).astype(jnp.bfloat16)


# ---------------------------------------------------------------------------
# Forward pass
# ---------------------------------------------------------------------------
def standard_cnn_forward(x_nchw, prep):
    n = x_nchw.shape[0]
    n_pad = ((n + B_TILE - 1) // B_TILE) * B_TILE
    steps = n_pad // B_TILE
    xc = _build_conv1_input(x_nchw, n_pad)

    weights = [prep["w1c"], prep["b1r"], prep["w2t"], prep["b2r"],
               prep["wf1c"], prep["bf1r"], prep["wf2c"], prep["bf2r"]]

    flops = 2 * steps * (B_TILE * R1 * KIN * C1 + 3 * B_TILE * R2 * C1 * C2
                         + B_TILE * 5 * C2 * 128 + B_TILE * 128 * 128)
    bytes_accessed = (int(xc.size) * 2 + n_pad * 128 * 4
                      + sum(int(w.size) * w.dtype.itemsize for w in weights))

    out = pl.pallas_call(
        _cnn_fused_kernel,
        out_shape=jax.ShapeDtypeStruct((n_pad, 128), jnp.float32),
        grid=(steps,),
        in_specs=[pl.BlockSpec((B_TILE * R1, KIN), lambda b: (b, 0))]
                 + [_const_spec(w) for w in weights],
        out_specs=pl.BlockSpec((B_TILE, 128), lambda b: (b, 0)),
        compiler_params=pltpu.CompilerParams(
            dimension_semantics=("parallel",)),
        cost_estimate=pl.CostEstimate(flops=flops, transcendentals=0,
                                      bytes_accessed=bytes_accessed),
    )(xc, *weights)

    return out[:n, :10]


# ---------------------------------------------------------------------------
# Plain-JAX reference (self-check) and PyTorch-layout param init
# ---------------------------------------------------------------------------
def _reference_forward(x, params):
    dn = ("NCHW", "OIHW", "NCHW")
    hi = jax.lax.Precision.HIGHEST
    y = jax.lax.conv_general_dilated(x, params["w1"], (1, 1), "VALID",
                                     dimension_numbers=dn, precision=hi)
    y = jax.nn.relu(y + params["b1"][None, :, None, None])
    y = jax.lax.reduce_window(y, -jnp.inf, jax.lax.max,
                              (1, 1, 2, 2), (1, 1, 2, 2), "VALID")
    y = jax.lax.conv_general_dilated(y, params["w2"], (1, 1), "VALID",
                                     dimension_numbers=dn, precision=hi)
    y = jax.nn.relu(y + params["b2"][None, :, None, None])
    y = jax.lax.reduce_window(y, -jnp.inf, jax.lax.max,
                              (1, 1, 2, 2), (1, 1, 2, 2), "VALID")
    y = y.reshape(y.shape[0], -1)
    y = jax.nn.relu(jnp.dot(y, params["w_fc1"].T, precision=hi)
                    + params["b_fc1"])
    return jnp.dot(y, params["w_fc2"].T, precision=hi) + params["b_fc2"]


def init_params(key):
    ks = jax.random.split(key, 8)
    s = 0.1
    return {
        "w1": s * jax.random.normal(ks[0], (16, 1, 3, 3), jnp.float32),
        "b1": s * jax.random.normal(ks[1], (16,), jnp.float32),
        "w2": s * jax.random.normal(ks[2], (32, 16, 3, 3), jnp.float32),
        "b2": s * jax.random.normal(ks[3], (32,), jnp.float32),
        "w_fc1": s * jax.random.normal(ks[4], (128, 32 * 5 * 5), jnp.float32),
        "b_fc1": s * jax.random.normal(ks[5], (128,), jnp.float32),
        "w_fc2": s * jax.random.normal(ks[6], (10, 128), jnp.float32),
        "b_fc2": s * jax.random.normal(ks[7], (10,), jnp.float32),
    }


if __name__ == "__main__":
    key = jax.random.PRNGKey(0)
    k_param, k_x = jax.random.split(key)
    params = init_params(k_param)
    prep = prepare_params(params)          # one-time layout / dtype work

    # Spatial size 28 is forced by fc1 expecting 32*5*5 features; batch small.
    x = jax.random.normal(k_x, (2, 1, 28, 28), jnp.float32)

    fwd = jax.jit(standard_cnn_forward)
    out = jax.block_until_ready(fwd(x, prep))
    assert out.shape == (2, 10), out.shape

    ref = jax.block_until_ready(_reference_forward(x, params))
    err = float(jnp.max(jnp.abs(out - ref)))
    assert err < 5e-2, f"max abs err vs reference: {err}"

    print("KERNEL_OK")
</pallas_src>

<mosaic_0001>
module attributes {stable_mosaic.version = 11 : i64} {
  func.func @_cnn_fused_kernel(%arg0: i32, %arg1: memref<256x84xbf16, #tpu.memory_space<vmem>>, %arg2: memref<84x512xbf16, #tpu.memory_space<vmem>>, %arg3: memref<1x512xf32, #tpu.memory_space<vmem>>, %arg4: memref<3x512x384xbf16, #tpu.memory_space<vmem>>, %arg5: memref<1x384xf32, #tpu.memory_space<vmem>>, %arg6: memref<1920x128xbf16, #tpu.memory_space<vmem>>, %arg7: memref<1x128xf32, #tpu.memory_space<vmem>>, %arg8: memref<128x128xbf16, #tpu.memory_space<vmem>>, %arg9: memref<1x128xf32, #tpu.memory_space<vmem>>, %arg10: memref<8x128xf32, #tpu.memory_space<vmem>>) attributes {dimension_semantics = [#tpu.dimension_semantics<parallel>], iteration_bounds = array<i64: 1>, scalar_prefetch = 0 : i64, scratch_operands = 0 : i64, tpu.core_type = #tpu.core_type<tc>, window_params = [{transform_indices = @transform_0, window_bounds = array<i64: 256, 84>}, {pipeline_mode = #tpu.pipeline_mode<synchronous>, transform_indices = @transform_1, window_bounds = array<i64: 84, 512>}, {pipeline_mode = #tpu.pipeline_mode<synchronous>, transform_indices = @transform_2, window_bounds = array<i64: 1, 512>}, {pipeline_mode = #tpu.pipeline_mode<synchronous>, transform_indices = @transform_3, window_bounds = array<i64: 3, 512, 384>}, {pipeline_mode = #tpu.pipeline_mode<synchronous>, transform_indices = @transform_4, window_bounds = array<i64: 1, 384>}, {pipeline_mode = #tpu.pipeline_mode<synchronous>, transform_indices = @transform_5, window_bounds = array<i64: 1920, 128>}, {pipeline_mode = #tpu.pipeline_mode<synchronous>, transform_indices = @transform_6, window_bounds = array<i64: 1, 128>}, {pipeline_mode = #tpu.pipeline_mode<synchronous>, transform_indices = @transform_7, window_bounds = array<i64: 128, 128>}, {pipeline_mode = #tpu.pipeline_mode<synchronous>, transform_indices = @transform_8, window_bounds = array<i64: 1, 128>}, {transform_indices = @transform_9, window_bounds = array<i64: 8, 128>}]} {
    %c0 = arith.constant 0 : index
    %c0_0 = arith.constant 0 : index
    %0 = vector.load %arg1[%c0, %c0_0] : memref<256x84xbf16, #tpu.memory_space<vmem>>, vector<256x84xbf16>
    %c0_1 = arith.constant 0 : index
    %c0_2 = arith.constant 0 : index
    %1 = vector.load %arg2[%c0_1, %c0_2] : memref<84x512xbf16, #tpu.memory_space<vmem>>, vector<84x512xbf16>
    %cst = arith.constant dense<0.000000e+00> : vector<256x512xf32>
    %2 = tpu.matmul %0, %1, %cst {dimension_numbers = #tpu.dot_dimension_numbers<[1], [0], [0], [1], [0, 0, 1, 1], [], []>} : vector<256x84xbf16>, vector<84x512xbf16>, vector<256x512xf32> -> vector<256x512xf32>
    %c0_3 = arith.constant 0 : index
    %c0_4 = arith.constant 0 : index
    %3 = vector.load %arg3[%c0_3, %c0_4] : memref<1x512xf32, #tpu.memory_space<vmem>>, vector<1x512xf32>
    %4 = vector.broadcast %3 : vector<1x512xf32> to vector<256x512xf32>
    %5 = arith.addf %2, %4 : vector<256x512xf32>
    %cst_5 = arith.constant 0.000000e+00 : f32
    %6 = vector.broadcast %cst_5 : f32 to vector<256x512xf32>
    %7 = arith.maximumf %5, %6 : vector<256x512xf32>
    %8 = vector.shape_cast %7 : vector<256x512xf32> to vector<8x32x512xf32>
    %9 = vector.extract_strided_slice %8 {offsets = [0, 0, 0], sizes = [8, 16, 512], strides = [1, 1, 1]} : vector<8x32x512xf32> to vector<8x16x512xf32>
    %10 = vector.extract_strided_slice %8 {offsets = [0, 16, 0], sizes = [8, 16, 512], strides = [1, 1, 1]} : vector<8x32x512xf32> to vector<8x16x512xf32>
    %11 = arith.maximumf %9, %10 : vector<8x16x512xf32>
    %12 = vector.shape_cast %11 : vector<8x16x512xf32> to vector<128x512xf32>
    %c496_i32 = arith.constant 496 : i32
    %13 = tpu.dynamic_rotate %12 by %c496_i32 dim 1 : vector<128x512xf32>, i32 -> vector<128x512xf32>
    %14 = arith.maximumf %12, %13 : vector<128x512xf32>
    %15 = arith.truncf %14 : vector<128x512xf32> to vector<128x512xbf16>
    %c0_6 = arith.constant 0 : index
    %c0_7 = arith.constant 0 : index
    %c0_8 = arith.constant 0 : index
    %16 = vector.load %arg4[%c0_6, %c0_7, %c0_8] : memref<3x512x384xbf16, #tpu.memory_space<vmem>>, vector<1x512x384xbf16>
    %17 = vector.shape_cast %16 : vector<1x512x384xbf16> to vector<512x384xbf16>
    %cst_9 = arith.constant dense<0.000000e+00> : vector<128x384xf32>
    %18 = tpu.matmul %15, %17, %cst_9 {dimension_numbers = #tpu.dot_dimension_numbers<[1], [0], [0], [1], [0, 0, 1, 1], [], []>} : vector<128x512xbf16>, vector<512x384xbf16>, vector<128x384xf32> -> vector<128x384xf32>
    %c1 = arith.constant 1 : index
    %c0_10 = arith.constant 0 : index
    %c0_11 = arith.constant 0 : index
    %19 = vector.load %arg4[%c1, %c0_10, %c0_11] : memref<3x512x384xbf16, #tpu.memory_space<vmem>>, vector<1x512x384xbf16>
    %20 = vector.shape_cast %19 : vector<1x512x384xbf16> to vector<512x384xbf16>
    %cst_12 = arith.constant dense<0.000000e+00> : vector<128x384xf32>
    %21 = tpu.matmul %15, %20, %cst_12 {dimension_numbers = #tpu.dot_dimension_numbers<[1], [0], [0], [1], [0, 0, 1, 1], [], []>} : vector<128x512xbf16>, vector<512x384xbf16>, vector<128x384xf32> -> vector<128x384xf32>
    %c2 = arith.constant 2 : index
    %c0_13 = arith.constant 0 : index
    %c0_14 = arith.constant 0 : index
    %22 = vector.load %arg4[%c2, %c0_13, %c0_14] : memref<3x512x384xbf16, #tpu.memory_space<vmem>>, vector<1x512x384xbf16>
    %23 = vector.shape_cast %22 : vector<1x512x384xbf16> to vector<512x384xbf16>
    %cst_15 = arith.constant dense<0.000000e+00> : vector<128x384xf32>
    %24 = tpu.matmul %15, %23, %cst_15 {dimension_numbers = #tpu.dot_dimension_numbers<[1], [0], [0], [1], [0, 0, 1, 1], [], []>} : vector<128x512xbf16>, vector<512x384xbf16>, vector<128x384xf32> -> vector<128x384xf32>
    %c127_i32 = arith.constant 127 : i32
    %25 = tpu.dynamic_rotate %21 by %c127_i32 dim 0 : vector<128x384xf32>, i32 -> vector<128x384xf32>
    %26 = arith.addf %18, %25 : vector<128x384xf32>
    %c126_i32 = arith.constant 126 : i32
    %27 = tpu.dynamic_rotate %24 by %c126_i32 dim 0 : vector<128x384xf32>, i32 -> vector<128x384xf32>
    %28 = arith.addf %26, %27 : vector<128x384xf32>
    %c0_16 = arith.constant 0 : index
    %c0_17 = arith.constant 0 : index
    %29 = vector.load %arg5[%c0_16, %c0_17] : memref<1x384xf32, #tpu.memory_space<vmem>>, vector<1x384xf32>
    %30 = vector.broadcast %29 : vector<1x384xf32> to vector<128x384xf32>
    %31 = arith.addf %28, %30 : vector<128x384xf32>
    %cst_18 = arith.constant 0.000000e+00 : f32
    %32 = vector.broadcast %cst_18 : f32 to vector<128x384xf32>
    %33 = arith.maximumf %31, %32 : vector<128x384xf32>
    %c127_i32_19 = arith.constant 127 : i32
    %34 = tpu.dynamic_rotate %33 by %c127_i32_19 dim 0 : vector<128x384xf32>, i32 -> vector<128x384xf32>
    %35 = arith.maximumf %33, %34 : vector<128x384xf32>
    %c352_i32 = arith.constant 352 : i32
    %36 = tpu.dynamic_rotate %35 by %c352_i32 dim 1 : vector<128x384xf32>, i32 -> vector<128x384xf32>
    %37 = arith.maximumf %35, %36 : vector<128x384xf32>
    %38 = vector.shape_cast %37 : vector<128x384xf32> to vector<8x16x384xf32>
    %39 = vector.extract_strided_slice %38 {offsets = [0, 0, 0], sizes = [8, 1, 384], strides = [1, 1, 1]} : vector<8x16x384xf32> to vector<8x1x384xf32>
    %40 = vector.shape_cast %39 : vector<8x1x384xf32> to vector<8x384xf32>
    %41 = vector.extract_strided_slice %38 {offsets = [0, 2, 0], sizes = [8, 1, 384], strides = [1, 1, 1]} : vector<8x16x384xf32> to vector<8x1x384xf32>
    %42 = vector.shape_cast %41 : vector<8x1x384xf32> to vector<8x384xf32>
    %43 = vector.extract_strided_slice %38 {offsets = [0, 4, 0], sizes = [8, 1, 384], strides = [1, 1, 1]} : vector<8x16x384xf32> to vector<8x1x384xf32>
    %44 = vector.shape_cast %43 : vector<8x1x384xf32> to vector<8x384xf32>
    %45 = vector.extract_strided_slice %38 {offsets = [0, 6, 0], sizes = [8, 1, 384], strides = [1, 1, 1]} : vector<8x16x384xf32> to vector<8x1x384xf32>
    %46 = vector.shape_cast %45 : vector<8x1x384xf32> to vector<8x384xf32>
    %47 = vector.extract_strided_slice %38 {offsets = [0, 8, 0], sizes = [8, 1, 384], strides = [1, 1, 1]} : vector<8x16x384xf32> to vector<8x1x384xf32>
    %48 = vector.shape_cast %47 : vector<8x1x384xf32> to vector<8x384xf32>
    %49 = tpu.concatenate %40, %42, %44, %46, %48 in 1 : vector<8x384xf32>, vector<8x384xf32>, vector<8x384xf32>, vector<8x384xf32>, vector<8x384xf32> -> vector<8x1920xf32>
    %50 = arith.truncf %49 : vector<8x1920xf32> to vector<8x1920xbf16>
    %c0_20 = arith.constant 0 : index
    %c0_21 = arith.constant 0 : index
    %51 = vector.load %arg6[%c0_20, %c0_21] : memref<1920x128xbf16, #tpu.memory_space<vmem>>, vector<1920x128xbf16>
    %cst_22 = arith.constant dense<0.000000e+00> : vector<8x128xf32>
    %52 = tpu.matmul %50, %51, %cst_22 {dimension_numbers = #tpu.dot_dimension_numbers<[1], [0], [0], [1], [0, 0, 1, 1], [], []>} : vector<8x1920xbf16>, vector<1920x128xbf16>, vector<8x128xf32> -> vector<8x128xf32>
    %c0_23 = arith.constant 0 : index
    %c0_24 = arith.constant 0 : index
    %53 = vector.load %arg7[%c0_23, %c0_24] : memref<1x128xf32, #tpu.memory_space<vmem>>, vector<1x128xf32>
    %54 = vector.broadcast %53 : vector<1x128xf32> to vector<8x128xf32>
    %55 = arith.addf %52, %54 : vector<8x128xf32>
    %cst_25 = arith.constant 0.000000e+00 : f32
    %56 = vector.broadcast %cst_25 : f32 to vector<8x128xf32>
    %57 = arith.maximumf %55, %56 : vector<8x128xf32>
    %58 = arith.truncf %57 : vector<8x128xf32> to vector<8x128xbf16>
    %c0_26 = arith.constant 0 : index
    %c0_27 = arith.constant 0 : index
    %59 = vector.load %arg8[%c0_26, %c0_27] : memref<128x128xbf16, #tpu.memory_space<vmem>>, vector<128x128xbf16>
    %cst_28 = arith.constant dense<0.000000e+00> : vector<8x128xf32>
    %60 = tpu.matmul %58, %59, %cst_28 {dimension_numbers = #tpu.dot_dimension_numbers<[1], [0], [0], [1], [0, 0, 1, 1], [], []>} : vector<8x128xbf16>, vector<128x128xbf16>, vector<8x128xf32> -> vector<8x128xf32>
    %c0_29 = arith.constant 0 : index
    %c0_30 = arith.constant 0 : index
    %61 = vector.load %arg9[%c0_29, %c0_30] : memref<1x128xf32, #tpu.memory_space<vmem>>, vector<1x128xf32>
    %62 = vector.broadcast %61 : vector<1x128xf32> to vector<8x128xf32>
    %63 = arith.addf %60, %62 : vector<8x128xf32>
    %c0_31 = arith.constant 0 : index
    %c0_32 = arith.constant 0 : index
    %64 = vector.load %arg10[%c0_31, %c0_32] : memref<8x128xf32, #tpu.memory_space<vmem>>, vector<8x128xf32>
    tpu.vector_store %arg10[%c0_31, %c0_32], %63 {strides = array<i32>} : memref<8x128xf32, #tpu.memory_space<vmem>>, vector<8x128xf32>,
    return
  }
  func.func @transform_0(%arg0: i32) -> (i32, i32) {
    %c0_i32 = arith.constant 0 : i32
    %c0_i32_0 = arith.constant 0 : i32
    return %arg0, %c0_i32 : i32, i32
  }
  func.func @transform_1(%arg0: i32) -> (i32, i32) {
    %c0_i32 = arith.constant 0 : i32
    %c0_i32_0 = arith.constant 0 : i32
    %c0_i32_1 = arith.constant 0 : i32
    return %c0_i32, %c0_i32_0 : i32, i32
  }
  func.func @transform_2(%arg0: i32) -> (i32, i32) {
    %c0_i32 = arith.constant 0 : i32
    %c0_i32_0 = arith.constant 0 : i32
    %c0_i32_1 = arith.constant 0 : i32
    return %c0_i32, %c0_i32_0 : i32, i32
  }
  func.func @transform_3(%arg0: i32) -> (i32, i32, i32) {
    %c0_i32 = arith.constant 0 : i32
    %c0_i32_0 = arith.constant 0 : i32
    %c0_i32_1 = arith.constant 0 : i32
    %c0_i32_2 = arith.constant 0 : i32
    return %c0_i32, %c0_i32_0, %c0_i32_1 : i32, i32, i32
  }
  func.func @transform_4(%arg0: i32) -> (i32, i32) {
    %c0_i32 = arith.constant 0 : i32
    %c0_i32_0 = arith.constant 0 : i32
    %c0_i32_1 = arith.constant 0 : i32
    return %c0_i32, %c0_i32_0 : i32, i32
  }
  func.func @transform_5(%arg0: i32) -> (i32, i32) {
    %c0_i32 = arith.constant 0 : i32
    %c0_i32_0 = arith.constant 0 : i32
    %c0_i32_1 = arith.constant 0 : i32
    return %c0_i32, %c0_i32_0 : i32, i32
  }
  func.func @transform_6(%arg0: i32) -> (i32, i32) {
    %c0_i32 = arith.constant 0 : i32
    %c0_i32_0 = arith.constant 0 : i32
    %c0_i32_1 = arith.constant 0 : i32
    return %c0_i32, %c0_i32_0 : i32, i32
  }
  func.func @transform_7(%arg0: i32) -> (i32, i32) {
    %c0_i32 = arith.constant 0 : i32
    %c0_i32_0 = arith.constant 0 : i32
    %c0_i32_1 = arith.constant 0 : i32
    return %c0_i32, %c0_i32_0 : i32, i32
  }
  func.func @transform_8(%arg0: i32) -> (i32, i32) {
    %c0_i32 = arith.constant 0 : i32
    %c0_i32_0 = arith.constant 0 : i32
    %c0_i32_1 = arith.constant 0 : i32
    return %c0_i32, %c0_i32_0 : i32, i32
  }
  func.func @transform_9(%arg0: i32) -> (i32, i32) {
    %c0_i32 = arith.constant 0 : i32
    %c0_i32_0 = arith.constant 0 : i32
    return %arg0, %c0_i32 : i32, i32
  }
}

</mosaic_0001>

<bundles_post_ra>
// kernel: standard_cnn_forward.1
= control target key start
LH: loop header
LB: loop body
LE: loop exit
PB: predicated region body
PF: predicated region fallthrough
CT: control target
= control target key end

     0   :  { %14 = vsyncpa [#allocation3], 0  ;;  %s12590_s0 = inlined_call_operand.vmem [shape: bf16[256,84], index: 0, kind: input, shape index: {}]   ;;  %s12591_s1 = inlined_call_operand.hbm [shape: bf16[84,512], index: 1, kind: input, shape index: {}]   ;;  %s12592_s2 = inlined_call_operand.hbm [shape: f32[1,512], index: 2, kind: input, shape index: {}]   ;;  %s12593_s3 = inlined_call_operand.hbm [shape: bf16[3,512,384], index: 3, kind: input, shape index: {}]   ;;  %s12594_s4 = inlined_call_operand.hbm [shape: f32[1,384], index: 4, kind: input, shape index: {}]   ;;  %s12595_s5 = inlined_call_operand.hbm [shape: bf16[1920,128], index: 5, kind: input, shape index: {}]   ;;  %s12596_s6 = inlined_call_operand.hbm [shape: f32[1,128], index: 6, kind: input, shape index: {}]   ;;  %s12597_s7 = inlined_call_operand.hbm [shape: bf16[128,128], index: 7, kind: input, shape index: {}]   ;;  %s12598_s8 = inlined_call_operand.hbm [shape: f32[1,128], index: 8, kind: input, shape index: {}]   ;;  %s12599_s9 = inlined_call_operand.vmem [shape: f32[8,128], index: 9, kind: output, shape index: {}]  }
   0x1   :  { %15 = vsyncpa [#allocation5], 0 }
   0x2   :  { %16 = vsyncpa [#allocation8], 0 }
   0x3   :  { %17 = vsyncpa [#allocation11], 0 }
   0x4   :  { %18 = vsyncpa [#allocation14], 0  ;;  %s9175_s30 = smov [#allocation4]   ;;  %s9176_s11 = smov [#allocation7]  }
   0x5   :  { %s39_s10 = sshll.u32 %s9175_s30, 4  ;;  %s61_s12 = sshll.u32 %s9176_s11, 4  ;;  %s40_s10 = int_to_ptr.vmem [resolvable:$true] %s39_s10  ;;  %s62_s12 = int_to_ptr.vmem [resolvable:$true] %s61_s12 }
   0x6   :  { %s8989_s15 = scalar_lea.hbm %s12592_s2, 64 }
   0x7   :  { %p8990_p0 = scmp.ne.s32.totalorder %s12592_s2, %s8989_s15  ;;  %p8993_p1 = scmp.lt.u32.totalorder %s8989_s15, %s12592_s2 }
   0x9   :  { %p8995_p2 = pnand %p8993_p1, %p8990_p0 }
   0xb   :  { %8998 = shalt.err (!%p8995_p2)
}
   0xc   :  { %s8999_s20 = scalar_lea.vmem %s40_s10, 64  ;;  %p9004_p4 = scmp.lt.s32.totalorder %s40_s10, %s40_s10 }
   0xd   :  { %p9000_p3 = scmp.ne.s32.totalorder %s40_s10, %s8999_s20  ;;  %p9005_p5 = scmp.lt.s32.totalorder %s8999_s20, %s8999_s20 }
   0xf   :  { %p9006_p6 = por %p9005_p5, %p9004_p4 }
  0x11   :  { %p9007_p7 = pnand %p9006_p6, %p9000_p3 }
  0x13   :  { %9010 = shalt.err (!%p9007_p7)
}
  0x14   :  { %42 = dma.hbm_to_vmem [thread:$0]  %s12592_s2, 64, %s40_s10, [#allocation5]  }
  0x15   :  { %s9011_s25 = scalar_lea.hbm %s12594_s4, 48 }
  0x16   :  { %p9012_p8 = scmp.ne.s32.totalorder %s12594_s4, %s9011_s25  ;;  %p9015_p9 = scmp.lt.u32.totalorder %s9011_s25, %s12594_s4 }
  0x18   :  { %p9017_p10 = pnand %p9015_p9, %p9012_p8 }
  0x1a   :  { %9020 = shalt.err (!%p9017_p10)
}
  0x1b   :  { %s9021_s30 = scalar_lea.vmem %s62_s12, 48  ;;  %s9025_s11 = scalar_lea.vmem %s62_s12, 64 }
  0x1c   :  { %p9022_p11 = scmp.ne.s32.totalorder %s62_s12, %s9021_s30  ;;  %p9026_p12 = scmp.lt.s32.totalorder %s62_s12, %s62_s12 }
  0x1d   :  { %p9027_p13 = scmp.lt.s32.totalorder %s9025_s11, %s9021_s30 }
  0x1f   :  { %p9028_p0 = por %p9027_p13, %p9026_p12 }
  0x21   :  { %p9029_p1 = pnand %p9028_p0, %p9022_p11 }
  0x23   :  { %9032 = shalt.err (!%p9029_p1)
}
  0x24   :  { %64 = dma.hbm_to_vmem [thread:$0]  %s12594_s4, 48, %s62_s12, [#allocation8]  }
  0x25   :  { %s9177_s13 = smov [#allocation10]   ;;  %s9178_s15 = smov [#allocation2]  }
  0x26   :  { %s83_s14 = sshll.u32 %s9177_s13, 4  ;;  %s26_s16 = sshll.u32 %s9178_s15, 4  ;;  %s84_s14 = int_to_ptr.vmem [resolvable:$true] %s83_s14  ;;  %s9268_s16 = int_to_ptr.vmem [resolvable:$true] %s26_s16 }
  0x27   :  { %s9033_s19 = scalar_lea.hbm %s12596_s6, 16 }
  0x28   :  { %p9034_p2 = scmp.ne.s32.totalorder %s12596_s6, %s9033_s19  ;;  %p9037_p3 = scmp.lt.u32.totalorder %s9033_s19, %s12596_s6 }
  0x2a   :  { %p9039_p4 = pnand %p9037_p3, %p9034_p2 }
  0x2c   :  { %9042 = shalt.err (!%p9039_p4)
}
  0x2d   :  { %s9043_s4 = scalar_lea.vmem %s84_s14, 16  ;;  %s9047_s12 = scalar_lea.vmem %s84_s14, 32 }
  0x2e   :  { %p9044_p5 = scmp.ne.s32.totalorder %s84_s14, %s9043_s4  ;;  %p9048_p6 = scmp.lt.s32.totalorder %s84_s14, %s84_s14 }
  0x2f   :  { %p9049_p7 = scmp.lt.s32.totalorder %s9047_s12, %s9043_s4 }
  0x31   :  { %p9050_p8 = por %p9049_p7, %p9048_p6 }
  0x33   :  { %p9051_p9 = pnand %p9050_p8, %p9044_p5 }
  0x35   :  { %9054 = shalt.err (!%p9051_p9)
}
  0x36   :  { %86 = dma.hbm_to_vmem [thread:$0]  %s12596_s6, 16, %s84_s14, [#allocation11]  }
  0x37   :  { %s9055_s28 = scalar_lea.hbm %s12591_s1, 2816 }
  0x38   :  { %p9056_p10 = scmp.ne.s32.totalorder %s12591_s1, %s9055_s28  ;;  %p9059_p11 = scmp.lt.u32.totalorder %s9055_s28, %s12591_s1 }
  0x3a   :  { %p9061_p12 = pnand %p9059_p11, %p9056_p10 }
  0x3c   :  { %9064 = shalt.err (!%p9061_p12)
}
  0x3d   :  { %s9065_s10 = scalar_lea.vmem %s9268_s16, 2816  ;;  %p9070_p0 = scmp.lt.s32.totalorder %s9268_s16, %s9268_s16 }
  0x3e   :  { %p9066_p13 = scmp.ne.s32.totalorder %s9268_s16, %s9065_s10  ;;  %p9071_p1 = scmp.lt.s32.totalorder %s9065_s10, %s9065_s10 }
  0x40   :  { %p9072_p2 = por %p9071_p1, %p9070_p0 }
  0x42   :  { %p9073_p3 = pnand %p9072_p2, %p9066_p13 }
  0x44   :  { %9076 = shalt.err (!%p9073_p3)
}
  0x45   :  { %s9179_s6 = smov 256   ;;  %s9180_s13 = smov 16  }
  0x46   :  { %32 = dma.hbm_to_vmem [thread:$0]  %s12591_s1, 2816, %s9268_s16, [#allocation3], %s9179_s6, %s9179_s6, %s9180_s13  }
  0x47   :  { %s9181_s17 = smov [#allocation6]   ;;  %s9077_s21 = scalar_lea.hbm %s12593_s3, 36864 }
  0x48   :  { %s48_s18 = sshll.u32 %s9181_s17, 4  ;;  %p9078_p4 = scmp.ne.s32.totalorder %s12593_s3, %s9077_s21  ;;  %s49_s18 = int_to_ptr.vmem [resolvable:$true] %s48_s18 }
  0x49   :  { %p9081_p5 = scmp.lt.u32.totalorder %s9077_s21, %s12593_s3 }
  0x4b   :  { %p9083_p6 = pnand %p9081_p5, %p9078_p4 }
  0x4d   :  { %9086 = shalt.err (!%p9083_p6)
}
  0x4e   :  { %s9087_s24 = scalar_lea.vmem %s49_s18, 36864  ;;  %p9092_p8 = scmp.lt.s32.totalorder %s49_s18, %s49_s18 }
  0x4f   :  { %p9088_p7 = scmp.ne.s32.totalorder %s49_s18, %s9087_s24  ;;  %p9093_p9 = scmp.lt.s32.totalorder %s9087_s24, %s9087_s24 }
  0x51   :  { %p9094_p10 = por %p9093_p9, %p9092_p8 }
  0x53   :  { %p9095_p11 = pnand %p9094_p10, %p9088_p7 }
  0x55   :  { %9098 = shalt.err (!%p9095_p11)
}
  0x56   :  { %s9182_s1 = smov 192   ;;  %s9183_s16 = smov 12  }
  0x57   :  { %54 = dma.hbm_to_vmem [thread:$0]  %s12593_s3, 36864, %s49_s18, [#allocation5], %s9182_s1, %s9182_s1, %s9183_s16  }
  0x58   :  { %s9184_s27 = smov [#allocation9]   ;;  %s9099_s11 = scalar_lea.hbm %s12595_s5, 15360 }
  0x59   :  { %s70_s28 = sshll.u32 %s9184_s27, 4  ;;  %p9100_p12 = scmp.ne.s32.totalorder %s12595_s5, %s9099_s11  ;;  %s71_s28 = int_to_ptr.vmem [resolvable:$true] %s70_s28 }
  0x5a   :  { %p9103_p13 = scmp.lt.u32.totalorder %s9099_s11, %s12595_s5 }
  0x5c   :  { %p9105_p0 = pnand %p9103_p13, %p9100_p12 }
  0x5e   :  { %9108 = shalt.err (!%p9105_p0)
}
  0x5f   :  { %s9109_s14 = scalar_lea.vmem %s71_s28, 15360  ;;  %p9114_p2 = scmp.lt.s32.totalorder %s71_s28, %s71_s28 }
  0x60   :  { %p9110_p1 = scmp.ne.s32.totalorder %s71_s28, %s9109_s14  ;;  %p9115_p3 = scmp.lt.s32.totalorder %s9109_s14, %s9109_s14 }
  0x62   :  { %p9116_p4 = por %p9115_p3, %p9114_p2 }
  0x64   :  { %p9117_p5 = pnand %p9116_p4, %p9110_p1 }
  0x66   :  { %9120 = shalt.err (!%p9117_p5)
}
  0x67   :  { %s9185_s3 = smov 64   ;;  %s9186_s15 = smov 4  }
  0x68   :  { %76 = dma.hbm_to_vmem [thread:$0]  %s12595_s5, 15360, %s71_s28, [#allocation8], %s9185_s3, %s9185_s3, %s9186_s15  }
  0x69   :  { %s9187_s19 = smov [#allocation12]   ;;  %s9188_s21 = smov [#allocation13]  }
  0x6a   :  { %s92_s20 = sshll.u32 %s9187_s19, 4  ;;  %s105_s22 = sshll.u32 %s9188_s21, 4  ;;  %s93_s20 = int_to_ptr.vmem [resolvable:$true] %s92_s20  ;;  %s106_s22 = int_to_ptr.vmem [resolvable:$true] %s105_s22 }
  0x6b   :  { %s9121_s12 = scalar_lea.hbm %s12597_s7, 1024 }
  0x6c   :  { %p9122_p6 = scmp.ne.s32.totalorder %s12597_s7, %s9121_s12  ;;  %p9125_p7 = scmp.lt.u32.totalorder %s9121_s12, %s12597_s7 }
  0x6e   :  { %p9127_p8 = pnand %p9125_p7, %p9122_p6 }
  0x70   :  { %9130 = shalt.err (!%p9127_p8)
}
  0x71   :  { %s9131_s5 = scalar_lea.vmem %s93_s20, 1024  ;;  %p9136_p10 = scmp.lt.s32.totalorder %s93_s20, %s93_s20 }
  0x72   :  { %p9132_p9 = scmp.ne.s32.totalorder %s93_s20, %s9131_s5  ;;  %p9137_p11 = scmp.lt.s32.totalorder %s9131_s5, %s9131_s5 }
  0x74   :  { %p9138_p12 = por %p9137_p11, %p9136_p10 }
  0x76   :  { %p9139_p13 = pnand %p9138_p12, %p9132_p9 }
  0x78   :  { %9142 = shalt.err (!%p9139_p13)
}
  0x79   :  { %98 = dma.hbm_to_vmem [thread:$0]  %s12597_s7, 1024, %s93_s20, [#allocation11], %s9185_s3, %s9185_s3, %s9186_s15  }
  0x7a   :  { %s9143_s30 = scalar_lea.hbm %s12598_s8, 16 }
  0x7b   :  { %p9144_p0 = scmp.ne.s32.totalorder %s12598_s8, %s9143_s30  ;;  %p9147_p1 = scmp.lt.u32.totalorder %s9143_s30, %s12598_s8 }
  0x7d   :  { %p9149_p2 = pnand %p9147_p1, %p9144_p0 }
  0x7f   :  { %9152 = shalt.err (!%p9149_p2)
}
  0x80   :  { %s9153_s13 = scalar_lea.vmem %s106_s22, 16  ;;  %s9157_s14 = scalar_lea.vmem %s106_s22, 32 }
  0x81   :  { %p9154_p3 = scmp.ne.s32.totalorder %s106_s22, %s9153_s13  ;;  %p9158_p4 = scmp.lt.s32.totalorder %s106_s22, %s106_s22 }
  0x82   :  { %p9159_p5 = scmp.lt.s32.totalorder %s9157_s14, %s9153_s13 }
  0x84   :  { %p9160_p6 = por %p9159_p5, %p9158_p4 }
  0x86   :  { %p9161_p7 = pnand %p9160_p6, %p9154_p3 }
  0x88   :  { %9164 = shalt.err (!%p9161_p7)
}
  0x89   :  { %108 = dma.hbm_to_vmem [thread:$0]  %s12598_s8, 16, %s106_s22, [#allocation14]  }
  0x8a   :  { %9165 = dma.done.wait [#allocation3], 2816  }
  0x8b   :  { %9166 = vsyncadd [#allocation3], 4294964480 }
  0x8c   :  { %9167 = dma.done.wait [#allocation5], 36928  }
  0x8d   :  { %9168 = vsyncadd [#allocation5], 4294930368 }
  0x8e   :  { %9169 = dma.done.wait [#allocation8], 15408  }
  0x8f   :  { %9170 = vsyncadd [#allocation8], 4294951888 }
  0x90   :  { %9171 = dma.done.wait [#allocation11], 1040  }
  0x91   :  { %9172 = vsyncadd [#allocation11], 4294966256 }
  0x92   :  { %9173 = dma.done.wait [#allocation14], 16  }
  0x93   :  { %9174 = vsyncadd [#allocation14], 4294967280  ;;  %v9189_v0 = vmov 0   ;;  %v8427_v1 = vld [vmem:[#allocation2 + $0x4] ss:$16 sps:$4 sm:$0xff]   ;;  %vm449_vm0 = vcmask 1041408   ;;  %v12603_v45 = vlaneseq }
  0x94   :  { %494 = vmatprep.mubr.bf16.mxu0 %v9189_v0  ;;  %687 = vmatprep.mubr.bf16.mxu1 %v9189_v0  ;;  %v8429_v2 = vld [vmem:[#allocation2 + $0xc] ss:$16 sps:$4 sm:$0xff]   ;;  %v8431_v3 = vld [vmem:[#allocation2] ss:$16 sps:$4 sm:$0xff]   ;;  %v8432_v4 = vld [vmem:[#allocation2 + $0x8] ss:$16 sps:$4 sm:$0xff]  }
  0x95   :  { %462 = vmatprep.subr.bf16.mxu0 %v8427_v1  ;;  %655 = vmatprep.subr.bf16.mxu1 %v8429_v2  ;;  %v8433_v5 = vld [vmem:[#allocation2 + $0x24] ss:$16 sps:$4 sm:$0xff]   ;;  %v8435_v6 = vld [vmem:[#allocation2 + $0x2c] ss:$16 sps:$4 sm:$0xff]   ;;  %v8437_v7 = vld [vmem:[#allocation2 + $0x20] ss:$16 sps:$4 sm:$0xff]  }
  0x96   :  { %463 = vmatpush1.bf16.msra.mxu0 %v8431_v3  ;;  %656 = vmatpush1.bf16.msra.mxu1 %v8432_v4  ;;  %v8438_v8 = vld [vmem:[#allocation2 + $0x28] ss:$16 sps:$4 sm:$0xff]   ;;  %v8439_v9 = vld [vmem:[#allocation2 + $0x44] ss:$16 sps:$4 sm:$0xff]   ;;  %v8441_v10 = vld [vmem:[#allocation2 + $0x4c] ss:$16 sps:$4 sm:$0xff]  }
  0x97   :  { %464 = vmatprep.subr.bf16.mxu0 %v8433_v5  ;;  %657 = vmatprep.subr.bf16.mxu1 %v8435_v6  ;;  %v8443_v11 = vld [vmem:[#allocation2 + $0x40] ss:$16 sps:$4 sm:$0xff]   ;;  %v8444_v12 = vld [vmem:[#allocation2 + $0x48] ss:$16 sps:$4 sm:$0xff]   ;;  %v8445_v13 = vld [vmem:[#allocation2 + $0x64] ss:$16 sps:$4 sm:$0xff]  }
  0x98   :  { %v8447_v14 = vld [vmem:[#allocation2 + $0x6c] ss:$16 sps:$4 sm:$0xff]   ;;  %v8449_v15 = vld [vmem:[#allocation2 + $0x60] ss:$16 sps:$4 sm:$0xff]   ;;  %v8450_v16 = vld [vmem:[#allocation2 + $0x68] ss:$16 sps:$4 sm:$0xff]  }
  0x99   :  { %v8451_v17 = vld [vmem:[#allocation2 + $0x84] ss:$16 sps:$4 sm:$0xff]   ;;  %v8453_v18 = vld [vmem:[#allocation2 + $0x8c] ss:$16 sps:$4 sm:$0xff]   ;;  %v8455_v21 = vld [vmem:[#allocation2 + $0x80] ss:$16 sps:$4 sm:$0xff]  }
  0x9a   :  { %465 = vmatpush1.bf16.msra.mxu0 %v8437_v7  ;;  %658 = vmatpush1.bf16.msra.mxu1 %v8438_v8  ;;  %v186_v19 = vld [vmem:[#allocation2 + $0xa0] sm:$0x33]  ;;  %v187_v20 = vld [vmem:[#allocation2 + $0xa8] sm:$0x33]  ;;  %vm400_vm1 = vcmask 687104   ;;  %v8463_v31 = vld [vmem:[%s12590_s0 + $0x10] sm:$0xff]  }
  0x9b   :  { %466 = vmatprep.subr.bf16.mxu0 %v8439_v9  ;;  %659 = vmatprep.subr.bf16.mxu1 %v8441_v10  ;;  %v8456_v22 = vld [vmem:[#allocation2 + $0x88] ss:$16 sps:$4 sm:$0xff]   ;;  %v6949_v23 = vcombine.high %v186_v19, %v186_v19  ;;  %v6951_v24 = vcombine.high %v187_v20, %v187_v20  ;;  %v6948_v25 = vcombine.low %v186_v19, %v186_v19  ;;  %v8461_v29 = vld [vmem:[%s12590_s0] sm:$0xff]   ;;  %v8467_v35 = vld [vmem:[%s12590_s0 + $0x30] sm:$0xff]   ;;  %v9460_v46 = vshrl.u32 %v12603_v45, 7  ;;  %s9191_s18 = smov 96  }
  0x9c   :  { %v6950_v26 = vcombine.low %v187_v20, %v187_v20  ;;  %v8462_v30 = vld [vmem:[%s12590_s0 + $0x8] sm:$0xff]   ;;  %v8464_v32 = vld [vmem:[%s12590_s0 + $0x18] sm:$0xff]   ;;  %v8465_v33 = vld [vmem:[%s12590_s0 + $0x20] sm:$0xff]   ;;  %vm5232_vm6 = vcmask 1041409   ;;  %vm5235_vm7 = vcmask 1042434   ;;  %vm5238_vm8 = vcmask 1043459  }
  0x9d   :  { %v451_v27 = vsel %vm449_vm0, %v6948_v25, 0  ;;  %v8466_v34 = vld [vmem:[%s12590_s0 + $0x28] sm:$0xff]   ;;  %v8468_v36 = vld [vmem:[%s12590_s0 + $0x38] sm:$0xff]   ;;  %v8469_v37 = vld [vmem:[%s12590_s0 + $0x40] sm:$0xff]   ;;  %12776 = vst [vmem:[#allocation20_spill] sm:$0xff] %v9460_v46  ;;  %v12602_v47 = vsub.s32 0, %v9460_v46 }
  0x9e   :  { %467 = vmatpush1.bf16.msra.mxu0 %v8443_v11  ;;  %660 = vmatpush1.bf16.msra.mxu1 %v8444_v12  ;;  %v457_v28 = vsel %vm449_vm0, %v6950_v26, 0  ;;  %v8470_v38 = vld [vmem:[%s12590_s0 + $0x48] sm:$0xff]   ;;  %v8471_v39 = vld [vmem:[%s12590_s0 + $0x50] sm:$0xff]   ;;  %v8472_v40 = vld [vmem:[%s12590_s0 + $0x58] sm:$0xff]   ;;  %v12601_v48 = vsub.s32 1, %v9460_v46  ;;  %v12600_v49 = vsub.s32 2, %v9460_v46 }
  0x9f   :  { %468 = vmatprep.subr.bf16.mxu0 %v8445_v13  ;;  %661 = vmatprep.subr.bf16.mxu1 %v8447_v14  ;;  %v8473_v41 = vld [vmem:[%s12590_s0 + $0x60] sm:$0xff]   ;;  %v8474_v42 = vld [vmem:[%s12590_s0 + $0x68] sm:$0xff]   ;;  %v8475_v43 = vld [vmem:[%s12590_s0 + $0x70] sm:$0xff]   ;;  %v204_v50 = vsub.s32 3, %v9460_v46  ;;  %vm5241_vm9 = vcmask 1044484   ;;  %vm5244_vm10 = vcmask 1045509  }
  0xa0   :  { %v8476_v44 = vld [vmem:[%s12590_s0 + $0x78] sm:$0xff]   ;;  %v8479_v53 = vld [vmem:[#allocation6 + $0x300] ss:$12 sps:$4 sm:$0xff]   ;;  %v8487_v58 = vld [vmem:[#allocation6 + $0x330] ss:$12 sps:$4 sm:$0xff]   ;;  %s9190_s0 = smov 112  }
  0xa1   :  { %v8477_v51 = vld [vmem:[#allocation6 + $0x3c8] ss:$12 sps:$4 sm:$0xff]   ;;  %v8481_v54 = vld [vmem:[#allocation6 + $0x304] ss:$12 sps:$4 sm:$0xff]   ;;  %v8492_v59 = vld [vmem:[#allocation6 + $0x34c] ss:$12 sps:$4 sm:$0xff]  }
  0xa2   :  { %469 = vmatpush1.bf16.msra.mxu0 %v8449_v15  ;;  %662 = vmatpush1.bf16.msra.mxu1 %v8450_v16  ;;  %v8478_v52 = vld [vmem:[#allocation6 + $0x308] ss:$12 sps:$4 sm:$0xff]   ;;  %v8482_v56 = vld [vmem:[#allocation6 + $0x318] ss:$12 sps:$4 sm:$0xff]   ;;  %v8485_v60 = vld [vmem:[#allocation6 + $0x3e0] ss:$12 sps:$4 sm:$0xff]  }
  0xa3   :  { %470 = vmatprep.subr.bf16.mxu0 %v8451_v17  ;;  %663 = vmatprep.subr.bf16.mxu1 %v8453_v18  ;;  %v8484_v55 = vld [vmem:[#allocation6 + $0x31c] ss:$12 sps:$4 sm:$0xff]   ;;  %v8489_v57 = vld [vmem:[#allocation6 + $0x334] ss:$12 sps:$4 sm:$0xff]   ;;  %v8495_v63 = vld [vmem:[#allocation6 + $0x364] ss:$12 sps:$4 sm:$0xff]  }
  0xa4   :  { %v8490_v61 = vld [vmem:[#allocation6 + $0x348] ss:$12 sps:$4 sm:$0xff]   ;;  %v8486_v62 = vld [vmem:[#allocation6 + $0x320] ss:$12 sps:$4 sm:$0xff]   ;;  %v8496_v2 = vld [vmem:[#allocation6 + $0x378] ss:$12 sps:$4 sm:$0xff]  }
  0xa5   :  { %v8498_v1 = vld [vmem:[#allocation6 + $0x37c] ss:$12 sps:$4 sm:$0xff]   ;;  %v8503_v3 = vld [vmem:[#allocation6 + $0x394] ss:$12 sps:$4 sm:$0xff]   ;;  %v8506_v5 = vld [vmem:[#allocation6 + $0x3ac] ss:$12 sps:$4 sm:$0xff]  }
  0xa6   :  { %471 = vmatpush1.bf16.msra.mxu0 %v8455_v21  ;;  %664 = vmatpush1.bf16.msra.mxu1 %v8456_v22  ;;  %v8501_v4 = vld [vmem:[#allocation6 + $0x390] ss:$12 sps:$4 sm:$0xff]   ;;  %v8499_v6 = vld [vmem:[#allocation6 + $0x3f8] ss:$12 sps:$4 sm:$0xff]   ;;  %v8504_v7 = vld [vmem:[#allocation6 + $0x3a8] ss:$12 sps:$4 sm:$0xff]  }
  0xa7   :  { %6952 = vmatprep.subr.msk.bf16.mxu0 %vm449_vm0, %v6949_v23  ;;  %6969 = vmatprep.subr.msk.bf16.mxu1 %vm449_vm0, %v6951_v24  ;;  %v8500_v8 = vld [vmem:[#allocation6 + $0x338] ss:$12 sps:$4 sm:$0xff]   ;;  %v8507_v10 = vld [vmem:[#allocation6 + $0x3c0] ss:$12 sps:$4 sm:$0xff]   ;;  %v8512_v11 = vld [vmem:[#allocation6 + $0x3dc] ss:$12 sps:$4 sm:$0xff]  }
  0xa8   :  { %v8509_v9 = vld [vmem:[#allocation6 + $0x3c4] ss:$12 sps:$4 sm:$0xff]   ;;  %v188_v13 = vld [vmem:[#allocation4] sm:$0xf]  ;;  %v8517_v14 = vld [vmem:[#allocation6 + $0x3f4] ss:$12 sps:$4 sm:$0xff]  }
  0xa9   :  { %v8510_v12 = vld [vmem:[#allocation6 + $0x3d8] ss:$12 sps:$4 sm:$0xff]   ;;  %v8515_v15 = vld [vmem:[#allocation6 + $0x3f0] ss:$12 sps:$4 sm:$0xff]   ;;  %v9468_v16 = vrot.slane %v188_v13, %v12602_v47  ;;  %v9472_v17 = vrot.slane %v188_v13, %v12600_v49  ;;  %v9476_v20 = vrot.slane %v188_v13, %v12601_v48  ;;  %v9480_v21 = vrot.slane %v188_v13, %v204_v50  ;;  %v8518_v23 = vld [vmem:[#allocation6 + $0x408] ss:$12 sps:$4 sm:$0xff]  }
  0xaa   :  { %473 = vmatpush1.bf16.msra.mxu0 %v451_v27  ;;  %666 = vmatpush1.bf16.msra.mxu1 %v457_v28  ;;  %v8513_v18 = vld [vmem:[#allocation6 + $0x410] ss:$12 sps:$4 sm:$0xff]   ;;  %v8520_v19 = vld [vmem:[#allocation6 + $0x40c] ss:$12 sps:$4 sm:$0xff]   ;;  %vm5247_vm11 = vcmask 1046534   ;;  %vm5250_vm12 = vcmask 1047559  }
  0xab   :  { %7404 = vmatprep.subr.bf16.mxu1 %v8477_v51  ;;  %2100 = vmatprep.subr.bf16.mxu0 %v8481_v54  ;;  %v8514_v22 = vld [vmem:[#allocation6 + $0x350] ss:$12 sps:$4 sm:$0xff]   ;;  %v8521_v26 = vld [vmem:[#allocation6 + $0x420] ss:$12 sps:$4 sm:$0xff]   ;;  %vm9193_vm13 = vmmov 0  }
  0xac   :  { %v8523_v27 = vld [vmem:[#allocation6 + $0x424] ss:$12 sps:$4 sm:$0xff]  }
  0xad   :  { %6953 = vmatmul.mubr.msk.bf16.vlgmr.msra.gmra.mrb[0].mxu0 %vm400_vm1, %v8461_v29  ;;  %6970 = vmatmul.mubr.msk.bf16.vlgmr.msra.gmra.mrb[0].mxu1 %vm400_vm1, %v8461_v29 }
  0xae   :  { %504 = vmatprep.mubr.bf16.mxu0 %v9189_v0  ;;  %697 = vmatprep.mubr.bf16.mxu1 %v9189_v0 }
  0xaf   :  { %7405 = vmatpush3.bf16.msra.mxu1 %v8478_v52  ;;  %2101 = vmatpush1.bf16.msra.mxu0 %v8479_v53 }
  0xb0   :  { %2102 = vmatprep.subr.bf16.mxu0 %v8484_v55  ;;  %7406 = vmatprep.subr.bf16.mxu1 %v8485_v60  ;;  %v8528_v55 = vld [vmem:[#allocation6 + $0x43c] ss:$12 sps:$4 sm:$0xff]   ;;  %v8530_v60 = vld [vmem:[#allocation6 + $0x380] ss:$12 sps:$4 sm:$0xff]  }
  0xb3   :  { %2103 = vmatpush1.bf16.msra.mxu0 %v8482_v56  ;;  %7407 = vmatpush3.bf16.msra.mxu1 %v8486_v62  ;;  %v8529_v56 = vld [vmem:[#allocation6 + $0x440] ss:$12 sps:$4 sm:$0xff]  }
  0xb4   :  { %2104 = vmatprep.subr.bf16.mxu0 %v8489_v57  ;;  %7408 = vmatprep.subr.bf16.mxu1 %v8499_v6 }
  0xb5   :  { %6954 = vmatmul.mubr.msk.bf16.gmra.mrb[4].mxu0 %vm400_vm1, %v8462_v30  ;;  %6971 = vmatmul.mubr.msk.bf16.gmra.mrb[4].mxu1 %vm400_vm1, %v8462_v30 }
  0xb6   :  { %514 = vmatprep.mubr.bf16.mxu0 %v9189_v0  ;;  %707 = vmatprep.mubr.bf16.mxu1 %v9189_v0 }
  0xb7   :  { %2105 = vmatpush1.bf16.msra.mxu0 %v8487_v58  ;;  %7409 = vmatpush3.bf16.msra.mxu1 %v8500_v8 }
  0xb8   :  { %2106 = vmatprep.subr.bf16.mxu0 %v8492_v59  ;;  %7410 = vmatprep.subr.bf16.mxu1 %v8513_v18  ;;  %v8526_v59 = vld [vmem:[#allocation6 + $0x438] ss:$12 sps:$4 sm:$0xff]  }
  0xbb   :  { %2107 = vmatpush1.bf16.msra.mxu0 %v8490_v61  ;;  %7411 = vmatpush3.bf16.msra.mxu1 %v8514_v22 }
  0xbc   :  { %2108 = vmatprep.subr.bf16.mxu0 %v8495_v63 }
  0xbd   :  { %6955 = vmatmul.mubr.msk.bf16.gmra.mrb[8].mxu0 %vm400_vm1, %v8463_v31  ;;  %6972 = vmatmul.mubr.msk.bf16.gmra.mrb[8].mxu1 %vm400_vm1, %v8463_v31 }
  0xbe   :  { %524 = vmatprep.mubr.bf16.mxu0 %v9189_v0  ;;  %717 = vmatprep.mubr.bf16.mxu1 %v9189_v0 }
  0xc5   :  { %6956 = vmatmul.mubr.msk.bf16.gmra.mrb[12].mxu0 %vm400_vm1, %v8464_v32  ;;  %6973 = vmatmul.mubr.msk.bf16.gmra.mrb[12].mxu1 %vm400_vm1, %v8464_v32  ;;  %v8524_v32 = vld [vmem:[#allocation6 + $0x428] ss:$12 sps:$4 sm:$0xff]  }
  0xc6   :  { %534 = vmatprep.mubr.bf16.mxu0 %v9189_v0  ;;  %727 = vmatprep.mubr.bf16.mxu1 %v9189_v0 }
  0xc7   :  { %7412 = vmatprep.subr.bf16.mxu1 %v8524_v32 }
  0xcd   :  { %6957 = vmatmul.mubr.msk.bf16.gmra.mrb[16].mxu0 %vm400_vm1, %v8465_v33  ;;  %6974 = vmatmul.mubr.msk.bf16.gmra.mrb[16].mxu1 %vm400_vm1, %v8465_v33 }
  0xce   :  { %544 = vmatprep.mubr.bf16.mxu0 %v9189_v0  ;;  %737 = vmatprep.mubr.bf16.mxu1 %v9189_v0 }
  0xd5   :  { %6958 = vmatmul.mubr.msk.bf16.gmra.mrb[20].mxu0 %vm400_vm1, %v8466_v34  ;;  %6975 = vmatmul.mubr.msk.bf16.gmra.mrb[20].mxu1 %vm400_vm1, %v8466_v34 }
  0xd6   :  { %554 = vmatprep.mubr.bf16.mxu0 %v9189_v0  ;;  %747 = vmatprep.mubr.bf16.mxu1 %v9189_v0 }
  0xdd   :  { %6959 = vmatmul.mubr.msk.bf16.gmra.mrb[24].mxu0 %vm400_vm1, %v8467_v35  ;;  %6976 = vmatmul.mubr.msk.bf16.gmra.mrb[24].mxu1 %vm400_vm1, %v8467_v35 }
  0xde   :  { %564 = vmatprep.mubr.bf16.mxu0 %v9189_v0  ;;  %757 = vmatprep.mubr.bf16.mxu1 %v9189_v0 }
  0xe5   :  { %6960 = vmatmul.mubr.msk.bf16.gmra.mrb[28].mxu0 %vm400_vm1, %v8468_v36  ;;  %6977 = vmatmul.mubr.msk.bf16.gmra.mrb[28].mxu1 %vm400_vm1, %v8468_v36 }
  0xe6   :  { %574 = vmatprep.mubr.bf16.mxu0 %v9189_v0  ;;  %767 = vmatprep.mubr.bf16.mxu1 %v9189_v0 }
  0xed   :  { %6961 = vmatmul.mubr.msk.bf16.gmra.mrb[32].mxu0 %vm400_vm1, %v8469_v37  ;;  %6978 = vmatmul.mubr.msk.bf16.gmra.mrb[32].mxu1 %vm400_vm1, %v8469_v37  ;;  %v8525_v37 = vld [vmem:[#allocation6 + $0x368] ss:$12 sps:$4 sm:$0xff]  }
  0xee   :  { %584 = vmatprep.mubr.bf16.mxu0 %v9189_v0  ;;  %777 = vmatprep.mubr.bf16.mxu1 %v9189_v0 }
  0xef   :  { %7413 = vmatpush3.bf16.msra.mxu1 %v8525_v37 }
  0xf0   :  { %7414 = vmatprep.subr.bf16.mxu1 %v8529_v56 }
  0xf3   :  { %7415 = vmatpush3.bf16.msra.mxu1 %v8530_v60 }
  0xf5   :  { %6962 = vmatmul.mubr.msk.bf16.gmra.mrb[36].mxu0 %vm400_vm1, %v8470_v38  ;;  %6979 = vmatmul.mubr.msk.bf16.gmra.mrb[36].mxu1 %vm400_vm1, %v8470_v38 }
  0xf6   :  { %594 = vmatprep.mubr.bf16.mxu0 %v9189_v0  ;;  %787 = vmatprep.mubr.bf16.mxu1 %v9189_v0 }
  0xfd   :  { %6963 = vmatmul.mubr.msk.bf16.gmra.mrb[40].mxu0 %vm400_vm1, %v8471_v39  ;;  %6980 = vmatmul.mubr.msk.bf16.gmra.mrb[40].mxu1 %vm400_vm1, %v8471_v39 }
  0xfe   :  { %604 = vmatprep.mubr.bf16.mxu0 %v9189_v0  ;;  %797 = vmatprep.mubr.bf16.mxu1 %v9189_v0 }
 0x105   :  { %6964 = vmatmul.mubr.msk.bf16.gmra.mrb[44].mxu0 %vm400_vm1, %v8472_v40  ;;  %6981 = vmatmul.mubr.msk.bf16.gmra.mrb[44].mxu1 %vm400_vm1, %v8472_v40 }
 0x106   :  { %614 = vmatprep.mubr.bf16.mxu0 %v9189_v0  ;;  %807 = vmatprep.mubr.bf16.mxu1 %v9189_v0 }
 0x10d   :  { %6965 = vmatmul.mubr.msk.bf16.gmra.mrb[48].mxu0 %vm400_vm1, %v8473_v41  ;;  %6982 = vmatmul.mubr.msk.bf16.gmra.mrb[48].mxu1 %vm400_vm1, %v8473_v41 }
 0x10e   :  { %624 = vmatprep.mubr.bf16.mxu0 %v9189_v0  ;;  %817 = vmatprep.mubr.bf16.mxu1 %v9189_v0 }
 0x115   :  { %6966 = vmatmul.mubr.msk.bf16.gmra.mrb[52].mxu0 %vm400_vm1, %v8474_v42  ;;  %6983 = vmatmul.mubr.msk.bf16.gmra.mrb[52].mxu1 %vm400_vm1, %v8474_v42 }
 0x116   :  { %634 = vmatprep.mubr.bf16.mxu0 %v9189_v0  ;;  %827 = vmatprep.mubr.bf16.mxu1 %v9189_v0 }
 0x11d   :  { %6967 = vmatmul.mubr.msk.bf16.gmra.mrb[56].mxu0 %vm400_vm1, %v8475_v43  ;;  %6984 = vmatmul.mubr.msk.bf16.gmra.mrb[56].mxu1 %vm400_vm1, %v8475_v43 }
 0x11e   :  { %644 = vmatprep.mubr.bf16.mxu0 %v9189_v0  ;;  %837 = vmatprep.mubr.bf16.mxu1 %v9189_v0  ;;  %v8493_v0 = vld [vmem:[#allocation6 + $0x360] ss:$12 sps:$4 sm:$0xff]  }
 0x11f   :  { %2109 = vmatpush1.bf16.msra.mxu0 %v8493_v0 }
 0x120   :  { %2110 = vmatprep.subr.bf16.mxu0 %v8498_v1 }
 0x123   :  { %2111 = vmatpush1.bf16.msra.mxu0 %v8496_v2 }
 0x124   :  { %2112 = vmatprep.subr.bf16.mxu0 %v8503_v3  ;;  %v8533_v3 = vld [vmem:[#allocation6 + $0x454] ss:$12 sps:$4 sm:$0xff]  }
 0x125   :  { %6968 = vmatmul.mubr.msk.bf16.gmra.mrb[60].mxu0 %vm400_vm1, %v8476_v44  ;;  %6985 = vmatmul.mubr.msk.bf16.gmra.mrb[60].mxu1 %vm400_vm1, %v8476_v44 }
 0x127   :  { %2113 = vmatpush1.bf16.msra.mxu0 %v8501_v4  ;;  %v8534_v4 = vld [vmem:[#allocation6 + $0x458] ss:$12 sps:$4 sm:$0xff]  }
 0x128   :  { %2114 = vmatprep.subr.bf16.mxu0 %v8506_v5  ;;  %7416 = vmatprep.subr.bf16.mxu1 %v8534_v4 }
 0x12b   :  { %2115 = vmatpush1.bf16.msra.mxu0 %v8504_v7 }
 0x12c   :  { %2116 = vmatprep.subr.bf16.mxu0 %v8509_v9  ;;  %v8531_v9 = vld [vmem:[#allocation6 + $0x450] ss:$12 sps:$4 sm:$0xff]  }
 0x12f   :  { %2117 = vmatpush1.bf16.msra.mxu0 %v8507_v10  ;;  %v8535_v10 = vld [vmem:[#allocation6 + $0x398] ss:$12 sps:$4 sm:$0xff]  }
 0x130   :  { %2118 = vmatprep.subr.bf16.mxu0 %v8512_v11  ;;  %7417 = vmatpush3.bf16.msra.mxu1 %v8535_v10 }
 0x133   :  { %2119 = vmatpush1.bf16.msra.mxu0 %v8510_v12 }
 0x134   :  { %2120 = vmatprep.subr.bf16.mxu0 %v8517_v14 }
 0x137   :  { %2121 = vmatpush1.bf16.msra.mxu0 %v8515_v15 }
 0x138   :  { %2122 = vmatprep.subr.bf16.mxu0 %v8520_v19 }
 0x13b   :  { %2123 = vmatpush1.bf16.msra.mxu0 %v8518_v23 }
 0x13c   :  { %2124 = vmatprep.subr.bf16.mxu0 %v8523_v27 }
 0x13f   :  { %2125 = vmatpush1.bf16.msra.mxu0 %v8521_v26 }
 0x140   :  { %2126 = vmatprep.subr.bf16.mxu0 %v8528_v55 }
 0x143   :  { %2127 = vmatpush1.bf16.msra.mxu0 %v8526_v59 }
 0x144   :  { %2128 = vmatprep.subr.bf16.mxu0 %v8533_v3 }
 0x147   :  { %2129 = vmatpush1.bf16.msra.mxu0 %v8531_v9 }
 0x180   :  { %v496_v24 = vpop.f32.mrb[0].mxu0  ;;  %v689_v25 = vpop.f32.mrb[0].mxu1 }
 0x181   :  { %v9483_v28 = vadd.f32 %v496_v24, %v9468_v16  ;;  %v498_v29 = vpop.f32.mrb[1].mxu0  ;;  %v9486_v30 = vadd.f32 %v689_v25, %v9472_v17  ;;  %v691_v31 = vpop.f32.mrb[1].mxu1 }
 0x182   :  { %v9489_v33 = vadd.f32 %v498_v29, %v9476_v20  ;;  %v500_v34 = vpop.f32.mrb[2].mxu0  ;;  %v9492_v35 = vadd.f32 %v691_v31, %v9480_v21  ;;  %v693_v36 = vpop.f32.mrb[2].mxu1  ;;  %v8538_v29 = vld [vmem:[#allocation6 + $0x46c] ss:$12 sps:$4 sm:$0xff]  }
 0x183   :  { %v848_v38 = vmax.f32 %v9483_v28, 0.0  ;;  %v850_v39 = vmax.f32 %v9486_v30, 0.0  ;;  %v9497_v40 = vadd.f32 %v500_v34, %v9468_v16  ;;  %v502_v41 = vpop.f32.mrb[3].mxu0  ;;  %v9500_v42 = vadd.f32 %v693_v36, %v9472_v17  ;;  %v695_v43 = vpop.f32.mrb[3].mxu1  ;;  %v8539_v30 = vld [vmem:[#allocation6 + $0x470] ss:$12 sps:$4 sm:$0xff]   ;;  %2130 = vmatprep.subr.bf16.mxu0 %v8538_v29 }
 0x184   :  { %v849_v44 = vmax.f32 %v9489_v33, 0.0  ;;  %v851_v50 = vmax.f32 %v9492_v35, 0.0  ;;  %v503_v51 = vadd.f32 %v502_v41, %v9476_v20  ;;  %v9506_v52 = vadd.f32 %v695_v43, %v9480_v21  ;;  %v8536_v35 = vld [vmem:[#allocation6 + $0x468] ss:$12 sps:$4 sm:$0xff]   ;;  %v8540_v36 = vld [vmem:[#allocation6 + $0x3b0] ss:$12 sps:$4 sm:$0xff]   ;;  %7418 = vmatprep.subr.bf16.mxu1 %v8539_v30 }
 0x185   :  { %v852_v53 = vmax.f32 %v9497_v40, 0.0  ;;  %v854_v54 = vmax.f32 %v9500_v42, 0.0  ;;  %2131 = vmatpush1.bf16.msra.mxu0 %v8536_v35  ;;  %7419 = vmatpush3.bf16.msra.mxu1 %v8540_v36 }
 0x186   :  { %v853_v57 = vmax.f32 %v503_v51, 0.0  ;;  %v855_v58 = vmax.f32 %v9506_v52, 0.0 }
 0x188   :  { %v506_v61 = vpop.f32.mrb[4].mxu0  ;;  %v699_v62 = vpop.f32.mrb[4].mxu1 }
 0x189   :  { %v507_v63 = vadd.f32 %v506_v61, %v9468_v16  ;;  %v700_v0 = vadd.f32 %v699_v62, %v9472_v17  ;;  %v508_v1 = vpop.f32.mrb[5].mxu0  ;;  %v701_v2 = vpop.f32.mrb[5].mxu1 }
 0x18a   :  { %v509_v5 = vadd.f32 %v508_v1, %v9476_v20  ;;  %v702_v6 = vadd.f32 %v701_v2, %v9480_v21  ;;  %v510_v7 = vpop.f32.mrb[6].mxu0  ;;  %v703_v8 = vpop.f32.mrb[6].mxu1 }
 0x18b   :  { %v856_v11 = vmax.f32 %v507_v63, 0.0  ;;  %v858_v12 = vmax.f32 %v700_v0, 0.0  ;;  %v511_v13 = vadd.f32 %v510_v7, %v9468_v16  ;;  %v704_v14 = vadd.f32 %v703_v8, %v9472_v17  ;;  %v512_v15 = vpop.f32.mrb[7].mxu0  ;;  %v705_v18 = vpop.f32.mrb[7].mxu1 }
 0x18c   :  { %v857_v19 = vmax.f32 %v509_v5, 0.0  ;;  %v859_v22 = vmax.f32 %v702_v6, 0.0  ;;  %v513_v23 = vadd.f32 %v512_v15, %v9476_v20  ;;  %v706_v24 = vadd.f32 %v705_v18, %v9480_v21 }
 0x18d   :  { %v9519_v25 = vmax.f32 %v848_v38, %v856_v11  ;;  %v860_v26 = vmax.f32 %v511_v13, 0.0  ;;  %v862_v27 = vmax.f32 %v704_v14, 0.0  ;;  %v9521_v28 = vmax.f32 %v850_v39, %v858_v12 }
 0x18e   :  { %v9523_v31 = vmax.f32 %v849_v44, %v857_v19  ;;  %v861_v32 = vmax.f32 %v513_v23, 0.0  ;;  %v863_v33 = vmax.f32 %v706_v24, 0.0  ;;  %v9525_v34 = vmax.f32 %v851_v50, %v859_v22 }
 0x18f   :  { %12777 = vst [vmem:[#allocation21_spill] sm:$0xff] %v9521_v28  ;;  %v9527_v37 = vmax.f32 %v852_v53, %v860_v26  ;;  %v9529_v40 = vmax.f32 %v854_v54, %v862_v27 }
 0x190   :  { %v9531_v38 = vmax.f32 %v853_v57, %v861_v32  ;;  %v516_v39 = vpop.f32.mrb[8].mxu0  ;;  %v709_v41 = vpop.f32.mrb[8].mxu1  ;;  %v9533_v42 = vmax.f32 %v855_v58, %v863_v33 }
 0x191   :  { %12778 = vst [vmem:[#allocation22_spill] sm:$0xff] %v9529_v40  ;;  %v517_v43 = vadd.f32 %v516_v39, %v9468_v16  ;;  %v518_v44 = vpop.f32.mrb[9].mxu0  ;;  %v710_v50 = vadd.f32 %v709_v41, %v9472_v17  ;;  %v711_v51 = vpop.f32.mrb[9].mxu1  ;;  %v8157_v52 = vpack.i.bf16 %v9527_v37, %v9519_v25  ;;  %v8152_v8 = vpack.i.bf16 %v9529_v40, %v9521_v28 }
 0x192   :  { %v519_v53 = vadd.f32 %v518_v44, %v9476_v20  ;;  %v520_v54 = vpop.f32.mrb[10].mxu0  ;;  %v712_v55 = vadd.f32 %v711_v51, %v9480_v21  ;;  %v713_v56 = vpop.f32.mrb[10].mxu1  ;;  %v8147_v57 = vpack.i.bf16 %v9531_v38, %v9523_v31 }
 0x193   :  { %v864_v58 = vmax.f32 %v517_v43, 0.0  ;;  %v866_v59 = vmax.f32 %v710_v50, 0.0  ;;  %v521_v60 = vadd.f32 %v520_v54, %v9468_v16  ;;  %v522_v61 = vpop.f32.mrb[11].mxu0  ;;  %v714_v62 = vadd.f32 %v713_v56, %v9472_v17  ;;  %8158 = vrot.lane.b32.xlu1 %v8157_v52, %s9190_s0  ;;  %v715_v63 = vpop.f32.mrb[11].mxu1 }
 0x194   :  { %v865_v0 = vmax.f32 %v519_v53, 0.0  ;;  %v867_v1 = vmax.f32 %v712_v55, 0.0  ;;  %v523_v2 = vadd.f32 %v522_v61, %v9476_v20  ;;  %v716_v3 = vadd.f32 %v715_v63, %v9480_v21  ;;  %8148 = vrot.lane.b32.xlu0 %v8147_v57, %s9190_s0 }
 0x195   :  { %v868_v4 = vmax.f32 %v521_v60, 0.0  ;;  %v870_v5 = vmax.f32 %v714_v62, 0.0 }
 0x196   :  { %v869_v6 = vmax.f32 %v523_v2, 0.0  ;;  %v871_v7 = vmax.f32 %v716_v3, 0.0 }
 0x198   :  { %v526_v9 = vpop.f32.mrb[12].mxu0  ;;  %v719_v10 = vpop.f32.mrb[12].mxu1  ;;  %8153 = vrot.lane.b32.xlu0 %v8152_v8, %s9190_s0 }
 0x199   :  { %v527_v11 = vadd.f32 %v526_v9, %v9468_v16  ;;  %v720_v12 = vadd.f32 %v719_v10, %v9472_v17  ;;  %v528_v13 = vpop.f32.mrb[13].mxu0  ;;  %v721_v14 = vpop.f32.mrb[13].mxu1 }
 0x19a   :  { %v529_v15 = vadd.f32 %v528_v13, %v9476_v20  ;;  %v722_v18 = vadd.f32 %v721_v14, %v9480_v21  ;;  %v530_v19 = vpop.f32.mrb[14].mxu0  ;;  %v723_v22 = vpop.f32.mrb[14].mxu1 }
 0x19b   :  { %v872_v23 = vmax.f32 %v527_v11, 0.0  ;;  %v874_v24 = vmax.f32 %v720_v12, 0.0  ;;  %v531_v26 = vadd.f32 %v530_v19, %v9468_v16  ;;  %v724_v27 = vadd.f32 %v723_v22, %v9472_v17  ;;  %v532_v29 = vpop.f32.mrb[15].mxu0  ;;  %v725_v30 = vpop.f32.mrb[15].mxu1 }
 0x19c   :  { %v873_v32 = vmax.f32 %v529_v15, 0.0  ;;  %v875_v33 = vmax.f32 %v722_v18, 0.0  ;;  %v533_v35 = vadd.f32 %v532_v29, %v9476_v20  ;;  %v726_v36 = vadd.f32 %v725_v30, %v9480_v21 }
 0x19d   :  { %v9560_v39 = vmax.f32 %v864_v58, %v872_v23  ;;  %v876_v41 = vmax.f32 %v531_v26, 0.0  ;;  %v878_v43 = vmax.f32 %v724_v27, 0.0  ;;  %v9562_v44 = vmax.f32 %v866_v59, %v874_v24 }
 0x19e   :  { %v9564_v50 = vmax.f32 %v865_v0, %v873_v32  ;;  %v877_v51 = vmax.f32 %v533_v35, 0.0  ;;  %v879_v52 = vmax.f32 %v726_v36, 0.0  ;;  %v9566_v53 = vmax.f32 %v867_v1, %v875_v33 }
 0x19f   :  { %12779 = vst [vmem:[#allocation23_spill] sm:$0xff] %v9562_v44  ;;  %v9568_v54 = vmax.f32 %v868_v4, %v876_v41  ;;  %v9570_v55 = vmax.f32 %v870_v5, %v878_v43 }
 0x1a0   :  { %v9572_v56 = vmax.f32 %v869_v6, %v877_v51  ;;  %v536_v57 = vpop.f32.mrb[16].mxu0  ;;  %v729_v60 = vpop.f32.mrb[16].mxu1  ;;  %v9574_v58 = vmax.f32 %v871_v7, %v879_v52 }
 0x1a1   :  { %12780 = vst [vmem:[#allocation24_spill] sm:$0xff] %v9570_v55  ;;  %v538_v61 = vpop.f32.mrb[17].mxu0  ;;  %v731_v62 = vpop.f32.mrb[17].mxu1  ;;  %v8162_v59 = vpack.i.bf16 %v9570_v55, %v9562_v44  ;;  %v537_v4 = vadd.f32 %v536_v57, %v9468_v16  ;;  %v730_v6 = vadd.f32 %v729_v60, %v9472_v17  ;;  %v8172_v12 = vpack.i.bf16 %v9568_v54, %v9560_v39 }
 0x1a2   :  { %v540_v63 = vpop.f32.mrb[18].mxu0  ;;  %v733_v0 = vpop.f32.mrb[18].mxu1  ;;  %v8167_v1 = vpack.i.bf16 %v9572_v56, %v9564_v50  ;;  %v539_v5 = vadd.f32 %v538_v61, %v9476_v20  ;;  %v732_v7 = vadd.f32 %v731_v62, %v9480_v21 }
 0x1a3   :  { %v542_v2 = vpop.f32.mrb[19].mxu0  ;;  %8163 = vrot.lane.b32.xlu0 %v8162_v59, %s9190_s0  ;;  %v735_v3 = vpop.f32.mrb[19].mxu1  ;;  %v541_v8 = vadd.f32 %v540_v63, %v9468_v16  ;;  %v734_v9 = vadd.f32 %v733_v0, %v9472_v17  ;;  %v880_v13 = vmax.f32 %v537_v4, 0.0  ;;  %v882_v15 = vmax.f32 %v730_v6, 0.0 }
 0x1a4   :  { %8168 = vrot.lane.b32.xlu1 %v8167_v1, %s9190_s0  ;;  %v543_v10 = vadd.f32 %v542_v2, %v9476_v20  ;;  %v736_v11 = vadd.f32 %v735_v3, %v9480_v21  ;;  %v881_v14 = vmax.f32 %v539_v5, 0.0  ;;  %v883_v18 = vmax.f32 %v732_v7, 0.0 }
 0x1a5   :  { %v884_v23 = vmax.f32 %v541_v8, 0.0  ;;  %v886_v24 = vmax.f32 %v734_v9, 0.0 }
 0x1a6   :  { %v885_v32 = vmax.f32 %v543_v10, 0.0  ;;  %v887_v33 = vmax.f32 %v736_v11, 0.0 }
 0x1a8   :  { %v546_v19 = vpop.f32.mrb[20].mxu0  ;;  %v739_v22 = vpop.f32.mrb[20].mxu1  ;;  %8173 = vrot.lane.b32.xlu1 %v8172_v12, %s9190_s0 }
 0x1a9   :  { %v547_v26 = vadd.f32 %v546_v19, %v9468_v16  ;;  %v740_v27 = vadd.f32 %v739_v22, %v9472_v17  ;;  %v548_v29 = vpop.f32.mrb[21].mxu0  ;;  %v741_v30 = vpop.f32.mrb[21].mxu1 }
 0x1aa   :  { %v549_v35 = vadd.f32 %v548_v29, %v9476_v20  ;;  %v742_v36 = vadd.f32 %v741_v30, %v9480_v21  ;;  %v550_v41 = vpop.f32.mrb[22].mxu0  ;;  %v743_v43 = vpop.f32.mrb[22].mxu1 }
 0x1ab   :  { %v888_v51 = vmax.f32 %v547_v26, 0.0  ;;  %v890_v52 = vmax.f32 %v740_v27, 0.0  ;;  %v551_v57 = vadd.f32 %v550_v41, %v9468_v16  ;;  %v744_v60 = vadd.f32 %v743_v43, %v9472_v17  ;;  %v552_v61 = vpop.f32.mrb[23].mxu0  ;;  %v745_v62 = vpop.f32.mrb[23].mxu1 }
 0x1ac   :  { %v889_v59 = vmax.f32 %v549_v35, 0.0  ;;  %v891_v63 = vmax.f32 %v742_v36, 0.0  ;;  %v553_v0 = vadd.f32 %v552_v61, %v9476_v20  ;;  %v746_v1 = vadd.f32 %v745_v62, %v9480_v21 }
 0x1ad   :  { %v9601_v2 = vmax.f32 %v880_v13, %v888_v51  ;;  %v9603_v3 = vmax.f32 %v882_v15, %v890_v52  ;;  %v892_v4 = vmax.f32 %v551_v57, 0.0  ;;  %v894_v5 = vmax.f32 %v744_v60, 0.0 }
 0x1ae   :  { %v9605_v6 = vmax.f32 %v881_v14, %v889_v59  ;;  %v9607_v7 = vmax.f32 %v883_v18, %v891_v63  ;;  %v893_v8 = vmax.f32 %v553_v0, 0.0  ;;  %v895_v9 = vmax.f32 %v746_v1, 0.0 }
 0x1af   :  { %12781 = vst [vmem:[#allocation25_spill] sm:$0xff] %v9603_v3  ;;  %v9609_v10 = vmax.f32 %v884_v23, %v892_v4  ;;  %v9611_v11 = vmax.f32 %v886_v24, %v894_v5 }
 0x1b0   :  { %v9613_v12 = vmax.f32 %v885_v32, %v893_v8  ;;  %v9615_v19 = vmax.f32 %v887_v33, %v895_v9  ;;  %v556_v13 = vpop.f32.mrb[24].mxu0  ;;  %v749_v22 = vpop.f32.mrb[24].mxu1 }
 0x1b1   :  { %12782 = vst [vmem:[#allocation26_spill] sm:$0xff] %v9611_v11  ;;  %v558_v15 = vpop.f32.mrb[25].mxu0  ;;  %v751_v26 = vpop.f32.mrb[25].mxu1  ;;  %v8177_v14 = vpack.i.bf16 %v9611_v11, %v9603_v3  ;;  %v557_v30 = vadd.f32 %v556_v13, %v9468_v16  ;;  %v750_v33 = vadd.f32 %v749_v22, %v9472_v17  ;;  %v8187_v52 = vpack.i.bf16 %v9609_v10, %v9601_v2 }
 0x1b2   :  { %v560_v27 = vpop.f32.mrb[26].mxu0  ;;  %v753_v18 = vpop.f32.mrb[26].mxu1  ;;  %v8182_v29 = vpack.i.bf16 %v9613_v12, %v9605_v6  ;;  %v559_v32 = vadd.f32 %v558_v15, %v9476_v20  ;;  %v752_v35 = vadd.f32 %v751_v26, %v9480_v21 }
 0x1b3   :  { %v562_v23 = vpop.f32.mrb[27].mxu0  ;;  %8178 = vrot.lane.b32.xlu1 %v8177_v14, %s9190_s0  ;;  %v755_v24 = vpop.f32.mrb[27].mxu1  ;;  %v561_v36 = vadd.f32 %v560_v27, %v9468_v16  ;;  %v754_v41 = vadd.f32 %v753_v18, %v9472_v17  ;;  %v896_v57 = vmax.f32 %v557_v30, 0.0  ;;  %v898_v61 = vmax.f32 %v750_v33, 0.0 }
 0x1b4   :  { %8183 = vrot.lane.b32.xlu0 %v8182_v29, %s9190_s0  ;;  %v563_v43 = vadd.f32 %v562_v23, %v9476_v20  ;;  %v756_v51 = vadd.f32 %v755_v24, %v9480_v21  ;;  %v897_v60 = vmax.f32 %v559_v32, 0.0  ;;  %v899_v62 = vmax.f32 %v752_v35, 0.0 }
 0x1b5   :  { %v900_v0 = vmax.f32 %v561_v36, 0.0  ;;  %v902_v1 = vmax.f32 %v754_v41, 0.0 }
 0x1b6   :  { %v901_v13 = vmax.f32 %v563_v43, 0.0  ;;  %v903_v22 = vmax.f32 %v756_v51, 0.0 }
 0x1b8   :  { %v566_v59 = vpop.f32.mrb[28].mxu0  ;;  %v759_v63 = vpop.f32.mrb[28].mxu1  ;;  %8188 = vrot.lane.b32.xlu0 %v8187_v52, %s9190_s0 }
 0x1b9   :  { %v567_v4 = vadd.f32 %v566_v59, %v9468_v16  ;;  %v760_v5 = vadd.f32 %v759_v63, %v9472_v17  ;;  %v568_v8 = vpop.f32.mrb[29].mxu0  ;;  %v761_v9 = vpop.f32.mrb[29].mxu1 }
 0x1ba   :  { %v569_v15 = vadd.f32 %v568_v8, %v9476_v20  ;;  %v762_v26 = vadd.f32 %v761_v9, %v9480_v21  ;;  %v570_v14 = vpop.f32.mrb[30].mxu0  ;;  %v763_v27 = vpop.f32.mrb[30].mxu1 }
 0x1bb   :  { %v904_v18 = vmax.f32 %v567_v4, 0.0  ;;  %v906_v29 = vmax.f32 %v760_v5, 0.0  ;;  %v571_v23 = vadd.f32 %v570_v14, %v9468_v16  ;;  %v764_v24 = vadd.f32 %v763_v27, %v9472_v17  ;;  %v572_v30 = vpop.f32.mrb[31].mxu0  ;;  %v765_v32 = vpop.f32.mrb[31].mxu1 }
 0x1bc   :  { %v905_v33 = vmax.f32 %v569_v15, 0.0  ;;  %v907_v35 = vmax.f32 %v762_v26, 0.0  ;;  %v573_v36 = vadd.f32 %v572_v30, %v9476_v20  ;;  %v766_v41 = vadd.f32 %v765_v32, %v9480_v21 }
 0x1bd   :  { %v9642_v43 = vmax.f32 %v896_v57, %v904_v18  ;;  %v9644_v51 = vmax.f32 %v898_v61, %v906_v29  ;;  %v908_v52 = vmax.f32 %v571_v23, 0.0  ;;  %v910_v59 = vmax.f32 %v764_v24, 0.0 }
 0x1be   :  { %v9646_v63 = vmax.f32 %v897_v60, %v905_v33  ;;  %v9648_v4 = vmax.f32 %v899_v62, %v907_v35  ;;  %v909_v5 = vmax.f32 %v573_v36, 0.0  ;;  %v911_v8 = vmax.f32 %v766_v41, 0.0 }
 0x1bf   :  { %12783 = vst [vmem:[#allocation27_spill] sm:$0xff] %v9644_v51  ;;  %v9650_v9 = vmax.f32 %v900_v0, %v908_v52  ;;  %v9652_v15 = vmax.f32 %v902_v1, %v910_v59 }
 0x1c0   :  { %v9654_v26 = vmax.f32 %v901_v13, %v909_v5  ;;  %v9656_v14 = vmax.f32 %v903_v22, %v911_v8  ;;  %v576_v57 = vpop.f32.mrb[32].mxu0  ;;  %v769_v27 = vpop.f32.mrb[32].mxu1 }
 0x1c1   :  { %12784 = vst [vmem:[#allocation28_spill] sm:$0xff] %v9652_v15  ;;  %v578_v61 = vpop.f32.mrb[33].mxu0  ;;  %v771_v18 = vpop.f32.mrb[33].mxu1  ;;  %v8192_v60 = vpack.i.bf16 %v9652_v15, %v9644_v51  ;;  %v577_v13 = vadd.f32 %v576_v57, %v9468_v16  ;;  %v770_v24 = vadd.f32 %v769_v27, %v9472_v17  ;;  %v8202_v41 = vpack.i.bf16 %v9650_v9, %v9642_v43 }
 0x1c2   :  { %v580_v29 = vpop.f32.mrb[34].mxu0  ;;  %v773_v62 = vpop.f32.mrb[34].mxu1  ;;  %v8197_v23 = vpack.i.bf16 %v9654_v26, %v9646_v63  ;;  %v579_v22 = vadd.f32 %v578_v61, %v9476_v20  ;;  %v772_v30 = vadd.f32 %v771_v18, %v9480_v21 }
 0x1c3   :  { %v582_v0 = vpop.f32.mrb[35].mxu0  ;;  %8193 = vrot.lane.b32.xlu0 %v8192_v60, %s9190_s0  ;;  %v775_v1 = vpop.f32.mrb[35].mxu1  ;;  %v581_v32 = vadd.f32 %v580_v29, %v9468_v16  ;;  %v774_v33 = vadd.f32 %v773_v62, %v9472_v17  ;;  %v912_v52 = vmax.f32 %v577_v13, 0.0  ;;  %v914_v5 = vmax.f32 %v770_v24, 0.0 }
 0x1c4   :  { %8198 = vrot.lane.b32.xlu1 %v8197_v23, %s9190_s0  ;;  %v583_v35 = vadd.f32 %v582_v0, %v9476_v20  ;;  %v776_v36 = vadd.f32 %v775_v1, %v9480_v21  ;;  %v913_v59 = vmax.f32 %v579_v22, 0.0  ;;  %v915_v8 = vmax.f32 %v772_v30, 0.0  ;;  %v8544_v0 = vld [vmem:[#allocation6 + $0x484] ss:$12 sps:$4 sm:$0xff]  }
 0x1c5   :  { %v916_v61 = vmax.f32 %v581_v32, 0.0  ;;  %v918_v18 = vmax.f32 %v774_v33, 0.0  ;;  %2213 = vmatprep.subr.bf16.mxu0 %v8544_v0 }
 0x1c6   :  { %v917_v1 = vmax.f32 %v583_v35, 0.0  ;;  %v919_v49 = vmax.f32 %v776_v36, 0.0 }
 0x1c8   :  { %v586_v57 = vpop.f32.mrb[36].mxu0  ;;  %v779_v27 = vpop.f32.mrb[36].mxu1  ;;  %8203 = vrot.lane.b32.xlu1 %v8202_v41, %s9190_s0 }
 0x1c9   :  { %v587_v60 = vadd.f32 %v586_v57, %v9468_v16  ;;  %v780_v29 = vadd.f32 %v779_v27, %v9472_v17  ;;  %v588_v62 = vpop.f32.mrb[37].mxu0  ;;  %v781_v23 = vpop.f32.mrb[37].mxu1 }
 0x1ca   :  { %v589_v13 = vadd.f32 %v588_v62, %v9476_v20  ;;  %v782_v22 = vadd.f32 %v781_v23, %v9480_v21  ;;  %v590_v24 = vpop.f32.mrb[38].mxu0  ;;  %v783_v30 = vpop.f32.mrb[38].mxu1  ;;  %v8541_v62 = vld [vmem:[#allocation6 + $0x548] ss:$12 sps:$4 sm:$0xff]  }
 0x1cb   :  { %v920_v48 = vmax.f32 %v587_v60, 0.0  ;;  %v922_v47 = vmax.f32 %v780_v29, 0.0  ;;  %v591_v32 = vadd.f32 %v590_v24, %v9468_v16  ;;  %v784_v33 = vadd.f32 %v783_v30, %v9472_v17  ;;  %v592_v41 = vpop.f32.mrb[39].mxu0  ;;  %v785_v57 = vpop.f32.mrb[39].mxu1  ;;  %7468 = vmatprep.subr.bf16.mxu1 %v8541_v62 }
 0x1cc   :  { %v921_v27 = vmax.f32 %v589_v13, 0.0  ;;  %v923_v45 = vmax.f32 %v782_v22, 0.0  ;;  %v593_v35 = vadd.f32 %v592_v41, %v9476_v20  ;;  %v786_v36 = vadd.f32 %v785_v57, %v9480_v21 }
 0x1cd   :  { %v9683_v46 = vmax.f32 %v912_v52, %v920_v48  ;;  %v9685_v23 = vmax.f32 %v914_v5, %v922_v47  ;;  %v924_v60 = vmax.f32 %v591_v32, 0.0  ;;  %v926_v29 = vmax.f32 %v784_v33, 0.0 }
 0x1ce   :  { %v9687_v51 = vmax.f32 %v913_v59, %v921_v27  ;;  %v9689_v24 = vmax.f32 %v915_v8, %v923_v45  ;;  %v925_v30 = vmax.f32 %v593_v35, 0.0  ;;  %v927_v15 = vmax.f32 %v786_v36, 0.0 }
 0x1cf   :  { %12785 = vst [vmem:[#allocation29_spill] sm:$0xff] %v9683_v46  ;;  %12786 = vst [vmem:[#allocation30_spill] sm:$0xff] %v9685_v23  ;;  %v9691_v0 = vmax.f32 %v916_v61, %v924_v60  ;;  %v9693_v13 = vmax.f32 %v918_v18, %v926_v29 }
 0x1d0   :  { %v9695_v22 = vmax.f32 %v917_v1, %v925_v30  ;;  %v9697_v41 = vmax.f32 %v919_v49, %v927_v15  ;;  %v596_v48 = vpop.f32.mrb[40].mxu0  ;;  %v789_v47 = vpop.f32.mrb[40].mxu1 }
 0x1d1   :  { %12787 = vst [vmem:[#allocation31_spill] sm:$0xff] %v9691_v0  ;;  %12788 = vst [vmem:[#allocation32_spill] sm:$0xff] %v9693_v13  ;;  %v598_v52 = vpop.f32.mrb[41].mxu0  ;;  %v791_v5 = vpop.f32.mrb[41].mxu1  ;;  %v8207_v59 = vpack.i.bf16 %v9693_v13, %v9685_v23  ;;  %v597_v1 = vadd.f32 %v596_v48, %v9468_v16  ;;  %v790_v15 = vadd.f32 %v789_v47, %v9472_v17 }
 0x1d2   :  { %v600_v45 = vpop.f32.mrb[42].mxu0  ;;  %v793_v8 = vpop.f32.mrb[42].mxu1  ;;  %v8212_v32 = vpack.i.bf16 %v9695_v22, %v9687_v51  ;;  %v599_v49 = vadd.f32 %v598_v52, %v9476_v20  ;;  %v792_v33 = vadd.f32 %v791_v5, %v9480_v21  ;;  %v8217_v62 = vpack.i.bf16 %v9691_v0, %v9683_v46 }
 0x1d3   :  { %v602_v61 = vpop.f32.mrb[43].mxu0  ;;  %8208 = vrot.lane.b32.xlu1 %v8207_v59, %s9190_s0  ;;  %v795_v18 = vpop.f32.mrb[43].mxu1  ;;  %v601_v57 = vadd.f32 %v600_v45, %v9468_v16  ;;  %v794_v27 = vadd.f32 %v793_v8, %v9472_v17  ;;  %v928_v60 = vmax.f32 %v597_v1, 0.0  ;;  %v930_v30 = vmax.f32 %v790_v15, 0.0 }
 0x1d4   :  { %8213 = vrot.lane.b32.xlu0 %v8212_v32, %s9190_s0  ;;  %v603_v35 = vadd.f32 %v602_v61, %v9476_v20  ;;  %v796_v36 = vadd.f32 %v795_v18, %v9480_v21  ;;  %v929_v29 = vmax.f32 %v599_v49, 0.0  ;;  %v931_v48 = vmax.f32 %v792_v33, 0.0 }
 0x1d5   :  { %v932_v5 = vmax.f32 %v601_v57, 0.0  ;;  %v934_v59 = vmax.f32 %v794_v27, 0.0 }
 0x1d6   :  { %v933_v18 = vmax.f32 %v603_v35, 0.0  ;;  %v935_v11 = vmax.f32 %v796_v36, 0.0 }
 0x1d8   :  { %v606_v47 = vpop.f32.mrb[44].mxu0  ;;  %v799_v52 = vpop.f32.mrb[44].mxu1  ;;  %8218 = vrot.lane.b32.xlu0 %v8217_v62, %s9190_s0 }
 0x1d9   :  { %v607_v45 = vadd.f32 %v606_v47, %v9468_v16  ;;  %v800_v8 = vadd.f32 %v799_v52, %v9472_v17  ;;  %v608_v32 = vpop.f32.mrb[45].mxu0  ;;  %v801_v61 = vpop.f32.mrb[45].mxu1 }
 0x1da   :  { %v609_v3 = vadd.f32 %v608_v32, %v9476_v20  ;;  %v802_v1 = vadd.f32 %v801_v61, %v9480_v21  ;;  %v610_v49 = vpop.f32.mrb[46].mxu0  ;;  %v803_v15 = vpop.f32.mrb[46].mxu1 }
 0x1db   :  { %v936_v33 = vmax.f32 %v607_v45, 0.0  ;;  %v938_v44 = vmax.f32 %v800_v8, 0.0  ;;  %v611_v62 = vadd.f32 %v610_v49, %v9468_v16  ;;  %v804_v57 = vadd.f32 %v803_v15, %v9472_v17  ;;  %v612_v27 = vpop.f32.mrb[47].mxu0  ;;  %v805_v47 = vpop.f32.mrb[47].mxu1 }
 0x1dc   :  { %v937_v55 = vmax.f32 %v609_v3, 0.0  ;;  %v939_v52 = vmax.f32 %v802_v1, 0.0  ;;  %v613_v13 = vadd.f32 %v612_v27, %v9476_v20  ;;  %v806_v35 = vadd.f32 %v805_v47, %v9480_v21 }
 0x1dd   :  { %v9724_v36 = vmax.f32 %v928_v60, %v936_v33  ;;  %v9726_v32 = vmax.f32 %v930_v30, %v938_v44  ;;  %v940_v61 = vmax.f32 %v611_v62, 0.0  ;;  %v942_v23 = vmax.f32 %v804_v57, 0.0 }
 0x1de   :  { %v9728_v45 = vmax.f32 %v929_v29, %v937_v55  ;;  %v9730_v8 = vmax.f32 %v931_v48, %v939_v52  ;;  %v941_v49 = vmax.f32 %v613_v13, 0.0  ;;  %v943_v15 = vmax.f32 %v806_v35, 0.0 }
 0x1df   :  { %12789 = vst [vmem:[#allocation33_spill] sm:$0xff] %v9724_v36  ;;  %12790 = vst [vmem:[#allocation34_spill] sm:$0xff] %v9726_v32  ;;  %v9732_v40 = vmax.f32 %v932_v5, %v940_v61  ;;  %v9734_v3 = vmax.f32 %v934_v59, %v942_v23 }
 0x1e0   :  { %12791 = vst [vmem:[#allocation35_spill] sm:$0xff] %v9728_v45  ;;  %v9736_v1 = vmax.f32 %v933_v18, %v941_v49  ;;  %v9738_v27 = vmax.f32 %v935_v11, %v943_v15  ;;  %v616_v60 = vpop.f32.mrb[48].mxu0  ;;  %v809_v33 = vpop.f32.mrb[48].mxu1 }
 0x1e1   :  { %12792 = vst [vmem:[#allocation36_spill] sm:$0xff] %v9732_v40  ;;  %12793 = vst [vmem:[#allocation37_spill] sm:$0xff] %v9734_v3  ;;  %v618_v44 = vpop.f32.mrb[49].mxu0  ;;  %v811_v30 = vpop.f32.mrb[49].mxu1  ;;  %v8222_v55 = vpack.i.bf16 %v9734_v3, %v9726_v32  ;;  %v617_v59 = vadd.f32 %v616_v60, %v9468_v16  ;;  %v810_v18 = vadd.f32 %v809_v33, %v9472_v17 }
 0x1e2   :  { %12794 = vst [vmem:[#allocation38_spill] sm:$0xff] %v9736_v1  ;;  %v620_v29 = vpop.f32.mrb[50].mxu0  ;;  %v813_v48 = vpop.f32.mrb[50].mxu1  ;;  %v8227_v13 = vpack.i.bf16 %v9736_v1, %v9728_v45  ;;  %v619_v11 = vadd.f32 %v618_v44, %v9476_v20  ;;  %v812_v62 = vadd.f32 %v811_v30, %v9480_v21  ;;  %v8232_v61 = vpack.i.bf16 %v9732_v40, %v9724_v36 }
 0x1e3   :  { %v622_v5 = vpop.f32.mrb[51].mxu0  ;;  %8223 = vrot.lane.b32.xlu0 %v8222_v55, %s9190_s0  ;;  %v815_v23 = vpop.f32.mrb[51].mxu1  ;;  %v621_v57 = vadd.f32 %v620_v29, %v9468_v16  ;;  %v814_v47 = vadd.f32 %v813_v48, %v9472_v17  ;;  %v944_v49 = vmax.f32 %v617_v59, 0.0  ;;  %v946_v60 = vmax.f32 %v810_v18, 0.0 }
 0x1e4   :  { %8228 = vrot.lane.b32.xlu1 %v8227_v13, %s9190_s0  ;;  %v623_v52 = vadd.f32 %v622_v5, %v9476_v20  ;;  %v816_v35 = vadd.f32 %v815_v23, %v9480_v21  ;;  %v945_v15 = vmax.f32 %v619_v11, 0.0  ;;  %v947_v44 = vmax.f32 %v812_v62, 0.0 }
 0x1e5   :  { %v948_v30 = vmax.f32 %v621_v57, 0.0  ;;  %v950_v13 = vmax.f32 %v814_v47, 0.0 }
 0x1e6   :  { %v949_v23 = vmax.f32 %v623_v52, 0.0  ;;  %v951_v3 = vmax.f32 %v816_v35, 0.0 }
 0x1e8   :  { %v626_v33 = vpop.f32.mrb[52].mxu0  ;;  %v819_v55 = vpop.f32.mrb[52].mxu1  ;;  %8233 = vrot.lane.b32.xlu1 %v8232_v61, %s9190_s0 }
 0x1e9   :  { %v627_v29 = vadd.f32 %v626_v33, %v9468_v16  ;;  %v820_v48 = vadd.f32 %v819_v55, %v9472_v17  ;;  %v628_v5 = vpop.f32.mrb[53].mxu0  ;;  %v821_v32 = vpop.f32.mrb[53].mxu1 }
 0x1ea   :  { %v629_v28 = vadd.f32 %v628_v5, %v9476_v20  ;;  %v822_v59 = vadd.f32 %v821_v32, %v9480_v21  ;;  %v630_v11 = vpop.f32.mrb[54].mxu0  ;;  %v823_v18 = vpop.f32.mrb[54].mxu1 }
 0x1eb   :  { %v952_v62 = vmax.f32 %v627_v29, 0.0  ;;  %v954_v40 = vmax.f32 %v820_v48, 0.0  ;;  %v631_v61 = vadd.f32 %v630_v11, %v9468_v16  ;;  %v824_v57 = vadd.f32 %v823_v18, %v9472_v17  ;;  %v632_v47 = vpop.f32.mrb[55].mxu0  ;;  %v825_v33 = vpop.f32.mrb[55].mxu1 }
 0x1ec   :  { %v953_v36 = vmax.f32 %v629_v28, 0.0  ;;  %v955_v55 = vmax.f32 %v822_v59, 0.0  ;;  %v633_v45 = vadd.f32 %v632_v47, %v9476_v20  ;;  %v826_v52 = vadd.f32 %v825_v33, %v9480_v21 }
 0x1ed   :  { %v9765_v35 = vmax.f32 %v944_v49, %v952_v62  ;;  %v9767_v5 = vmax.f32 %v946_v60, %v954_v40  ;;  %v956_v32 = vmax.f32 %v631_v61, 0.0  ;;  %v958_v1 = vmax.f32 %v824_v57, 0.0 }
 0x1ee   :  { %v9769_v29 = vmax.f32 %v945_v15, %v953_v36  ;;  %v9771_v48 = vmax.f32 %v947_v44, %v955_v55  ;;  %v957_v11 = vmax.f32 %v633_v45, 0.0  ;;  %v959_v18 = vmax.f32 %v826_v52, 0.0 }
 0x1ef   :  { %12795 = vst [vmem:[#allocation39_spill] sm:$0xff] %v9765_v35  ;;  %12796 = vst [vmem:[#allocation40_spill] sm:$0xff] %v9767_v5  ;;  %v9773_v0 = vmax.f32 %v948_v30, %v956_v32  ;;  %v9775_v28 = vmax.f32 %v950_v13, %v958_v1 }
 0x1f0   :  { %12797 = vst [vmem:[#allocation41_spill] sm:$0xff] %v9769_v29  ;;  %v9777_v59 = vmax.f32 %v949_v23, %v957_v11  ;;  %v9779_v47 = vmax.f32 %v951_v3, %v959_v18  ;;  %v636_v49 = vpop.f32.mrb[56].mxu0  ;;  %v829_v62 = vpop.f32.mrb[56].mxu1 }
 0x1f1   :  { %12798 = vst [vmem:[#allocation42_spill] sm:$0xff] %v9773_v0  ;;  %12799 = vst [vmem:[#allocation43_spill] sm:$0xff] %v9775_v28  ;;  %v638_v40 = vpop.f32.mrb[57].mxu0  ;;  %v831_v60 = vpop.f32.mrb[57].mxu1  ;;  %v8237_v36 = vpack.i.bf16 %v9775_v28, %v9767_v5  ;;  %v637_v13 = vadd.f32 %v636_v49, %v9468_v16  ;;  %v830_v23 = vadd.f32 %v829_v62, %v9472_v17 }
 0x1f2   :  { %12800 = vst [vmem:[#allocation44_spill] sm:$0xff] %v9777_v59  ;;  %v640_v15 = vpop.f32.mrb[58].mxu0  ;;  %v833_v44 = vpop.f32.mrb[58].mxu1  ;;  %v8242_v45 = vpack.i.bf16 %v9777_v59, %v9769_v29  ;;  %v639_v3 = vadd.f32 %v638_v40, %v9476_v20  ;;  %v832_v61 = vadd.f32 %v831_v60, %v9480_v21  ;;  %v8247_v32 = vpack.i.bf16 %v9773_v0, %v9765_v35 }
 0x1f3   :  { %v642_v30 = vpop.f32.mrb[59].mxu0  ;;  %8238 = vrot.lane.b32.xlu1 %v8237_v36, %s9190_s0  ;;  %v835_v1 = vpop.f32.mrb[59].mxu1  ;;  %v641_v57 = vadd.f32 %v640_v15, %v9468_v16  ;;  %v834_v33 = vadd.f32 %v833_v44, %v9472_v17  ;;  %v960_v11 = vmax.f32 %v637_v13, 0.0  ;;  %v962_v49 = vmax.f32 %v830_v23, 0.0 }
 0x1f4   :  { %8243 = vrot.lane.b32.xlu0 %v8242_v45, %s9190_s0  ;;  %v643_v55 = vadd.f32 %v642_v30, %v9476_v20  ;;  %v836_v52 = vadd.f32 %v835_v1, %v9480_v21  ;;  %v961_v18 = vmax.f32 %v639_v3, 0.0  ;;  %v963_v40 = vmax.f32 %v832_v61, 0.0 }
 0x1f5   :  { %v964_v60 = vmax.f32 %v641_v57, 0.0  ;;  %v966_v45 = vmax.f32 %v834_v33, 0.0 }
 0x1f6   :  { %v965_v1 = vmax.f32 %v643_v55, 0.0  ;;  %v967_v5 = vmax.f32 %v836_v52, 0.0 }
 0x1f8   :  { %v646_v62 = vpop.f32.mrb[60].mxu0  ;;  %v839_v36 = vpop.f32.mrb[60].mxu1  ;;  %8248 = vrot.lane.b32.xlu0 %v8247_v32, %s9190_s0 }
 0x1f9   :  { %v647_v15 = vadd.f32 %v646_v62, %v9468_v16  ;;  %v840_v44 = vadd.f32 %v839_v36, %v9472_v17  ;;  %v648_v30 = vpop.f32.mrb[61].mxu0  ;;  %v841_v28 = vpop.f32.mrb[61].mxu1 }
 0x1fa   :  { %v649_v0 = vadd.f32 %v648_v30, %v9476_v20  ;;  %v842_v13 = vadd.f32 %v841_v28, %v9480_v21  ;;  %v650_v3 = vpop.f32.mrb[62].mxu0  ;;  %v843_v23 = vpop.f32.mrb[62].mxu1 }
 0x1fb   :  { %v968_v61 = vmax.f32 %v647_v15, 0.0  ;;  %v970_v35 = vmax.f32 %v840_v44, 0.0  ;;  %v651_v32 = vadd.f32 %v650_v3, %v9468_v16  ;;  %v844_v57 = vadd.f32 %v843_v23, %v9472_v17  ;;  %v652_v33 = vpop.f32.mrb[63].mxu0  ;;  %v845_v62 = vpop.f32.mrb[63].mxu1 }
 0x1fc   :  { %v969_v59 = vmax.f32 %v649_v0, 0.0  ;;  %v971_v36 = vmax.f32 %v842_v13, 0.0  ;;  %v653_v29 = vadd.f32 %v652_v33, %v9476_v20  ;;  %v846_v55 = vadd.f32 %v845_v62, %v9480_v21 }
 0x1fd   :  { %v9806_v52 = vmax.f32 %v960_v11, %v968_v61  ;;  %v9808_v30 = vmax.f32 %v962_v49, %v970_v35  ;;  %v972_v28 = vmax.f32 %v651_v32, 0.0  ;;  %v974_v46 = vmax.f32 %v844_v57, 0.0 }
 0x1fe   :  { %v9810_v15 = vmax.f32 %v961_v18, %v969_v59  ;;  %v9812_v44 = vmax.f32 %v963_v40, %v971_v36  ;;  %v973_v16 = vmax.f32 %v653_v29, 0.0  ;;  %v975_v17 = vmax.f32 %v846_v55, 0.0 }
 0x1ff   :  { %v9814_v3 = vmax.f32 %v964_v60, %v972_v28  ;;  %v9816_v0 = vmax.f32 %v966_v45, %v974_v46  ;;  %v12801_v59 = vlaneseq  ;;  %v8267_v46 = vpack.i.bf16 %v9533_v42, %v9525_v34 }
 0x200   :  { %v9818_v13 = vmax.f32 %v965_v1, %v973_v16  ;;  %v9820_v20 = vmax.f32 %v967_v5, %v975_v17  ;;  %v8277_v1 = vpack.i.bf16 %v9615_v19, %v9607_v7  ;;  %v8272_v57 = vpack.i.bf16 %v9574_v58, %v9566_v53 }
 0x201   :  { %v8252_v21 = vpack.i.bf16 %v9816_v0, %v9808_v30  ;;  %v9827_v11 = vand.u32 127, %v12801_v59  ;;  %v8262_v40 = vpack.i.bf16 %v9814_v3, %v9806_v52  ;;  %v8287_v36 = vpack.i.bf16 %v9697_v41, %v9689_v24 }
 0x202   :  { %v8257_v35 = vpack.i.bf16 %v9818_v13, %v9810_v15  ;;  %v8282_v59 = vpack.i.bf16 %v9656_v14, %v9648_v4 }
 0x203   :  { %12802 = vst [vmem:[#allocation45_spill] sm:$0xff] %v9827_v11  ;;  %8253 = vrot.lane.b32.xlu0 %v8252_v21, %s9190_s0  ;;  %vm1170_vm2 = vcmp.lt.s32.totalorder %v9827_v11, 112  ;;  %v8853_v11 = vld [vmem:[#allocation6 + $0x2f0] ss:$12 sps:$4 sm:$0xff]  }
 0x204   :  { %8258 = vrot.lane.b32.xlu1 %v8257_v35, %s9190_s0 }
 0x205   :  { %v9831_v29 = vpop.permute.xlu1 %8158 }
 0x206   :  { %v12656_v5 = vunpack.i.h.bf16 %v9831_v29  ;;  %v12657_v18 = vunpack.i.l.bf16 %v9831_v29  ;;  %v8149_v49 = vpop.permute.xlu0 %8148 }
 0x207   :  { %v8151_v60 = vunpack.i.h.bf16 %v8149_v49  ;;  %v8150_v45 = vunpack.i.l.bf16 %v8149_v49  ;;  %8268 = vrot.lane.b32.xlu0 %v8267_v46, %s9190_s0  ;;  %v8297_v46 = vpack.i.bf16 %v9779_v47, %v9771_v48  ;;  %v8542_v49 = vld [vmem:[#allocation6 + $0x480] ss:$12 sps:$4 sm:$0xff]  }
 0x208   :  { %8263 = vrot.lane.b32.xlu1 %v8262_v40, %s9190_s0  ;;  %v8545_v40 = vld [vmem:[#allocation6 + $0x488] ss:$12 sps:$4 sm:$0xff]  }
 0x209   :  { %v1203_v23 = vsel %vm1170_vm2, %v12657_v18, %v8150_v45  ;;  %v1204_v61 = vsel %vm1170_vm2, %v12656_v5, %v8151_v60 }
 0x20a   :  { %v9852_v32 = vpop.permute.xlu0 %8153  ;;  %v1235_v55 = vmax.f32 %v9519_v25, %v1203_v23  ;;  %v1239_v28 = vmax.f32 %v9527_v37, %v1204_v61  ;;  %v8553_v23 = vld [vmem:[#allocation6 + $0x4a0] ss:$12 sps:$4 sm:$0xff]  }
 0x20b   :  { %v12631_v33 = vunpack.i.h.bf16 %v9852_v32  ;;  %v12651_v62 = vunpack.i.l.bf16 %v9852_v32  ;;  %8278 = vrot.lane.b32.xlu0 %v8277_v1, %s9190_s0  ;;  %v8546_v1 = vld [vmem:[#allocation6 + $0x498] ss:$12 sps:$4 sm:$0xff]  }
 0x20c   :  { %8273 = vrot.lane.b32.xlu1 %v8272_v57, %s9190_s0  ;;  %v9880_v37 = vpack.c.bf16 %v1239_v28, %v1235_v55  ;;  %v8302_v55 = vpack.i.bf16 %v9820_v20, %v9812_v44  ;;  %v8552_v28 = vld [vmem:[#allocation6 + $0x4b4] ss:$12 sps:$4 sm:$0xff]  }
 0x20d   :  { %v1187_v16 = vsel %vm1170_vm2, %v8150_v45, %v12651_v62  ;;  %v1188_v17 = vsel %vm1170_vm2, %v8151_v60, %v12631_v33  ;;  %v8549_v60 = vld [vmem:[#allocation6 + $0x560] ss:$12 sps:$4 sm:$0xff]  }
 0x20e   :  { %v1236_v21 = vmax.f32 %v9523_v31, %v1187_v16  ;;  %v1240_v35 = vmax.f32 %v9531_v38, %v1188_v17  ;;  %v8292_v31 = vpack.i.bf16 %v9738_v27, %v9730_v8  ;;  %v8548_v38 = vld [vmem:[#allocation6 + $0x49c] ss:$12 sps:$4 sm:$0xff]   ;;  %v8557_v16 = vld [vmem:[#allocation6 + $0x578] ss:$12 sps:$4 sm:$0xff]  }
 0x20f   :  { %8288 = vrot.lane.b32.xlu0 %v8287_v36, %s9190_s0 }
 0x210   :  { %v9877_v25 = vpack.c.bf16 %v1240_v35, %v1236_v21  ;;  %8283 = vrot.lane.b32.xlu1 %v8282_v59, %s9190_s0 }
 0x212   :  { %2132 = vmatprep.mubr.bf16.mxu0 %v9877_v25  ;;  %2358 = vmatprep.mubr.bf16.mxu1 %v9877_v25 }
 0x213   :  { %8298 = vrot.lane.b32.xlu0 %v8297_v46, %s9190_s0  ;;  %2133 = vmatmul.mubr.bf16.vlgmr.msra.gmra.mrb[64].mxu0 %v9880_v37  ;;  %v8550_v46 = vld [vmem:[#allocation6 + $0x4b0] ss:$12 sps:$4 sm:$0xff]  }
 0x214   :  { %2359 = vmatmul.mubr.bf16.vlgmr.msra.gmra.mrb[64].mxu1 %v9880_v37  ;;  %8293 = vrot.lane.b32.xlu1 %v8292_v31, %s9190_s0 }
 0x215   :  { %v9892_v45 = vpop.permute.xlu0 %8163  ;;  %7469 = vmatpush3.bf16.msra.mxu1 %v8545_v40  ;;  %2214 = vmatpush1.bf16.msra.mxu0 %v8542_v49  ;;  %v8561_v49 = vld [vmem:[#allocation6 + $0x4b8] ss:$12 sps:$4 sm:$0xff]  }
 0x216   :  { %v12630_v61 = vunpack.i.h.bf16 %v9892_v45  ;;  %v12634_v57 = vunpack.i.l.bf16 %v9892_v45  ;;  %v8169_v36 = vpop.permute.xlu1 %8168  ;;  %2215 = vmatprep.subr.bf16.mxu0 %v8548_v38  ;;  %7470 = vmatprep.subr.bf16.mxu1 %v8549_v60 }
 0x217   :  { %v8171_v17 = vunpack.i.h.bf16 %v8169_v36  ;;  %v8170_v21 = vunpack.i.l.bf16 %v8169_v36 }
 0x218   :  { %8303 = vrot.lane.b32.xlu1 %v8302_v55, %s9190_s0  ;;  %v8556_v55 = vld [vmem:[#allocation6 + $0x4cc] ss:$12 sps:$4 sm:$0xff]  }
 0x219   :  { %v1190_v35 = vsel %vm1170_vm2, %v8171_v17, %v12630_v61  ;;  %v1189_v59 = vsel %vm1170_vm2, %v8170_v21, %v12634_v57  ;;  %2216 = vmatpush1.bf16.msra.mxu0 %v8546_v1  ;;  %7471 = vmatpush3.bf16.msra.mxu1 %v8553_v23  ;;  %v8565_v61 = vld [vmem:[#allocation6 + $0x590] ss:$12 sps:$4 sm:$0xff]  }
 0x21a   :  { %v1248_v40 = vmax.f32 %v9572_v56, %v1190_v35  ;;  %v1244_v31 = vmax.f32 %v9564_v50, %v1189_v59  ;;  %v9909_v38 = vpop.permute.xlu1 %8173  ;;  %2217 = vmatprep.subr.bf16.mxu0 %v8552_v28  ;;  %7472 = vmatprep.subr.bf16.mxu1 %v8557_v16  ;;  %v8554_v56 = vld [vmem:[#allocation6 + $0x4c8] ss:$12 sps:$4 sm:$0xff]   ;;  %v8569_v23 = vld [vmem:[#allocation6 + $0x4d0] ss:$12 sps:$4 sm:$0xff]  }
 0x21b   :  { %v12635_v60 = vunpack.i.h.bf16 %v9909_v38  ;;  %v12633_v36 = vunpack.i.l.bf16 %v9909_v38  ;;  %v8560_v35 = vld [vmem:[#allocation6 + $0x4e4] ss:$12 sps:$4 sm:$0xff]  }
 0x21c   :  { %v9913_v33 = vpack.c.bf16 %v1248_v40, %v1244_v31  ;;  %v8562_v40 = vld [vmem:[#allocation6 + $0x4f8] ss:$12 sps:$4 sm:$0xff]   ;;  %v8597_v57 = vld [vmem:[#allocation6 + $0x5f0] ss:$12 sps:$4 sm:$0xff]  }
 0x21d   :  { %v1205_v1 = vsel %vm1170_vm2, %v12633_v36, %v8170_v21  ;;  %v1206_v50 = vsel %vm1170_vm2, %v12635_v60, %v8171_v17  ;;  %2218 = vmatpush1.bf16.msra.mxu0 %v8550_v46  ;;  %7473 = vmatpush3.bf16.msra.mxu1 %v8561_v49  ;;  %v8573_v21 = vld [vmem:[#allocation6 + $0x5a8] ss:$12 sps:$4 sm:$0xff]   ;;  %v8558_v17 = vld [vmem:[#allocation6 + $0x4e0] ss:$12 sps:$4 sm:$0xff]  }
 0x21e   :  { %v1243_v28 = vmax.f32 %v9560_v39, %v1205_v1  ;;  %v1247_v16 = vmax.f32 %v9568_v54, %v1206_v50  ;;  %2142 = vmatprep.mubr.bf16.mxu0 %v9913_v33  ;;  %2366 = vmatprep.mubr.bf16.mxu1 %v9913_v33  ;;  %v8577_v46 = vld [vmem:[#allocation6 + $0x4e8] ss:$12 sps:$4 sm:$0xff]   ;;  %v8581_v54 = vld [vmem:[#allocation6 + $0x5c0] ss:$12 sps:$4 sm:$0xff]  }
 0x21f   :  { %2219 = vmatprep.subr.bf16.mxu0 %v8556_v55  ;;  %7474 = vmatprep.subr.bf16.mxu1 %v8565_v61  ;;  %v8564_v39 = vld [vmem:[#allocation6 + $0x4fc] ss:$12 sps:$4 sm:$0xff]   ;;  %v8585_v61 = vld [vmem:[#allocation6 + $0x500] ss:$12 sps:$4 sm:$0xff]  }
 0x220   :  { %v9927_v59 = vpack.c.bf16 %v1247_v16, %v1243_v28  ;;  %v8568_v50 = vld [vmem:[#allocation6 + $0x514] ss:$12 sps:$4 sm:$0xff]   ;;  %v8572_v36 = vld [vmem:[#allocation6 + $0x52c] ss:$12 sps:$4 sm:$0xff]  }
 0x221   :  { %2220 = vmatpush1.bf16.msra.mxu0 %v8554_v56  ;;  %7475 = vmatpush3.bf16.msra.mxu1 %v8569_v23  ;;  %v8589_v56 = vld [vmem:[#allocation6 + $0x5d8] ss:$12 sps:$4 sm:$0xff]  }
 0x222   :  { %2143 = vmatmul.mubr.bf16.gmra.mrb[68].mxu0 %v9927_v59  ;;  %2367 = vmatmul.mubr.bf16.gmra.mrb[68].mxu1 %v9927_v59 }
 0x223   :  { %2221 = vmatprep.subr.bf16.mxu0 %v8560_v35  ;;  %7476 = vmatprep.subr.bf16.mxu1 %v8573_v21  ;;  %v8566_v21 = vld [vmem:[#allocation6 + $0x510] ss:$12 sps:$4 sm:$0xff]  }
 0x225   :  { %v9931_v49 = vpop.permute.xlu1 %8178  ;;  %2222 = vmatpush1.bf16.msra.mxu0 %v8558_v17  ;;  %7477 = vmatpush3.bf16.msra.mxu1 %v8577_v46  ;;  %v8593_v17 = vld [vmem:[#allocation6 + $0x518] ss:$12 sps:$4 sm:$0xff]  }
 0x226   :  { %v12640_v31 = vunpack.i.h.bf16 %v9931_v49  ;;  %v12632_v55 = vunpack.i.l.bf16 %v9931_v49  ;;  %v8184_v1 = vpop.permute.xlu0 %8183  ;;  %2223 = vmatprep.subr.bf16.mxu0 %v8564_v39  ;;  %7478 = vmatprep.subr.bf16.mxu1 %v8581_v54 }
 0x227   :  { %v8186_v23 = vunpack.i.h.bf16 %v8184_v1  ;;  %v8185_v28 = vunpack.i.l.bf16 %v8184_v1 }
 0x229   :  { %v1191_v16 = vsel %vm1170_vm2, %v8185_v28, %v12632_v55  ;;  %v1192_v35 = vsel %vm1170_vm2, %v8186_v23, %v12640_v31  ;;  %2224 = vmatpush1.bf16.msra.mxu0 %v8562_v40  ;;  %7479 = vmatpush3.bf16.msra.mxu1 %v8585_v61  ;;  %v8601_v61 = vld [vmem:[#allocation6 + $0x530] ss:$12 sps:$4 sm:$0xff]  }
 0x22a   :  { %v1252_v46 = vmax.f32 %v9605_v6, %v1191_v16  ;;  %v1256_v39 = vmax.f32 %v9613_v12, %v1192_v35  ;;  %v9945_v54 = vpop.permute.xlu0 %8188  ;;  %2225 = vmatprep.subr.bf16.mxu0 %v8568_v50  ;;  %7480 = vmatprep.subr.bf16.mxu1 %v8589_v56  ;;  %v8570_v12 = vld [vmem:[#allocation6 + $0x528] ss:$12 sps:$4 sm:$0xff]   ;;  %v8576_v16 = vld [vmem:[#allocation6 + $0x544] ss:$12 sps:$4 sm:$0xff]  }
 0x22b   :  { %v12641_v1 = vunpack.i.h.bf16 %v9945_v54  ;;  %v12642_v55 = vunpack.i.l.bf16 %v9945_v54 }
 0x22c   :  { %v9949_v60 = vpack.c.bf16 %v1256_v39, %v1252_v46  ;;  %v8584_v46 = vld [vmem:[#allocation6 + $0x574] ss:$12 sps:$4 sm:$0xff]  }
 0x22d   :  { %v1207_v40 = vsel %vm1170_vm2, %v12642_v55, %v8185_v28  ;;  %v1208_v6 = vsel %vm1170_vm2, %v12641_v1, %v8186_v23  ;;  %2226 = vmatpush1.bf16.msra.mxu0 %v8566_v21  ;;  %7481 = vmatpush3.bf16.msra.mxu1 %v8593_v17  ;;  %v8605_v28 = vld [vmem:[#allocation6 + $0x6c8] ss:$12 sps:$4 sm:$0xff]   ;;  %v8574_v23 = vld [vmem:[#allocation6 + $0x540] ss:$12 sps:$4 sm:$0xff]   ;;  %v8578_v21 = vld [vmem:[#allocation6 + $0x558] ss:$12 sps:$4 sm:$0xff]  }
 0x22e   :  { %v1251_v50 = vmax.f32 %v9601_v2, %v1207_v40  ;;  %v1255_v56 = vmax.f32 %v9609_v10, %v1208_v6  ;;  %2152 = vmatprep.mubr.bf16.mxu0 %v9949_v60  ;;  %2374 = vmatprep.mubr.bf16.mxu1 %v9949_v60  ;;  %v8580_v2 = vld [vmem:[#allocation6 + $0x55c] ss:$12 sps:$4 sm:$0xff]  }
 0x22f   :  { %2227 = vmatprep.subr.bf16.mxu0 %v8572_v36  ;;  %7482 = vmatprep.subr.bf16.mxu1 %v8597_v57 }
 0x230   :  { %v9963_v35 = vpack.c.bf16 %v1255_v56, %v1251_v50 }
 0x231   :  { %2228 = vmatpush1.bf16.msra.mxu0 %v8570_v12  ;;  %7483 = vmatpush3.bf16.msra.mxu1 %v8601_v61  ;;  %v8582_v61 = vld [vmem:[#allocation6 + $0x570] ss:$12 sps:$4 sm:$0xff]  }
 0x232   :  { %2153 = vmatmul.mubr.bf16.gmra.mrb[72].mxu0 %v9963_v35  ;;  %2375 = vmatmul.mubr.bf16.gmra.mrb[72].mxu1 %v9963_v35 }
 0x233   :  { %2229 = vmatprep.subr.bf16.mxu0 %v8576_v16  ;;  %7532 = vmatprep.subr.bf16.mxu1 %v8605_v28 }
 0x235   :  { %v9967_v10 = vpop.permute.xlu0 %8193  ;;  %2230 = vmatpush1.bf16.msra.mxu0 %v8574_v23 }
 0x236   :  { %v12637_v36 = vunpack.i.h.bf16 %v9967_v10  ;;  %v12636_v57 = vunpack.i.l.bf16 %v9967_v10  ;;  %v8199_v17 = vpop.permute.xlu1 %8198  ;;  %2231 = vmatprep.subr.bf16.mxu0 %v8580_v2  ;;  %v8588_v2 = vld [vmem:[#allocation6 + $0x58c] ss:$12 sps:$4 sm:$0xff]  }
 0x237   :  { %v8201_v39 = vunpack.i.h.bf16 %v8199_v17  ;;  %v8200_v40 = vunpack.i.l.bf16 %v8199_v17 }
 0x239   :  { %v1194_v6 = vsel %vm1170_vm2, %v8201_v39, %v12637_v36  ;;  %v1193_v12 = vsel %vm1170_vm2, %v8200_v40, %v12636_v57  ;;  %2232 = vmatpush1.bf16.msra.mxu0 %v8578_v21 }
 0x23a   :  { %v1264_v50 = vmax.f32 %v9654_v26, %v1194_v6  ;;  %v1260_v56 = vmax.f32 %v9646_v63, %v1193_v12  ;;  %v9981_v16 = vpop.permute.xlu1 %8203  ;;  %2233 = vmatprep.subr.bf16.mxu0 %v8584_v46  ;;  %v8586_v26 = vld [vmem:[#allocation6 + $0x588] ss:$12 sps:$4 sm:$0xff]   ;;  %v8592_v12 = vld [vmem:[#allocation6 + $0x5a4] ss:$12 sps:$4 sm:$0xff]  }
 0x23b   :  { %v12638_v28 = vunpack.i.h.bf16 %v9981_v16  ;;  %v12639_v23 = vunpack.i.l.bf16 %v9981_v16 }
 0x23c   :  { %v9985_v17 = vpack.c.bf16 %v1264_v50, %v1260_v56 }
 0x23d   :  { %v1209_v21 = vsel %vm1170_vm2, %v12639_v23, %v8200_v40  ;;  %v1210_v63 = vsel %vm1170_vm2, %v12638_v28, %v8201_v39  ;;  %2234 = vmatpush1.bf16.msra.mxu0 %v8582_v61  ;;  %v8590_v40 = vld [vmem:[#allocation6 + $0x5a0] ss:$12 sps:$4 sm:$0xff]   ;;  %v8596_v39 = vld [vmem:[#allocation6 + $0x5bc] ss:$12 sps:$4 sm:$0xff]  }
 0x23e   :  { %v1259_v46 = vmax.f32 %v9642_v43, %v1209_v21  ;;  %v1263_v6 = vmax.f32 %v9650_v9, %v1210_v63  ;;  %2162 = vmatprep.mubr.bf16.mxu0 %v9985_v17  ;;  %2382 = vmatprep.mubr.bf16.mxu1 %v9985_v17  ;;  %v8594_v43 = vld [vmem:[#allocation6 + $0x5b8] ss:$12 sps:$4 sm:$0xff]   ;;  %v8600_v21 = vld [vmem:[#allocation6 + $0x5d4] ss:$12 sps:$4 sm:$0xff]  }
 0x23f   :  { %2235 = vmatprep.subr.bf16.mxu0 %v8588_v2  ;;  %v8604_v28 = vld [vmem:[#allocation6 + $0x5ec] ss:$12 sps:$4 sm:$0xff]  }
 0x240   :  { %v9999_v50 = vpack.c.bf16 %v1263_v6, %v1259_v46 }
 0x241   :  { %2236 = vmatpush1.bf16.msra.mxu0 %v8586_v26 }
 0x242   :  { %2163 = vmatmul.mubr.bf16.gmra.mrb[76].mxu0 %v9999_v50  ;;  %2383 = vmatmul.mubr.bf16.gmra.mrb[76].mxu1 %v9999_v50 }
 0x243   :  { %2237 = vmatprep.subr.bf16.mxu0 %v8592_v12  ;;  %v8598_v12 = vld [vmem:[#allocation6 + $0x5d0] ss:$12 sps:$4 sm:$0xff]  }
 0x245   :  { %v10003_v61 = vpop.permute.xlu1 %8208  ;;  %2238 = vmatpush1.bf16.msra.mxu0 %v8590_v40 }
 0x246   :  { %v12650_v9 = vunpack.i.h.bf16 %v10003_v61  ;;  %v12648_v56 = vunpack.i.l.bf16 %v10003_v61  ;;  %v8214_v2 = vpop.permute.xlu0 %8213  ;;  %2239 = vmatprep.subr.bf16.mxu0 %v8596_v39 }
 0x247   :  { %v8216_v63 = vunpack.i.h.bf16 %v8214_v2  ;;  %v8215_v26 = vunpack.i.l.bf16 %v8214_v2 }
 0x249   :  { %v1195_v46 = vsel %vm1170_vm2, %v8215_v26, %v12648_v56  ;;  %v1196_v6 = vsel %vm1170_vm2, %v8216_v63, %v12650_v9  ;;  %2240 = vmatpush1.bf16.msra.mxu0 %v8594_v43 }
 0x24a   :  { %v1268_v40 = vmax.f32 %v9687_v51, %v1195_v46  ;;  %v1272_v57 = vmax.f32 %v9695_v22, %v1196_v6  ;;  %v10017_v39 = vpop.permute.xlu0 %8218  ;;  %2241 = vmatprep.subr.bf16.mxu0 %v8600_v21  ;;  %v8602_v22 = vld [vmem:[#allocation6 + $0x5e8] ss:$12 sps:$4 sm:$0xff]   ;;  %v12804_v6 = vld [vmem:[#allocation31_spill] sm:$0xff] }
 0x24b   :  { %v12649_v2 = vunpack.i.h.bf16 %v10017_v39  ;;  %v12643_v36 = vunpack.i.l.bf16 %v10017_v39  ;;  %v12803_v21 = vld [vmem:[#allocation29_spill] sm:$0xff] }
 0x24c   :  { %v10021_v23 = vpack.c.bf16 %v1272_v57, %v1268_v40  ;;  %v8608_v57 = vld [vmem:[#allocation6 + $0x604] ss:$12 sps:$4 sm:$0xff]  }
 0x24d   :  { %v1211_v43 = vsel %vm1170_vm2, %v12643_v36, %v8215_v26  ;;  %v1212_v51 = vsel %vm1170_vm2, %v12649_v2, %v8216_v63  ;;  %2242 = vmatpush1.bf16.msra.mxu0 %v8598_v12 }
 0x24e   :  { %v1267_v46 = vmax.f32 %v12803_v21, %v1211_v43  ;;  %v1271_v31 = vmax.f32 %v12804_v6, %v1212_v51  ;;  %2172 = vmatprep.mubr.bf16.mxu0 %v10021_v23  ;;  %2390 = vmatprep.mubr.bf16.mxu1 %v10021_v23  ;;  %v12807_v6 = vld [vmem:[#allocation35_spill] sm:$0xff] }
 0x24f   :  { %2243 = vmatprep.subr.bf16.mxu0 %v8604_v28 }
 0x250   :  { %v10035_v40 = vpack.c.bf16 %v1271_v31, %v1267_v46 }
 0x251   :  { %2244 = vmatpush1.bf16.msra.mxu0 %v8602_v22  ;;  %v12806_v22 = vld [vmem:[#allocation38_spill] sm:$0xff] }
 0x252   :  { %12805 = vst [vmem:[#allocation29_spill] sm:$0xff] %v10035_v40  ;;  %2173 = vmatmul.mubr.bf16.gmra.mrb[80].mxu0 %v10035_v40  ;;  %2391 = vmatmul.mubr.bf16.gmra.mrb[80].mxu1 %v10035_v40 }
 0x253   :  { %3161 = vmatprep.subr.bf16.mxu0 %v8608_v57 }
 0x255   :  { %v10039_v63 = vpop.permute.xlu0 %8223 }
 0x256   :  { %v12644_v26 = vunpack.i.h.bf16 %v10039_v63  ;;  %v12645_v12 = vunpack.i.l.bf16 %v10039_v63  ;;  %v8229_v43 = vpop.permute.xlu1 %8228 }
 0x257   :  { %v8231_v51 = vunpack.i.h.bf16 %v8229_v43  ;;  %v8230_v21 = vunpack.i.l.bf16 %v8229_v43 }
 0x259   :  { %v1198_v31 = vsel %vm1170_vm2, %v8231_v51, %v12644_v26  ;;  %v1197_v28 = vsel %vm1170_vm2, %v8230_v21, %v12645_v12 }
 0x25a   :  { %v1280_v46 = vmax.f32 %v12806_v22, %v1198_v31  ;;  %v1276_v57 = vmax.f32 %v12807_v6, %v1197_v28  ;;  %v10053_v1 = vpop.permute.xlu1 %8233  ;;  %v12809_v22 = vld [vmem:[#allocation33_spill] sm:$0xff]  ;;  %v12810_v6 = vld [vmem:[#allocation36_spill] sm:$0xff] }
 0x25b   :  { %v12646_v55 = vunpack.i.h.bf16 %v10053_v1  ;;  %v12647_v43 = vunpack.i.l.bf16 %v10053_v1 }
 0x25c   :  { %v10057_v36 = vpack.c.bf16 %v1280_v46, %v1276_v57 }
 0x25d   :  { %v1213_v26 = vsel %vm1170_vm2, %v12647_v43, %v8230_v21  ;;  %v1214_v31 = vsel %vm1170_vm2, %v12646_v55, %v8231_v51  ;;  %v12813_v43 = vld [vmem:[#allocation44_spill] sm:$0xff] }
 0x25e   :  { %12808 = vst [vmem:[#allocation31_spill] sm:$0xff] %v10057_v36  ;;  %v1275_v28 = vmax.f32 %v12809_v22, %v1213_v26  ;;  %v1279_v12 = vmax.f32 %v12810_v6, %v1214_v31  ;;  %2182 = vmatprep.mubr.bf16.mxu0 %v10057_v36  ;;  %2398 = vmatprep.mubr.bf16.mxu1 %v10057_v36  ;;  %v12820_v36 = vunpack.i.h.bf16 %v9831_v29 }
 0x260   :  { %v10071_v46 = vpack.c.bf16 %v1279_v12, %v1275_v28  ;;  %v12812_v28 = vld [vmem:[#allocation41_spill] sm:$0xff] }
 0x262   :  { %12811 = vst [vmem:[#allocation38_spill] sm:$0xff] %v10071_v46  ;;  %2183 = vmatmul.mubr.bf16.gmra.mrb[84].mxu0 %v10071_v46  ;;  %2399 = vmatmul.mubr.bf16.gmra.mrb[84].mxu1 %v10071_v46 }
 0x265   :  { %v10075_v21 = vpop.permute.xlu1 %8238 }
 0x266   :  { %v12653_v57 = vunpack.i.h.bf16 %v10075_v21  ;;  %v12652_v51 = vunpack.i.l.bf16 %v10075_v21  ;;  %v8244_v55 = vpop.permute.xlu0 %8243 }
 0x267   :  { %v8246_v26 = vunpack.i.h.bf16 %v8244_v55  ;;  %v8245_v22 = vunpack.i.l.bf16 %v8244_v55 }
 0x269   :  { %v1199_v31 = vsel %vm1170_vm2, %v8245_v22, %v12652_v51  ;;  %v1200_v12 = vsel %vm1170_vm2, %v8246_v26, %v12653_v57 }
 0x26a   :  { %v1284_v6 = vmax.f32 %v12812_v28, %v1199_v31  ;;  %v1288_v56 = vmax.f32 %v12813_v43, %v1200_v12  ;;  %v10089_v2 = vpop.permute.xlu0 %8248  ;;  %v12815_v28 = vld [vmem:[#allocation39_spill] sm:$0xff]  ;;  %v12816_v12 = vld [vmem:[#allocation42_spill] sm:$0xff] }
 0x26b   :  { %v12654_v9 = vunpack.i.h.bf16 %v10089_v2  ;;  %v12655_v55 = vunpack.i.l.bf16 %v10089_v2 }
 0x26c   :  { %v10093_v62 = vpack.c.bf16 %v1288_v56, %v1284_v6 }
 0x26d   :  { %v1215_v51 = vsel %vm1170_vm2, %v12655_v55, %v8245_v22  ;;  %v1216_v31 = vsel %vm1170_vm2, %v12654_v9, %v8246_v26 }
 0x26e   :  { %12814 = vst [vmem:[#allocation35_spill] sm:$0xff] %v10093_v62  ;;  %v1283_v43 = vmax.f32 %v12815_v28, %v1215_v51  ;;  %v1287_v57 = vmax.f32 %v12816_v12, %v1216_v31  ;;  %2192 = vmatprep.mubr.bf16.mxu0 %v10093_v62  ;;  %2406 = vmatprep.mubr.bf16.mxu1 %v10093_v62 }
 0x270   :  { %v10107_v56 = vpack.c.bf16 %v1287_v57, %v1283_v43 }
 0x272   :  { %12817 = vst [vmem:[#allocation33_spill] sm:$0xff] %v10107_v56  ;;  %2193 = vmatmul.mubr.bf16.gmra.mrb[88].mxu0 %v10107_v56  ;;  %2407 = vmatmul.mubr.bf16.gmra.mrb[88].mxu1 %v10107_v56 }
 0x275   :  { %v10111_v22 = vpop.permute.xlu0 %8253 }
 0x276   :  { %v12664_v6 = vunpack.i.h.bf16 %v10111_v22  ;;  %v12665_v26 = vunpack.i.l.bf16 %v10111_v22  ;;  %v8259_v9 = vpop.permute.xlu1 %8258 }
 0x277   :  { %v8261_v51 = vunpack.i.h.bf16 %v8259_v9  ;;  %v8260_v28 = vunpack.i.l.bf16 %v8259_v9 }
 0x279   :  { %v1202_v31 = vsel %vm1170_vm2, %v8261_v51, %v12664_v6  ;;  %v1201_v57 = vsel %vm1170_vm2, %v8260_v28, %v12665_v26  ;;  %v8269_v43 = vpop.permute.xlu0 %8268  ;;  %v12819_v6 = vunpack.i.l.bf16 %v9831_v29 }
 0x27a   :  { %v1296_v12 = vmax.f32 %v9818_v13, %v1202_v31  ;;  %v1292_v55 = vmax.f32 %v9810_v15, %v1201_v57  ;;  %v8271_v5 = vunpack.i.h.bf16 %v8269_v43  ;;  %v8270_v18 = vunpack.i.l.bf16 %v8269_v43  ;;  %v10125_v56 = vpop.permute.xlu1 %8263 }
 0x27b   :  { %v12668_v9 = vunpack.i.h.bf16 %v10125_v56  ;;  %v12669_v62 = vunpack.i.l.bf16 %v10125_v56 }
 0x27c   :  { %v10129_v46 = vpack.c.bf16 %v1296_v12, %v1292_v55  ;;  %v1219_v26 = vsel %vm1170_vm2, %v8270_v18, %v12819_v6  ;;  %v1220_v15 = vsel %vm1170_vm2, %v8271_v5, %v12820_v36 }
 0x27d   :  { %v1238_v13 = vmax.f32 %v9525_v34, %v1219_v26  ;;  %v10140_v31 = vpop.permute.xlu0 %8278  ;;  %v1242_v57 = vmax.f32 %v9533_v42, %v1220_v15  ;;  %v1217_v55 = vsel %vm1170_vm2, %v12669_v62, %v8260_v28  ;;  %v1218_v6 = vsel %vm1170_vm2, %v12668_v9, %v8261_v51  ;;  %v12823_v9 = vld [vmem:[#allocation21_spill] sm:$0xff] }
 0x27e   :  { %12818 = vst [vmem:[#allocation36_spill] sm:$0xff] %v10129_v46  ;;  %v8274_v29 = vpop.permute.xlu1 %8273  ;;  %2202 = vmatprep.mubr.bf16.mxu0 %v10129_v46  ;;  %2414 = vmatprep.mubr.bf16.mxu1 %v10129_v46  ;;  %v12821_v34 = vunpack.i.l.bf16 %v9852_v32  ;;  %v1291_v36 = vmax.f32 %v9806_v52, %v1217_v55  ;;  %v1295_v26 = vmax.f32 %v9814_v3, %v1218_v6  ;;  %v12822_v28 = vunpack.i.h.bf16 %v9852_v32 }
 0x27f   :  { %v8276_v51 = vunpack.i.h.bf16 %v8274_v29  ;;  %v10166_v46 = vpack.c.bf16 %v1242_v57, %v1238_v13  ;;  %v8275_v52 = vunpack.i.l.bf16 %v8274_v29  ;;  %v12826_v3 = vunpack.i.h.bf16 %v9909_v38 }
 0x280   :  { %v1171_v42 = vsel %vm1170_vm2, %v12821_v34, %v8270_v18  ;;  %v1172_v43 = vsel %vm1170_vm2, %v12822_v28, %v8271_v5  ;;  %v10163_v12 = vpack.c.bf16 %v1295_v26, %v1291_v36  ;;  %v12825_v18 = vld [vmem:[#allocation22_spill] sm:$0xff]  ;;  %v8281_v5 = vunpack.i.h.bf16 %v10140_v31 }
 0x281   :  { %v8289_v15 = vpop.permute.xlu0 %8288  ;;  %v1237_v62 = vmax.f32 %v12823_v9, %v1171_v42  ;;  %12824 = vst [vmem:[#allocation41_spill] sm:$0xff] %v10166_v46  ;;  %v1241_v34 = vmax.f32 %v12825_v18, %v1172_v43  ;;  %v1222_v32 = vsel %vm1170_vm2, %v8276_v51, %v12826_v3  ;;  %v12827_v13 = vunpack.i.h.bf16 %v9892_v45 }
 0x282   :  { %v10168_v40 = vpop.permute.xlu1 %8283  ;;  %v8291_v55 = vunpack.i.h.bf16 %v8289_v15  ;;  %2203 = vmatmul.mubr.bf16.gmra.mrb[92].mxu0 %v10163_v12  ;;  %2415 = vmatmul.mubr.bf16.gmra.mrb[92].mxu1 %v10163_v12  ;;  %v8290_v6 = vunpack.i.l.bf16 %v8289_v15  ;;  %v12828_v29 = vunpack.i.l.bf16 %v9892_v45  ;;  %v12829_v36 = vunpack.i.l.bf16 %v9909_v38 }
 0x283   :  { %v1174_v57 = vsel %vm1170_vm2, %v12827_v13, %v8276_v51  ;;  %2245 = vmatprep.mubr.bf16.mxu0 %v10166_v46  ;;  %2455 = vmatprep.mubr.bf16.mxu1 %v10166_v46  ;;  %v12830_v28 = vunpack.i.h.bf16 %v10003_v61  ;;  %v12831_v51 = vunpack.i.h.bf16 %v10017_v39  ;;  %v1250_v18 = vmax.f32 %v9574_v58, %v1222_v32 }
 0x284   :  { %v1173_v42 = vsel %vm1170_vm2, %v12828_v29, %v8275_v52  ;;  %v1221_v26 = vsel %vm1170_vm2, %v8275_v52, %v12829_v36  ;;  %v12832_v3 = vunpack.i.l.bf16 %v10003_v61  ;;  %v12833_v52 = vunpack.i.l.bf16 %v10017_v39 }
 0x285   :  { %v1180_v43 = vsel %vm1170_vm2, %v12830_v28, %v8291_v55  ;;  %v1228_v15 = vsel %vm1170_vm2, %v8291_v55, %v12831_v51  ;;  %v1246_v45 = vmax.f32 %v9566_v53, %v1221_v26  ;;  %v8299_v29 = vpop.permute.xlu0 %8298  ;;  %v12834_v28 = vld [vmem:[#allocation30_spill] sm:$0xff]  ;;  %v12835_v51 = vld [vmem:[#allocation32_spill] sm:$0xff]  ;;  %v10215_v32 = vpack.c.bf16 %v1241_v34, %v1237_v62 }
 0x286   :  { %v1179_v38 = vsel %vm1170_vm2, %v12832_v3, %v8290_v6  ;;  %v1227_v13 = vsel %vm1170_vm2, %v8290_v6, %v12833_v52  ;;  %v8294_v36 = vpop.permute.xlu1 %8293  ;;  %v1273_v53 = vmax.f32 %v12835_v51, %v1180_v43  ;;  %v1274_v58 = vmax.f32 %v9697_v41, %v1228_v15  ;;  %v12838_v6 = vld [vmem:[#allocation24_spill] sm:$0xff]  ;;  %v12839_v52 = vld [vmem:[#allocation23_spill] sm:$0xff] }
 0x287   :  { %v1269_v9 = vmax.f32 %v12834_v28, %v1179_v38  ;;  %v1270_v55 = vmax.f32 %v9689_v24, %v1227_v13  ;;  %v12836_v61 = vunpack.i.l.bf16 %v9945_v54  ;;  %v12837_v26 = vunpack.i.l.bf16 %v10140_v31  ;;  %v8609_v41 = vld [vmem:[#allocation6 + $0x608] ss:$12 sps:$4 sm:$0xff]  }
 0x288   :  { %v1249_v3 = vmax.f32 %v12838_v6, %v1174_v57  ;;  %v1245_v46 = vmax.f32 %v12839_v52, %v1173_v42  ;;  %v8301_v43 = vunpack.i.h.bf16 %v8299_v29  ;;  %v8300_v13 = vunpack.i.l.bf16 %v8299_v29  ;;  %v8606_v42 = vld [vmem:[#allocation6 + $0x600] ss:$12 sps:$4 sm:$0xff]  }
 0x289   :  { %v1223_v39 = vsel %vm1170_vm2, %v12837_v26, %v12836_v61  ;;  %v10225_v38 = vpack.c.bf16 %v1273_v53, %v1269_v9  ;;  %v10227_v24 = vpack.c.bf16 %v1274_v58, %v1270_v55  ;;  %v12840_v62 = vunpack.i.h.bf16 %v9945_v54  ;;  %v8613_v29 = vld [vmem:[#allocation6 + $0x6e0] ss:$12 sps:$4 sm:$0xff]   ;;  %v8612_v61 = vld [vmem:[#allocation6 + $0x61c] ss:$12 sps:$4 sm:$0xff]  }
 0x28a   :  { %v12841_v15 = vunpack.i.h.bf16 %v9931_v49  ;;  %v1254_v57 = vmax.f32 %v9607_v7, %v1223_v39  ;;  %v10240_v9 = vpack.c.bf16 %v1250_v18, %v1246_v45  ;;  %2246 = vmatmul.mubr.bf16.vlgmr.msra.gmra.mrb[64].mxu0 %v10215_v32  ;;  %v12842_v55 = vunpack.i.l.bf16 %v10075_v21  ;;  %v10259_v58 = vpop.permute.xlu1 %8303  ;;  %2456 = vmatmul.mubr.bf16.vlgmr.msra.gmra.mrb[96].mxu1 %v10215_v32  ;;  %v12846_v39 = vld [vmem:[#allocation40_spill] sm:$0xff] }
 0x28b   :  { %v1224_v34 = vsel %vm1170_vm2, %v8281_v5, %v12840_v62  ;;  %v12843_v51 = vunpack.i.h.bf16 %v10075_v21  ;;  %v12845_v45 = vunpack.i.h.bf16 %v10089_v2  ;;  %v10263_v26 = vpack.c.bf16 %v1249_v3, %v1245_v46  ;;  %7533 = vmatpush3.bf16.msra.mxu1 %v8609_v41  ;;  %v12847_v62 = vld [vmem:[#allocation43_spill] sm:$0xff]  ;;  %3162 = vmatpush1.bf16.msra.mxu0 %v8606_v42 }
 0x28c   :  { %v10237_v28 = vsel %vm1170_vm2, %v12841_v15, %v8281_v5  ;;  %v1183_v54 = vsel %vm1170_vm2, %v12842_v55, %v8300_v13  ;;  %v12844_v5 = vunpack.i.l.bf16 %v10089_v2  ;;  %v1258_v21 = vmax.f32 %v9615_v19, %v1224_v34  ;;  %2255 = vmatprep.mubr.bf16.mxu0 %v10240_v9  ;;  %2463 = vmatprep.mubr.bf16.mxu1 %v10240_v9  ;;  %v8610_v41 = vld [vmem:[#allocation6 + $0x618] ss:$12 sps:$4 sm:$0xff]  }
 0x28d   :  { %v1184_v53 = vsel %vm1170_vm2, %v12843_v51, %v8301_v43  ;;  %v1232_v18 = vsel %vm1170_vm2, %v8301_v43, %v12845_v45  ;;  %v1285_v6 = vmax.f32 %v12846_v39, %v1183_v54  ;;  %v8296_v43 = vunpack.i.h.bf16 %v8294_v36  ;;  %v8621_v51 = vld [vmem:[#allocation6 + $0x6f8] ss:$12 sps:$4 sm:$0xff]   ;;  %7534 = vmatprep.subr.bf16.mxu1 %v8613_v29  ;;  %3163 = vmatprep.subr.bf16.mxu0 %v8612_v61 }
 0x28e   :  { %v1231_v7 = vsel %vm1170_vm2, %v8300_v13, %v12844_v5  ;;  %v8617_v13 = vld [vmem:[#allocation6 + $0x620] ss:$12 sps:$4 sm:$0xff]   ;;  %v1289_v2 = vmax.f32 %v12847_v62, %v1184_v53  ;;  %v1290_v15 = vmax.f32 %v9779_v47, %v1232_v18  ;;  %v8295_v55 = vunpack.i.l.bf16 %v8294_v36  ;;  %v12850_v5 = vld [vmem:[#allocation37_spill] sm:$0xff]  ;;  %v12853_v39 = vld [vmem:[#allocation34_spill] sm:$0xff] }
 0x28f   :  { %v1286_v52 = vmax.f32 %v9771_v48, %v1231_v7  ;;  %v8286_v19 = vunpack.i.h.bf16 %v10168_v40  ;;  %v8285_v46 = vunpack.i.l.bf16 %v10168_v40  ;;  %v8306_v3 = vunpack.i.h.bf16 %v10259_v58  ;;  %7535 = vmatpush3.bf16.msra.mxu1 %v8617_v13  ;;  %3164 = vmatpush1.bf16.msra.mxu0 %v8610_v41  ;;  %v12860_v41 = vld [vmem:[#allocation25_spill] sm:$0xff] }
 0x290   :  { %v8305_v48 = vunpack.i.l.bf16 %v10259_v58  ;;  %v10275_v34 = vpack.c.bf16 %v1289_v2, %v1285_v6  ;;  %v12848_v36 = vunpack.i.h.bf16 %v10039_v63  ;;  %v12849_v53 = vunpack.i.l.bf16 %v10039_v63  ;;  %7536 = vmatprep.subr.bf16.mxu1 %v8621_v51  ;;  %v8656_v58 = vld [vmem:[#allocation6 + $0x724] ss:$12 sps:$4 sm:$0xff]  }
 0x291   :  { %v10277_v47 = vpack.c.bf16 %v1290_v15, %v1286_v52  ;;  %v12851_v42 = vunpack.i.l.bf16 %v10053_v1  ;;  %v12852_v45 = vunpack.i.h.bf16 %v10053_v1  ;;  %v8616_v52 = vld [vmem:[#allocation6 + $0x634] ss:$12 sps:$4 sm:$0xff]   ;;  %v12854_v62 = vunpack.i.h.bf16 %v10111_v22 }
 0x292   :  { %v1182_v54 = vsel %vm1170_vm2, %v12848_v36, %v8296_v43  ;;  %v1181_v40 = vsel %vm1170_vm2, %v12849_v53, %v8295_v55  ;;  %v12855_v1 = vunpack.i.l.bf16 %v10111_v22  ;;  %v12856_v13 = vunpack.i.l.bf16 %v10140_v31  ;;  %v8625_v22 = vld [vmem:[#allocation6 + $0x638] ss:$12 sps:$4 sm:$0xff]   ;;  %2256 = vmatmul.mubr.bf16.gmra.mrb[68].mxu0 %v10263_v26  ;;  %2464 = vmatmul.mubr.bf16.gmra.mrb[100].mxu1 %v10263_v26 }
 0x293   :  { %v1281_v7 = vmax.f32 %v12850_v5, %v1182_v54  ;;  %v1229_v29 = vsel %vm1170_vm2, %v8295_v55, %v12851_v42  ;;  %v1230_v18 = vsel %vm1170_vm2, %v8296_v43, %v12852_v45  ;;  %v1277_v6 = vmax.f32 %v12853_v39, %v1181_v40  ;;  %v8614_v54 = vld [vmem:[#allocation6 + $0x630] ss:$12 sps:$4 sm:$0xff]   ;;  %3165 = vmatprep.subr.bf16.mxu0 %v8616_v52  ;;  %v8618_v45 = vld [vmem:[#allocation6 + $0x648] ss:$12 sps:$4 sm:$0xff]  }
 0x294   :  { %v1278_v63 = vmax.f32 %v9730_v8, %v1229_v29  ;;  %v1282_v61 = vmax.f32 %v9738_v27, %v1230_v18  ;;  %v1186_v2 = vsel %vm1170_vm2, %v12854_v62, %v8306_v3  ;;  %v1185_v15 = vsel %vm1170_vm2, %v12855_v1, %v8305_v48  ;;  %3166 = vmatpush1.bf16.msra.mxu0 %v8614_v54  ;;  %v8633_v18 = vld [vmem:[#allocation6 + $0x650] ss:$12 sps:$4 sm:$0xff]   ;;  %v8622_v62 = vld [vmem:[#allocation6 + $0x660] ss:$12 sps:$4 sm:$0xff]  }
 0x295   :  { %v12857_v8 = vunpack.i.l.bf16 %v9931_v49  ;;  %v10317_v43 = vpack.c.bf16 %v1258_v21, %v1254_v57  ;;  %v10319_v55 = vpack.c.bf16 %v1281_v7, %v1277_v6  ;;  %v1297_v36 = vmax.f32 %v9816_v0, %v1186_v2  ;;  %v8620_v0 = vld [vmem:[#allocation6 + $0x64c] ss:$12 sps:$4 sm:$0xff]   ;;  %v8629_v21 = vld [vmem:[#allocation6 + $0x710] ss:$12 sps:$4 sm:$0xff]   ;;  %7537 = vmatpush3.bf16.msra.mxu1 %v8625_v22  ;;  %v8641_v2 = vld [vmem:[#allocation6 + $0x668] ss:$12 sps:$4 sm:$0xff]  }
 0x296   :  { %v12858_v53 = vunpack.i.l.bf16 %v9981_v16  ;;  %v12859_v31 = vunpack.i.h.bf16 %v9981_v16  ;;  %v10330_v40 = vpack.c.bf16 %v1282_v61, %v1278_v63  ;;  %v1293_v57 = vmax.f32 %v9808_v30, %v1185_v15  ;;  %v12861_v7 = vld [vmem:[#allocation26_spill] sm:$0xff]  ;;  %3167 = vmatprep.subr.bf16.mxu0 %v8620_v0  ;;  %v8624_v39 = vld [vmem:[#allocation6 + $0x664] ss:$12 sps:$4 sm:$0xff]   ;;  %7538 = vmatprep.subr.bf16.mxu1 %v8629_v21  ;;  %v8645_v15 = vld [vmem:[#allocation6 + $0x740] ss:$12 sps:$4 sm:$0xff]  }
 0x297   :  { %v1175_v27 = vsel %vm1170_vm2, %v12857_v8, %v12856_v13  ;;  %v1257_v42 = vmax.f32 %v12861_v7, %v10237_v28  ;;  %2265 = vmatprep.mubr.bf16.mxu0 %v10317_v43  ;;  %2471 = vmatprep.mubr.bf16.mxu1 %v10317_v43  ;;  %v8637_v28 = vld [vmem:[#allocation6 + $0x728] ss:$12 sps:$4 sm:$0xff]   ;;  %v12862_v52 = vunpack.i.h.bf16 %v9967_v10  ;;  %v12863_v61 = vunpack.i.l.bf16 %v9967_v10  ;;  %v12865_v13 = vld [vmem:[#allocation27_spill] sm:$0xff]  ;;  %v8665_v0 = vld [vmem:[#allocation6 + $0x6b0] ss:$12 sps:$4 sm:$0xff]  }
 0x298   :  { %v1225_v51 = vsel %vm1170_vm2, %v8285_v46, %v12858_v53  ;;  %v1226_v49 = vsel %vm1170_vm2, %v8286_v19, %v12859_v31  ;;  %v1253_v5 = vmax.f32 %v12860_v41, %v1175_v27  ;;  %v10338_v16 = vpack.c.bf16 %v1297_v36, %v1293_v57  ;;  %3168 = vmatpush1.bf16.msra.mxu0 %v8618_v45  ;;  %v8628_v1 = vld [vmem:[#allocation6 + $0x67c] ss:$12 sps:$4 sm:$0xff]   ;;  %v8649_v27 = vld [vmem:[#allocation6 + $0x680] ss:$12 sps:$4 sm:$0xff]   ;;  %v8653_v22 = vld [vmem:[#allocation6 + $0x758] ss:$12 sps:$4 sm:$0xff]  }
 0x299   :  { %v1262_v30 = vmax.f32 %v9648_v4, %v1225_v51  ;;  %v1266_v29 = vmax.f32 %v9656_v14, %v1226_v49  ;;  %v1178_v63 = vsel %vm1170_vm2, %v12862_v52, %v8286_v19  ;;  %v1177_v4 = vsel %vm1170_vm2, %v12863_v61, %v8285_v46  ;;  %7539 = vmatpush3.bf16.msra.mxu1 %v8633_v18  ;;  %v12864_v19 = vld [vmem:[#allocation28_spill] sm:$0xff]  ;;  %v8626_v46 = vld [vmem:[#allocation6 + $0x678] ss:$12 sps:$4 sm:$0xff]   ;;  %v8632_v36 = vld [vmem:[#allocation6 + $0x694] ss:$12 sps:$4 sm:$0xff]  }
 0x29a   :  { %v10344_v6 = vpack.c.bf16 %v1257_v42, %v1253_v5  ;;  %3169 = vmatprep.subr.bf16.mxu0 %v8624_v39  ;;  %v1265_v10 = vmax.f32 %v12864_v19, %v1178_v63  ;;  %v1261_v8 = vmax.f32 %v12865_v13, %v1177_v4  ;;  %7540 = vmatprep.subr.bf16.mxu1 %v8637_v28  ;;  %v8630_v53 = vld [vmem:[#allocation6 + $0x690] ss:$12 sps:$4 sm:$0xff]   ;;  %v8657_v51 = vld [vmem:[#allocation6 + $0x698] ss:$12 sps:$4 sm:$0xff]   ;;  %v8634_v57 = vld [vmem:[#allocation6 + $0x6a8] ss:$12 sps:$4 sm:$0xff]   ;;  %v12866_v45 = vunpack.i.l.bf16 %v10125_v56 }
 0x29b   :  { %v10354_v14 = vpack.c.bf16 %v1266_v29, %v1262_v30  ;;  %v8636_v31 = vld [vmem:[#allocation6 + $0x6ac] ss:$12 sps:$4 sm:$0xff]   ;;  %v8661_v49 = vld [vmem:[#allocation6 + $0x770] ss:$12 sps:$4 sm:$0xff]   ;;  %v8669_v41 = vld [vmem:[#allocation6 + $0x848] ss:$12 sps:$4 sm:$0xff]   ;;  %v12867_v39 = vunpack.i.h.bf16 %v10125_v56 }
 0x29c   :  { %2266 = vmatmul.mubr.bf16.gmra.mrb[72].mxu0 %v10344_v6  ;;  %2472 = vmatmul.mubr.bf16.gmra.mrb[104].mxu1 %v10344_v6  ;;  %v10362_v54 = vpack.c.bf16 %v1265_v10, %v1261_v8  ;;  %v8640_v21 = vld [vmem:[#allocation6 + $0x6c4] ss:$12 sps:$4 sm:$0xff]   ;;  %v8638_v5 = vld [vmem:[#allocation6 + $0x6c0] ss:$12 sps:$4 sm:$0xff]   ;;  %v8644_v7 = vld [vmem:[#allocation6 + $0x6dc] ss:$12 sps:$4 sm:$0xff]   ;;  %v1233_v18 = vsel %vm1170_vm2, %v8305_v48, %v12866_v45 }
 0x29d   :  { %2275 = vmatprep.mubr.bf16.mxu0 %v10354_v14  ;;  %2479 = vmatprep.mubr.bf16.mxu1 %v10354_v14  ;;  %v8642_v42 = vld [vmem:[#allocation6 + $0x6d8] ss:$12 sps:$4 sm:$0xff]   ;;  %v8648_v30 = vld [vmem:[#allocation6 + $0x6f4] ss:$12 sps:$4 sm:$0xff]   ;;  %v8646_v29 = vld [vmem:[#allocation6 + $0x6f0] ss:$12 sps:$4 sm:$0xff]   ;;  %v1234_v28 = vsel %vm1170_vm2, %v8306_v3, %v12867_v39  ;;  %v1294_v63 = vmax.f32 %v9812_v44, %v1233_v18 }
 0x29e   :  { %3170 = vmatpush1.bf16.msra.mxu0 %v8622_v62  ;;  %7541 = vmatpush3.bf16.msra.mxu1 %v8641_v2  ;;  %v8652_v52 = vld [vmem:[#allocation6 + $0x70c] ss:$12 sps:$4 sm:$0xff]   ;;  %v1298_v48 = vmax.f32 %v9820_v20, %v1234_v28  ;;  %v8650_v56 = vld [vmem:[#allocation6 + $0x708] ss:$12 sps:$4 sm:$0xff]   ;;  %v8662_v62 = vld [vmem:[#allocation6 + $0x750] ss:$12 sps:$4 sm:$0xff]  }
 0x29f   :  { %3171 = vmatprep.subr.bf16.mxu0 %v8628_v1  ;;  %7542 = vmatprep.subr.bf16.mxu1 %v8645_v15  ;;  %v8654_v3 = vld [vmem:[#allocation6 + $0x720] ss:$12 sps:$4 sm:$0xff]   ;;  %v8660_v4 = vld [vmem:[#allocation6 + $0x73c] ss:$12 sps:$4 sm:$0xff]   ;;  %v8658_v44 = vld [vmem:[#allocation6 + $0x738] ss:$12 sps:$4 sm:$0xff]  }
 0x2a0   :  { %v10390_v61 = vpack.c.bf16 %v1298_v48, %v1294_v63  ;;  %v8664_v20 = vld [vmem:[#allocation6 + $0x754] ss:$12 sps:$4 sm:$0xff]   ;;  %v8668_v2 = vld [vmem:[#allocation6 + $0x76c] ss:$12 sps:$4 sm:$0xff]   ;;  %v8672_v15 = vld [vmem:[#allocation6 + $0x784] ss:$12 sps:$4 sm:$0xff]  }
 0x2a1   :  { %v8666_v1 = vld [vmem:[#allocation6 + $0x768] ss:$12 sps:$4 sm:$0xff]   ;;  %v8670_v10 = vld [vmem:[#allocation6 + $0x780] ss:$12 sps:$4 sm:$0xff]   ;;  %v8717_v39 = vld [vmem:[#allocation6 + $0x8d8] ss:$12 sps:$4 sm:$0xff]  }
 0x2a2   :  { %3172 = vmatpush1.bf16.msra.mxu0 %v8626_v46  ;;  %7543 = vmatpush3.bf16.msra.mxu1 %v8649_v27  ;;  %v8673_v19 = vld [vmem:[#allocation6 + $0x788] ss:$12 sps:$4 sm:$0xff]   ;;  %v8677_v8 = vld [vmem:[#allocation6 + $0x860] ss:$12 sps:$4 sm:$0xff]   ;;  %v8674_v27 = vld [vmem:[#allocation6 + $0x798] ss:$12 sps:$4 sm:$0xff]  }
 0x2a3   :  { %3173 = vmatprep.subr.bf16.mxu0 %v8632_v36  ;;  %7544 = vmatprep.subr.bf16.mxu1 %v8653_v22  ;;  %v8676_v13 = vld [vmem:[#allocation6 + $0x79c] ss:$12 sps:$4 sm:$0xff]   ;;  %v8681_v46 = vld [vmem:[#allocation6 + $0x7a0] ss:$12 sps:$4 sm:$0xff]   ;;  %v8685_v36 = vld [vmem:[#allocation6 + $0x878] ss:$12 sps:$4 sm:$0xff]  }
 0x2a4   :  { %2276 = vmatmul.mubr.bf16.gmra.mrb[76].mxu0 %v10362_v54  ;;  %2480 = vmatmul.mubr.bf16.gmra.mrb[108].mxu1 %v10362_v54  ;;  %v8680_v22 = vld [vmem:[#allocation6 + $0x7b4] ss:$12 sps:$4 sm:$0xff]   ;;  %v8694_v28 = vld [vmem:[#allocation6 + $0x810] ss:$12 sps:$4 sm:$0xff]   ;;  %v8721_v63 = vld [vmem:[#allocation6 + $0x818] ss:$12 sps:$4 sm:$0xff]  }
 0x2a5   :  { %2285 = vmatprep.mubr.bf16.mxu0 %v10227_v24  ;;  %2487 = vmatprep.mubr.bf16.mxu1 %v10227_v24  ;;  %v8696_v45 = vld [vmem:[#allocation6 + $0x814] ss:$12 sps:$4 sm:$0xff]   ;;  %v8725_v48 = vld [vmem:[#allocation6 + $0x8f0] ss:$12 sps:$4 sm:$0xff]  }
 0x2a6   :  { %3174 = vmatpush1.bf16.msra.mxu0 %v8630_v53  ;;  %7545 = vmatpush3.bf16.msra.mxu1 %v8657_v51  ;;  %v8678_v53 = vld [vmem:[#allocation6 + $0x7b0] ss:$12 sps:$4 sm:$0xff]   ;;  %v8684_v51 = vld [vmem:[#allocation6 + $0x7cc] ss:$12 sps:$4 sm:$0xff]  }
 0x2a7   :  { %3175 = vmatprep.subr.bf16.mxu0 %v8636_v31  ;;  %7546 = vmatprep.subr.bf16.mxu1 %v8661_v49  ;;  %v8689_v31 = vld [vmem:[#allocation6 + $0x7b8] ss:$12 sps:$4 sm:$0xff]   ;;  %v8693_v49 = vld [vmem:[#allocation6 + $0x890] ss:$12 sps:$4 sm:$0xff]   ;;  %v8713_v18 = vld [vmem:[#allocation6 + $0x800] ss:$12 sps:$4 sm:$0xff]  }
 0x2aa   :  { %3176 = vmatpush1.bf16.msra.mxu0 %v8634_v57  ;;  %7547 = vmatpush3.bf16.msra.mxu1 %v8665_v0  ;;  %v8682_v57 = vld [vmem:[#allocation6 + $0x7c8] ss:$12 sps:$4 sm:$0xff]   ;;  %v8688_v0 = vld [vmem:[#allocation6 + $0x7e4] ss:$12 sps:$4 sm:$0xff]  }
 0x2ab   :  { %3177 = vmatprep.subr.bf16.mxu0 %v8640_v21  ;;  %7596 = vmatprep.subr.bf16.mxu1 %v8669_v41  ;;  %v8697_v21 = vld [vmem:[#allocation6 + $0x7d0] ss:$12 sps:$4 sm:$0xff]   ;;  %v8701_v41 = vld [vmem:[#allocation6 + $0x8a8] ss:$12 sps:$4 sm:$0xff]  }
 0x2ac   :  { %2286 = vmatmul.mubr.bf16.gmra.mrb[80].mxu0 %v10225_v38  ;;  %2488 = vmatmul.mubr.bf16.gmra.mrb[112].mxu1 %v10225_v38 }
 0x2ad   :  { %2295 = vmatprep.mubr.bf16.mxu0 %v10330_v40  ;;  %2495 = vmatprep.mubr.bf16.mxu1 %v10330_v40 }
 0x2ae   :  { %3178 = vmatpush1.bf16.msra.mxu0 %v8638_v5  ;;  %v8686_v5 = vld [vmem:[#allocation6 + $0x7e0] ss:$12 sps:$4 sm:$0xff]  }
 0x2af   :  { %3179 = vmatprep.subr.bf16.mxu0 %v8644_v7  ;;  %v8692_v7 = vld [vmem:[#allocation6 + $0x7fc] ss:$12 sps:$4 sm:$0xff]  }
 0x2b2   :  { %3180 = vmatpush1.bf16.msra.mxu0 %v8642_v42  ;;  %v8705_v42 = vld [vmem:[#allocation6 + $0x7e8] ss:$12 sps:$4 sm:$0xff]  }
 0x2b3   :  { %3181 = vmatprep.subr.bf16.mxu0 %v8648_v30  ;;  %v8709_v30 = vld [vmem:[#allocation6 + $0x8c0] ss:$12 sps:$4 sm:$0xff]  }
 0x2b4   :  { %2296 = vmatmul.mubr.bf16.gmra.mrb[84].mxu0 %v10319_v55  ;;  %2496 = vmatmul.mubr.bf16.gmra.mrb[116].mxu1 %v10319_v55 }
 0x2b5   :  { %2305 = vmatprep.mubr.bf16.mxu0 %v10277_v47  ;;  %2503 = vmatprep.mubr.bf16.mxu1 %v10277_v47 }
 0x2b6   :  { %3182 = vmatpush1.bf16.msra.mxu0 %v8646_v29  ;;  %v8690_v29 = vld [vmem:[#allocation6 + $0x7f8] ss:$12 sps:$4 sm:$0xff]  }
 0x2b7   :  { %3183 = vmatprep.subr.bf16.mxu0 %v8652_v52  ;;  %v8700_v52 = vld [vmem:[#allocation6 + $0x82c] ss:$12 sps:$4 sm:$0xff]  }
 0x2ba   :  { %3184 = vmatpush1.bf16.msra.mxu0 %v8650_v56 }
 0x2bb   :  { %3185 = vmatprep.subr.bf16.mxu0 %v8656_v58  ;;  %v8698_v58 = vld [vmem:[#allocation6 + $0x828] ss:$12 sps:$4 sm:$0xff]  }
 0x2bc   :  { %2306 = vmatmul.mubr.bf16.gmra.mrb[88].mxu0 %v10275_v34  ;;  %2504 = vmatmul.mubr.bf16.gmra.mrb[120].mxu1 %v10275_v34 }
 0x2bd   :  { %2315 = vmatprep.mubr.bf16.mxu0 %v10390_v61  ;;  %2511 = vmatprep.mubr.bf16.mxu1 %v10390_v61 }
 0x2be   :  { %3186 = vmatpush1.bf16.msra.mxu0 %v8654_v3 }
 0x2bf   :  { %3187 = vmatprep.subr.bf16.mxu0 %v8660_v4  ;;  %v8704_v4 = vld [vmem:[#allocation6 + $0x844] ss:$12 sps:$4 sm:$0xff]  }
 0x2c2   :  { %3188 = vmatpush1.bf16.msra.mxu0 %v8658_v44  ;;  %v8729_v44 = vld [vmem:[#allocation6 + $0x830] ss:$12 sps:$4 sm:$0xff]  }
 0x2c3   :  { %3189 = vmatprep.subr.bf16.mxu0 %v8664_v20 }
 0x2c4   :  { %2316 = vmatmul.mubr.bf16.gmra.mrb[92].mxu0 %v10338_v16  ;;  %2512 = vmatmul.mubr.bf16.gmra.mrb[124].mxu1 %v10338_v16 }
 0x2c5   :  { %3193 = vmatprep.mubr.bf16.mxu0 %v9877_v25  ;;  %3419 = vmatprep.mubr.bf16.mxu1 %v9877_v25 }
 0x2c6   :  { %3190 = vmatpush1.bf16.msra.mxu0 %v8662_v62 }
 0x2c7   :  { %3191 = vmatprep.subr.bf16.mxu0 %v8668_v2  ;;  %v8733_v2 = vld [vmem:[#allocation6 + $0xc8] ss:$12 sps:$4 sm:$0xff]  }
 0x2ca   :  { %3192 = vmatpush1.bf16.msra.mxu0 %v8666_v1 }
 0x2cb   :  { %3274 = vmatprep.subr.bf16.mxu0 %v8672_v15 }
 0x2cc   :  { %3420 = vmatmul.mubr.bf16.vlgmr.msra.gmra.mrb[128].mxu1 %v9880_v37 }
 0x2cd   :  { %3194 = vmatmul.mubr.bf16.vlgmr.msra.gmra.mrb[96].mxu0 %v9880_v37  ;;  %7597 = vmatpush3.bf16.msra.mxu1 %v8673_v19  ;;  %v8702_v19 = vld [vmem:[#allocation6 + $0x840] ss:$12 sps:$4 sm:$0xff]  }
 0x2ce   :  { %3203 = vmatprep.mubr.bf16.mxu0 %v9913_v33  ;;  %3275 = vmatpush1.bf16.msra.mxu0 %v8670_v10  ;;  %v8708_v10 = vld [vmem:[#allocation6 + $0x85c] ss:$12 sps:$4 sm:$0xff]  }
 0x2cf   :  { %3427 = vmatprep.mubr.bf16.mxu1 %v9913_v33  ;;  %3276 = vmatprep.subr.bf16.mxu0 %v8676_v13  ;;  %v12868_v13 = vld [vmem:[#allocation29_spill] sm:$0xff] }
 0x2d0   :  { %7598 = vmatprep.subr.bf16.mxu1 %v8677_v8  ;;  %v12869_v8 = vld [vmem:[#allocation31_spill] sm:$0xff] }
 0x2d1   :  { %7599 = vmatpush3.bf16.msra.mxu1 %v8681_v46  ;;  %v8706_v46 = vld [vmem:[#allocation6 + $0x858] ss:$12 sps:$4 sm:$0xff]  }
 0x2d2   :  { %3277 = vmatpush1.bf16.msra.mxu0 %v8674_v27  ;;  %7600 = vmatprep.subr.bf16.mxu1 %v8685_v36  ;;  %v8712_v27 = vld [vmem:[#allocation6 + $0x874] ss:$12 sps:$4 sm:$0xff]   ;;  %v8710_v36 = vld [vmem:[#allocation6 + $0x870] ss:$12 sps:$4 sm:$0xff]  }
 0x2d3   :  { %3278 = vmatprep.subr.bf16.mxu0 %v8680_v22  ;;  %v8716_v22 = vld [vmem:[#allocation6 + $0x88c] ss:$12 sps:$4 sm:$0xff]  }
 0x2d4   :  { %3428 = vmatmul.mubr.bf16.gmra.mrb[132].mxu1 %v9927_v59 }
 0x2d5   :  { %3204 = vmatmul.mubr.bf16.gmra.mrb[100].mxu0 %v9927_v59  ;;  %3435 = vmatprep.mubr.bf16.mxu1 %v9949_v60 }
 0x2d6   :  { %3213 = vmatprep.mubr.bf16.mxu0 %v9949_v60  ;;  %3279 = vmatpush1.bf16.msra.mxu0 %v8678_v53  ;;  %v12870_v53 = vld [vmem:[#allocation38_spill] sm:$0xff] }
 0x2d7   :  { %3280 = vmatprep.subr.bf16.mxu0 %v8684_v51  ;;  %7601 = vmatpush3.bf16.msra.mxu1 %v8689_v31  ;;  %v12871_v31 = vld [vmem:[#allocation35_spill] sm:$0xff] }
 0x2d8   :  { %7602 = vmatprep.subr.bf16.mxu1 %v8693_v49 }
 0x2da   :  { %3281 = vmatpush1.bf16.msra.mxu0 %v8682_v57 }
 0x2db   :  { %3282 = vmatprep.subr.bf16.mxu0 %v8688_v0  ;;  %7603 = vmatpush3.bf16.msra.mxu1 %v8697_v21  ;;  %v8714_v0 = vld [vmem:[#allocation6 + $0x888] ss:$12 sps:$4 sm:$0xff]  }
 0x2dc   :  { %3436 = vmatmul.mubr.bf16.gmra.mrb[136].mxu1 %v9963_v35  ;;  %7604 = vmatprep.subr.bf16.mxu1 %v8701_v41 }
 0x2dd   :  { %3214 = vmatmul.mubr.bf16.gmra.mrb[104].mxu0 %v9963_v35  ;;  %3443 = vmatprep.mubr.bf16.mxu1 %v9985_v17 }
 0x2de   :  { %3223 = vmatprep.mubr.bf16.mxu0 %v9985_v17  ;;  %3283 = vmatpush1.bf16.msra.mxu0 %v8686_v5  ;;  %v8720_v5 = vld [vmem:[#allocation6 + $0x8a4] ss:$12 sps:$4 sm:$0xff]  }
 0x2df   :  { %3284 = vmatprep.subr.bf16.mxu0 %v8692_v7  ;;  %7605 = vmatpush3.bf16.msra.mxu1 %v8705_v42  ;;  %v8718_v42 = vld [vmem:[#allocation6 + $0x8a0] ss:$12 sps:$4 sm:$0xff]  }
 0x2e0   :  { %7606 = vmatprep.subr.bf16.mxu1 %v8709_v30  ;;  %v8724_v30 = vld [vmem:[#allocation6 + $0x8bc] ss:$12 sps:$4 sm:$0xff]  }
 0x2e2   :  { %3285 = vmatpush1.bf16.msra.mxu0 %v8690_v29  ;;  %v12872_v29 = vld [vmem:[#allocation33_spill] sm:$0xff] }
 0x2e3   :  { %3286 = vmatprep.subr.bf16.mxu0 %v8696_v45  ;;  %7607 = vmatpush3.bf16.msra.mxu1 %v8713_v18  ;;  %v12873_v45 = vld [vmem:[#allocation36_spill] sm:$0xff]  ;;  %v8722_v18 = vld [vmem:[#allocation6 + $0x8b8] ss:$12 sps:$4 sm:$0xff]  }
 0x2e4   :  { %3444 = vmatmul.mubr.bf16.gmra.mrb[140].mxu1 %v9999_v50  ;;  %7608 = vmatprep.subr.bf16.mxu1 %v8717_v39  ;;  %v8728_v39 = vld [vmem:[#allocation6 + $0x8d4] ss:$12 sps:$4 sm:$0xff]  }
 0x2e5   :  { %3224 = vmatmul.mubr.bf16.gmra.mrb[108].mxu0 %v9999_v50  ;;  %3451 = vmatprep.mubr.bf16.mxu1 %v10021_v23 }
 0x2e6   :  { %3233 = vmatprep.mubr.bf16.mxu0 %v10021_v23  ;;  %3287 = vmatpush1.bf16.msra.mxu0 %v8694_v28  ;;  %v8726_v28 = vld [vmem:[#allocation6 + $0x8d0] ss:$12 sps:$4 sm:$0xff]  }
 0x2e7   :  { %v7420_v56 = vpop.f32.mrb[64].mxu1  ;;  %3288 = vmatprep.subr.bf16.mxu0 %v8700_v52  ;;  %7609 = vmatpush3.bf16.msra.mxu1 %v8721_v63  ;;  %v8732_v52 = vld [vmem:[#allocation6 + $0x8ec] ss:$12 sps:$4 sm:$0xff]  }
 0x2e8   :  { %v7421_v3 = vpop.f32.mrb[65].mxu1  ;;  %7610 = vmatprep.subr.bf16.mxu1 %v8725_v48  ;;  %v12874_v48 = vld [vmem:[#allocation41_spill] sm:$0xff] }
 0x2e9   :  { %v10416_v20 = vadd.f32 %v7421_v3, %v7420_v56  ;;  %v7423_v62 = vpop.f32.mrb[66].mxu1  ;;  %v8730_v3 = vld [vmem:[#allocation6 + $0x8e8] ss:$12 sps:$4 sm:$0xff]  }
 0x2ea   :  { %v7424_v1 = vpop.f32.mrb[67].mxu1  ;;  %3289 = vmatpush1.bf16.msra.mxu0 %v8698_v58 }
 0x2eb   :  { %v10418_v15 = vadd.f32 %v7424_v1, %v7423_v62  ;;  %3290 = vmatprep.subr.bf16.mxu0 %v8704_v4  ;;  %7611 = vmatpush3.bf16.msra.mxu1 %v8729_v44  ;;  %v8736_v62 = vld [vmem:[#allocation6 + $0x4] ss:$12 sps:$4 sm:$0xff]   ;;  %v8737_v1 = vld [vmem:[#allocation6 + $0x8] ss:$12 sps:$4 sm:$0xff]  }
 0x2ec   :  { %3452 = vmatmul.mubr.bf16.gmra.mrb[144].mxu1 %v12868_v13  ;;  %7660 = vmatprep.subr.bf16.mxu1 %v8733_v2 }
 0x2ed   :  { %3234 = vmatmul.mubr.bf16.gmra.mrb[112].mxu0 %v12868_v13  ;;  %3459 = vmatprep.mubr.bf16.mxu1 %v12869_v8 }
 0x2ee   :  { %3243 = vmatprep.mubr.bf16.mxu0 %v12869_v8  ;;  %3291 = vmatpush1.bf16.msra.mxu0 %v8702_v19  ;;  %v8734_v19 = vld [vmem:[#allocation6] ss:$12 sps:$4 sm:$0xff]  }
 0x2ef   :  { %3292 = vmatprep.subr.bf16.mxu0 %v8708_v10  ;;  %v8741_v10 = vld [vmem:[#allocation6 + $0xe0] ss:$12 sps:$4 sm:$0xff]  }
 0x2f2   :  { %3293 = vmatpush1.bf16.msra.mxu0 %v8706_v46  ;;  %v8740_v46 = vld [vmem:[#allocation6 + $0x1c] ss:$12 sps:$4 sm:$0xff]  }
 0x2f3   :  { %3294 = vmatprep.subr.bf16.mxu0 %v8712_v27  ;;  %v8745_v27 = vld [vmem:[#allocation6 + $0x20] ss:$12 sps:$4 sm:$0xff]  }
 0x2f4   :  { %3460 = vmatmul.mubr.bf16.gmra.mrb[148].mxu1 %v12870_v53 }
 0x2f5   :  { %v7426_v51 = vpop.f32.mrb[68].mxu1  ;;  %3244 = vmatmul.mubr.bf16.gmra.mrb[116].mxu0 %v12870_v53  ;;  %3467 = vmatprep.mubr.bf16.mxu1 %v12871_v31 }
 0x2f6   :  { %v7427_v49 = vpop.f32.mrb[69].mxu1  ;;  %3253 = vmatprep.mubr.bf16.mxu0 %v12871_v31  ;;  %3295 = vmatpush1.bf16.msra.mxu0 %v8710_v36  ;;  %v8749_v36 = vld [vmem:[#allocation6 + $0xf8] ss:$12 sps:$4 sm:$0xff]  }
 0x2f7   :  { %v10428_v57 = vadd.f32 %v7427_v49, %v7426_v51  ;;  %v7429_v21 = vpop.f32.mrb[70].mxu1  ;;  %3296 = vmatprep.subr.bf16.mxu0 %v8716_v22  ;;  %v8738_v22 = vld [vmem:[#allocation6 + $0x18] ss:$12 sps:$4 sm:$0xff]   ;;  %v8744_v51 = vld [vmem:[#allocation6 + $0x34] ss:$12 sps:$4 sm:$0xff]  }
 0x2f8   :  { %v7430_v41 = vpop.f32.mrb[71].mxu1  ;;  %v8753_v49 = vld [vmem:[#allocation6 + $0x38] ss:$12 sps:$4 sm:$0xff]  }
 0x2f9   :  { %v10430_v7 = vadd.f32 %v7430_v41, %v7429_v21  ;;  %v8757_v21 = vld [vmem:[#allocation6 + $0x110] ss:$12 sps:$4 sm:$0xff]  }
 0x2fa   :  { %3297 = vmatpush1.bf16.msra.mxu0 %v8714_v0  ;;  %v8742_v0 = vld [vmem:[#allocation6 + $0x30] ss:$12 sps:$4 sm:$0xff]  }
 0x2fb   :  { %3298 = vmatprep.subr.bf16.mxu0 %v8720_v5  ;;  %v8748_v5 = vld [vmem:[#allocation6 + $0x4c] ss:$12 sps:$4 sm:$0xff]  }
 0x2fc   :  { %3468 = vmatmul.mubr.bf16.gmra.mrb[152].mxu1 %v12872_v29 }
 0x2fd   :  { %3254 = vmatmul.mubr.bf16.gmra.mrb[120].mxu0 %v12872_v29  ;;  %3475 = vmatprep.mubr.bf16.mxu1 %v12873_v45 }
 0x2fe   :  { %3263 = vmatprep.mubr.bf16.mxu0 %v12873_v45  ;;  %3299 = vmatpush1.bf16.msra.mxu0 %v8718_v42 }
 0x2ff   :  { %3300 = vmatprep.subr.bf16.mxu0 %v8724_v30 }
 0x302   :  { %3301 = vmatpush1.bf16.msra.mxu0 %v8722_v18 }
 0x303   :  { %3302 = vmatprep.subr.bf16.mxu0 %v8728_v39  ;;  %v8761_v39 = vld [vmem:[#allocation6 + $0x50] ss:$12 sps:$4 sm:$0xff]  }
 0x304   :  { %3476 = vmatmul.mubr.bf16.gmra.mrb[156].mxu1 %v10163_v12 }
 0x305   :  { %v7432_v63 = vpop.f32.mrb[72].mxu1  ;;  %3264 = vmatmul.mubr.bf16.gmra.mrb[124].mxu0 %v10163_v12  ;;  %3516 = vmatprep.mubr.bf16.mxu1 %v12874_v48 }
 0x306   :  { %v7433_v56 = vpop.f32.mrb[73].mxu1  ;;  %3303 = vmatpush1.bf16.msra.mxu0 %v8726_v28  ;;  %3306 = vmatprep.mubr.bf16.mxu0 %v12874_v48  ;;  %v8746_v28 = vld [vmem:[#allocation6 + $0x48] ss:$12 sps:$4 sm:$0xff]  }
 0x307   :  { %v10440_v58 = vadd.f32 %v7433_v56, %v7432_v63  ;;  %v7435_v4 = vpop.f32.mrb[74].mxu1  ;;  %3304 = vmatprep.subr.bf16.mxu0 %v8732_v52  ;;  %v8765_v63 = vld [vmem:[#allocation6 + $0x128] ss:$12 sps:$4 sm:$0xff]  }
 0x308   :  { %v7436_v44 = vpop.f32.mrb[75].mxu1 }
 0x309   :  { %v10442_v2 = vadd.f32 %v7436_v44, %v7435_v4  ;;  %v8769_v4 = vld [vmem:[#allocation6 + $0x68] ss:$12 sps:$4 sm:$0xff]   ;;  %v8750_v44 = vld [vmem:[#allocation6 + $0x60] ss:$12 sps:$4 sm:$0xff]  }
 0x30a   :  { %3305 = vmatpush1.bf16.msra.mxu0 %v8730_v3  ;;  %v8752_v3 = vld [vmem:[#allocation6 + $0x64] ss:$12 sps:$4 sm:$0xff]  }
 0x30b   :  { %4192 = vmatprep.subr.bf16.mxu0 %v8736_v62  ;;  %v8773_v62 = vld [vmem:[#allocation6 + $0x140] ss:$12 sps:$4 sm:$0xff]  }
 0x30c   :  { %3517 = vmatmul.mubr.bf16.vlgmr.msra.gmra.mrb[160].mxu1 %v10215_v32 }
 0x30d   :  { %3307 = vmatmul.mubr.bf16.vlgmr.msra.gmra.mrb[96].mxu0 %v10215_v32  ;;  %7661 = vmatpush3.bf16.msra.mxu1 %v8737_v1  ;;  %v8756_v1 = vld [vmem:[#allocation6 + $0x7c] ss:$12 sps:$4 sm:$0xff]  }
 0x30e   :  { %3316 = vmatprep.mubr.bf16.mxu0 %v10240_v9  ;;  %3524 = vmatprep.mubr.bf16.mxu1 %v10240_v9 }
 0x30f   :  { %4193 = vmatpush1.bf16.msra.mxu0 %v8734_v19  ;;  %7662 = vmatprep.subr.bf16.mxu1 %v8741_v10  ;;  %v8777_v19 = vld [vmem:[#allocation6 + $0x80] ss:$12 sps:$4 sm:$0xff]   ;;  %v8754_v10 = vld [vmem:[#allocation6 + $0x78] ss:$12 sps:$4 sm:$0xff]  }
 0x310   :  { %4194 = vmatprep.subr.bf16.mxu0 %v8740_v46  ;;  %v8781_v46 = vld [vmem:[#allocation6 + $0x158] ss:$12 sps:$4 sm:$0xff]  }
 0x311   :  { %7663 = vmatpush3.bf16.msra.mxu1 %v8745_v27  ;;  %v8760_v27 = vld [vmem:[#allocation6 + $0x94] ss:$12 sps:$4 sm:$0xff]  }
 0x312   :  { %7664 = vmatprep.subr.bf16.mxu1 %v8749_v36  ;;  %v8785_v36 = vld [vmem:[#allocation6 + $0x98] ss:$12 sps:$4 sm:$0xff]  }
 0x313   :  { %4195 = vmatpush1.bf16.msra.mxu0 %v8738_v22  ;;  %v8758_v22 = vld [vmem:[#allocation6 + $0x90] ss:$12 sps:$4 sm:$0xff]  }
 0x314   :  { %3525 = vmatmul.mubr.bf16.gmra.mrb[164].mxu1 %v10263_v26  ;;  %4196 = vmatprep.subr.bf16.mxu0 %v8744_v51  ;;  %v8789_v51 = vld [vmem:[#allocation6 + $0x170] ss:$12 sps:$4 sm:$0xff]  }
 0x315   :  { %v7438_v41 = vpop.f32.mrb[76].mxu1  ;;  %3317 = vmatmul.mubr.bf16.gmra.mrb[100].mxu0 %v10263_v26  ;;  %3532 = vmatprep.mubr.bf16.mxu1 %v10317_v43 }
 0x316   :  { %v7439_v42 = vpop.f32.mrb[77].mxu1  ;;  %3326 = vmatprep.mubr.bf16.mxu0 %v10317_v43  ;;  %7665 = vmatpush3.bf16.msra.mxu1 %v8753_v49 }
 0x317   :  { %v10452_v30 = vadd.f32 %v7439_v42, %v7438_v41  ;;  %v7441_v18 = vpop.f32.mrb[78].mxu1  ;;  %4197 = vmatpush1.bf16.msra.mxu0 %v8742_v0  ;;  %7666 = vmatprep.subr.bf16.mxu1 %v8757_v21  ;;  %v8764_v0 = vld [vmem:[#allocation6 + $0xac] ss:$12 sps:$4 sm:$0xff]   ;;  %v8793_v42 = vld [vmem:[#allocation6 + $0xb0] ss:$12 sps:$4 sm:$0xff]  }
 0x318   :  { %v7442_v52 = vpop.f32.mrb[79].mxu1  ;;  %4198 = vmatprep.subr.bf16.mxu0 %v8748_v5 }
 0x319   :  { %v10454_v56 = vadd.f32 %v7442_v52, %v7441_v18  ;;  %v8762_v18 = vld [vmem:[#allocation6 + $0xa8] ss:$12 sps:$4 sm:$0xff]  }
 0x31a   :  { %7667 = vmatpush3.bf16.msra.mxu1 %v8761_v39 }
 0x31b   :  { %4199 = vmatpush1.bf16.msra.mxu0 %v8746_v28  ;;  %7668 = vmatprep.subr.bf16.mxu1 %v8765_v63  ;;  %v8797_v28 = vld [vmem:[#allocation6 + $0x248] ss:$12 sps:$4 sm:$0xff]   ;;  %v8768_v63 = vld [vmem:[#allocation6 + $0xc4] ss:$12 sps:$4 sm:$0xff]  }
 0x31c   :  { %3533 = vmatmul.mubr.bf16.gmra.mrb[168].mxu1 %v10344_v6  ;;  %4200 = vmatprep.subr.bf16.mxu0 %v8752_v3  ;;  %v8766_v3 = vld [vmem:[#allocation6 + $0xc0] ss:$12 sps:$4 sm:$0xff]  }
 0x31d   :  { %3327 = vmatmul.mubr.bf16.gmra.mrb[104].mxu0 %v10344_v6  ;;  %3540 = vmatprep.mubr.bf16.mxu1 %v10354_v14 }
 0x31e   :  { %3336 = vmatprep.mubr.bf16.mxu0 %v10354_v14  ;;  %7669 = vmatpush3.bf16.msra.mxu1 %v8769_v4  ;;  %v8772_v4 = vld [vmem:[#allocation6 + $0xdc] ss:$12 sps:$4 sm:$0xff]  }
 0x31f   :  { %4201 = vmatpush1.bf16.msra.mxu0 %v8750_v44  ;;  %7670 = vmatprep.subr.bf16.mxu1 %v8773_v62  ;;  %v8770_v44 = vld [vmem:[#allocation6 + $0xd8] ss:$12 sps:$4 sm:$0xff]   ;;  %v8776_v62 = vld [vmem:[#allocation6 + $0xf4] ss:$12 sps:$4 sm:$0xff]  }
 0x320   :  { %4202 = vmatprep.subr.bf16.mxu0 %v8756_v1  ;;  %v8774_v1 = vld [vmem:[#allocation6 + $0xf0] ss:$12 sps:$4 sm:$0xff]  }
 0x322   :  { %7671 = vmatpush3.bf16.msra.mxu1 %v8777_v19 }
 0x323   :  { %4203 = vmatpush1.bf16.msra.mxu0 %v8754_v10  ;;  %7672 = vmatprep.subr.bf16.mxu1 %v8781_v46  ;;  %v8780_v10 = vld [vmem:[#allocation6 + $0x10c] ss:$12 sps:$4 sm:$0xff]  }
 0x324   :  { %3541 = vmatmul.mubr.bf16.gmra.mrb[172].mxu1 %v10362_v54  ;;  %4204 = vmatprep.subr.bf16.mxu0 %v8760_v27 }
 0x325   :  { %v7444_v49 = vpop.f32.mrb[80].mxu1  ;;  %3337 = vmatmul.mubr.bf16.gmra.mrb[108].mxu0 %v10362_v54  ;;  %3548 = vmatprep.mubr.bf16.mxu1 %v10227_v24 }
 0x326   :  { %v7445_v21 = vpop.f32.mrb[81].mxu1  ;;  %3346 = vmatprep.mubr.bf16.mxu0 %v10227_v24  ;;  %7673 = vmatpush3.bf16.msra.mxu1 %v8785_v36 }
 0x327   :  { %v10464_v41 = vadd.f32 %v7445_v21, %v7444_v49  ;;  %v7447_v5 = vpop.f32.mrb[82].mxu1  ;;  %4205 = vmatpush1.bf16.msra.mxu0 %v8758_v22  ;;  %7674 = vmatprep.subr.bf16.mxu1 %v8789_v51  ;;  %v8778_v22 = vld [vmem:[#allocation6 + $0x108] ss:$12 sps:$4 sm:$0xff]   ;;  %v8782_v21 = vld [vmem:[#allocation6 + $0x120] ss:$12 sps:$4 sm:$0xff]  }
 0x328   :  { %v7448_v39 = vpop.f32.mrb[83].mxu1  ;;  %4206 = vmatprep.subr.bf16.mxu0 %v8764_v0  ;;  %v8784_v0 = vld [vmem:[#allocation6 + $0x124] ss:$12 sps:$4 sm:$0xff]  }
 0x329   :  { %v10466_v52 = vadd.f32 %v7448_v39, %v7447_v5  ;;  %v8788_v5 = vld [vmem:[#allocation6 + $0x13c] ss:$12 sps:$4 sm:$0xff]  }
 0x32a   :  { %7675 = vmatpush3.bf16.msra.mxu1 %v8793_v42  ;;  %v8786_v42 = vld [vmem:[#allocation6 + $0x138] ss:$12 sps:$4 sm:$0xff]   ;;  %v8790_v39 = vld [vmem:[#allocation6 + $0x150] ss:$12 sps:$4 sm:$0xff]  }
 0x32b   :  { %4207 = vmatpush1.bf16.msra.mxu0 %v8762_v18  ;;  %7724 = vmatprep.subr.bf16.mxu1 %v8797_v28  ;;  %v8792_v18 = vld [vmem:[#allocation6 + $0x154] ss:$12 sps:$4 sm:$0xff]  }
 0x32c   :  { %3549 = vmatmul.mubr.bf16.gmra.mrb[176].mxu1 %v10225_v38  ;;  %4208 = vmatprep.subr.bf16.mxu0 %v8768_v63  ;;  %v8796_v63 = vld [vmem:[#allocation6 + $0x16c] ss:$12 sps:$4 sm:$0xff]  }
 0x32d   :  { %3347 = vmatmul.mubr.bf16.gmra.mrb[112].mxu0 %v10225_v38  ;;  %3556 = vmatprep.mubr.bf16.mxu1 %v10330_v40 }
 0x32e   :  { %3356 = vmatprep.mubr.bf16.mxu0 %v10330_v40 }
 0x32f   :  { %4209 = vmatpush1.bf16.msra.mxu0 %v8766_v3 }
 0x330   :  { %4210 = vmatprep.subr.bf16.mxu0 %v8772_v4 }
 0x333   :  { %4211 = vmatpush1.bf16.msra.mxu0 %v8770_v44 }
 0x334   :  { %3557 = vmatmul.mubr.bf16.gmra.mrb[180].mxu1 %v10319_v55  ;;  %4212 = vmatprep.subr.bf16.mxu0 %v8776_v62  ;;  %v8794_v62 = vld [vmem:[#allocation6 + $0x168] ss:$12 sps:$4 sm:$0xff]  }
 0x335   :  { %v7450_v19 = vpop.f32.mrb[84].mxu1  ;;  %3357 = vmatmul.mubr.bf16.gmra.mrb[116].mxu0 %v10319_v55  ;;  %3564 = vmatprep.mubr.bf16.mxu1 %v10277_v47 }
 0x336   :  { %v7451_v46 = vpop.f32.mrb[85].mxu1  ;;  %3366 = vmatprep.mubr.bf16.mxu0 %v10277_v47 }
 0x337   :  { %v10476_v27 = vadd.f32 %v7451_v46, %v7450_v19  ;;  %v7453_v36 = vpop.f32.mrb[86].mxu1  ;;  %4213 = vmatpush1.bf16.msra.mxu0 %v8774_v1  ;;  %v8801_v46 = vld [vmem:[#allocation6 + $0x188] ss:$12 sps:$4 sm:$0xff]  }
 0x338   :  { %v7454_v51 = vpop.f32.mrb[87].mxu1  ;;  %4214 = vmatprep.subr.bf16.mxu0 %v8780_v10  ;;  %v8800_v10 = vld [vmem:[#allocation6 + $0x184] ss:$12 sps:$4 sm:$0xff]  }
 0x339   :  { %v10478_v49 = vadd.f32 %v7454_v51, %v7453_v36  ;;  %v8805_v36 = vld [vmem:[#allocation6 + $0x260] ss:$12 sps:$4 sm:$0xff]   ;;  %v8804_v51 = vld [vmem:[#allocation6 + $0x19c] ss:$12 sps:$4 sm:$0xff]  }
 0x33b   :  { %4215 = vmatpush1.bf16.msra.mxu0 %v8778_v22  ;;  %v8798_v22 = vld [vmem:[#allocation6 + $0x180] ss:$12 sps:$4 sm:$0xff]  }
 0x33c   :  { %3565 = vmatmul.mubr.bf16.gmra.mrb[184].mxu1 %v10275_v34  ;;  %4216 = vmatprep.subr.bf16.mxu0 %v8784_v0  ;;  %v8813_v0 = vld [vmem:[#allocation6 + $0x278] ss:$12 sps:$4 sm:$0xff]  }
 0x33d   :  { %3367 = vmatmul.mubr.bf16.gmra.mrb[120].mxu0 %v10275_v34  ;;  %3572 = vmatprep.mubr.bf16.mxu1 %v10390_v61 }
 0x33e   :  { %3376 = vmatprep.mubr.bf16.mxu0 %v10390_v61 }
 0x33f   :  { %4217 = vmatpush1.bf16.msra.mxu0 %v8782_v21  ;;  %v8802_v21 = vld [vmem:[#allocation6 + $0x198] ss:$12 sps:$4 sm:$0xff]  }
 0x340   :  { %4218 = vmatprep.subr.bf16.mxu0 %v8788_v5  ;;  %v8808_v5 = vld [vmem:[#allocation6 + $0x1b4] ss:$12 sps:$4 sm:$0xff]  }
 0x343   :  { %4219 = vmatpush1.bf16.msra.mxu0 %v8786_v42  ;;  %v8817_v42 = vld [vmem:[#allocation6 + $0x1b8] ss:$12 sps:$4 sm:$0xff]  }
 0x344   :  { %3573 = vmatmul.mubr.bf16.gmra.mrb[188].mxu1 %v10338_v16  ;;  %4220 = vmatprep.subr.bf16.mxu0 %v8792_v18  ;;  %v8821_v18 = vld [vmem:[#allocation6 + $0x290] ss:$12 sps:$4 sm:$0xff]  }
 0x345   :  { %v7456_v28 = vpop.f32.mrb[88].mxu1  ;;  %3377 = vmatmul.mubr.bf16.gmra.mrb[124].mxu0 %v10338_v16  ;;  %4450 = vmatprep.mubr.bf16.mxu1 %v9877_v25 }
 0x346   :  { %v7457_v3 = vpop.f32.mrb[89].mxu1  ;;  %4224 = vmatprep.mubr.bf16.mxu0 %v9877_v25  ;;  %v8809_v25 = vld [vmem:[#allocation6 + $0x1a0] ss:$12 sps:$4 sm:$0xff]  }
 0x347   :  { %v10488_v4 = vadd.f32 %v7457_v3, %v7456_v28  ;;  %v7459_v44 = vpop.f32.mrb[90].mxu1  ;;  %4221 = vmatpush1.bf16.msra.mxu0 %v8790_v39  ;;  %v8806_v39 = vld [vmem:[#allocation6 + $0x1b0] ss:$12 sps:$4 sm:$0xff]   ;;  %v8812_v28 = vld [vmem:[#allocation6 + $0x1cc] ss:$12 sps:$4 sm:$0xff]  }
 0x348   :  { %v7460_v1 = vpop.f32.mrb[91].mxu1  ;;  %4222 = vmatprep.subr.bf16.mxu0 %v8796_v63  ;;  %v8825_v63 = vld [vmem:[#allocation6 + $0x1d0] ss:$12 sps:$4 sm:$0xff]   ;;  %v8829_v3 = vld [vmem:[#allocation6 + $0x2a8] ss:$12 sps:$4 sm:$0xff]  }
 0x349   :  { %v10490_v19 = vadd.f32 %v7460_v1, %v7459_v44 }
 0x34b   :  { %4223 = vmatpush1.bf16.msra.mxu0 %v8794_v62  ;;  %v8810_v62 = vld [vmem:[#allocation6 + $0x1c8] ss:$12 sps:$4 sm:$0xff]  }
 0x34c   :  { %4305 = vmatprep.subr.bf16.mxu0 %v8800_v10  ;;  %4451 = vmatmul.mubr.bf16.vlgmr.msra.gmra.mrb[192].mxu1 %v9880_v37 }
 0x34d   :  { %7725 = vmatpush3.bf16.msra.mxu1 %v8801_v46  ;;  %4458 = vmatprep.mubr.bf16.mxu1 %v9913_v33  ;;  %v8816_v46 = vld [vmem:[#allocation6 + $0x1e4] ss:$12 sps:$4 sm:$0xff]  }
 0x34e   :  { %4225 = vmatmul.mubr.bf16.vlgmr.msra.gmra.mrb[128].mxu0 %v9880_v37  ;;  %7726 = vmatprep.subr.bf16.mxu1 %v8805_v36 }
 0x34f   :  { %4234 = vmatprep.mubr.bf16.mxu0 %v9913_v33  ;;  %4306 = vmatpush1.bf16.msra.mxu0 %v8798_v22  ;;  %v8833_v22 = vld [vmem:[#allocation6 + $0x1e8] ss:$12 sps:$4 sm:$0xff]  }
 0x350   :  { %4307 = vmatprep.subr.bf16.mxu0 %v8804_v51  ;;  %v8837_v51 = vld [vmem:[#allocation6 + $0x2c0] ss:$12 sps:$4 sm:$0xff]  }
 0x351   :  { %7727 = vmatpush3.bf16.msra.mxu1 %v8809_v25 }
 0x352   :  { %7728 = vmatprep.subr.bf16.mxu1 %v8813_v0  ;;  %v8841_v0 = vld [vmem:[#allocation6 + $0x200] ss:$12 sps:$4 sm:$0xff]  }
 0x353   :  { %4308 = vmatpush1.bf16.msra.mxu0 %v8802_v21 }
 0x354   :  { %4309 = vmatprep.subr.bf16.mxu0 %v8808_v5  ;;  %4459 = vmatmul.mubr.bf16.gmra.mrb[196].mxu1 %v9927_v59 }
 0x355   :  { %4466 = vmatprep.mubr.bf16.mxu1 %v9949_v60  ;;  %v7462_v37 = vpop.f32.mrb[92].mxu1  ;;  %7729 = vmatpush3.bf16.msra.mxu1 %v8817_v42  ;;  %v8845_v42 = vld [vmem:[#allocation6 + $0x2d8] ss:$12 sps:$4 sm:$0xff]  }
 0x356   :  { %4235 = vmatmul.mubr.bf16.gmra.mrb[132].mxu0 %v9927_v59  ;;  %v7463_v33 = vpop.f32.mrb[93].mxu1  ;;  %7730 = vmatprep.subr.bf16.mxu1 %v8821_v18  ;;  %v8814_v59 = vld [vmem:[#allocation6 + $0x1e0] ss:$12 sps:$4 sm:$0xff]  }
 0x357   :  { %4244 = vmatprep.mubr.bf16.mxu0 %v9949_v60  ;;  %4310 = vmatpush1.bf16.msra.mxu0 %v8806_v39  ;;  %v10500_v44 = vadd.f32 %v7463_v33, %v7462_v37  ;;  %v7465_v1 = vpop.f32.mrb[94].mxu1  ;;  %v8820_v60 = vld [vmem:[#allocation6 + $0x1fc] ss:$12 sps:$4 sm:$0xff]  }
 0x358   :  { %4311 = vmatprep.subr.bf16.mxu0 %v8812_v28  ;;  %v7466_v10 = vpop.f32.mrb[95].mxu1  ;;  %v12875_v18 = vld [vmem:[#allocation20_spill] sm:$0xff]  ;;  %v8818_v28 = vld [vmem:[#allocation6 + $0x1f8] ss:$12 sps:$4 sm:$0xff]  }
 0x359   :  { %v10502_v36 = vadd.f32 %v7466_v10, %v7465_v1  ;;  %7731 = vmatpush3.bf16.msra.mxu1 %v8825_v63  ;;  %vm3631_vm3 = vcmp.lt.s32.totalorder %v12875_v18, 7  ;;  %v8824_v1 = vld [vmem:[#allocation6 + $0x214] ss:$12 sps:$4 sm:$0xff]   ;;  %vm4660_vm4 = vcmp.lt.s32.totalorder %v12875_v18, 6 }
 0x35a   :  { %7732 = vmatprep.subr.bf16.mxu1 %v8829_v3 }
 0x35b   :  { %4312 = vmatpush1.bf16.msra.mxu0 %v8810_v62 }
 0x35c   :  { %4313 = vmatprep.subr.bf16.mxu0 %v8816_v46  ;;  %4467 = vmatmul.mubr.bf16.gmra.mrb[200].mxu1 %v9963_v35 }
 0x35d   :  { %4474 = vmatprep.mubr.bf16.mxu1 %v9985_v17  ;;  %v10506_v25 = vpop.f32.mrb[64].mxu0  ;;  %7733 = vmatpush3.bf16.msra.mxu1 %v8833_v22  ;;  %v7484_v21 = vpop.f32.mrb[96].mxu1 }
 0x35e   :  { %4245 = vmatmul.mubr.bf16.gmra.mrb[136].mxu0 %v9963_v35  ;;  %v10509_v5 = vpop.f32.mrb[65].mxu0  ;;  %7734 = vmatprep.subr.bf16.mxu1 %v8837_v51  ;;  %v7485_v39 = vpop.f32.mrb[97].mxu1  ;;  %v12679_v63 = vrot.slane %v10506_v25, 1  ;;  %v8849_v51 = vld [vmem:[#allocation6 + $0x218] ss:$12 sps:$4 sm:$0xff]  }
 0x35f   :  { %4254 = vmatprep.mubr.bf16.mxu0 %v9985_v17  ;;  %4314 = vmatpush1.bf16.msra.mxu0 %v8814_v59  ;;  %v2251_v37 = vpop.f32.mrb[66].mxu0  ;;  %v7486_v33 = vadd.f32 %v7485_v39, %v7484_v21  ;;  %v7487_v62 = vpop.f32.mrb[98].mxu1  ;;  %v12678_v10 = vrot.slane %v10509_v5, 1  ;;  %v8822_v21 = vld [vmem:[#allocation6 + $0x210] ss:$12 sps:$4 sm:$0xff]  }
 0x360   :  { %4315 = vmatprep.subr.bf16.mxu0 %v8820_v60  ;;  %v3584_v3 = vrot.slane %v2251_v37, 1  ;;  %v2253_v35 = vpop.f32.mrb[67].mxu0  ;;  %v7488_v22 = vpop.f32.mrb[99].mxu1  ;;  %v8857_v39 = vld [vmem:[#allocation6 + $0x230] ss:$12 sps:$4 sm:$0xff]  }
 0x361   :  { %v3585_v46 = vrot.slane %v2253_v35, 1  ;;  %7735 = vmatpush3.bf16.msra.mxu1 %v8841_v0  ;;  %v10516_v17 = vadd.f32 %v7486_v33, %v10416_v20  ;;  %v7489_v59 = vadd.f32 %v7488_v22, %v7487_v62 }
 0x362   :  { %7736 = vmatprep.subr.bf16.mxu1 %v8845_v42  ;;  %v10522_v60 = vsel %vm3631_vm3, %v12679_v63, %v3584_v3  ;;  %v8828_v42 = vld [vmem:[#allocation6 + $0x22c] ss:$12 sps:$4 sm:$0xff]  }
 0x363   :  { %12876 = vst [vmem:[#allocation44_spill] sm:$0xff] %v10522_v60  ;;  %4316 = vmatpush1.bf16.msra.mxu0 %v8818_v28  ;;  %v10528_v0 = vsel %vm3631_vm3, %v12678_v10, %v3585_v46  ;;  %v2461_v20 = vadd.f32 %v7489_v59, %v10418_v15  ;;  %v12680_v37 = vrot.slane %v10516_v17, 1  ;;  %v8830_v60 = vld [vmem:[#allocation6 + $0x240] ss:$12 sps:$4 sm:$0xff]  }
 0x364   :  { %12877 = vst [vmem:[#allocation39_spill] sm:$0xff] %v10528_v0  ;;  %4317 = vmatprep.subr.bf16.mxu0 %v8824_v1  ;;  %4475 = vmatmul.mubr.bf16.gmra.mrb[204].mxu1 %v9999_v50  ;;  %v8826_v1 = vld [vmem:[#allocation6 + $0x228] ss:$12 sps:$4 sm:$0xff]  }
 0x365   :  { %4482 = vmatprep.mubr.bf16.mxu1 %v10021_v23  ;;  %7737 = vmatpush3.bf16.msra.mxu1 %v8849_v51  ;;  %v3586_v28 = vrot.slane %v2461_v20, 1  ;;  %v2257_v33 = vpop.f32.mrb[68].mxu0  ;;  %v7490_v15 = vpop.f32.mrb[100].mxu1  ;;  %v8832_v51 = vld [vmem:[#allocation6 + $0x244] ss:$12 sps:$4 sm:$0xff]  }
 0x366   :  { %4255 = vmatmul.mubr.bf16.gmra.mrb[140].mxu0 %v9999_v50  ;;  %7738 = vmatprep.subr.bf16.mxu1 %v8853_v11  ;;  %v3587_v62 = vrot.slane %v2257_v33, 1  ;;  %v2259_v35 = vpop.f32.mrb[69].mxu0  ;;  %v7491_v59 = vpop.f32.mrb[101].mxu1 }
 0x367   :  { %4264 = vmatprep.mubr.bf16.mxu0 %v10021_v23  ;;  %4318 = vmatpush1.bf16.msra.mxu0 %v8822_v21  ;;  %v3588_v22 = vrot.slane %v2259_v35, 1  ;;  %v2261_v10 = vpop.f32.mrb[70].mxu0  ;;  %v10540_v20 = vsel %vm3631_vm3, %v12680_v37, %v3586_v28  ;;  %v7492_v50 = vadd.f32 %v7491_v59, %v7490_v15  ;;  %v7493_v63 = vpop.f32.mrb[102].mxu1 }
 0x368   :  { %4319 = vmatprep.subr.bf16.mxu0 %v8828_v42  ;;  %v3590_v11 = vrot.slane %v2261_v10, 1  ;;  %v2263_v23 = vpop.f32.mrb[71].mxu0  ;;  %v10544_v21 = vsel %vm3631_vm3, %v3584_v3, %v3587_v62  ;;  %v7494_v35 = vpop.f32.mrb[103].mxu1  ;;  %v8836_v3 = vld [vmem:[#allocation6 + $0x25c] ss:$12 sps:$4 sm:$0xff]  }
 0x369   :  { %7739 = vmatpush3.bf16.msra.mxu1 %v8857_v39  ;;  %v3591_v33 = vrot.slane %v2263_v23, 1  ;;  %v10548_v42 = vsel %vm3631_vm3, %v3585_v46, %v3588_v22  ;;  %v2466_v0 = vadd.f32 %v7492_v50, %v10428_v57  ;;  %v7495_v37 = vadd.f32 %v7494_v35, %v7493_v63 }
 0x36a   :  { %v10553_v10 = vsel %vm3631_vm3, %v3587_v62, %v3590_v11 }
 0x36b   :  { %4320 = vmatpush1.bf16.msra.mxu0 %v8826_v1  ;;  %v10558_v39 = vsel %vm3631_vm3, %v3588_v22, %v3591_v33  ;;  %v3589_v15 = vrot.slane %v2466_v0, 1  ;;  %v2469_v46 = vadd.f32 %v7495_v37, %v10430_v7  ;;  %v8840_v37 = vld [vmem:[#allocation6 + $0x274] ss:$12 sps:$4 sm:$0xff]  }
 0x36c   :  { %4321 = vmatprep.subr.bf16.mxu0 %v8832_v51  ;;  %4483 = vmatmul.mubr.bf16.gmra.mrb[208].mxu1 %v12868_v13  ;;  %v8834_v51 = vld [vmem:[#allocation6 + $0x258] ss:$12 sps:$4 sm:$0xff]  }
 0x36d   :  { %4490 = vmatprep.mubr.bf16.mxu1 %v12869_v8  ;;  %v3592_v63 = vrot.slane %v2469_v46, 1  ;;  %v10566_v22 = vsel %vm3631_vm3, %v3586_v28, %v3589_v15 }
 0x36e   :  { %4265 = vmatmul.mubr.bf16.gmra.mrb[144].mxu0 %v12868_v13 }
 0x36f   :  { %v2267_v57 = vpop.f32.mrb[72].mxu0  ;;  %4274 = vmatprep.mubr.bf16.mxu0 %v12869_v8  ;;  %4322 = vmatpush1.bf16.msra.mxu0 %v8830_v60  ;;  %v7496_v1 = vpop.f32.mrb[104].mxu1  ;;  %v10570_v8 = vsel %vm3631_vm3, %v3589_v15, %v3592_v63 }
 0x370   :  { %v3593_v62 = vrot.slane %v2267_v57, 1  ;;  %v2269_v59 = vpop.f32.mrb[73].mxu0  ;;  %v7497_v50 = vpop.f32.mrb[105].mxu1  ;;  %4323 = vmatprep.subr.bf16.mxu0 %v8836_v3 }
 0x371   :  { %v3594_v0 = vrot.slane %v2269_v59, 1  ;;  %v2271_v7 = vpop.f32.mrb[74].mxu0  ;;  %v7498_v23 = vadd.f32 %v7497_v50, %v7496_v1  ;;  %v7499_v35 = vpop.f32.mrb[106].mxu1  ;;  %v8838_v50 = vld [vmem:[#allocation6 + $0x270] ss:$12 sps:$4 sm:$0xff]  }
 0x372   :  { %v3596_v13 = vrot.slane %v2271_v7, 1  ;;  %v2273_v46 = vpop.f32.mrb[75].mxu0  ;;  %v10574_v60 = vsel %vm3631_vm3, %v3590_v11, %v3593_v62  ;;  %v7500_v28 = vpop.f32.mrb[107].mxu1  ;;  %v8844_v11 = vld [vmem:[#allocation6 + $0x28c] ss:$12 sps:$4 sm:$0xff]  }
 0x373   :  { %v3597_v57 = vrot.slane %v2273_v46, 1  ;;  %v10578_v59 = vsel %vm3631_vm3, %v3591_v33, %v3594_v0  ;;  %v2474_v3 = vadd.f32 %v7498_v23, %v10440_v58  ;;  %4324 = vmatpush1.bf16.msra.mxu0 %v8834_v51  ;;  %v7501_v1 = vadd.f32 %v7500_v28, %v7499_v35  ;;  %v8842_v35 = vld [vmem:[#allocation6 + $0x288] ss:$12 sps:$4 sm:$0xff]  }
 0x374   :  { %12878 = vst [vmem:[#allocation42_spill] sm:$0xff] %v10578_v59  ;;  %v10583_v7 = vsel %vm3631_vm3, %v3593_v62, %v3596_v13  ;;  %4325 = vmatprep.subr.bf16.mxu0 %v8840_v37  ;;  %4491 = vmatmul.mubr.bf16.gmra.mrb[212].mxu1 %v12870_v53 }
 0x375   :  { %12879 = vst [vmem:[#allocation21_spill] sm:$0xff] %v10583_v7  ;;  %v10588_v15 = vsel %vm3631_vm3, %v3594_v0, %v3597_v57  ;;  %v3595_v46 = vrot.slane %v2474_v3, 1  ;;  %v2477_v33 = vadd.f32 %v7501_v1, %v10442_v2  ;;  %4498 = vmatprep.mubr.bf16.mxu1 %v12871_v31  ;;  %v8848_v1 = vld [vmem:[#allocation6 + $0x2a4] ss:$12 sps:$4 sm:$0xff]  }
 0x376   :  { %12880 = vst [vmem:[#allocation22_spill] sm:$0xff] %v10588_v15  ;;  %4275 = vmatmul.mubr.bf16.gmra.mrb[148].mxu0 %v12870_v53 }
 0x377   :  { %v2277_v58 = vpop.f32.mrb[76].mxu0  ;;  %v3598_v51 = vrot.slane %v2477_v33, 1  ;;  %4284 = vmatprep.mubr.bf16.mxu0 %v12871_v31  ;;  %4326 = vmatpush1.bf16.msra.mxu0 %v8838_v50  ;;  %v7502_v37 = vpop.f32.mrb[108].mxu1  ;;  %v10596_v0 = vsel %vm3631_vm3, %v3592_v63, %v3595_v46 }
 0x378   :  { %v3599_v62 = vrot.slane %v2277_v58, 1  ;;  %v2279_v23 = vpop.f32.mrb[77].mxu0  ;;  %v7503_v3 = vpop.f32.mrb[109].mxu1  ;;  %4327 = vmatprep.subr.bf16.mxu0 %v8844_v11 }
 0x379   :  { %v3600_v28 = vrot.slane %v2279_v23, 1  ;;  %v2281_v2 = vpop.f32.mrb[78].mxu0  ;;  %v7504_v15 = vadd.f32 %v7503_v3, %v7502_v37  ;;  %v7505_v7 = vpop.f32.mrb[110].mxu1  ;;  %v10600_v31 = vsel %vm3631_vm3, %v3595_v46, %v3598_v51  ;;  %v8846_v3 = vld [vmem:[#allocation6 + $0x2a0] ss:$12 sps:$4 sm:$0xff]  }
 0x37a   :  { %v3602_v53 = vrot.slane %v2281_v2, 1  ;;  %v2283_v33 = vpop.f32.mrb[79].mxu0  ;;  %v10604_v50 = vsel %vm3631_vm3, %v3596_v13, %v3599_v62  ;;  %v7506_v63 = vpop.f32.mrb[111].mxu1  ;;  %v8852_v13 = vld [vmem:[#allocation6 + $0x2bc] ss:$12 sps:$4 sm:$0xff]  }
 0x37b   :  { %12881 = vst [vmem:[#allocation30_spill] sm:$0xff] %v10604_v50  ;;  %v3603_v58 = vrot.slane %v2283_v33, 1  ;;  %v10608_v23 = vsel %vm3631_vm3, %v3597_v57, %v3600_v28  ;;  %v2482_v11 = vadd.f32 %v7504_v15, %v10452_v30  ;;  %4328 = vmatpush1.bf16.msra.mxu0 %v8842_v35  ;;  %v7507_v37 = vadd.f32 %v7506_v63, %v7505_v7 }
 0x37c   :  { %12882 = vst [vmem:[#allocation32_spill] sm:$0xff] %v10608_v23  ;;  %v10613_v2 = vsel %vm3631_vm3, %v3599_v62, %v3602_v53  ;;  %4329 = vmatprep.subr.bf16.mxu0 %v8848_v1  ;;  %4499 = vmatmul.mubr.bf16.gmra.mrb[216].mxu1 %v12872_v29  ;;  %v8850_v1 = vld [vmem:[#allocation6 + $0x2b8] ss:$12 sps:$4 sm:$0xff]  }
 0x37d   :  { %12883 = vst [vmem:[#allocation24_spill] sm:$0xff] %v10613_v2  ;;  %v10618_v46 = vsel %vm3631_vm3, %v3600_v28, %v3603_v58  ;;  %v3601_v33 = vrot.slane %v2482_v11, 1  ;;  %v2485_v57 = vadd.f32 %v7507_v37, %v10454_v56  ;;  %4506 = vmatprep.mubr.bf16.mxu1 %v12873_v45  ;;  %v8856_v37 = vld [vmem:[#allocation6 + $0x2d4] ss:$12 sps:$4 sm:$0xff]  }
 0x37e   :  { %12884 = vst [vmem:[#allocation23_spill] sm:$0xff] %v10618_v46  ;;  %4285 = vmatmul.mubr.bf16.gmra.mrb[152].mxu0 %v12872_v29 }
 0x37f   :  { %v2287_v30 = vpop.f32.mrb[80].mxu0  ;;  %v3604_v7 = vrot.slane %v2485_v57, 1  ;;  %4294 = vmatprep.mubr.bf16.mxu0 %v12873_v45  ;;  %4330 = vmatpush1.bf16.msra.mxu0 %v8846_v3  ;;  %v7508_v62 = vpop.f32.mrb[112].mxu1  ;;  %v10626_v28 = vsel %vm3631_vm3, %v3598_v51, %v3601_v33 }
 0x380   :  { %v3605_v15 = vrot.slane %v2287_v30, 1  ;;  %v2289_v35 = vpop.f32.mrb[81].mxu0  ;;  %v7509_v11 = vpop.f32.mrb[113].mxu1  ;;  %4331 = vmatprep.subr.bf16.mxu0 %v8852_v13 }
 0x381   :  { %v3606_v63 = vrot.slane %v2289_v35, 1  ;;  %v2291_v56 = vpop.f32.mrb[82].mxu0  ;;  %v7510_v46 = vadd.f32 %v7509_v11, %v7508_v62  ;;  %v7511_v2 = vpop.f32.mrb[114].mxu1  ;;  %v10630_v45 = vsel %vm3631_vm3, %v3601_v33, %v3604_v7  ;;  %v8854_v11 = vld [vmem:[#allocation6 + $0x2d0] ss:$12 sps:$4 sm:$0xff]  }
 0x382   :  { %v3608_v29 = vrot.slane %v2291_v56, 1  ;;  %v2293_v57 = vpop.f32.mrb[83].mxu0  ;;  %v10634_v3 = vsel %vm3631_vm3, %v3602_v53, %v3605_v15  ;;  %v7512_v51 = vpop.f32.mrb[115].mxu1  ;;  %v8860_v53 = vld [vmem:[#allocation6 + $0x2ec] ss:$12 sps:$4 sm:$0xff]  }
 0x383   :  { %12885 = vst [vmem:[#allocation40_spill] sm:$0xff] %v10634_v3  ;;  %v3609_v30 = vrot.slane %v2293_v57, 1  ;;  %v10638_v35 = vsel %vm3631_vm3, %v3603_v58, %v3606_v63  ;;  %v2490_v13 = vadd.f32 %v7510_v46, %v10464_v41  ;;  %4332 = vmatpush1.bf16.msra.mxu0 %v8850_v1  ;;  %v7513_v62 = vadd.f32 %v7512_v51, %v7511_v2 }
 0x384   :  { %12886 = vst [vmem:[#allocation43_spill] sm:$0xff] %v10638_v35  ;;  %v10643_v56 = vsel %vm3631_vm3, %v3605_v15, %v3608_v29  ;;  %4333 = vmatprep.subr.bf16.mxu0 %v8856_v37  ;;  %4507 = vmatmul.mubr.bf16.gmra.mrb[220].mxu1 %v10163_v12  ;;  %v8858_v37 = vld [vmem:[#allocation6 + $0x2e8] ss:$12 sps:$4 sm:$0xff]  }
 0x385   :  { %12887 = vst [vmem:[#allocation37_spill] sm:$0xff] %v10643_v56  ;;  %v10648_v33 = vsel %vm3631_vm3, %v3606_v63, %v3609_v30  ;;  %v3607_v57 = vrot.slane %v2490_v13, 1  ;;  %v2493_v58 = vadd.f32 %v7513_v62, %v10466_v52  ;;  %4547 = vmatprep.mubr.bf16.mxu1 %v12874_v48 }
 0x386   :  { %12888 = vst [vmem:[#allocation34_spill] sm:$0xff] %v10648_v33  ;;  %4295 = vmatmul.mubr.bf16.gmra.mrb[156].mxu0 %v10163_v12 }
 0x387   :  { %v2297_v41 = vpop.f32.mrb[84].mxu0  ;;  %v3610_v2 = vrot.slane %v2493_v58, 1  ;;  %4334 = vmatpush1.bf16.msra.mxu0 %v8854_v11  ;;  %4337 = vmatprep.mubr.bf16.mxu0 %v12874_v48  ;;  %v7514_v15 = vpop.f32.mrb[116].mxu1  ;;  %v10656_v63 = vsel %vm3631_vm3, %v3604_v7, %v3607_v57 }
 0x388   :  { %v3611_v46 = vrot.slane %v2297_v41, 1  ;;  %v2299_v1 = vpop.f32.mrb[85].mxu0  ;;  %v7515_v13 = vpop.f32.mrb[117].mxu1  ;;  %4335 = vmatprep.subr.bf16.mxu0 %v8860_v53 }
 0x389   :  { %v3612_v51 = vrot.slane %v2299_v1, 1  ;;  %v2301_v52 = vpop.f32.mrb[86].mxu0  ;;  %v7516_v62 = vadd.f32 %v7515_v13, %v7514_v15  ;;  %v7517_v12 = vpop.f32.mrb[118].mxu1  ;;  %v10660_v11 = vsel %vm3631_vm3, %v3607_v57, %v3610_v2 }
 0x38a   :  { %v3614_v33 = vrot.slane %v2301_v52, 1  ;;  %v2303_v56 = vpop.f32.mrb[87].mxu0  ;;  %v10664_v48 = vsel %vm3631_vm3, %v3608_v29, %v3611_v46  ;;  %v7518_v41 = vpop.f32.mrb[119].mxu1 }
 0x38b   :  { %12889 = vst [vmem:[#allocation25_spill] sm:$0xff] %v10664_v48  ;;  %v3615_v58 = vrot.slane %v2303_v56, 1  ;;  %v10668_v7 = vsel %vm3631_vm3, %v3609_v30, %v3612_v51  ;;  %v2498_v53 = vadd.f32 %v7516_v62, %v10476_v27  ;;  %4336 = vmatpush1.bf16.msra.mxu0 %v8858_v37  ;;  %v7519_v15 = vadd.f32 %v7518_v41, %v7517_v12 }
 0x38c   :  { %12890 = vst [vmem:[#allocation26_spill] sm:$0xff] %v10668_v7  ;;  %v10673_v1 = vsel %vm3631_vm3, %v3611_v46, %v3614_v33  ;;  %4548 = vmatmul.mubr.bf16.vlgmr.msra.gmra.mrb[224].mxu1 %v10215_v32 }
 0x38d   :  { %12891 = vst [vmem:[#allocation28_spill] sm:$0xff] %v10673_v1  ;;  %v10678_v29 = vsel %vm3631_vm3, %v3612_v51, %v3615_v58  ;;  %v3613_v56 = vrot.slane %v2498_v53, 1  ;;  %v2501_v57 = vadd.f32 %v7519_v15, %v10478_v49  ;;  %4555 = vmatprep.mubr.bf16.mxu1 %v10240_v9 }
 0x38e   :  { %12892 = vst [vmem:[#allocation27_spill] sm:$0xff] %v10678_v29  ;;  %4338 = vmatmul.mubr.bf16.vlgmr.msra.gmra.mrb[128].mxu0 %v10215_v32 }
 0x38f   :  { %v2307_v27 = vpop.f32.mrb[88].mxu0  ;;  %v3616_v30 = vrot.slane %v2501_v57, 1  ;;  %4347 = vmatprep.mubr.bf16.mxu0 %v10240_v9  ;;  %v7520_v46 = vpop.f32.mrb[120].mxu1  ;;  %v10686_v52 = vsel %vm3631_vm3, %v3610_v2, %v3613_v56 }
 0x390   :  { %v3617_v37 = vrot.slane %v2307_v27, 1  ;;  %v2309_v13 = vpop.f32.mrb[89].mxu0  ;;  %v7521_v62 = vpop.f32.mrb[121].mxu1 }
 0x391   :  { %v3618_v51 = vrot.slane %v2309_v13, 1  ;;  %v2311_v12 = vpop.f32.mrb[90].mxu0  ;;  %v7522_v41 = vadd.f32 %v7521_v62, %v7520_v46  ;;  %v7523_v53 = vpop.f32.mrb[122].mxu1  ;;  %v10690_v32 = vsel %vm3631_vm3, %v3613_v56, %v3616_v30 }
 0x392   :  { %v3620_v49 = vrot.slane %v2311_v12, 1  ;;  %v2313_v15 = vpop.f32.mrb[91].mxu0  ;;  %v10694_v9 = vsel %vm3631_vm3, %v3614_v33, %v3617_v37  ;;  %v7524_v27 = vpop.f32.mrb[123].mxu1 }
 0x393   :  { %12893 = vst [vmem:[#allocation29_spill] sm:$0xff] %v10694_v9  ;;  %v3621_v57 = vrot.slane %v2313_v15, 1  ;;  %v10698_v2 = vsel %vm3631_vm3, %v3615_v58, %v3618_v51  ;;  %v2506_v13 = vadd.f32 %v7522_v41, %v10488_v4  ;;  %v7525_v46 = vadd.f32 %v7524_v27, %v7523_v53 }
 0x394   :  { %12894 = vst [vmem:[#allocation31_spill] sm:$0xff] %v10698_v2  ;;  %v10703_v62 = vsel %vm3631_vm3, %v3617_v37, %v3620_v49  ;;  %4556 = vmatmul.mubr.bf16.gmra.mrb[228].mxu1 %v10263_v26 }
 0x395   :  { %12895 = vst [vmem:[#allocation38_spill] sm:$0xff] %v10703_v62  ;;  %v10708_v56 = vsel %vm3631_vm3, %v3618_v51, %v3621_v57  ;;  %v3619_v33 = vrot.slane %v2506_v13, 1  ;;  %v2509_v12 = vadd.f32 %v7525_v46, %v10490_v19  ;;  %4563 = vmatprep.mubr.bf16.mxu1 %v10317_v43 }
 0x396   :  { %12896 = vst [vmem:[#allocation35_spill] sm:$0xff] %v10708_v56  ;;  %4348 = vmatmul.mubr.bf16.gmra.mrb[132].mxu0 %v10263_v26 }
 0x397   :  { %v2317_v58 = vpop.f32.mrb[92].mxu0  ;;  %v3622_v4 = vrot.slane %v2509_v12, 1  ;;  %4357 = vmatprep.mubr.bf16.mxu0 %v10317_v43  ;;  %v7526_v37 = vpop.f32.mrb[124].mxu1  ;;  %v10716_v15 = vsel %vm3631_vm3, %v3616_v30, %v3619_v33 }
 0x398   :  { %v3623_v41 = vrot.slane %v2317_v58, 1  ;;  %v2319_v53 = vpop.f32.mrb[93].mxu0  ;;  %v7527_v27 = vpop.f32.mrb[125].mxu1 }
 0x399   :  { %v3624_v51 = vrot.slane %v2319_v53, 1  ;;  %v2321_v13 = vpop.f32.mrb[94].mxu0  ;;  %v7528_v56 = vadd.f32 %v7527_v27, %v7526_v37  ;;  %v7529_v46 = vpop.f32.mrb[126].mxu1  ;;  %v10720_v26 = vsel %vm3631_vm3, %v3619_v33, %v3622_v4  ;;  %v12900_v33 = vrot.slane %v10506_v25, 1 }
 0x39a   :  { %v3626_v19 = vrot.slane %v2321_v13, 1  ;;  %v2323_v62 = vpop.f32.mrb[95].mxu0  ;;  %v10724_v43 = vsel %vm3631_vm3, %v3620_v49, %v3623_v41  ;;  %v7530_v58 = vpop.f32.mrb[127].mxu1 }
 0x39b   :  { %12897 = vst [vmem:[#allocation33_spill] sm:$0xff] %v10724_v43  ;;  %v3627_v12 = vrot.slane %v2323_v62, 1  ;;  %v10728_v30 = vsel %vm3631_vm3, %v3621_v57, %v3624_v51  ;;  %v2514_v53 = vadd.f32 %v7528_v56, %v10500_v44  ;;  %v7531_v37 = vadd.f32 %v7530_v58, %v7529_v46 }
 0x39c   :  { %12898 = vst [vmem:[#allocation36_spill] sm:$0xff] %v10728_v30  ;;  %v10733_v27 = vsel %vm3631_vm3, %v3623_v41, %v3626_v19  ;;  %v10739_v13 = vsel %vm3631_vm3, %v3626_v19, %v12900_v33  ;;  %4564 = vmatmul.mubr.bf16.gmra.mrb[232].mxu1 %v10344_v6  ;;  %v12903_v57 = vrot.slane %v10509_v5, 1 }
 0x39d   :  { %12899 = vst [vmem:[#allocation41_spill] sm:$0xff] %v10733_v27  ;;  %12901 = vst [vmem:[#allocation20_spill] sm:$0xff] %v10739_v13  ;;  %v10744_v49 = vsel %vm3631_vm3, %v3624_v51, %v3627_v12  ;;  %v3625_v62 = vrot.slane %v2514_v53, 1  ;;  %v2517_v56 = vadd.f32 %v7531_v37, %v10502_v36  ;;  %4571 = vmatprep.mubr.bf16.mxu1 %v10354_v14  ;;  %v12905_v36 = vrot.slane %v10516_v17, 1 }
 0x39e   :  { %12902 = vst [vmem:[#allocation46_spill] sm:$0xff] %v10744_v49  ;;  %v10750_v44 = vsel %vm3631_vm3, %v3627_v12, %v12903_v57  ;;  %4358 = vmatmul.mubr.bf16.gmra.mrb[136].mxu0 %v10344_v6 }
 0x39f   :  { %12904 = vst [vmem:[#allocation47_spill] sm:$0xff] %v10750_v44  ;;  %v3628_v25 = vrot.slane %v2517_v56, 1  ;;  %4367 = vmatprep.mubr.bf16.mxu0 %v10354_v14  ;;  %v7548_v41 = vpop.f32.mrb[128].mxu1  ;;  %v10758_v51 = vsel %vm3631_vm3, %v3622_v4, %v3625_v62 }
 0x3a0   :  { %v7549_v5 = vpop.f32.mrb[129].mxu1 }
 0x3a1   :  { %v10760_v19 = vadd.f32 %v7549_v5, %v7548_v41  ;;  %v7551_v46 = vpop.f32.mrb[130].mxu1  ;;  %v10764_v12 = vsel %vm3631_vm3, %v3625_v62, %v3628_v25  ;;  %v10770_v6 = vsel %vm3631_vm3, %v3628_v25, %v12905_v36 }
 0x3a2   :  { %v7552_v14 = vpop.f32.mrb[131].mxu1 }
 0x3a3   :  { %v10772_v58 = vadd.f32 %v7552_v14, %v7551_v46 }
 0x3a4   :  { %4572 = vmatmul.mubr.bf16.gmra.mrb[236].mxu1 %v10362_v54 }
 0x3a5   :  { %4579 = vmatprep.mubr.bf16.mxu1 %v10227_v24 }
 0x3a6   :  { %4368 = vmatmul.mubr.bf16.gmra.mrb[140].mxu0 %v10362_v54 }
 0x3a7   :  { %4377 = vmatprep.mubr.bf16.mxu0 %v10227_v24  ;;  %v7554_v4 = vpop.f32.mrb[132].mxu1 }
 0x3a8   :  { %v7555_v53 = vpop.f32.mrb[133].mxu1 }
 0x3a9   :  { %v10778_v37 = vadd.f32 %v7555_v53, %v7554_v4  ;;  %v7557_v17 = vpop.f32.mrb[134].mxu1 }
 0x3aa   :  { %v7558_v33 = vpop.f32.mrb[135].mxu1 }
 0x3ab   :  { %v10780_v57 = vadd.f32 %v7558_v33, %v7557_v17 }
 0x3ac   :  { %4580 = vmatmul.mubr.bf16.gmra.mrb[240].mxu1 %v10225_v38 }
 0x3ad   :  { %4587 = vmatprep.mubr.bf16.mxu1 %v10330_v40 }
 0x3ae   :  { %4378 = vmatmul.mubr.bf16.gmra.mrb[144].mxu0 %v10225_v38 }
 0x3af   :  { %4387 = vmatprep.mubr.bf16.mxu0 %v10330_v40  ;;  %v7560_v62 = vpop.f32.mrb[136].mxu1 }
 0x3b0   :  { %v7561_v54 = vpop.f32.mrb[137].mxu1 }
 0x3b1   :  { %v10786_v56 = vadd.f32 %v7561_v54, %v7560_v62  ;;  %v7563_v24 = vpop.f32.mrb[138].mxu1 }
 0x3b2   :  { %v7564_v25 = vpop.f32.mrb[139].mxu1 }
 0x3b3   :  { %v10788_v41 = vadd.f32 %v7564_v25, %v7563_v24 }
 0x3b4   :  { %4588 = vmatmul.mubr.bf16.gmra.mrb[244].mxu1 %v10319_v55 }
 0x3b5   :  { %4595 = vmatprep.mubr.bf16.mxu1 %v10277_v47 }
 0x3b6   :  { %4388 = vmatmul.mubr.bf16.gmra.mrb[148].mxu0 %v10319_v55 }
 0x3b7   :  { %4397 = vmatprep.mubr.bf16.mxu0 %v10277_v47  ;;  %v7566_v5 = vpop.f32.mrb[140].mxu1 }
 0x3b8   :  { %v7567_v38 = vpop.f32.mrb[141].mxu1 }
 0x3b9   :  { %v10794_v46 = vadd.f32 %v7567_v38, %v7566_v5  ;;  %v7569_v40 = vpop.f32.mrb[142].mxu1 }
 0x3ba   :  { %v7570_v36 = vpop.f32.mrb[143].mxu1 }
 0x3bb   :  { %v10796_v14 = vadd.f32 %v7570_v36, %v7569_v40 }
 0x3bc   :  { %4596 = vmatmul.mubr.bf16.gmra.mrb[248].mxu1 %v10275_v34 }
 0x3bd   :  { %4603 = vmatprep.mubr.bf16.mxu1 %v10390_v61 }
 0x3be   :  { %4398 = vmatmul.mubr.bf16.gmra.mrb[152].mxu0 %v10275_v34 }
 0x3bf   :  { %4407 = vmatprep.mubr.bf16.mxu0 %v10390_v61  ;;  %v7572_v4 = vpop.f32.mrb[144].mxu1 }
 0x3c0   :  { %v7573_v55 = vpop.f32.mrb[145].mxu1 }
 0x3c1   :  { %v10802_v53 = vadd.f32 %v7573_v55, %v7572_v4  ;;  %v7575_v47 = vpop.f32.mrb[146].mxu1 }
 0x3c2   :  { %v7576_v17 = vpop.f32.mrb[147].mxu1 }
 0x3c3   :  { %v10804_v33 = vadd.f32 %v7576_v17, %v7575_v47 }
 0x3c4   :  { %4604 = vmatmul.mubr.bf16.gmra.mrb[252].mxu1 %v10338_v16 }
 0x3c6   :  { %4408 = vmatmul.mubr.bf16.gmra.mrb[156].mxu0 %v10338_v16 }
 0x3c7   :  { %v7578_v62 = vpop.f32.mrb[148].mxu1 }
 0x3c8   :  { %v7579_v54 = vpop.f32.mrb[149].mxu1 }
 0x3c9   :  { %v10808_v24 = vadd.f32 %v7579_v54, %v7578_v62  ;;  %v7581_v25 = vpop.f32.mrb[150].mxu1 }
 0x3ca   :  { %v7582_v34 = vpop.f32.mrb[151].mxu1 }
 0x3cb   :  { %v10810_v5 = vadd.f32 %v7582_v34, %v7581_v25 }
 0x3cf   :  { %v7584_v61 = vpop.f32.mrb[152].mxu1 }
 0x3d0   :  { %v7585_v38 = vpop.f32.mrb[153].mxu1 }
 0x3d1   :  { %v10812_v40 = vadd.f32 %v7585_v38, %v7584_v61  ;;  %v7587_v36 = vpop.f32.mrb[154].mxu1 }
 0x3d2   :  { %v7588_v4 = vpop.f32.mrb[155].mxu1 }
 0x3d3   :  { %v10814_v55 = vadd.f32 %v7588_v4, %v7587_v36 }
 0x3d7   :  { %v7590_v47 = vpop.f32.mrb[156].mxu1 }
 0x3d8   :  { %v7591_v17 = vpop.f32.mrb[157].mxu1 }
 0x3d9   :  { %v10816_v44 = vadd.f32 %v7591_v17, %v7590_v47  ;;  %v7593_v16 = vpop.f32.mrb[158].mxu1 }
 0x3da   :  { %v7594_v13 = vpop.f32.mrb[159].mxu1 }
 0x3db   :  { %v10818_v62 = vadd.f32 %v7594_v13, %v7593_v16 }
 0x3df   :  { %v7612_v54 = vpop.f32.mrb[160].mxu1 }
 0x3e0   :  { %v10820_v49 = vpop.f32.mrb[96].mxu0  ;;  %v7613_v25 = vpop.f32.mrb[161].mxu1 }
 0x3e1   :  { %v10822_v34 = vpop.f32.mrb[97].mxu0  ;;  %v7614_v61 = vadd.f32 %v7613_v25, %v7612_v54  ;;  %v7615_v38 = vpop.f32.mrb[162].mxu1  ;;  %v12681_v27 = vrot.slane %v10820_v49, 2 }
 0x3e2   :  { %v3312_v36 = vpop.f32.mrb[98].mxu0  ;;  %v7616_v4 = vpop.f32.mrb[163].mxu1  ;;  %v12682_v30 = vrot.slane %v10822_v34, 2 }
 0x3e3   :  { %v10827_v47 = vadd.f32 %v7614_v61, %v10760_v19  ;;  %v4615_v17 = vrot.slane %v3312_v36, 2  ;;  %v3314_v13 = vpop.f32.mrb[99].mxu0  ;;  %v7617_v16 = vadd.f32 %v7616_v4, %v7615_v38 }
 0x3e4   :  { %v4616_v43 = vrot.slane %v3314_v13, 2 }
 0x3e5   :  { %v3522_v2 = vadd.f32 %v7617_v16, %v10772_v58  ;;  %v10835_v54 = vsel %vm4660_vm4, %v12681_v27, %v4615_v17  ;;  %v12683_v25 = vrot.slane %v10827_v47, 2 }
 0x3e6   :  { %v10841_v19 = vsel %vm4660_vm4, %v12682_v30, %v4616_v43 }
 0x3e7   :  { %v4617_v61 = vrot.slane %v3522_v2, 2  ;;  %v7618_v38 = vpop.f32.mrb[164].mxu1 }
 0x3e8   :  { %v3318_v36 = vpop.f32.mrb[100].mxu0  ;;  %v7619_v4 = vpop.f32.mrb[165].mxu1 }
 0x3e9   :  { %v4618_v13 = vrot.slane %v3318_v36, 2  ;;  %v3320_v58 = vpop.f32.mrb[101].mxu0  ;;  %v7620_v16 = vadd.f32 %v7619_v4, %v7618_v38  ;;  %v7621_v9 = vpop.f32.mrb[166].mxu1  ;;  %v10848_v27 = vsel %vm4660_vm4, %v12683_v25, %v4617_v61 }
 0x3ea   :  { %v4619_v29 = vrot.slane %v3320_v58, 2  ;;  %v3322_v1 = vpop.f32.mrb[102].mxu0  ;;  %v7622_v30 = vpop.f32.mrb[167].mxu1 }
 0x3eb   :  { %v3527_v7 = vadd.f32 %v7620_v16, %v10778_v37  ;;  %v4621_v48 = vrot.slane %v3322_v1, 2  ;;  %v3324_v2 = vpop.f32.mrb[103].mxu0  ;;  %v7623_v35 = vadd.f32 %v7622_v30, %v7621_v9  ;;  %v10853_v36 = vsel %vm4660_vm4, %v4615_v17, %v4618_v13 }
 0x3ec   :  { %v4622_v38 = vrot.slane %v3324_v2, 2  ;;  %v10857_v4 = vsel %vm4660_vm4, %v4616_v43, %v4619_v29 }
 0x3ed   :  { %v4620_v3 = vrot.slane %v3527_v7, 2  ;;  %v3530_v25 = vadd.f32 %v7623_v35, %v10780_v57  ;;  %v10862_v58 = vsel %vm4660_vm4, %v4618_v13, %v4621_v48 }
 0x3ee   :  { %v10866_v1 = vsel %vm4660_vm4, %v4619_v29, %v4622_v38 }
 0x3ef   :  { %12906 = vst [vmem:[#allocation48_spill] sm:$0xff] %v10866_v1  ;;  %v4623_v9 = vrot.slane %v3530_v25, 2  ;;  %v7624_v30 = vpop.f32.mrb[168].mxu1  ;;  %v10870_v37 = vsel %vm4660_vm4, %v4617_v61, %v4620_v3 }
 0x3f0   :  { %v3328_v17 = vpop.f32.mrb[104].mxu0  ;;  %v7625_v43 = vpop.f32.mrb[169].mxu1 }
 0x3f1   :  { %v4624_v16 = vrot.slane %v3328_v17, 2  ;;  %v3330_v7 = vpop.f32.mrb[105].mxu0  ;;  %v7626_v2 = vadd.f32 %v7625_v43, %v7624_v30  ;;  %v7627_v35 = vpop.f32.mrb[170].mxu1  ;;  %v10874_v57 = vsel %vm4660_vm4, %v4620_v3, %v4623_v9 }
 0x3f2   :  { %v4625_v13 = vrot.slane %v3330_v7, 2  ;;  %v3332_v23 = vpop.f32.mrb[106].mxu0  ;;  %v7628_v29 = vpop.f32.mrb[171].mxu1 }
 0x3f3   :  { %v3535_v25 = vadd.f32 %v7626_v2, %v10786_v56  ;;  %v4627_v50 = vrot.slane %v3332_v23, 2  ;;  %v3334_v1 = vpop.f32.mrb[107].mxu0  ;;  %v7629_v59 = vadd.f32 %v7628_v29, %v7627_v35  ;;  %v10879_v61 = vsel %vm4660_vm4, %v4621_v48, %v4624_v16 }
 0x3f4   :  { %12907 = vst [vmem:[#allocation49_spill] sm:$0xff] %v10879_v61  ;;  %v4628_v17 = vrot.slane %v3334_v1, 2  ;;  %v10883_v30 = vsel %vm4660_vm4, %v4622_v38, %v4625_v13 }
 0x3f5   :  { %12908 = vst [vmem:[#allocation50_spill] sm:$0xff] %v10883_v30  ;;  %v4626_v43 = vrot.slane %v3535_v25, 2  ;;  %v3538_v3 = vadd.f32 %v7629_v59, %v10788_v41  ;;  %v10888_v7 = vsel %vm4660_vm4, %v4624_v16, %v4627_v50 }
 0x3f6   :  { %12909 = vst [vmem:[#allocation51_spill] sm:$0xff] %v10888_v7  ;;  %v10892_v23 = vsel %vm4660_vm4, %v4625_v13, %v4628_v17 }
 0x3f7   :  { %12910 = vst [vmem:[#allocation52_spill] sm:$0xff] %v10892_v23  ;;  %v4629_v56 = vrot.slane %v3538_v3, 2  ;;  %v7630_v2 = vpop.f32.mrb[172].mxu1  ;;  %v10896_v48 = vsel %vm4660_vm4, %v4623_v9, %v4626_v43 }
 0x3f8   :  { %v3338_v1 = vpop.f32.mrb[108].mxu0  ;;  %v7631_v38 = vpop.f32.mrb[173].mxu1 }
 0x3f9   :  { %v4630_v35 = vrot.slane %v3338_v1, 2  ;;  %v3340_v29 = vpop.f32.mrb[109].mxu0  ;;  %v7632_v25 = vadd.f32 %v7631_v38, %v7630_v2  ;;  %v7633_v59 = vpop.f32.mrb[174].mxu1  ;;  %v10900_v41 = vsel %vm4660_vm4, %v4626_v43, %v4629_v56 }
 0x3fa   :  { %v4631_v16 = vrot.slane %v3340_v29, 2  ;;  %v3342_v7 = vpop.f32.mrb[110].mxu0  ;;  %v7634_v13 = vpop.f32.mrb[175].mxu1 }
 0x3fb   :  { %v3543_v3 = vadd.f32 %v7632_v25, %v10794_v46  ;;  %v4633_v23 = vrot.slane %v3342_v7, 2  ;;  %v3344_v30 = vpop.f32.mrb[111].mxu0  ;;  %v7635_v61 = vadd.f32 %v7634_v13, %v7633_v59  ;;  %v10905_v9 = vsel %vm4660_vm4, %v4627_v50, %v4630_v35 }
 0x3fc   :  { %12911 = vst [vmem:[#allocation53_spill] sm:$0xff] %v10905_v9  ;;  %v4634_v1 = vrot.slane %v3344_v30, 2  ;;  %v10909_v2 = vsel %vm4660_vm4, %v4628_v17, %v4631_v16 }
 0x3fd   :  { %12912 = vst [vmem:[#allocation54_spill] sm:$0xff] %v10909_v2  ;;  %v4632_v38 = vrot.slane %v3543_v3, 2  ;;  %v3546_v43 = vadd.f32 %v7635_v61, %v10796_v14  ;;  %v10914_v29 = vsel %vm4660_vm4, %v4630_v35, %v4633_v23 }
 0x3fe   :  { %12913 = vst [vmem:[#allocation55_spill] sm:$0xff] %v10914_v29  ;;  %v10918_v46 = vsel %vm4660_vm4, %v4631_v16, %v4634_v1 }
 0x3ff   :  { %12914 = vst [vmem:[#allocation56_spill] sm:$0xff] %v10918_v46  ;;  %v4635_v7 = vrot.slane %v3546_v43, 2  ;;  %v7636_v25 = vpop.f32.mrb[176].mxu1  ;;  %v10922_v50 = vsel %vm4660_vm4, %v4629_v56, %v4632_v38 }
 0x400   :  { %v3348_v30 = vpop.f32.mrb[112].mxu0  ;;  %v7637_v17 = vpop.f32.mrb[177].mxu1 }
 0x401   :  { %v4636_v59 = vrot.slane %v3348_v30, 2  ;;  %v3350_v13 = vpop.f32.mrb[113].mxu0  ;;  %v7638_v3 = vadd.f32 %v7637_v17, %v7636_v25  ;;  %v7639_v14 = vpop.f32.mrb[178].mxu1  ;;  %v10926_v61 = vsel %vm4660_vm4, %v4632_v38, %v4635_v7 }
 0x402   :  { %v4637_v35 = vrot.slane %v3350_v13, 2  ;;  %v3352_v29 = vpop.f32.mrb[114].mxu0  ;;  %v7640_v16 = vpop.f32.mrb[179].mxu1 }
 0x403   :  { %v3551_v43 = vadd.f32 %v7638_v3, %v10802_v53  ;;  %v4639_v46 = vrot.slane %v3352_v29, 2  ;;  %v3354_v2 = vpop.f32.mrb[115].mxu0  ;;  %v7641_v9 = vadd.f32 %v7640_v16, %v7639_v14  ;;  %v10931_v56 = vsel %vm4660_vm4, %v4633_v23, %v4636_v59 }
 0x404   :  { %12915 = vst [vmem:[#allocation57_spill] sm:$0xff] %v10931_v56  ;;  %v4640_v30 = vrot.slane %v3354_v2, 2  ;;  %v10935_v25 = vsel %vm4660_vm4, %v4634_v1, %v4637_v35 }
 0x405   :  { %12916 = vst [vmem:[#allocation58_spill] sm:$0xff] %v10935_v25  ;;  %v4638_v17 = vrot.slane %v3551_v43, 2  ;;  %v3554_v38 = vadd.f32 %v7641_v9, %v10804_v33  ;;  %v10940_v13 = vsel %vm4660_vm4, %v4636_v59, %v4639_v46 }
 0x406   :  { %12917 = vst [vmem:[#allocation59_spill] sm:$0xff] %v10940_v13  ;;  %v10944_v53 = vsel %vm4660_vm4, %v4637_v35, %v4640_v30 }
 0x407   :  { %12918 = vst [vmem:[#allocation60_spill] sm:$0xff] %v10944_v53  ;;  %v4641_v29 = vrot.slane %v3554_v38, 2  ;;  %v7642_v3 = vpop.f32.mrb[180].mxu1  ;;  %v10948_v23 = vsel %vm4660_vm4, %v4635_v7, %v4638_v17 }
 0x408   :  { %v3358_v2 = vpop.f32.mrb[116].mxu0  ;;  %v7643_v1 = vpop.f32.mrb[181].mxu1 }
 0x409   :  { %v4642_v14 = vrot.slane %v3358_v2, 2  ;;  %v3360_v16 = vpop.f32.mrb[117].mxu0  ;;  %v7644_v43 = vadd.f32 %v7643_v1, %v7642_v3  ;;  %v7645_v33 = vpop.f32.mrb[182].mxu1  ;;  %v10952_v9 = vsel %vm4660_vm4, %v4638_v17, %v4641_v29 }
 0x40a   :  { %v4643_v59 = vrot.slane %v3360_v16, 2  ;;  %v3362_v13 = vpop.f32.mrb[118].mxu0  ;;  %v7646_v35 = vpop.f32.mrb[183].mxu1 }
 0x40b   :  { %v3559_v38 = vadd.f32 %v7644_v43, %v10808_v24  ;;  %v4645_v53 = vrot.slane %v3362_v13, 2  ;;  %v3364_v25 = vpop.f32.mrb[119].mxu0  ;;  %v7647_v56 = vadd.f32 %v7646_v35, %v7645_v33  ;;  %v10957_v7 = vsel %vm4660_vm4, %v4639_v46, %v4642_v14 }
 0x40c   :  { %12919 = vst [vmem:[#allocation61_spill] sm:$0xff] %v10957_v7  ;;  %v4646_v2 = vrot.slane %v3364_v25, 2  ;;  %v10961_v3 = vsel %vm4660_vm4, %v4640_v30, %v4643_v59 }
 0x40d   :  { %12920 = vst [vmem:[#allocation62_spill] sm:$0xff] %v10961_v3  ;;  %v4644_v1 = vrot.slane %v3559_v38, 2  ;;  %v3562_v17 = vadd.f32 %v7647_v56, %v10810_v5  ;;  %v10966_v16 = vsel %vm4660_vm4, %v4642_v14, %v4645_v53 }
 0x40e   :  { %12921 = vst [vmem:[#allocation63_spill] sm:$0xff] %v10966_v16  ;;  %v10970_v24 = vsel %vm4660_vm4, %v4643_v59, %v4646_v2 }
 0x40f   :  { %12922 = vst [vmem:[#allocation64_spill] sm:$0xff] %v10970_v24  ;;  %v4647_v13 = vrot.slane %v3562_v17, 2  ;;  %v7648_v43 = vpop.f32.mrb[184].mxu1  ;;  %v10974_v46 = vsel %vm4660_vm4, %v4641_v29, %v4644_v1 }
 0x410   :  { %v3368_v25 = vpop.f32.mrb[120].mxu0  ;;  %v7649_v30 = vpop.f32.mrb[185].mxu1 }
 0x411   :  { %v4648_v33 = vrot.slane %v3368_v25, 2  ;;  %v3370_v35 = vpop.f32.mrb[121].mxu0  ;;  %v7650_v38 = vadd.f32 %v7649_v30, %v7648_v43  ;;  %v7651_v5 = vpop.f32.mrb[186].mxu1  ;;  %v10978_v56 = vsel %vm4660_vm4, %v4644_v1, %v4647_v13 }
 0x412   :  { %12923 = vst [vmem:[#allocation65_spill] sm:$0xff] %v10978_v56  ;;  %v4649_v14 = vrot.slane %v3370_v35, 2  ;;  %v3372_v16 = vpop.f32.mrb[122].mxu0  ;;  %v7652_v59 = vpop.f32.mrb[187].mxu1 }
 0x413   :  { %v3567_v17 = vadd.f32 %v7650_v38, %v10812_v40  ;;  %v4651_v24 = vrot.slane %v3372_v16, 2  ;;  %v3374_v3 = vpop.f32.mrb[123].mxu0  ;;  %v7653_v7 = vadd.f32 %v7652_v59, %v7651_v5  ;;  %v10983_v29 = vsel %vm4660_vm4, %v4645_v53, %v4648_v33 }
 0x414   :  { %v4652_v25 = vrot.slane %v3374_v3, 2  ;;  %v10987_v43 = vsel %vm4660_vm4, %v4646_v2, %v4649_v14 }
 0x415   :  { %12924 = vst [vmem:[#allocation66_spill] sm:$0xff] %v10987_v43  ;;  %v4650_v30 = vrot.slane %v3567_v17, 2  ;;  %v3570_v1 = vadd.f32 %v7653_v7, %v10814_v55  ;;  %v10992_v35 = vsel %vm4660_vm4, %v4648_v33, %v4651_v24 }
 0x416   :  { %12925 = vst [vmem:[#allocation67_spill] sm:$0xff] %v10992_v35  ;;  %v10996_v40 = vsel %vm4660_vm4, %v4649_v14, %v4652_v25 }
 0x417   :  { %12926 = vst [vmem:[#allocation68_spill] sm:$0xff] %v10996_v40  ;;  %v4653_v16 = vrot.slane %v3570_v1, 2  ;;  %v7654_v38 = vpop.f32.mrb[188].mxu1  ;;  %v11000_v53 = vsel %vm4660_vm4, %v4647_v13, %v4650_v30 }
 0x418   :  { %v3378_v3 = vpop.f32.mrb[124].mxu0  ;;  %v7655_v2 = vpop.f32.mrb[189].mxu1 }
 0x419   :  { %v4654_v5 = vrot.slane %v3378_v3, 2  ;;  %v3380_v59 = vpop.f32.mrb[125].mxu0  ;;  %v7656_v17 = vadd.f32 %v7655_v2, %v7654_v38  ;;  %v7657_v55 = vpop.f32.mrb[190].mxu1  ;;  %v11004_v7 = vsel %vm4660_vm4, %v4650_v30, %v4653_v16 }
 0x41a   :  { %12927 = vst [vmem:[#allocation69_spill] sm:$0xff] %v11004_v7  ;;  %v4655_v33 = vrot.slane %v3380_v59, 2  ;;  %v3382_v35 = vpop.f32.mrb[126].mxu0  ;;  %v7658_v14 = vpop.f32.mrb[191].mxu1 }
 0x41b   :  { %v3575_v1 = vadd.f32 %v7656_v17, %v10816_v44  ;;  %v4657_v40 = vrot.slane %v3382_v35, 2  ;;  %v3384_v43 = vpop.f32.mrb[127].mxu0  ;;  %v7659_v56 = vadd.f32 %v7658_v14, %v7657_v55  ;;  %v11009_v13 = vsel %vm4660_vm4, %v4651_v24, %v4654_v5 }
 0x41c   :  { %v4658_v3 = vrot.slane %v3384_v43, 2  ;;  %v11013_v38 = vsel %vm4660_vm4, %v4652_v25, %v4655_v33  ;;  %v12930_v44 = vrot.slane %v10820_v49, 2  ;;  %v12933_v25 = vrot.slane %v10822_v34, 2 }
 0x41d   :  { %12928 = vst [vmem:[#allocation70_spill] sm:$0xff] %v11013_v38  ;;  %v4656_v2 = vrot.slane %v3575_v1, 2  ;;  %v3578_v30 = vadd.f32 %v7659_v56, %v10818_v62  ;;  %v11018_v59 = vsel %vm4660_vm4, %v4654_v5, %v4657_v40 }
 0x41e   :  { %12929 = vst [vmem:[#allocation71_spill] sm:$0xff] %v11018_v59  ;;  %v11024_v35 = vsel %vm4660_vm4, %v4657_v40, %v12930_v44  ;;  %v11028_v24 = vsel %vm4660_vm4, %v4655_v33, %v4658_v3  ;;  %v11034_v43 = vsel %vm4660_vm4, %v4658_v3, %v12933_v25  ;;  %v12937_v33 = vrot.slane %v10827_v47, 2 }
 0x41f   :  { %12931 = vst [vmem:[#allocation72_spill] sm:$0xff] %v11024_v35  ;;  %12932 = vst [vmem:[#allocation73_spill] sm:$0xff] %v11028_v24  ;;  %v4659_v62 = vrot.slane %v3578_v30, 2  ;;  %v7676_v56 = vpop.f32.mrb[192].mxu1  ;;  %v11038_v5 = vsel %vm4660_vm4, %v4653_v16, %v4656_v2 }
 0x420   :  { %12934 = vst [vmem:[#allocation74_spill] sm:$0xff] %v11034_v43  ;;  %12935 = vst [vmem:[#allocation75_spill] sm:$0xff] %v11038_v5  ;;  %v7677_v49 = vpop.f32.mrb[193].mxu1 }
 0x421   :  { %v7678_v17 = vadd.f32 %v7677_v49, %v7676_v56  ;;  %v7679_v40 = vpop.f32.mrb[194].mxu1  ;;  %v11042_v55 = vsel %vm4660_vm4, %v4656_v2, %v4659_v62  ;;  %v11048_v34 = vsel %vm4660_vm4, %v4659_v62, %v12937_v33 }
 0x422   :  { %12936 = vst [vmem:[#allocation76_spill] sm:$0xff] %v11042_v55  ;;  %12938 = vst [vmem:[#allocation77_spill] sm:$0xff] %v11048_v34  ;;  %v7680_v14 = vpop.f32.mrb[195].mxu1 }
 0x423   :  { %v11051_v1 = vadd.f32 %v7678_v17, %v10540_v20  ;;  %v7681_v3 = vadd.f32 %v7680_v14, %v7679_v40 }
 0x425   :  { %v11054_v16 = vadd.f32 %v7681_v3, %v10566_v22 }
 0x427   :  { %v7682_v30 = vpop.f32.mrb[196].mxu1 }
 0x428   :  { %v7683_v44 = vpop.f32.mrb[197].mxu1 }
 0x429   :  { %v7684_v25 = vadd.f32 %v7683_v44, %v7682_v30  ;;  %v7685_v56 = vpop.f32.mrb[198].mxu1 }
 0x42a   :  { %v7686_v2 = vpop.f32.mrb[199].mxu1 }
 0x42b   :  { %v11057_v49 = vadd.f32 %v7684_v25, %v10570_v8  ;;  %v7687_v47 = vadd.f32 %v7686_v2, %v7685_v56 }
 0x42d   :  { %v11060_v62 = vadd.f32 %v7687_v47, %v10596_v0 }
 0x42f   :  { %v7688_v33 = vpop.f32.mrb[200].mxu1 }
 0x430   :  { %v7689_v34 = vpop.f32.mrb[201].mxu1 }
 0x431   :  { %v7690_v20 = vadd.f32 %v7689_v34, %v7688_v33  ;;  %v7691_v17 = vpop.f32.mrb[202].mxu1 }
 0x432   :  { %v7692_v40 = vpop.f32.mrb[203].mxu1 }
 0x433   :  { %v11063_v22 = vadd.f32 %v7690_v20, %v10600_v31  ;;  %v7693_v14 = vadd.f32 %v7692_v40, %v7691_v17 }
 0x435   :  { %v11066_v3 = vadd.f32 %v7693_v14, %v10626_v28 }
 0x437   :  { %v7694_v30 = vpop.f32.mrb[204].mxu1 }
 0x438   :  { %v7695_v44 = vpop.f32.mrb[205].mxu1 }
 0x439   :  { %v7696_v8 = vadd.f32 %v7695_v44, %v7694_v30  ;;  %v7697_v25 = vpop.f32.mrb[206].mxu1 }
 0x43a   :  { %v7698_v56 = vpop.f32.mrb[207].mxu1 }
 0x43b   :  { %v11069_v0 = vadd.f32 %v7696_v8, %v10630_v45  ;;  %v7699_v2 = vadd.f32 %v7698_v56, %v7697_v25 }
 0x43d   :  { %v11072_v34 = vadd.f32 %v7699_v2, %v10656_v63 }
 0x43f   :  { %v7700_v47 = vpop.f32.mrb[208].mxu1 }
 0x440   :  { %v7701_v33 = vpop.f32.mrb[209].mxu1 }
 0x441   :  { %v7702_v31 = vadd.f32 %v7701_v33, %v7700_v47  ;;  %v7703_v20 = vpop.f32.mrb[210].mxu1 }
 0x442   :  { %v7704_v17 = vpop.f32.mrb[211].mxu1 }
 0x443   :  { %v11075_v28 = vadd.f32 %v7702_v31, %v10660_v11  ;;  %v7705_v40 = vadd.f32 %v7704_v17, %v7703_v20  ;;  %v8861_v11 = vld [vmem:[#allocation9 + $0x40] sm:$0xff]  }
 0x444   :  { %v8862_v31 = vld [vmem:[#allocation9] sm:$0xff]   ;;  %7788 = vmatprep.subr.bf16.mxu0 %v8861_v11  ;;  %v4757_v11 = vld [vmem:[#allocation7] sm:$0x7] }
 0x445   :  { %v11078_v14 = vadd.f32 %v7705_v40, %v10686_v52  ;;  %v8863_v20 = vld [vmem:[#allocation9 + $0xc0] sm:$0xff]   ;;  %7789 = vmatpush3.bf16.msra.mxu0 %v8862_v31 }
 0x446   :  { %7810 = vmatprep.subr.bf16.mxu1 %v8863_v20 }
 0x447   :  { %v7706_v30 = vpop.f32.mrb[212].mxu1 }
 0x448   :  { %v7707_v44 = vpop.f32.mrb[213].mxu1 }
 0x449   :  { %v7708_v45 = vadd.f32 %v7707_v44, %v7706_v30  ;;  %v7709_v8 = vpop.f32.mrb[214].mxu1 }
 0x44a   :  { %v7710_v25 = vpop.f32.mrb[215].mxu1 }
 0x44b   :  { %v11081_v63 = vadd.f32 %v7708_v45, %v10690_v32  ;;  %v7711_v56 = vadd.f32 %v7710_v25, %v7709_v8 }
 0x44d   :  { %v11084_v2 = vadd.f32 %v7711_v56, %v10716_v15 }
 0x44f   :  { %v7712_v47 = vpop.f32.mrb[216].mxu1 }
 0x450   :  { %v7713_v33 = vpop.f32.mrb[217].mxu1 }
 0x451   :  { %v7714_v17 = vadd.f32 %v7713_v33, %v7712_v47  ;;  %v7715_v52 = vpop.f32.mrb[218].mxu1 }
 0x452   :  { %v7716_v40 = vpop.f32.mrb[219].mxu1 }
 0x453   :  { %v11087_v30 = vadd.f32 %v7714_v17, %v10720_v26  ;;  %v7717_v44 = vadd.f32 %v7716_v40, %v7715_v52 }
 0x455   :  { %v11090_v32 = vadd.f32 %v7717_v44, %v10758_v51  ;;  %v12942_v51 = vld [vmem:[#allocation44_spill] sm:$0xff]  ;;  %v12943_v44 = vsub.s32 0, %v12875_v18 }
 0x457   :  { %12939 = vst [vmem:[#allocation78_spill] sm:$0xff] %v11090_v32  ;;  %v7718_v15 = vpop.f32.mrb[220].mxu1 }
 0x458   :  { %v7719_v45 = vpop.f32.mrb[221].mxu1 }
 0x459   :  { %v7720_v8 = vadd.f32 %v7719_v45, %v7718_v15  ;;  %v7721_v25 = vpop.f32.mrb[222].mxu1  ;;  %v11101_v15 = vrot.slane %v4757_v11, %v12943_v44 }
 0x45a   :  { %v7722_v56 = vpop.f32.mrb[223].mxu1 }
 0x45b   :  { %v11093_v43 = vadd.f32 %v7720_v8, %v10764_v12  ;;  %v7723_v47 = vadd.f32 %v7722_v56, %v7721_v25  ;;  %v12944_v12 = vsub.s32 1, %v12875_v18 }
 0x45d   :  { %12940 = vst [vmem:[#allocation79_spill] sm:$0xff] %v11093_v43  ;;  %v11096_v33 = vadd.f32 %v7723_v47, %v10770_v6  ;;  %v11105_v8 = vrot.slane %v4757_v11, %v12944_v12  ;;  %v12945_v6 = vld [vmem:[#allocation39_spill] sm:$0xff] }
 0x45f   :  { %12941 = vst [vmem:[#allocation80_spill] sm:$0xff] %v11096_v33  ;;  %v7740_v26 = vpop.f32.mrb[224].mxu1  ;;  %v12946_v33 = vsub.s32 2, %v12875_v18 }
 0x460   :  { %v7741_v20 = vpop.f32.mrb[225].mxu1 }
 0x461   :  { %v4339_v17 = vpop.f32.mrb[128].mxu0  ;;  %v7742_v31 = vadd.f32 %v7741_v20, %v7740_v26  ;;  %v7743_v52 = vpop.f32.mrb[226].mxu1  ;;  %v11111_v26 = vrot.slane %v4757_v11, %v12946_v33 }
 0x462   :  { %v8000_v40 = vadd.f32 %v4339_v17, %v12942_v51  ;;  %v4341_v45 = vpop.f32.mrb[129].mxu0  ;;  %v7744_v25 = vpop.f32.mrb[227].mxu1 }
 0x463   :  { %v8001_v56 = vadd.f32 %v4341_v45, %v12945_v6  ;;  %v4550_v47 = vadd.f32 %v7742_v31, %v11051_v1  ;;  %v4343_v20 = vpop.f32.mrb[130].mxu0  ;;  %v7745_v17 = vadd.f32 %v7744_v25, %v7743_v52 }
 0x464   :  { %v4709_v51 = vadd.f32 %v8000_v40, %v10835_v54  ;;  %v8002_v44 = vadd.f32 %v4343_v20, %v10544_v21  ;;  %v4345_v55 = vpop.f32.mrb[131].mxu0 }
 0x465   :  { %v4710_v35 = vadd.f32 %v8001_v56, %v10841_v19  ;;  %v4711_v12 = vadd.f32 %v10848_v27, %v4550_v47  ;;  %v8003_v43 = vadd.f32 %v4345_v55, %v10548_v42  ;;  %v4553_v45 = vadd.f32 %v7745_v17, %v11054_v16 }
 0x466   :  { %v4774_v1 = vadd.f32 %v11101_v15, %v4709_v51  ;;  %v4712_v33 = vadd.f32 %v8002_v44, %v10853_v36 }
 0x467   :  { %v11122_v11 = vadd.f32 %v11105_v8, %v4710_v35  ;;  %v11125_v54 = vadd.f32 %v11111_v26, %v4711_v12  ;;  %v4713_v21 = vadd.f32 %v8003_v43, %v10857_v4  ;;  %v4714_v19 = vadd.f32 %v10870_v37, %v4553_v45  ;;  %v7746_v31 = vpop.f32.mrb[228].mxu1 }
 0x468   :  { %v4822_v27 = vmax.f32 %v4774_v1, 0.0  ;;  %v11130_v42 = vadd.f32 %v11101_v15, %v4712_v33  ;;  %v7747_v55 = vpop.f32.mrb[229].mxu1 }
 0x469   :  { %v12685_v16 = vmax.f32 %v11122_v11, 0.0  ;;  %v12687_v36 = vmax.f32 %v11125_v54, 0.0  ;;  %v11135_v35 = vadd.f32 %v11105_v8, %v4713_v21  ;;  %v11138_v52 = vadd.f32 %v11111_v26, %v4714_v19  ;;  %v4349_v40 = vpop.f32.mrb[132].mxu0  ;;  %v7749_v4 = vpop.f32.mrb[230].mxu1 }
 0x46a   :  { %12947 = vst [vmem:[#allocation44_spill] sm:$0xff] %v11130_v42  ;;  %v11140_v43 = vrot.slane %v4822_v27, 1  ;;  %v12684_v37 = vmax.f32 %v11130_v42, 0.0  ;;  %v8004_v25 = vadd.f32 %v4349_v40, %v10553_v10  ;;  %v4351_v6 = vpop.f32.mrb[133].mxu0  ;;  %v7748_v56 = vadd.f32 %v7747_v55, %v7746_v31  ;;  %v7750_v47 = vpop.f32.mrb[231].mxu1  ;;  %v12955_v40 = vld [vmem:[#allocation42_spill] sm:$0xff] }
 0x46b   :  { %12948 = vst [vmem:[#allocation39_spill] sm:$0xff] %v11135_v35  ;;  %12949 = vst [vmem:[#allocation81_spill] sm:$0xff] %v11138_v52  ;;  %v11146_v20 = vrot.slane %v12685_v16, 1  ;;  %v11150_v17 = vrot.slane %v12687_v36, 1  ;;  %v12686_v51 = vmax.f32 %v11135_v35, 0.0  ;;  %v12689_v44 = vmax.f32 %v11138_v52, 0.0 }
 0x46c   :  { %12950 = vst [vmem:[#allocation82_spill] sm:$0xff] %v11140_v43  ;;  %v4353_v12 = vpop.f32.mrb[134].mxu0  ;;  %v11156_v45 = vrot.slane %v12684_v37, 1  ;;  %v4715_v10 = vadd.f32 %v8004_v25, %v10862_v58  ;;  %v8005_v1 = vadd.f32 %v4351_v6, %v10558_v39  ;;  %v4558_v33 = vadd.f32 %v7748_v56, %v11057_v49  ;;  %v12956_v58 = vld [vmem:[#allocation48_spill] sm:$0xff]  ;;  %v12957_v6 = vld [vmem:[#allocation49_spill] sm:$0xff]  ;;  %v12974_v52 = vld [vmem:[#allocation30_spill] sm:$0xff] }
 0x46d   :  { %12951 = vst [vmem:[#allocation83_spill] sm:$0xff] %v11146_v20  ;;  %12952 = vst [vmem:[#allocation84_spill] sm:$0xff] %v11150_v17  ;;  %v4355_v21 = vpop.f32.mrb[135].mxu0  ;;  %v11163_v19 = vrot.slane %v12686_v51, 1  ;;  %v11167_v31 = vrot.slane %v12689_v44, 1  ;;  %v8006_v55 = vadd.f32 %v4353_v12, %v10574_v60  ;;  %v7751_v25 = vadd.f32 %v7750_v47, %v7749_v4  ;;  %v12958_v51 = vld [vmem:[#allocation50_spill] sm:$0xff] }
 0x46e   :  { %12953 = vst [vmem:[#allocation85_spill] sm:$0xff] %v11156_v45  ;;  %v8007_v37 = vadd.f32 %v4355_v21, %v12955_v40  ;;  %v11172_v16 = vadd.f32 %v11101_v15, %v4715_v10  ;;  %v4716_v39 = vadd.f32 %v8005_v1, %v12956_v58  ;;  %v4717_v49 = vadd.f32 %v10874_v57, %v4558_v33 }
 0x46f   :  { %12954 = vst [vmem:[#allocation86_spill] sm:$0xff] %v11167_v31  ;;  %v4718_v56 = vadd.f32 %v8006_v55, %v12957_v6  ;;  %v7752_v42 = vpop.f32.mrb[232].mxu1  ;;  %v4960_v60 = vsel %vm3631_vm3, %v11140_v43, %v11156_v45  ;;  %v11186_v12 = vsel %vm3631_vm3, %v11150_v17, %v11167_v31  ;;  %v12973_v43 = vld [vmem:[#allocation52_spill] sm:$0xff] }
 0x470   :  { %v4719_v36 = vadd.f32 %v8007_v37, %v12958_v51  ;;  %v12690_v10 = vmax.f32 %v11172_v16, 0.0  ;;  %v11190_v57 = vadd.f32 %v11105_v8, %v4716_v39  ;;  %v11193_v4 = vadd.f32 %v11111_v26, %v4717_v49  ;;  %v7753_v47 = vpop.f32.mrb[233].mxu1 }
 0x471   :  { %v4561_v37 = vadd.f32 %v7751_v25, %v11060_v62  ;;  %v11197_v51 = vadd.f32 %v11101_v15, %v4718_v56  ;;  %v4359_v33 = vpop.f32.mrb[136].mxu0  ;;  %v7754_v21 = vadd.f32 %v7753_v47, %v7752_v42  ;;  %v7755_v55 = vpop.f32.mrb[234].mxu1  ;;  %v11202_v40 = vmax.f32 %v4822_v27, %v4960_v60  ;;  %v12963_v42 = vld [vmem:[#allocation21_spill] sm:$0xff]  ;;  %v12964_v27 = vld [vmem:[#allocation22_spill] sm:$0xff] }
 0x472   :  { %v11200_v1 = vadd.f32 %v11105_v8, %v4719_v36  ;;  %v11206_v58 = vrot.slane %v12690_v10, 1  ;;  %v12692_v39 = vmax.f32 %v11190_v57, 0.0  ;;  %v12695_v62 = vmax.f32 %v11193_v4, 0.0  ;;  %v4361_v25 = vpop.f32.mrb[137].mxu0  ;;  %v7756_v6 = vpop.f32.mrb[235].mxu1 }
 0x473   :  { %12959 = vst [vmem:[#allocation42_spill] sm:$0xff] %v11197_v51  ;;  %12961 = vst [vmem:[#allocation49_spill] sm:$0xff] %v11202_v40  ;;  %v4720_v49 = vadd.f32 %v10896_v48, %v4561_v37  ;;  %v8008_v47 = vadd.f32 %v4359_v33, %v12963_v42  ;;  %v8009_v60 = vadd.f32 %v4361_v25, %v12964_v27  ;;  %v4363_v44 = vpop.f32.mrb[138].mxu0  ;;  %v12968_v56 = vmax.f32 %v11197_v51, 0.0  ;;  %v12972_v27 = vld [vmem:[#allocation51_spill] sm:$0xff] }
 0x474   :  { %12960 = vst [vmem:[#allocation48_spill] sm:$0xff] %v11200_v1  ;;  %12962 = vst [vmem:[#allocation50_spill] sm:$0xff] %v11206_v58  ;;  %v11217_v10 = vrot.slane %v12692_v39, 1  ;;  %v11221_v17 = vrot.slane %v12695_v62, 1  ;;  %v4566_v37 = vadd.f32 %v7754_v21, %v11063_v22  ;;  %v4365_v36 = vpop.f32.mrb[139].mxu0  ;;  %v12970_v25 = vmax.f32 %v11200_v1, 0.0 }
 0x475   :  { %v11224_v48 = vadd.f32 %v11111_v26, %v4720_v49  ;;  %v11229_v33 = vrot.slane %v12968_v56, 1  ;;  %v4721_v39 = vadd.f32 %v8008_v47, %v12972_v27  ;;  %v4722_v45 = vadd.f32 %v8009_v60, %v12973_v43  ;;  %v12975_v22 = vld [vmem:[#allocation32_spill] sm:$0xff]  ;;  %v12986_v1 = vld [vmem:[#allocation55_spill] sm:$0xff] }
 0x476   :  { %12965 = vst [vmem:[#allocation21_spill] sm:$0xff] %v11217_v10  ;;  %12966 = vst [vmem:[#allocation22_spill] sm:$0xff] %v11221_v17  ;;  %v11233_v42 = vrot.slane %v12970_v25, 1  ;;  %v4723_v49 = vadd.f32 %v10900_v41, %v4566_v37  ;;  %v8010_v31 = vadd.f32 %v4363_v44, %v12974_v52  ;;  %v8011_v21 = vadd.f32 %v4365_v36, %v12975_v22  ;;  %v12977_v44 = vld [vmem:[#allocation53_spill] sm:$0xff]  ;;  %v12978_v36 = vld [vmem:[#allocation54_spill] sm:$0xff] }
 0x477   :  { %12967 = vst [vmem:[#allocation87_spill] sm:$0xff] %v11224_v48  ;;  %12969 = vst [vmem:[#allocation88_spill] sm:$0xff] %v11229_v33  ;;  %v12700_v62 = vmax.f32 %v11224_v48, 0.0  ;;  %v11242_v35 = vadd.f32 %v11101_v15, %v4721_v39  ;;  %v11245_v56 = vadd.f32 %v11105_v8, %v4722_v45  ;;  %v7757_v25 = vadd.f32 %v7756_v6, %v7755_v55  ;;  %v7758_v51 = vpop.f32.mrb[236].mxu1 }
 0x478   :  { %12971 = vst [vmem:[#allocation89_spill] sm:$0xff] %v11233_v42  ;;  %v4955_v43 = vsel %vm3631_vm3, %v11217_v10, %v11233_v42  ;;  %v11256_v52 = vadd.f32 %v11111_v26, %v4723_v49  ;;  %v4724_v39 = vadd.f32 %v8010_v31, %v12977_v44  ;;  %v4725_v47 = vadd.f32 %v8011_v21, %v12978_v36  ;;  %v7759_v45 = vpop.f32.mrb[237].mxu1  ;;  %v12981_v31 = vld [vmem:[#allocation24_spill] sm:$0xff] }
 0x479   :  { %v11253_v41 = vrot.slane %v12700_v62, 1  ;;  %v12704_v55 = vmax.f32 %v11242_v35, 0.0  ;;  %v4569_v60 = vadd.f32 %v7757_v25, %v11066_v3  ;;  %v4369_v37 = vpop.f32.mrb[140].mxu0  ;;  %v7760_v27 = vadd.f32 %v7759_v45, %v7758_v51  ;;  %v7761_v22 = vpop.f32.mrb[238].mxu1  ;;  %v12984_v45 = vld [vmem:[#allocation23_spill] sm:$0xff] }
 0x47a   :  { %v11265_v10 = vadd.f32 %v11101_v15, %v4724_v39  ;;  %v11268_v49 = vadd.f32 %v11105_v8, %v4725_v47  ;;  %v8012_v21 = vadd.f32 %v4369_v37, %v12981_v31  ;;  %v4371_v44 = vpop.f32.mrb[141].mxu0  ;;  %v7762_v36 = vpop.f32.mrb[239].mxu1  ;;  %v12983_v3 = vmax.f32 %v11245_v56, 0.0 }
 0x47b   :  { %12976 = vst [vmem:[#allocation51_spill] sm:$0xff] %v11253_v41  ;;  %v11273_v6 = vrot.slane %v12704_v55, 1  ;;  %v4726_v25 = vadd.f32 %v10922_v50, %v4569_v60  ;;  %v8013_v39 = vadd.f32 %v4371_v44, %v12984_v45  ;;  %v4373_v62 = vpop.f32.mrb[142].mxu0  ;;  %v12985_v47 = vmax.f32 %v11256_v52, 0.0  ;;  %v12989_v60 = vld [vmem:[#allocation40_spill] sm:$0xff] }
 0x47c   :  { %12979 = vst [vmem:[#allocation52_spill] sm:$0xff] %v11265_v10  ;;  %12980 = vst [vmem:[#allocation30_spill] sm:$0xff] %v11268_v49  ;;  %v11277_v51 = vrot.slane %v12983_v3, 1  ;;  %v12706_v37 = vmax.f32 %v11265_v10, 0.0  ;;  %v12708_v31 = vmax.f32 %v11268_v49, 0.0  ;;  %v4727_v55 = vadd.f32 %v8012_v21, %v12986_v1  ;;  %v4375_v42 = vpop.f32.mrb[143].mxu0 }
 0x47d   :  { %12982 = vst [vmem:[#allocation32_spill] sm:$0xff] %v11273_v6  ;;  %v11283_v48 = vrot.slane %v12985_v47, 1  ;;  %v11289_v24 = vadd.f32 %v11111_v26, %v4726_v25  ;;  %v12988_v3 = vld [vmem:[#allocation56_spill] sm:$0xff]  ;;  %v4574_v50 = vadd.f32 %v7760_v27, %v11069_v0  ;;  %v8014_v44 = vadd.f32 %v4373_v62, %v12989_v60  ;;  %v12992_v21 = vld [vmem:[#allocation43_spill] sm:$0xff]  ;;  %v12993_v62 = vld [vmem:[#allocation57_spill] sm:$0xff] }
 0x47e   :  { %v4728_v59 = vadd.f32 %v8013_v39, %v12988_v3  ;;  %v11296_v45 = vrot.slane %v12706_v37, 1  ;;  %v11300_v47 = vrot.slane %v12708_v31, 1  ;;  %v11303_v1 = vadd.f32 %v11101_v15, %v4727_v55  ;;  %v8864_v60 = vld [vmem:[#allocation9 + $0x80] sm:$0xff]   ;;  %v8865_v37 = vld [vmem:[#allocation9 + $0x48] sm:$0xff]   ;;  %v12994_v49 = vld [vmem:[#allocation58_spill] sm:$0xff] }
 0x47f   :  { %12987 = vst [vmem:[#allocation53_spill] sm:$0xff] %v11289_v24  ;;  %v8015_v25 = vadd.f32 %v4375_v42, %v12992_v21  ;;  %v12710_v5 = vmax.f32 %v11289_v24, 0.0  ;;  %v4729_v0 = vadd.f32 %v10926_v61, %v4574_v50  ;;  %v4730_v27 = vadd.f32 %v8014_v44, %v12993_v62  ;;  %v7764_v3 = vpop.f32.mrb[240].mxu1  ;;  %v8866_v10 = vld [vmem:[#allocation9 + $0x8] sm:$0xff]   ;;  %7811 = vmatpush3.bf16.msra.mxu1 %v8864_v60 }
 0x480   :  { %12990 = vst [vmem:[#allocation54_spill] sm:$0xff] %v11296_v45  ;;  %12991 = vst [vmem:[#allocation24_spill] sm:$0xff] %v11300_v47  ;;  %v11308_v39 = vadd.f32 %v11105_v8, %v4728_v59  ;;  %v12712_v31 = vmax.f32 %v11303_v1, 0.0  ;;  %v7763_v32 = vadd.f32 %v7762_v36, %v7761_v22  ;;  %v4956_v42 = vsel %vm3631_vm3, %v11221_v17, %v11253_v41  ;;  %v7765_v59 = vpop.f32.mrb[241].mxu1 }
 0x481   :  { %v4731_v55 = vadd.f32 %v8015_v25, %v12994_v49  ;;  %v11320_v61 = vrot.slane %v12710_v5, 1  ;;  %v11324_v44 = vadd.f32 %v11111_v26, %v4729_v0  ;;  %v11327_v21 = vadd.f32 %v11101_v15, %v4730_v27  ;;  %v4379_v49 = vpop.f32.mrb[144].mxu0  ;;  %v7767_v22 = vpop.f32.mrb[242].mxu1  ;;  %7790 = vmatprep.subr.bf16.mxu0 %v8865_v37 }
 0x482   :  { %v11331_v36 = vrot.slane %v12712_v31, 1  ;;  %v4577_v62 = vadd.f32 %v7763_v32, %v11072_v34  ;;  %v12999_v5 = vmax.f32 %v11190_v57, 0.0  ;;  %v4381_v50 = vpop.f32.mrb[145].mxu0  ;;  %v7768_v27 = vpop.f32.mrb[243].mxu1  ;;  %7791 = vmatpush3.bf16.msra.mxu0 %v8866_v10  ;;  %v13001_v17 = vmax.f32 %v11308_v39, 0.0  ;;  %v13004_v57 = vld [vmem:[#allocation37_spill] sm:$0xff] }
 0x483   :  { %12995 = vst [vmem:[#allocation23_spill] sm:$0xff] %v11320_v61  ;;  %12996 = vst [vmem:[#allocation55_spill] sm:$0xff] %v11327_v21  ;;  %v11334_v25 = vadd.f32 %v11105_v8, %v4731_v55  ;;  %v12716_v37 = vmax.f32 %v11324_v44, 0.0  ;;  %v12715_v31 = vmax.f32 %v11327_v21, 0.0  ;;  %v13002_v55 = vmax.f32 %v11193_v4, 0.0  ;;  %v4383_v34 = vpop.f32.mrb[146].mxu0 }
 0x484   :  { %12997 = vst [vmem:[#allocation56_spill] sm:$0xff] %v11331_v36  ;;  %v11339_v0 = vmax.f32 %v12999_v5, %v4955_v43  ;;  %v11343_v60 = vrot.slane %v13001_v17, 1  ;;  %v4732_v5 = vadd.f32 %v10948_v23, %v4577_v62  ;;  %v8016_v43 = vadd.f32 %v4379_v49, %v13004_v57  ;;  %v13005_v10 = vld [vmem:[#allocation34_spill] sm:$0xff]  ;;  %v4385_v38 = vpop.f32.mrb[147].mxu0 }
 0x485   :  { %12998 = vst [vmem:[#allocation40_spill] sm:$0xff] %v11334_v25  ;;  %v11349_v24 = vmax.f32 %v13002_v55, %v4956_v42  ;;  %v12719_v32 = vmax.f32 %v11334_v25, 0.0  ;;  %v8017_v41 = vadd.f32 %v4381_v50, %v13005_v10  ;;  %v11357_v17 = vrot.slane %v12716_v37, 1  ;;  %v13008_v50 = vld [vmem:[#allocation59_spill] sm:$0xff]  ;;  %v13009_v55 = vld [vmem:[#allocation60_spill] sm:$0xff] }
 0x486   :  { %13000 = vst [vmem:[#allocation43_spill] sm:$0xff] %v11339_v0  ;;  %v11361_v7 = vrot.slane %v12715_v31, 1  ;;  %v7766_v42 = vadd.f32 %v7765_v59, %v7764_v3  ;;  %v11370_v49 = vadd.f32 %v11111_v26, %v4732_v5  ;;  %v4733_v62 = vadd.f32 %v8016_v43, %v13008_v50  ;;  %v13010_v31 = vld [vmem:[#allocation25_spill] sm:$0xff] }
 0x487   :  { %13003 = vst [vmem:[#allocation57_spill] sm:$0xff] %v11349_v24  ;;  %v8307_v4 = vpack.i.bf16 %v11349_v24, %v11339_v0  ;;  %v11367_v23 = vrot.slane %v12719_v32, 1  ;;  %v4734_v57 = vadd.f32 %v8017_v41, %v13009_v55  ;;  %v8018_v37 = vadd.f32 %v4383_v34, %v13010_v31  ;;  %v13011_v24 = vld [vmem:[#allocation26_spill] sm:$0xff]  ;;  %v7770_v0 = vpop.f32.mrb[244].mxu1  ;;  %v13012_v34 = vld [vmem:[#allocation61_spill] sm:$0xff] }
 0x488   :  { %13006 = vst [vmem:[#allocation58_spill] sm:$0xff] %v11361_v7  ;;  %13007 = vst [vmem:[#allocation37_spill] sm:$0xff] %v11370_v49  ;;  %v4582_v10 = vadd.f32 %v7766_v42, %v11075_v28  ;;  %v8019_v3 = vadd.f32 %v4385_v38, %v13011_v24  ;;  %v7769_v59 = vadd.f32 %v7768_v27, %v7767_v22  ;;  %v12720_v32 = vmax.f32 %v11370_v49, 0.0  ;;  %v7771_v28 = vpop.f32.mrb[245].mxu1  ;;  %v13013_v24 = vld [vmem:[#allocation62_spill] sm:$0xff]  ;;  %v8867_v50 = vld [vmem:[#allocation9 + $0xc8] sm:$0xff]  }
 0x489   :  { %8308 = vrot.lane.b32.xlu0 %v8307_v4, %s9191_s18  ;;  %v11380_v5 = vadd.f32 %v11101_v15, %v4733_v62  ;;  %v11383_v43 = vadd.f32 %v11105_v8, %v4734_v57  ;;  %v4949_v41 = vsel %vm3631_vm3, %v11277_v51, %v11300_v47  ;;  %v4736_v38 = vadd.f32 %v8018_v37, %v13012_v34  ;;  %v4389_v4 = vpop.f32.mrb[148].mxu0  ;;  %v7773_v42 = vpop.f32.mrb[246].mxu1  ;;  %v8868_v25 = vld [vmem:[#allocation9 + $0x88] sm:$0xff]  }
 0x48a   :  { %v4735_v31 = vadd.f32 %v10952_v9, %v4582_v10  ;;  %v4737_v22 = vadd.f32 %v8019_v3, %v13013_v24  ;;  %v4585_v27 = vadd.f32 %v7769_v59, %v11078_v14  ;;  %v11395_v62 = vrot.slane %v12720_v32, 1  ;;  %v4391_v37 = vpop.f32.mrb[149].mxu0  ;;  %v7774_v10 = vpop.f32.mrb[247].mxu1  ;;  %7812 = vmatprep.subr.bf16.mxu1 %v8867_v50 }
 0x48b   :  { %v12724_v55 = vmax.f32 %v11380_v5, 0.0  ;;  %v12725_v57 = vmax.f32 %v11383_v43, 0.0  ;;  %v4954_v9 = vsel %vm3631_vm3, %v11206_v58, %v11229_v33  ;;  %v11407_v3 = vadd.f32 %v11101_v15, %v4736_v38  ;;  %v4393_v24 = vpop.f32.mrb[150].mxu0  ;;  %v8870_v33 = vld [vmem:[#allocation9 + $0x10] sm:$0xff]   ;;  %7813 = vmatpush3.bf16.msra.mxu1 %v8868_v25  ;;  %v13033_v25 = vld [vmem:[#allocation31_spill] sm:$0xff] }
 0x48c   :  { %v11404_v14 = vadd.f32 %v11111_v26, %v4735_v31  ;;  %v11410_v59 = vadd.f32 %v11105_v8, %v4737_v22  ;;  %v4738_v34 = vadd.f32 %v10974_v46, %v4585_v27  ;;  %v13016_v31 = vmax.f32 %v11172_v16, 0.0  ;;  %v4395_v49 = vpop.f32.mrb[151].mxu0 }
 0x48d   :  { %13014 = vst [vmem:[#allocation34_spill] sm:$0xff] %v11407_v3  ;;  %v11415_v32 = vrot.slane %v12724_v55, 1  ;;  %v11419_v21 = vrot.slane %v12725_v57, 1  ;;  %v13018_v38 = vmax.f32 %v11245_v56, 0.0  ;;  %v12731_v27 = vmax.f32 %v11407_v3, 0.0 }
 0x48e   :  { %13015 = vst [vmem:[#allocation59_spill] sm:$0xff] %v11410_v59  ;;  %v11423_v58 = vmax.f32 %v13016_v31, %v4954_v9  ;;  %v12729_v46 = vmax.f32 %v11404_v14, 0.0  ;;  %v12734_v50 = vmax.f32 %v11410_v59, 0.0  ;;  %v11433_v55 = vadd.f32 %v11111_v26, %v4738_v34  ;;  %v13027_v59 = vld [vmem:[#allocation27_spill] sm:$0xff] }
 0x48f   :  { %v11427_v22 = vmax.f32 %v13018_v38, %v4949_v41  ;;  %v4948_v16 = vsel %vm3631_vm3, %v11273_v6, %v11296_v45  ;;  %v4950_v56 = vsel %vm3631_vm3, %v11283_v48, %v11320_v61  ;;  %v13021_v41 = vld [vmem:[#allocation28_spill] sm:$0xff]  ;;  %v11452_v34 = vrot.slane %v12731_v27, 1  ;;  %v13026_v27 = vld [vmem:[#allocation63_spill] sm:$0xff]  ;;  %v8871_v6 = vld [vmem:[#allocation9 + $0xd0] sm:$0xff]  }
 0x490   :  { %13017 = vst [vmem:[#allocation60_spill] sm:$0xff] %v11423_v58  ;;  %13020 = vst [vmem:[#allocation26_spill] sm:$0xff] %v11433_v55  ;;  %v8020_v9 = vadd.f32 %v4389_v4, %v13021_v41  ;;  %v11448_v31 = vrot.slane %v12729_v46, 1  ;;  %v11456_v38 = vrot.slane %v12734_v50, 1  ;;  %v13022_v4 = vmax.f32 %v11242_v35, 0.0  ;;  %7814 = vmatprep.subr.bf16.mxu1 %v8871_v6 }
 0x491   :  { %13019 = vst [vmem:[#allocation25_spill] sm:$0xff] %v11427_v22  ;;  %v8312_v57 = vpack.i.bf16 %v11427_v22, %v11423_v58  ;;  %v11459_v58 = vpop.f32.mrb[248].mxu1  ;;  %v13024_v46 = vmax.f32 %v11256_v52, 0.0  ;;  %v8021_v50 = vadd.f32 %v4391_v37, %v13027_v59  ;;  %v8869_v22 = vld [vmem:[#allocation9 + $0x50] sm:$0xff]   ;;  %v13028_v47 = vmax.f32 %v11433_v55, 0.0 }
 0x492   :  { %v11464_v41 = vmax.f32 %v13022_v4, %v4948_v16  ;;  %v4739_v61 = vadd.f32 %v8020_v9, %v13026_v27  ;;  %v11472_v45 = vpop.f32.mrb[249].mxu1  ;;  %v7772_v35 = vadd.f32 %v7771_v28, %v7770_v0  ;;  %v13029_v16 = vld [vmem:[#allocation29_spill] sm:$0xff]  ;;  %v4942_v52 = vsel %vm3631_vm3, %v11331_v36, %v11361_v7  ;;  %7792 = vmatprep.subr.bf16.mxu0 %v8869_v22 }
 0x493   :  { %8313 = vrot.lane.b32.xlu1 %v8312_v57, %s9191_s18  ;;  %v11468_v3 = vmax.f32 %v13024_v46, %v4950_v56  ;;  %v11476_v57 = vrot.slane %v13028_v47, 1  ;;  %v8022_v4 = vadd.f32 %v4393_v24, %v13029_v16  ;;  %v4399_v46 = vpop.f32.mrb[152].mxu0  ;;  %v11483_v27 = vpop.f32.mrb[250].mxu1  ;;  %v13030_v47 = vld [vmem:[#allocation64_spill] sm:$0xff]  ;;  %v13031_v0 = vmax.f32 %v11303_v1, 0.0  ;;  %7793 = vmatpush3.bf16.msra.mxu0 %v8870_v33 }
 0x494   :  { %13023 = vst [vmem:[#allocation61_spill] sm:$0xff] %v11464_v41  ;;  %v11488_v59 = vadd.f32 %v11101_v15, %v4739_v61  ;;  %v4740_v56 = vadd.f32 %v8021_v50, %v13030_v47  ;;  %v4401_v24 = vpop.f32.mrb[153].mxu0  ;;  %v7780_v9 = vpop.f32.mrb[251].mxu1  ;;  %v4590_v16 = vadd.f32 %v7772_v35, %v11081_v63  ;;  %v8023_v7 = vadd.f32 %v4395_v49, %v13033_v25  ;;  %v13034_v49 = vld [vmem:[#allocation65_spill] sm:$0xff] }
 0x495   :  { %13025 = vst [vmem:[#allocation62_spill] sm:$0xff] %v11468_v3  ;;  %v8317_v37 = vpack.i.bf16 %v11464_v41, %v11468_v3  ;;  %v11493_v28 = vmax.f32 %v13031_v0, %v4942_v52  ;;  %v4742_v55 = vadd.f32 %v8022_v4, %v10983_v29  ;;  %v7775_v36 = vadd.f32 %v7774_v10, %v7773_v42  ;;  %v4403_v3 = vpop.f32.mrb[154].mxu0  ;;  %v13035_v10 = vld [vmem:[#allocation66_spill] sm:$0xff]  ;;  %v13050_v41 = vld [vmem:[#allocation36_spill] sm:$0xff] }
 0x496   :  { %v12743_v61 = vmax.f32 %v11488_v59, 0.0  ;;  %v11501_v1 = vadd.f32 %v11105_v8, %v4740_v56  ;;  %v4944_v29 = vsel %vm3631_vm3, %v11357_v17, %v11395_v62  ;;  %v4405_v63 = vpop.f32.mrb[155].mxu0  ;;  %v4741_v42 = vadd.f32 %v13034_v49, %v4590_v16  ;;  %v8872_v16 = vld [vmem:[#allocation9 + $0x90] sm:$0xff]   ;;  %v13044_v49 = vld [vmem:[#allocation35_spill] sm:$0xff] }
 0x497   :  { %13032 = vst [vmem:[#allocation28_spill] sm:$0xff] %v11493_v28  ;;  %8318 = vrot.lane.b32.xlu0 %v8317_v37, %s9191_s18  ;;  %v8322_v50 = vpack.i.bf16 %v11493_v28, %v11202_v40  ;;  %v11511_v33 = vadd.f32 %v11101_v15, %v4742_v55  ;;  %v4743_v22 = vadd.f32 %v8023_v7, %v13035_v10  ;;  %v13036_v6 = vmax.f32 %v11125_v54, 0.0  ;;  %v11538_v0 = vpop.f32.mrb[252].mxu1 }
 0x498   :  { %v4593_v35 = vadd.f32 %v7775_v36, %v11084_v2  ;;  %v11517_v4 = vrot.slane %v12743_v61, 1  ;;  %v12745_v52 = vmax.f32 %v11501_v1, 0.0  ;;  %v13038_v55 = vmax.f32 %v11324_v44, 0.0  ;;  %v11554_v25 = vpop.f32.mrb[253].mxu1  ;;  %7815 = vmatpush3.bf16.msra.mxu1 %v8872_v16 }
 0x499   :  { %8323 = vrot.lane.b32.xlu1 %v8322_v50, %s9191_s18  ;;  %v11524_v37 = vmax.f32 %v13036_v6, %v11186_v12  ;;  %v11531_v7 = vadd.f32 %v11111_v26, %v4741_v42  ;;  %v12744_v2 = vmax.f32 %v11511_v33, 0.0  ;;  %v11535_v36 = vadd.f32 %v11105_v8, %v4743_v22  ;;  %v4409_v10 = vpop.f32.mrb[156].mxu0  ;;  %v11565_v22 = vpop.f32.mrb[254].mxu1 }
 0x49a   :  { %v11528_v47 = vmax.f32 %v13038_v55, %v4944_v29  ;;  %v4744_v56 = vadd.f32 %v11000_v53, %v4593_v35  ;;  %v11542_v54 = vrot.slane %v12745_v52, 1  ;;  %v4943_v44 = vsel %vm3631_vm3, %v11343_v60, %v11367_v23  ;;  %v11578_v28 = vpop.f32.mrb[255].mxu1 }
 0x49b   :  { %13037 = vst [vmem:[#allocation63_spill] sm:$0xff] %v11524_v37  ;;  %v4961_v53 = vsel %vm3631_vm3, %v11146_v20, %v11163_v19  ;;  %v11559_v29 = vrot.slane %v12744_v2, 1  ;;  %v13040_v35 = vmax.f32 %v11122_v11, 0.0  ;;  %v13042_v55 = vmax.f32 %v11308_v39, 0.0  ;;  %v13043_v2 = vld [vmem:[#allocation38_spill] sm:$0xff] }
 0x49c   :  { %13039 = vst [vmem:[#allocation27_spill] sm:$0xff] %v11528_v47  ;;  %v8332_v12 = vpack.i.bf16 %v11528_v47, %v11524_v37  ;;  %v11563_v42 = vadd.f32 %v11111_v26, %v4744_v56  ;;  %v8024_v52 = vadd.f32 %v4399_v46, %v13043_v2  ;;  %v8025_v50 = vadd.f32 %v4401_v24, %v13044_v49  ;;  %v4411_v56 = vpop.f32.mrb[157].mxu0  ;;  %v13047_v24 = vld [vmem:[#allocation67_spill] sm:$0xff]  ;;  %v13048_v49 = vld [vmem:[#allocation68_spill] sm:$0xff] }
 0x49d   :  { %v11570_v6 = vmax.f32 %v13040_v35, %v4961_v53  ;;  %v11574_v61 = vmax.f32 %v13042_v55, %v4943_v44  ;;  %v13045_v40 = vmax.f32 %v11531_v7, 0.0  ;;  %v7778_v39 = vadd.f32 %v11472_v45, %v11459_v58  ;;  %v4413_v44 = vpop.f32.mrb[158].mxu0  ;;  %v13049_v55 = vld [vmem:[#allocation33_spill] sm:$0xff] }
 0x49e   :  { %8333 = vrot.lane.b32.xlu0 %v8332_v12, %s9191_s18  ;;  %v13046_v12 = vmax.f32 %v11535_v36, 0.0  ;;  %v12752_v53 = vmax.f32 %v11563_v42, 0.0  ;;  %v4745_v2 = vadd.f32 %v8024_v52, %v13047_v24  ;;  %v4746_v35 = vadd.f32 %v8025_v50, %v13048_v49  ;;  %v4415_v47 = vpop.f32.mrb[159].mxu0 }
 0x49f   :  { %13041 = vst [vmem:[#allocation29_spill] sm:$0xff] %v11570_v6  ;;  %v11582_v16 = vrot.slane %v13045_v40, 1  ;;  %v8327_v46 = vpack.i.bf16 %v11574_v61, %v11570_v6  ;;  %v8026_v40 = vadd.f32 %v4403_v3, %v13049_v55  ;;  %v4598_v37 = vadd.f32 %v7778_v39, %v11087_v30  ;;  %v13051_v30 = vld [vmem:[#allocation69_spill] sm:$0xff]  ;;  %v8875_v55 = vld [vmem:[#allocation9 + $0xd8] sm:$0xff]  }
 0x4a0   :  { %v11586_v11 = vrot.slane %v13046_v12, 1  ;;  %v11598_v12 = vrot.slane %v12752_v53, 1  ;;  %v8027_v20 = vadd.f32 %v4405_v63, %v13050_v41  ;;  %v7781_v58 = vadd.f32 %v7780_v9, %v11483_v27  ;;  %v13052_v41 = vld [vmem:[#allocation70_spill] sm:$0xff]  ;;  %7816 = vmatprep.subr.bf16.mxu1 %v8875_v55 }
 0x4a1   :  { %8328 = vrot.lane.b32.xlu1 %v8327_v46, %s9191_s18  ;;  %v11605_v45 = vadd.f32 %v11101_v15, %v4745_v2  ;;  %v11608_v52 = vadd.f32 %v11105_v8, %v4746_v35  ;;  %v4748_v3 = vadd.f32 %v8026_v40, %v11009_v13  ;;  %v4937_v50 = vsel %vm3631_vm3, %v11419_v21, %v11456_v38  ;;  %v13053_v27 = vld [vmem:[#allocation78_spill] sm:$0xff] }
 0x4a2   :  { %v4747_v39 = vadd.f32 %v13051_v30, %v4598_v37  ;;  %v4749_v63 = vadd.f32 %v8027_v20, %v13052_v41  ;;  %v4601_v9 = vadd.f32 %v7781_v58, %v13053_v27  ;;  %v4938_v46 = vsel %vm3631_vm3, %v11448_v31, %v11476_v57  ;;  %v8873_v37 = vld [vmem:[#allocation9 + $0x58] sm:$0xff]  }
 0x4a3   :  { %v12753_v24 = vmax.f32 %v11605_v45, 0.0  ;;  %v12754_v13 = vmax.f32 %v11608_v52, 0.0  ;;  %v11625_v2 = vadd.f32 %v11101_v15, %v4748_v3  ;;  %v13054_v49 = vmax.f32 %v11383_v43, 0.0  ;;  %v8874_v20 = vld [vmem:[#allocation9 + $0x18] sm:$0xff]   ;;  %7794 = vmatprep.subr.bf16.mxu0 %v8873_v37 }
 0x4a4   :  { %v11632_v40 = vadd.f32 %v11111_v26, %v4747_v39  ;;  %v11635_v58 = vadd.f32 %v11105_v8, %v4749_v63  ;;  %v13056_v30 = vld [vmem:[#allocation75_spill] sm:$0xff]  ;;  %v13057_v27 = vmax.f32 %v11404_v14, 0.0  ;;  %v13059_v39 = vld [vmem:[#allocation41_spill] sm:$0xff]  ;;  %7795 = vmatpush3.bf16.msra.mxu0 %v8874_v20  ;;  %v13061_v55 = vld [vmem:[#allocation46_spill] sm:$0xff]  ;;  %v7784_v14 = vadd.f32 %v11554_v25, %v11538_v0 }
 0x4a5   :  { %v11629_v35 = vmax.f32 %v13054_v49, %v4937_v50  ;;  %v4750_v41 = vadd.f32 %v13056_v30, %v4601_v9  ;;  %v11644_v43 = vrot.slane %v12753_v24, 1  ;;  %v11648_v3 = vrot.slane %v12754_v13, 1  ;;  %v8876_v63 = vld [vmem:[#allocation9 + $0x98] sm:$0xff]   ;;  %v8877_v9 = vld [vmem:[#allocation9 + $0x60] sm:$0xff]   ;;  %v13065_v0 = vld [vmem:[#allocation73_spill] sm:$0xff] }
 0x4a6   :  { %v11640_v53 = vmax.f32 %v13057_v27, %v4938_v46  ;;  %v12756_v50 = vmax.f32 %v11625_v2, 0.0  ;;  %v8028_v49 = vadd.f32 %v4409_v10, %v13059_v39  ;;  %v8878_v24 = vld [vmem:[#allocation9 + $0x20] sm:$0xff]   ;;  %v8029_v39 = vadd.f32 %v4411_v56, %v13061_v55  ;;  %7817 = vmatpush3.bf16.msra.mxu1 %v8876_v63  ;;  %7796 = vmatprep.subr.bf16.mxu0 %v8877_v9 }
 0x4a7   :  { %13055 = vst [vmem:[#allocation64_spill] sm:$0xff] %v11629_v35  ;;  %v11655_v30 = vadd.f32 %v11111_v26, %v4750_v41  ;;  %v13060_v10 = vld [vmem:[#allocation71_spill] sm:$0xff]  ;;  %v13062_v41 = vmax.f32 %v11632_v40, 0.0  ;;  %v13063_v20 = vmax.f32 %v11635_v58, 0.0 }
 0x4a8   :  { %13058 = vst [vmem:[#allocation31_spill] sm:$0xff] %v11640_v53  ;;  %v8337_v27 = vpack.i.bf16 %v11640_v53, %v11629_v35  ;;  %v11661_v13 = vrot.slane %v12756_v50, 1  ;;  %v4751_v37 = vadd.f32 %v8028_v49, %v13060_v10  ;;  %v13064_v49 = vld [vmem:[#allocation20_spill] sm:$0xff]  ;;  %v4752_v25 = vadd.f32 %v8029_v39, %v13065_v0  ;;  %v13066_v63 = vld [vmem:[#allocation79_spill] sm:$0xff]  ;;  %7797 = vmatpush3.bf16.msra.mxu0 %v8878_v24 }
 0x4a9   :  { %v11669_v46 = vrot.slane %v13062_v41, 1  ;;  %v11673_v53 = vrot.slane %v13063_v20, 1  ;;  %v12761_v50 = vmax.f32 %v11655_v30, 0.0  ;;  %v8030_v10 = vadd.f32 %v4413_v44, %v13064_v49  ;;  %v13067_v55 = vld [vmem:[#allocation47_spill] sm:$0xff]  ;;  %v13068_v20 = vld [vmem:[#allocation72_spill] sm:$0xff]  ;;  %v13070_v49 = vld [vmem:[#allocation74_spill] sm:$0xff] }
 0x4aa   :  { %8338 = vrot.lane.b32.xlu0 %v8337_v27, %s9191_s18  ;;  %v11679_v56 = vadd.f32 %v11101_v15, %v4751_v37  ;;  %v4606_v9 = vadd.f32 %v7784_v14, %v13066_v63  ;;  %v8031_v41 = vadd.f32 %v4415_v47, %v13067_v55  ;;  %v7787_v27 = vadd.f32 %v11578_v28, %v11565_v22  ;;  %v13069_v47 = vld [vmem:[#allocation76_spill] sm:$0xff] }
 0x4ab   :  { %v11686_v35 = vrot.slane %v12761_v50, 1  ;;  %v4754_v6 = vadd.f32 %v8030_v10, %v13068_v20  ;;  %v4931_v44 = vsel %vm3631_vm3, %v11542_v54, %v11586_v11  ;;  %v4817_v14 = vadd.f32 %v11105_v8, %v4752_v25  ;;  %v13071_v10 = vld [vmem:[#allocation80_spill] sm:$0xff]  ;;  %v13074_v20 = vld [vmem:[#allocation77_spill] sm:$0xff] }
 0x4ac   :  { %v4864_v37 = vmax.f32 %v11679_v56, 0.0  ;;  %v4753_v39 = vadd.f32 %v13069_v47, %v4606_v9  ;;  %v4755_v0 = vadd.f32 %v8031_v41, %v13070_v49  ;;  %v4609_v55 = vadd.f32 %v7787_v27, %v13071_v10 }
 0x4ad   :  { %v11700_v63 = vadd.f32 %v11101_v15, %v4754_v6  ;;  %v4936_v28 = vsel %vm3631_vm3, %v11415_v32, %v11452_v34  ;;  %v13072_v22 = vmax.f32 %v11501_v1, 0.0  ;;  %v4865_v25 = vmax.f32 %v4817_v14, 0.0  ;;  %v8879_v15 = vld [vmem:[#allocation9 + $0xe0] sm:$0xff]  }
 0x4ae   :  { %v11711_v56 = vrot.slane %v4864_v37, 1  ;;  %v4818_v9 = vadd.f32 %v11111_v26, %v4753_v39  ;;  %v11715_v41 = vadd.f32 %v11105_v8, %v4755_v0  ;;  %v4756_v27 = vadd.f32 %v13074_v20, %v4609_v55  ;;  %7818 = vmatprep.subr.bf16.mxu1 %v8879_v15 }
 0x4af   :  { %v11709_v24 = vmax.f32 %v13072_v22, %v4931_v44  ;;  %v12759_v6 = vmax.f32 %v11700_v63, 0.0  ;;  %v13075_v47 = vmax.f32 %v11380_v5, 0.0  ;;  %v4930_v1 = vsel %vm3631_vm3, %v11517_v4, %v11559_v29 }
 0x4b0   :  { %v11727_v44 = vrot.slane %v4865_v25, 1  ;;  %v4866_v14 = vmax.f32 %v4818_v9, 0.0  ;;  %v12760_v8 = vmax.f32 %v11715_v41, 0.0  ;;  %v4932_v39 = vsel %vm3631_vm3, %v11582_v16, %v11598_v12 }
 0x4b1   :  { %13073 = vst [vmem:[#allocation65_spill] sm:$0xff] %v11709_v24  ;;  %v11721_v49 = vmax.f32 %v13075_v47, %v4936_v28  ;;  %v11736_v5 = vrot.slane %v12759_v6, 1  ;;  %v11739_v0 = vadd.f32 %v11111_v26, %v4756_v27  ;;  %v13077_v55 = vmax.f32 %v11488_v59, 0.0  ;;  %v8880_v27 = vld [vmem:[#allocation9 + $0xa0] sm:$0xff]   ;;  %v8881_v47 = vld [vmem:[#allocation9 + $0x68] sm:$0xff]  }
 0x4b2   :  { %v11747_v22 = vrot.slane %v4866_v14, 1  ;;  %v11751_v9 = vrot.slane %v12760_v8, 1  ;;  %v13079_v15 = vmax.f32 %v11531_v7, 0.0  ;;  %v4925_v26 = vsel %vm3631_vm3, %v11648_v3, %v11673_v53  ;;  %v8883_v6 = vld [vmem:[#allocation9 + $0xe8] sm:$0xff]   ;;  %7819 = vmatpush3.bf16.msra.mxu1 %v8880_v27  ;;  %7798 = vmatprep.subr.bf16.mxu0 %v8881_v47 }
 0x4b3   :  { %13076 = vst [vmem:[#allocation66_spill] sm:$0xff] %v11721_v49  ;;  %v8342_v10 = vpack.i.bf16 %v11709_v24, %v11721_v49  ;;  %v11745_v28 = vmax.f32 %v13077_v55, %v4930_v1  ;;  %v12764_v59 = vmax.f32 %v11739_v0, 0.0  ;;  %v4926_v1 = vsel %vm3631_vm3, %v11669_v46, %v11686_v35  ;;  %7820 = vmatprep.subr.bf16.mxu1 %v8883_v6 }
 0x4b4   :  { %v11755_v20 = vmax.f32 %v13079_v15, %v4932_v39  ;;  %v13080_v7 = vmax.f32 %v11608_v52, 0.0  ;;  %v4924_v55 = vsel %vm3631_vm3, %v11644_v43, %v11661_v13  ;;  %v8882_v15 = vld [vmem:[#allocation9 + $0x28] sm:$0xff]   ;;  %v4919_v52 = vsel %vm3631_vm3, %v11727_v44, %v11751_v9 }
 0x4b5   :  { %13078 = vst [vmem:[#allocation38_spill] sm:$0xff] %v11745_v28  ;;  %8343 = vrot.lane.b32.xlu1 %v8342_v10, %s9191_s18  ;;  %v13081_v10 = vmax.f32 %v11632_v40, 0.0  ;;  %v11791_v49 = vrot.slane %v12764_v59, 1  ;;  %v11793_v24 = vmax.f32 %v4865_v25, %v4919_v52  ;;  %v4918_v40 = vsel %vm3631_vm3, %v11711_v56, %v11736_v5  ;;  %7799 = vmatpush3.bf16.msra.mxu0 %v8882_v15  ;;  %v13099_v15 = vld [vmem:[#allocation42_spill] sm:$0xff] }
 0x4b6   :  { %v11769_v39 = vmax.f32 %v13080_v7, %v4925_v26  ;;  %v8347_v8 = vpack.i.bf16 %v11745_v28, %v11755_v20  ;;  %v13083_v26 = vmax.f32 %v11605_v45, 0.0  ;;  %v8884_v45 = vld [vmem:[#allocation9 + $0xa8] sm:$0xff]   ;;  %v11806_v25 = vmax.f32 %v4864_v37, %v4918_v40 }
 0x4b7   :  { %v11779_v50 = vmax.f32 %v13081_v10, %v4926_v1  ;;  %13085 = vst [vmem:[#allocation68_spill] sm:$0xff] %v11793_v24  ;;  %v13086_v1 = vld [vmem:[#allocation89_spill] sm:$0xff]  ;;  %v4920_v6 = vsel %vm3631_vm3, %v11747_v22, %v11791_v49  ;;  %v13092_v40 = vld [vmem:[#allocation24_spill] sm:$0xff]  ;;  %7821 = vmatpush3.bf16.msra.mxu1 %v8884_v45 }
 0x4b8   :  { %v11787_v7 = vmax.f32 %v13083_v26, %v4924_v55  ;;  %v4952_v10 = vsel %vm3631_vm3, %v13086_v1, %v11277_v51  ;;  %8348 = vrot.lane.b32.xlu0 %v8347_v8, %s9191_s18  ;;  %v13087_v55 = vld [vmem:[#allocation51_spill] sm:$0xff]  ;;  %v13088_v26 = vld [vmem:[#allocation48_spill] sm:$0xff]  ;;  %v11831_v1 = vmax.f32 %v4866_v14, %v4920_v6 }
 0x4b9   :  { %13082 = vst [vmem:[#allocation35_spill] sm:$0xff] %v11779_v50  ;;  %v8352_v27 = vpack.i.bf16 %v11779_v50, %v11769_v39  ;;  %v4953_v52 = vsel %vm3631_vm3, %v13087_v55, %v11283_v48  ;;  %v13089_v59 = vmax.f32 %v13088_v26, 0.0  ;;  %v13090_v8 = vld [vmem:[#allocation87_spill] sm:$0xff]  ;;  %v4946_v48 = vsel %vm3631_vm3, %v13092_v40, %v11343_v60  ;;  %v13094_v55 = vld [vmem:[#allocation88_spill] sm:$0xff] }
 0x4ba   :  { %13084 = vst [vmem:[#allocation67_spill] sm:$0xff] %v11787_v7  ;;  %v8357_v51 = vpack.i.bf16 %v11793_v24, %v11787_v7  ;;  %v13091_v37 = vmax.f32 %v13090_v8, 0.0  ;;  %v13095_v24 = vld [vmem:[#allocation30_spill] sm:$0xff]  ;;  %v13100_v40 = vmax.f32 %v13099_v15, 0.0  ;;  %v13101_v14 = vld [vmem:[#allocation23_spill] sm:$0xff]  ;;  %v13102_v6 = vld [vmem:[#allocation52_spill] sm:$0xff] }
 0x4bb   :  { %v11814_v28 = vmax.f32 %v13089_v59, %v4952_v10  ;;  %v8885_v59 = vld [vmem:[#allocation9 + $0x70] sm:$0xff]   ;;  %8353 = vrot.lane.b32.xlu1 %v8352_v27, %s9191_s18  ;;  %v13093_v10 = vld [vmem:[#allocation32_spill] sm:$0xff]  ;;  %v13096_v8 = vmax.f32 %v13095_v24, 0.0  ;;  %v4947_v27 = vsel %vm3631_vm3, %v13101_v14, %v11357_v17  ;;  %v4940_v17 = vsel %vm3631_vm3, %v11367_v23, %v11419_v21 }
 0x4bc   :  { %v11824_v47 = vmax.f32 %v13091_v37, %v4953_v52  ;;  %v4951_v26 = vsel %vm3631_vm3, %v13094_v55, %v13093_v10  ;;  %v13097_v37 = vld [vmem:[#allocation56_spill] sm:$0xff]  ;;  %v13098_v7 = vld [vmem:[#allocation54_spill] sm:$0xff]  ;;  %v13103_v10 = vmax.f32 %v13102_v6, 0.0  ;;  %8358 = vrot.lane.b32.xlu0 %v8357_v51, %s9191_s18  ;;  %7800 = vmatprep.subr.bf16.mxu0 %v8885_v59  ;;  %v13116_v59 = vld [vmem:[#allocation81_spill] sm:$0xff] }
 0x4bd   :  { %v11839_v52 = vmax.f32 %v13096_v8, %v4946_v48  ;;  %v4945_v60 = vsel %vm3631_vm3, %v13098_v7, %v13097_v37  ;;  %v11847_v50 = vmax.f32 %v13100_v40, %v4951_v26  ;;  %v8886_v24 = vld [vmem:[#allocation9 + $0x30] sm:$0xff]   ;;  %v8362_v7 = vpack.i.bf16 %v11806_v25, %v11831_v1  ;;  %v13109_v40 = vld [vmem:[#allocation40_spill] sm:$0xff] }
 0x4be   :  { %v11855_v55 = vmax.f32 %v13103_v10, %v4945_v60  ;;  %v13104_v48 = vld [vmem:[#allocation53_spill] sm:$0xff]  ;;  %v13107_v60 = vld [vmem:[#allocation39_spill] sm:$0xff]  ;;  %v13110_v14 = vmax.f32 %v13109_v40, 0.0  ;;  %v13111_v23 = vld [vmem:[#allocation22_spill] sm:$0xff]  ;;  %7801 = vmatpush3.bf16.msra.mxu0 %v8886_v24  ;;  %v4928_v24 = vsel %vm3631_vm3, %v11586_v11, %v11648_v3 }
 0x4bf   :  { %v13105_v8 = vmax.f32 %v13104_v48, 0.0  ;;  %v13106_v37 = vld [vmem:[#allocation21_spill] sm:$0xff]  ;;  %v13108_v15 = vmax.f32 %v13107_v60, 0.0  ;;  %8363 = vrot.lane.b32.xlu1 %v8362_v7, %s9191_s18  ;;  %v13112_v10 = vld [vmem:[#allocation86_spill] sm:$0xff]  ;;  %v13117_v7 = vmax.f32 %v13116_v59, 0.0  ;;  %v4935_v59 = vsel %vm3631_vm3, %v11476_v57, %v11582_v16 }
 0x4c0   :  { %v4958_v45 = vsel %vm3631_vm3, %v11163_v19, %v13106_v37  ;;  %v11878_v6 = vmax.f32 %v13110_v14, %v4940_v17  ;;  %v8887_v21 = vld [vmem:[#allocation9 + $0xf0] sm:$0xff]   ;;  %v8367_v19 = vpack.i.bf16 %v11824_v47, %v11814_v28  ;;  %v4959_v48 = vsel %vm3631_vm3, %v13112_v10, %v13111_v23  ;;  %v13120_v23 = vld [vmem:[#allocation55_spill] sm:$0xff] }
 0x4c1   :  { %v11862_v26 = vmax.f32 %v13105_v8, %v4947_v27  ;;  %v11874_v51 = vmax.f32 %v13108_v15, %v4958_v45  ;;  %v4941_v27 = vsel %vm3631_vm3, %v11395_v62, %v11448_v31  ;;  %v13113_v8 = vld [vmem:[#allocation37_spill] sm:$0xff]  ;;  %v13115_v45 = vld [vmem:[#allocation58_spill] sm:$0xff]  ;;  %v8372_v31 = vpack.i.bf16 %v11839_v52, %v11847_v50  ;;  %7822 = vmatprep.subr.bf16.mxu1 %v8887_v21 }
 0x4c2   :  { %v13114_v17 = vmax.f32 %v13113_v8, 0.0  ;;  %v4939_v62 = vsel %vm3631_vm3, %v13115_v45, %v11415_v32  ;;  %v11903_v60 = vmax.f32 %v13117_v7, %v4959_v48  ;;  %v13118_v15 = vld [vmem:[#allocation50_spill] sm:$0xff]  ;;  %v13119_v40 = vld [vmem:[#allocation85_spill] sm:$0xff]  ;;  %8368 = vrot.lane.b32.xlu0 %v8367_v19, %s9191_s18  ;;  %v13122_v32 = vld [vmem:[#allocation44_spill] sm:$0xff]  ;;  %v4934_v48 = vsel %vm3631_vm3, %v11456_v38, %v11542_v54 }
 0x4c3   :  { %v4957_v14 = vsel %vm3631_vm3, %v13119_v40, %v13118_v15  ;;  %v8888_v8 = vld [vmem:[#allocation9 + $0xb0] sm:$0xff]   ;;  %v13124_v19 = vld [vmem:[#allocation59_spill] sm:$0xff]  ;;  %v4933_v38 = vsel %vm3631_vm3, %v11452_v34, %v11517_v4  ;;  %8373 = vrot.lane.b32.xlu1 %v8372_v31, %s9191_s18  ;;  %v8377_v54 = vpack.i.bf16 %v11855_v55, %v11862_v26  ;;  %v4927_v34 = vsel %vm3631_vm3, %v11559_v29, %v11644_v43 }
 0x4c4   :  { %v11893_v37 = vmax.f32 %v13114_v17, %v4941_v27  ;;  %v13121_v27 = vmax.f32 %v13120_v23, 0.0  ;;  %v13123_v17 = vmax.f32 %v13122_v32, 0.0  ;;  %v13126_v15 = vld [vmem:[#allocation26_spill] sm:$0xff]  ;;  %v13130_v23 = vmax.f32 %v11535_v36, 0.0  ;;  %7823 = vmatpush3.bf16.msra.mxu1 %v8888_v8 }
 0x4c5   :  { %v13127_v40 = vmax.f32 %v13126_v15, 0.0  ;;  %v8889_v57 = vld [vmem:[#allocation9 + $0x78] sm:$0xff]   ;;  %v4929_v4 = vsel %vm3631_vm3, %v11598_v12, %v11669_v46  ;;  %v13132_v21 = vmax.f32 %v11511_v33, 0.0  ;;  %v4922_v36 = vsel %vm3631_vm3, %v11673_v53, %v11727_v44 }
 0x4c6   :  { %v11911_v10 = vmax.f32 %v13121_v27, %v4939_v62  ;;  %v11916_v45 = vmax.f32 %v13123_v17, %v4957_v14  ;;  %v13125_v62 = vmax.f32 %v13124_v19, 0.0  ;;  %v13128_v16 = vld [vmem:[#allocation34_spill] sm:$0xff]  ;;  %v11951_v27 = vmax.f32 %v13130_v23, %v4928_v24  ;;  %8378 = vrot.lane.b32.xlu0 %v8377_v54, %s9191_s18  ;;  %7802 = vmatprep.subr.bf16.mxu0 %v8889_v57 }
 0x4c7   :  { %v11936_v14 = vmax.f32 %v13127_v40, %v4935_v59  ;;  %v13129_v11 = vmax.f32 %v13128_v16, 0.0  ;;  %v11963_v31 = vmax.f32 %v13132_v21, %v4927_v34  ;;  %v8890_v32 = vld [vmem:[#allocation9 + $0x38] sm:$0xff]   ;;  %v8382_v29 = vpack.i.bf16 %v11878_v6, %v11874_v51  ;;  %v13148_v21 = vld [vmem:[#allocation45_spill] sm:$0xff] }
 0x4c8   :  { %v11932_v7 = vmax.f32 %v13125_v62, %v4934_v48  ;;  %13131 = vst [vmem:[#allocation33_spill] sm:$0xff] %v11951_v27  ;;  %v8891_v17 = vld [vmem:[#allocation9 + $0xf8] sm:$0xff]   ;;  %v13133_v43 = vmax.f32 %v11563_v42, 0.0  ;;  %v4923_v33 = vsel %vm3631_vm3, %v11686_v35, %v11747_v22  ;;  %v13134_v46 = vmax.f32 %v11635_v58, 0.0  ;;  %7803 = vmatpush3.bf16.msra.mxu0 %v8890_v32 }
 0x4c9   :  { %v11947_v3 = vmax.f32 %v13129_v11, %v4933_v38  ;;  %v8892_v44 = vld [vmem:[#allocation9 + $0xb8] sm:$0xff]   ;;  %v13136_v8 = vmax.f32 %v11655_v30, 0.0  ;;  %v4921_v42 = vsel %vm3631_vm3, %v11661_v13, %v11711_v56  ;;  %8383 = vrot.lane.b32.xlu1 %v8382_v29, %s9191_s18  ;;  %v8387_v30 = vpack.i.bf16 %v11893_v37, %v11903_v60  ;;  %7824 = vmatprep.subr.bf16.mxu1 %v8891_v17 }
 0x4ca   :  { %v11974_v12 = vmax.f32 %v13133_v43, %v4929_v4  ;;  %v11982_v53 = vmax.f32 %v13134_v46, %v4922_v36  ;;  %v13137_v59 = vld [vmem:[#allocation83_spill] sm:$0xff]  ;;  %v13138_v35 = vld [vmem:[#allocation82_spill] sm:$0xff]  ;;  %v13139_v22 = vmax.f32 %v11625_v2, 0.0  ;;  %v13141_v13 = vmax.f32 %v11715_v41, 0.0  ;;  %7825 = vmatpush3.bf16.msra.mxu1 %v8892_v44 }
 0x4cb   :  { %v11986_v48 = vmax.f32 %v13136_v8, %v4923_v33  ;;  %v4964_v24 = vsel %vm3631_vm3, %v11751_v9, %v13137_v59  ;;  %v4963_v58 = vsel %vm3631_vm3, %v11736_v5, %v13138_v35  ;;  %v13143_v9 = vld [vmem:[#allocation84_spill] sm:$0xff]  ;;  %v13144_v5 = vmax.f32 %v11700_v63, 0.0  ;;  %8388 = vrot.lane.b32.xlu0 %v8387_v30, %s9191_s18  ;;  %v13149_v29 = vld [vmem:[#allocation43_spill] sm:$0xff] }
 0x4cc   :  { %13135 = vst [vmem:[#allocation36_spill] sm:$0xff] %v11982_v53  ;;  %v12005_v19 = vmax.f32 %v13139_v22, %v4921_v42  ;;  %v12009_v56 = vmax.f32 %v13141_v13, %v4964_v24  ;;  %v4965_v62 = vsel %vm3631_vm3, %v11791_v49, %v13143_v9  ;;  %v13146_v40 = vmax.f32 %v11739_v0, 0.0  ;;  %v8893_v63 = vld [vmem:[#allocation9 + $0x140] sm:$0xff]   ;;  %v13159_v13 = vld [vmem:[#allocation29_spill] sm:$0xff] }
 0x4cd   :  { %v12017_v15 = vmax.f32 %v13144_v5, %v4963_v58  ;;  %v8392_v2 = vpack.i.bf16 %v11911_v10, %v11916_v45  ;;  %v8397_v18 = vpack.i.bf16 %v11936_v14, %v11932_v7  ;;  %v8894_v41 = vld [vmem:[#allocation9 + $0x1c0] sm:$0xff]   ;;  %v8402_v49 = vpack.i.bf16 %v11951_v27, %v11947_v3  ;;  %7832 = vmatprep.subr.bf16.mxu0 %v8893_v63  ;;  %v13151_v58 = vld [vmem:[#allocation57_spill] sm:$0xff] }
 0x4ce   :  { %13140 = vst [vmem:[#allocation69_spill] sm:$0xff] %v12005_v19  ;;  %13142 = vst [vmem:[#allocation70_spill] sm:$0xff] %v12009_v56  ;;  %v12021_v38 = vmax.f32 %v13146_v40, %v4965_v62  ;;  %7854 = vmatprep.subr.bf16.mxu1 %v8894_v41  ;;  %v8407_v0 = vpack.i.bf16 %v11963_v31, %v11974_v12  ;;  %v8412_v57 = vpack.i.bf16 %v11986_v48, %v11982_v53  ;;  %v13150_v24 = vld [vmem:[#allocation60_spill] sm:$0xff] }
 0x4cf   :  { %13145 = vst [vmem:[#allocation78_spill] sm:$0xff] %v12017_v15  ;;  %8393 = vrot.lane.b32.xlu1 %v8392_v2, %s9191_s18  ;;  %8398 = vrot.lane.b32.xlu0 %v8397_v18, %s9191_s18  ;;  %v8417_v54 = vpack.i.bf16 %v12009_v56, %v12005_v19  ;;  %vm5110_vm5 = vcmp.lt.s32.totalorder %v13148_v21, 96  ;;  %v13163_v19 = vld [vmem:[#allocation64_spill] sm:$0xff] }
 0x4d0   :  { %13147 = vst [vmem:[#allocation75_spill] sm:$0xff] %v12021_v38  ;;  %v8422_v16 = vpack.i.bf16 %v12017_v15, %v12021_v38 }
 0x4d3   :  { %8403 = vrot.lane.b32.xlu1 %v8402_v49, %s9191_s18  ;;  %8408 = vrot.lane.b32.xlu0 %v8407_v0, %s9191_s18 }
 0x4d7   :  { %8413 = vrot.lane.b32.xlu1 %v8412_v57, %s9191_s18  ;;  %8418 = vrot.lane.b32.xlu0 %v8417_v54, %s9191_s18 }
 0x4db   :  { %8423 = vrot.lane.b32.xlu1 %v8422_v16, %s9191_s18  ;;  %v13152_v16 = vld [vmem:[#allocation61_spill] sm:$0xff] }
 0x4fb   :  { %v8309_v11 = vpop.permute.xlu0 %8308 }
 0x4fc   :  { %v8311_v23 = vunpack.i.h.bf16 %v8309_v11  ;;  %v8310_v34 = vunpack.i.l.bf16 %v8309_v11 }
 0x4fe   :  { %v5113_v32 = vsel %vm5110_vm5, %v8310_v34, %v8311_v23 }
 0x4ff   :  { %v12049_v43 = vmax.f32 %v13149_v29, %v5113_v32  ;;  %v13153_v29 = vld [vmem:[#allocation25_spill] sm:$0xff] }
 0x501   :  { %v13161_v0 = vrot.slane %v12049_v43, 5 }
 0x505   :  { %v8314_v4 = vpop.permute.xlu1 %8313 }
 0x506   :  { %v8315_v36 = vunpack.i.l.bf16 %v8314_v4  ;;  %v8316_v59 = vunpack.i.h.bf16 %v8314_v4 }
 0x508   :  { %v5129_v33 = vsel %vm5110_vm5, %v8315_v36, %v8310_v34  ;;  %v5145_v46 = vsel %vm5110_vm5, %v8311_v23, %v8315_v36 }
 0x509   :  { %v8319_v17 = vpop.permute.xlu0 %8318  ;;  %v12056_v35 = vmax.f32 %v13150_v24, %v5129_v33  ;;  %v12059_v30 = vmax.f32 %v13151_v58, %v5145_v46  ;;  %v13154_v46 = vld [vmem:[#allocation62_spill] sm:$0xff]  ;;  %v13156_v58 = vld [vmem:[#allocation27_spill] sm:$0xff] }
 0x50a   :  { %v8321_v44 = vunpack.i.h.bf16 %v8319_v17  ;;  %v8320_v8 = vunpack.i.l.bf16 %v8319_v17 }
 0x50b   :  { %v8324_v42 = vpop.permute.xlu1 %8323  ;;  %v5231_v57 = vrot.slane %v12056_v35, 7  ;;  %v5266_v54 = vrot.slane %v12059_v30, 7  ;;  %v5329_v24 = vrot.slane %v12056_v35, 3 }
 0x50c   :  { %v5131_v9 = vsel %vm5110_vm5, %v8321_v44, %v8316_v59  ;;  %v5115_v40 = vsel %vm5110_vm5, %v8316_v59, %v8320_v8  ;;  %v5147_v2 = vsel %vm5110_vm5, %v8320_v8, %v8321_v44  ;;  %v8326_v18 = vunpack.i.h.bf16 %v8324_v42  ;;  %v13155_v8 = vld [vmem:[#allocation63_spill] sm:$0xff] }
 0x50d   :  { %v8325_v63 = vunpack.i.l.bf16 %v8324_v42  ;;  %v12074_v11 = vmax.f32 %v13152_v16, %v5131_v9  ;;  %v12082_v33 = vmax.f32 %v13153_v29, %v5115_v40  ;;  %v12085_v44 = vmax.f32 %v13154_v46, %v5147_v2  ;;  %v13157_v2 = vld [vmem:[#allocation49_spill] sm:$0xff] }
 0x50e   :  { %v5312_v59 = vrot.slane %v12059_v30, 1  ;;  %v5357_v16 = vrot.slane %v12059_v30, 3 }
 0x50f   :  { %v5390_v56 = vrot.slane %v12082_v33, 4 }
 0x510   :  { %v8334_v22 = vpop.permute.xlu0 %8333 }
 0x511   :  { %v8336_v41 = vunpack.i.h.bf16 %v8334_v22  ;;  %v8335_v49 = vunpack.i.l.bf16 %v8334_v22 }
 0x513   :  { %v8329_v23 = vpop.permute.xlu1 %8328  ;;  %v5143_v34 = vsel %vm5110_vm5, %v8335_v49, %v8325_v63  ;;  %v5149_v4 = vsel %vm5110_vm5, %v8336_v41, %v8326_v18 }
 0x514   :  { %v8331_v36 = vunpack.i.h.bf16 %v8329_v23  ;;  %v8330_v32 = vunpack.i.l.bf16 %v8329_v23  ;;  %v12088_v42 = vmax.f32 %v13155_v8, %v5143_v34  ;;  %v12093_v22 = vmax.f32 %v13156_v58, %v5149_v4 }
 0x515   :  { %v5234_v23 = vrot.slane %v12074_v11, 6  ;;  %v5268_v8 = vrot.slane %v12085_v44, 6  ;;  %v5331_v58 = vrot.slane %v12074_v11, 2 }
 0x516   :  { %v5127_v9 = vsel %vm5110_vm5, %v8325_v63, %v8330_v32  ;;  %v5267_v34 = vsel %vm5232_vm6, %v5266_v54, %v12088_v42  ;;  %v5356_v29 = vrot.slane %v12088_v42, 4  ;;  %v5117_v4 = vsel %vm5110_vm5, %v8331_v36, %v8336_v41 }
 0x517   :  { %v5111_v46 = vsel %vm5110_vm5, %v8330_v32, %v8335_v49  ;;  %v5254_v63 = vrot.slane %v12082_v33, 6  ;;  %v12112_v40 = vmax.f32 %v13157_v2, %v5127_v9  ;;  %v5270_v5 = vrot.slane %v12093_v22, 5 }
 0x518   :  { %v5311_v54 = vrot.slane %v12088_v42, 2  ;;  %v12117_v62 = vsel %vm5232_vm6, %v5357_v16, %v5356_v29  ;;  %v5133_v41 = vsel %vm5110_vm5, %v8326_v18, %v8331_v36  ;;  %v5269_v32 = vsel %vm5235_vm7, %v5268_v8, %v5267_v34  ;;  %v13160_v36 = vld [vmem:[#allocation28_spill] sm:$0xff] }
 0x519   :  { %13158 = vst [vmem:[#allocation41_spill] sm:$0xff] %v12117_v62  ;;  %v12124_v17 = vmax.f32 %v11574_v61, %v5117_v4  ;;  %v5160_v9 = vmax.f32 %v13159_v13, %v5111_v46  ;;  %v12134_v49 = vmax.f32 %v13160_v36, %v5133_v41  ;;  %v5328_v61 = vrot.slane %v12112_v40, 4 }
 0x51a   :  { %v12140_v13 = vsel %vm5238_vm8, %v5270_v5, %v5269_v32  ;;  %v5401_v4 = vrot.slane %v12088_v42, 6  ;;  %v5313_v8 = vsel %vm5232_vm6, %v5312_v59, %v5311_v54  ;;  %v5233_v41 = vsel %vm5232_vm6, %v5231_v57, %v12112_v40 }
 0x51b   :  { %v5256_v2 = vrot.slane %v12124_v17, 5  ;;  %v5301_v18 = vrot.slane %v12124_v17, 7  ;;  %v5387_v36 = vrot.slane %v5160_v9, 6  ;;  %v5283_v16 = vrot.slane %v12112_v40, 2 }
 0x51c   :  { %v12137_v34 = vpop.permute.xlu0 %8338  ;;  %v5330_v5 = vsel %vm5232_vm6, %v5329_v24, %v5328_v61  ;;  %v5392_v46 = vrot.slane %v12124_v17, 3  ;;  %v5237_v59 = vrot.slane %v12134_v49, 5  ;;  %v5297_v54 = vrot.slane %v5160_v9, 2 }
 0x51d   :  { %v8341_v32 = vunpack.i.h.bf16 %v12137_v34  ;;  %v8340_v42 = vunpack.i.l.bf16 %v12137_v34  ;;  %v5389_v29 = vsel %vm5232_vm6, %v13161_v0, %v5387_v36  ;;  %v5236_v57 = vsel %vm5235_vm7, %v5234_v23, %v5233_v41 }
 0x51e   :  { %v13162_v62 = vrot.slane %v12049_v43, 7  ;;  %v5391_v24 = vsel %vm5235_vm7, %v5390_v56, %v5389_v29  ;;  %v5342_v34 = vrot.slane %v5160_v9, 4  ;;  %v5332_v27 = vsel %vm5235_vm7, %v5331_v58, %v5330_v5 }
 0x51f   :  { %v5119_v61 = vsel %vm5110_vm5, %v8340_v42, %v8341_v32  ;;  %v5393_v15 = vsel %vm5238_vm8, %v5392_v46, %v5391_v24  ;;  %v5347_v0 = vrot.slane %v12124_v17, 1  ;;  %v5287_v23 = vrot.slane %v12134_v49, 7 }
 0x520   :  { %v5253_v38 = vsel %vm5232_vm6, %v13162_v62, %v5160_v9  ;;  %v5184_v53 = vmax.f32 %v13163_v19, %v5119_v61  ;;  %v5333_v41 = vrot.slane %v12134_v49, 1  ;;  %v13164_v62 = vrot.slane %v12056_v35, 1 }
 0x521   :  { %v12175_v29 = vsel %vm5238_vm8, %v5237_v59, %v5236_v57  ;;  %v13165_v9 = vrot.slane %v12049_v43, 1  ;;  %v5373_v58 = vrot.slane %v12112_v40, 6  ;;  %v5378_v17 = vrot.slane %v12134_v49, 3 }
 0x522   :  { %v5285_v56 = vsel %vm5232_vm6, %v13164_v62, %v5283_v16  ;;  %v5394_v46 = vrot.slane %v5184_v53, 2  ;;  %v12183_v24 = vsel %vm5238_vm8, %v5333_v41, %v5332_v27  ;;  %v5255_v61 = vsel %vm5235_vm7, %v5254_v63, %v5253_v38 }
 0x523   :  { %v5299_v19 = vsel %vm5232_vm6, %v13165_v9, %v5297_v54  ;;  %v5286_v57 = vsel %vm5235_vm7, %v12074_v11, %v5285_v56  ;;  %v5314_v54 = vsel %vm5235_vm7, %v12085_v44, %v5313_v8  ;;  %v13166_v40 = vrot.slane %v12049_v43, 3 }
 0x524   :  { %v5395_v59 = vsel %vm5241_vm9, %v5394_v46, %v5393_v15  ;;  %v5258_v38 = vrot.slane %v5184_v53, 4  ;;  %v5257_v15 = vsel %vm5238_vm8, %v5256_v2, %v5255_v61  ;;  %v5300_v56 = vsel %vm5235_vm7, %v12082_v33, %v5299_v19  ;;  %v13169_v2 = vld [vmem:[#allocation31_spill] sm:$0xff] }
 0x525   :  { %v5344_v49 = vsel %vm5232_vm6, %v13166_v40, %v5342_v34  ;;  %v13167_v8 = vrot.slane %v12056_v35, 5  ;;  %v5303_v46 = vrot.slane %v5184_v53, 6 }
 0x527   :  { %v8344_v36 = vpop.permute.xlu1 %8343  ;;  %v5375_v43 = vsel %vm5232_vm6, %v13167_v8, %v5373_v58  ;;  %v13170_v58 = vrot.slane %v12082_v33, 2  ;;  %v13171_v8 = vrot.slane %v12059_v30, 5 }
 0x528   :  { %v8345_v5 = vunpack.i.l.bf16 %v8344_v36  ;;  %v8346_v62 = vunpack.i.h.bf16 %v8344_v36  ;;  %v13168_v36 = vrot.slane %v12093_v22, 7 }
 0x529   :  { %v5346_v40 = vsel %vm5235_vm7, %v13170_v58, %v5344_v49 }
 0x52a   :  { %v8349_v16 = vpop.permute.xlu0 %8348  ;;  %v5151_v27 = vsel %vm5110_vm5, %v8341_v32, %v8345_v5  ;;  %v12205_v32 = vsel %vm5238_vm8, %v5287_v23, %v5286_v57  ;;  %v12223_v23 = vsel %vm5232_vm6, %v13171_v8, %v5401_v4  ;;  %v5135_v57 = vsel %vm5110_vm5, %v8345_v5, %v8340_v42 }
 0x52b   :  { %v8351_v41 = vunpack.i.h.bf16 %v8349_v16  ;;  %v8350_v9 = vunpack.i.l.bf16 %v8349_v16  ;;  %v12210_v16 = vsel %vm5238_vm8, %v13168_v36, %v5314_v54  ;;  %v12213_v61 = vmax.f32 %v13169_v2, %v5151_v27  ;;  %v13173_v2 = vld [vmem:[#allocation65_spill] sm:$0xff] }
 0x52c   :  { %v5302_v27 = vsel %vm5238_vm8, %v5301_v18, %v5300_v56  ;;  %v13172_v36 = vrot.slane %v12074_v11, 4  ;;  %v12237_v4 = vsel %vm5241_vm9, %v5258_v38, %v5257_v15  ;;  %v5348_v11 = vsel %vm5238_vm8, %v5347_v0, %v5346_v40  ;;  %v13174_v56 = vld [vmem:[#allocation66_spill] sm:$0xff] }
 0x52d   :  { %v8354_v63 = vpop.permute.xlu1 %8353  ;;  %v5121_v34 = vsel %vm5110_vm5, %v8346_v62, %v8350_v9  ;;  %v5153_v35 = vsel %vm5110_vm5, %v8350_v9, %v8351_v41  ;;  %v5137_v33 = vsel %vm5110_vm5, %v8351_v41, %v8346_v62  ;;  %v12244_v18 = vsel %vm5241_vm9, %v5303_v46, %v5302_v27  ;;  %v13177_v27 = vld [vmem:[#allocation35_spill] sm:$0xff] }
 0x52e   :  { %v8359_v19 = vpop.permute.xlu0 %8358  ;;  %v8356_v54 = vunpack.i.h.bf16 %v8354_v63  ;;  %v5377_v9 = vsel %vm5235_vm7, %v13172_v36, %v5375_v43  ;;  %v12234_v49 = vmax.f32 %v13173_v2, %v5121_v34  ;;  %v8355_v30 = vunpack.i.l.bf16 %v8354_v63 }
 0x52f   :  { %v12240_v42 = vmax.f32 %v11755_v20, %v5153_v35  ;;  %v8360_v5 = vunpack.i.l.bf16 %v8359_v19  ;;  %v12247_v62 = vmax.f32 %v13174_v56, %v5135_v57  ;;  %v5272_v41 = vrot.slane %v12213_v61, 4  ;;  %v13175_v20 = vld [vmem:[#allocation38_spill] sm:$0xff] }
 0x530   :  { %v5396_v63 = vrot.slane %v12234_v49, 1  ;;  %v12252_v38 = vsel %vm5241_vm9, %v5184_v53, %v5348_v11  ;;  %v12255_v15 = vmax.f32 %v13175_v20, %v5137_v33  ;;  %v5123_v0 = vsel %vm5110_vm5, %v8355_v30, %v8356_v54 }
 0x531   :  { %v8364_v58 = vpop.permute.xlu1 %8363  ;;  %v5155_v46 = vsel %vm5110_vm5, %v8356_v54, %v8360_v5  ;;  %v12262_v34 = vsel %vm5238_vm8, %v5378_v17, %v5377_v9  ;;  %v12265_v35 = vmax.f32 %v11769_v39, %v5123_v0  ;;  %v8361_v8 = vunpack.i.h.bf16 %v8359_v19  ;;  %v13178_v19 = vld [vmem:[#allocation67_spill] sm:$0xff] }
 0x532   :  { %13176 = vst [vmem:[#allocation71_spill] sm:$0xff] %v12262_v34  ;;  %v5397_v40 = vsel %vm5244_vm10, %v5396_v63, %v5395_v59  ;;  %v5139_v53 = vsel %vm5110_vm5, %v8360_v5, %v8355_v30  ;;  %v5274_v57 = vrot.slane %v12240_v42, 3  ;;  %v12272_v36 = vmax.f32 %v13177_v27, %v5155_v46 }
 0x533   :  { %v8366_v33 = vunpack.i.h.bf16 %v8364_v58  ;;  %v8365_v2 = vunpack.i.l.bf16 %v8364_v58  ;;  %v5273_v17 = vsel %vm5241_vm9, %v5272_v41, %v12140_v13  ;;  %v5398_v39 = vsel %vm5247_vm11, %v12265_v35, %v5397_v40  ;;  %v13180_v41 = vld [vmem:[#allocation68_spill] sm:$0xff] }
 0x534   :  { %v8369_v43 = vpop.permute.xlu0 %8368  ;;  %v12279_v11 = vmax.f32 %v13178_v19, %v5139_v53  ;;  %v5276_v30 = vrot.slane %v12272_v36, 2  ;;  %v5289_v13 = vrot.slane %v12247_v62, 6  ;;  %v5275_v46 = vsel %vm5244_vm10, %v5274_v57, %v5273_v17 }
 0x535   :  { %v8371_v54 = vunpack.i.h.bf16 %v8369_v43  ;;  %v8370_v9 = vunpack.i.l.bf16 %v8369_v43  ;;  %v8374_v59 = vpop.permute.xlu1 %8373  ;;  %v5125_v5 = vsel %vm5110_vm5, %v8361_v8, %v8365_v2  ;;  %v5157_v58 = vsel %vm5110_vm5, %v8365_v2, %v8366_v33 }
 0x536   :  { %13179 = vst [vmem:[#allocation46_spill] sm:$0xff] %v12279_v11  ;;  %v12289_v63 = vmax.f32 %v13180_v41, %v5125_v5  ;;  %v12292_v43 = vmax.f32 %v11831_v1, %v5157_v58  ;;  %v5141_v40 = vsel %vm5110_vm5, %v8366_v33, %v8361_v8  ;;  %v8375_v53 = vunpack.i.l.bf16 %v8374_v59 }
 0x537   :  { %v5277_v27 = vsel %vm5247_vm11, %v5276_v30, %v5275_v46  ;;  %v5114_v5 = vsel %vm5110_vm5, %v8370_v9, %v8371_v54  ;;  %v5336_v1 = vrot.slane %v12255_v15, 7  ;;  %v5338_v58 = vrot.slane %v12279_v11, 6 }
 0x538   :  { %v8379_v20 = vpop.permute.xlu0 %8378  ;;  %v5278_v2 = vrot.slane %v12292_v43, 1  ;;  %v5399_v19 = vrot.slane %v12289_v63, 7  ;;  %v5130_v57 = vsel %vm5110_vm5, %v8375_v53, %v8370_v9  ;;  %v12308_v8 = vmax.f32 %v11806_v25, %v5141_v40 }
 0x539   :  { %v8381_v17 = vunpack.i.h.bf16 %v8379_v20  ;;  %v8376_v30 = vunpack.i.h.bf16 %v8374_v59  ;;  %v5146_v41 = vsel %vm5110_vm5, %v8371_v54, %v8375_v53  ;;  %v5335_v46 = vsel %vm5241_vm9, %v12247_v62, %v12183_v24 }
 0x53a   :  { %v12311_v33 = vsel %vm5250_vm12, %v5399_v19, %v5398_v39  ;;  %v12319_v0 = vsel %vm5250_vm12, %v5278_v2, %v5277_v27  ;;  %v5169_v9 = vmax.f32 %v11814_v28, %v5114_v5  ;;  %v5168_v56 = vmax.f32 %v11847_v50, %v5130_v57 }
 0x53b   :  { %13181 = vst [vmem:[#allocation20_spill] sm:$0xff] %v12311_v33  ;;  %v8384_v25 = vpop.permute.xlu1 %8383  ;;  %v8380_v59 = vunpack.i.l.bf16 %v8379_v20  ;;  %v5132_v54 = vsel %vm5110_vm5, %v8381_v17, %v8376_v30  ;;  %v5243_v53 = vrot.slane %v12255_v15, 3  ;;  %v5337_v24 = vsel %vm5244_vm10, %v5336_v1, %v5335_v46 }
 0x53c   :  { %v5246_v27 = vrot.slane %v12279_v11, 2  ;;  %v5170_v2 = vmax.f32 %v11824_v47, %v5146_v41  ;;  %v12332_v50 = vsel %vm5247_vm11, %v5338_v58, %v5337_v24  ;;  %v5249_v19 = vrot.slane %v12308_v8, 1 }
 0x53d   :  { %v8389_v28 = vpop.permute.xlu0 %8388  ;;  %v5489_v20 = vpack.c.bf16 %v12319_v0, %v12319_v0  ;;  %v12338_v57 = vrot.slane %v5169_v9, 7  ;;  %v5442_v40 = vrot.slane %v5168_v56, 7  ;;  %v5174_v1 = vmax.f32 %v11855_v55, %v5132_v54 }
 0x53e   :  { %v8386_v46 = vunpack.i.h.bf16 %v8384_v25  ;;  %v5148_v47 = vsel %vm5110_vm5, %v8380_v59, %v8381_v17  ;;  %v8391_v41 = vunpack.i.h.bf16 %v8389_v28  ;;  %v5260_v58 = vrot.slane %v12234_v49, 3 }
 0x53f   :  { %v5262_v24 = vrot.slane %v12265_v35, 2  ;;  %v5470_v39 = vrot.slane %v5170_v2, 7  ;;  %v8385_v33 = vunpack.i.l.bf16 %v8384_v25  ;;  %v8390_v5 = vunpack.i.l.bf16 %v8389_v28 }
 0x540   :  { %v5264_v34 = vrot.slane %v12289_v63, 1  ;;  %v12348_v56 = vsel %vm5110_vm5, %v8376_v30, %v8380_v59  ;;  %v5261_v55 = vsel %vm5244_vm10, %v5260_v58, %v12237_v4  ;;  %v5290_v17 = vsel %vm5241_vm9, %v5289_v13, %v12205_v32 }
 0x541   :  { %v8394_v0 = vpop.permute.xlu1 %8393  ;;  %v5291_v9 = vrot.slane %v12255_v15, 5  ;;  %v5176_v54 = vmax.f32 %v11862_v26, %v5148_v47  ;;  %v5263_v25 = vsel %vm5247_vm11, %v5262_v24, %v5261_v55  ;;  %v5293_v2 = vrot.slane %v12279_v11, 4 }
 0x542   :  { %v5295_v28 = vrot.slane %v12308_v8, 3  ;;  %v12361_v30 = vsel %vm5110_vm5, %v8386_v46, %v8391_v41  ;;  %v5265_v59 = vsel %vm5250_vm12, %v5264_v34, %v5263_v25  ;;  %v8396_v58 = vunpack.i.h.bf16 %v8394_v0 }
 0x543   :  { %v5292_v4 = vsel %vm5244_vm10, %v5291_v9, %v5290_v17  ;;  %v12367_v32 = vsel %vm5110_vm5, %v8385_v33, %v8390_v5  ;;  %v5488_v26 = vpack.c.bf16 %v5265_v59, %v5265_v59  ;;  %v8395_v47 = vunpack.i.l.bf16 %v8394_v0  ;;  %v12379_v9 = vpop.permute.xlu0 %8398 }
 0x544   :  { %v5294_v13 = vsel %vm5247_vm11, %v5293_v2, %v5292_v4  ;;  %v5150_v55 = vsel %vm5110_vm5, %v8391_v41, %v8396_v58  ;;  %v5134_v11 = vsel %vm5110_vm5, %v8396_v58, %v8386_v46  ;;  %v13182_v34 = vrot.slane %v12247_v62, 4  ;;  %v8898_v58 = vld [vmem:[#allocation9 + $0x1c8] sm:$0xff]  }
 0x545   :  { %v5296_v24 = vsel %vm5250_vm12, %v5295_v28, %v5294_v13  ;;  %6501 = vmatprep.mubr.bf16.mxu0 %v5488_v26  ;;  %v5182_v2 = vmax.f32 %v11893_v37, %v5150_v55  ;;  %v5128_v0 = vsel %vm5110_vm5, %v8395_v47, %v8385_v33  ;;  %v5144_v41 = vsel %vm5110_vm5, %v8390_v5, %v8395_v47  ;;  %v8896_v28 = vld [vmem:[#allocation9 + $0x180] sm:$0xff]   ;;  %v12390_v26 = vpop.permute.xlu1 %8403 }
 0x546   :  { %v5242_v17 = vsel %vm5241_vm9, %v13182_v34, %v12175_v29  ;;  %v5490_v25 = vpack.c.bf16 %v5296_v24, %v5296_v24  ;;  %v5162_v46 = vmax.f32 %v11916_v45, %v5128_v0  ;;  %v5164_v59 = vmax.f32 %v11903_v60, %v5144_v41  ;;  %v8895_v45 = vld [vmem:[#allocation9 + $0x100] sm:$0xff]   ;;  %v8900_v24 = vld [vmem:[#allocation9 + $0x188] sm:$0xff]  }
 0x547   :  { %v5180_v4 = vmax.f32 %v11911_v10, %v5134_v11  ;;  %v5245_v29 = vsel %vm5244_vm10, %v5243_v53, %v5242_v17  ;;  %v5175_v37 = vmax.f32 %v11839_v52, %v12348_v56  ;;  %v5444_v13 = vrot.slane %v5174_v1, 6  ;;  %v12409_v17 = vpop.permute.xlu0 %8408 }
 0x548   :  { %6541 = vmatprep.mubr.bf16.mxu1 %v5490_v25  ;;  %v5248_v33 = vsel %vm5247_vm11, %v5246_v27, %v5245_v29  ;;  %v5319_v5 = vrot.slane %v12240_v42, 5  ;;  %v5472_v47 = vrot.slane %v5176_v54, 6  ;;  %v5181_v60 = vmax.f32 %v11878_v6, %v12361_v30  ;;  %v8897_v54 = vld [vmem:[#allocation9 + $0x148] sm:$0xff]  }
 0x549   :  { %v5251_v10 = vsel %vm5250_vm12, %v5249_v19, %v5248_v33  ;;  %6542 = vmatmul.mubr.bf16.vlgmr.msra.gmra.mrb[0].mxu1 %v5489_v20  ;;  %v13183_v11 = vrot.slane %v12213_v61, 6  ;;  %v5163_v52 = vmax.f32 %v11874_v51, %v12367_v32  ;;  %v5474_v1 = vrot.slane %v5182_v2, 5  ;;  %v8901_v33 = vld [vmem:[#allocation9 + $0x150] sm:$0xff]  }
 0x54a   :  { %v5443_v27 = vsel %vm5232_vm6, %v5442_v40, %v5162_v46  ;;  %v5487_v56 = vpack.c.bf16 %v5251_v10, %v5251_v10  ;;  %7855 = vmatpush3.bf16.msra.mxu1 %v8896_v28  ;;  %v5446_v55 = vrot.slane %v5180_v4, 5  ;;  %v5471_v19 = vsel %vm5232_vm6, %v5470_v39, %v5164_v59  ;;  %v8899_v28 = vld [vmem:[#allocation9 + $0x108] sm:$0xff]   ;;  %v12419_v46 = vpop.permute.xlu1 %8413 }
 0x54b   :  { %v5318_v53 = vsel %vm5241_vm9, %v13183_v11, %v12210_v16  ;;  %v5321_v20 = vrot.slane %v12272_v36, 4  ;;  %v5323_v34 = vrot.slane %v12292_v43, 3  ;;  %7856 = vmatprep.subr.bf16.mxu1 %v8898_v58  ;;  %v8902_v16 = vld [vmem:[#allocation9 + $0x1d0] sm:$0xff]   ;;  %v5350_v40 = vrot.slane %v12234_v49, 7 }
 0x54c   :  { %6502 = vmatmul.mubr.bf16.vlgmr.msra.gmra.mrb[160].mxu0 %v5487_v56  ;;  %v5320_v51 = vsel %vm5244_vm10, %v5319_v5, %v5318_v53  ;;  %v5352_v32 = vrot.slane %v12265_v35, 6  ;;  %v5354_v25 = vrot.slane %v12289_v63, 5  ;;  %v8401_v2 = vunpack.i.h.bf16 %v12379_v9  ;;  %v8904_v5 = vld [vmem:[#allocation9 + $0x190] sm:$0xff]   ;;  %v8906_v53 = vld [vmem:[#allocation9 + $0x1d8] sm:$0xff]  }
 0x54d   :  { %7833 = vmatpush3.bf16.msra.mxu0 %v8895_v45  ;;  %v5322_v39 = vsel %vm5247_vm11, %v5321_v20, %v5320_v51  ;;  %v8400_v0 = vunpack.i.l.bf16 %v12379_v9  ;;  %v8405_v41 = vunpack.i.l.bf16 %v12390_v26  ;;  %v5351_v4 = vsel %vm5244_vm10, %v5350_v40, %v12252_v38  ;;  %v8908_v40 = vld [vmem:[#allocation9 + $0x198] sm:$0xff]   ;;  %v13184_v30 = vld [vmem:[#allocation33_spill] sm:$0xff] }
 0x54e   :  { %v5324_v59 = vsel %vm5250_vm12, %v5323_v34, %v5322_v39  ;;  %7834 = vmatprep.subr.bf16.mxu0 %v8897_v54  ;;  %7857 = vmatpush3.bf16.msra.mxu1 %v8900_v24  ;;  %v8411_v29 = vunpack.i.h.bf16 %v12409_v17  ;;  %v8410_v58 = vunpack.i.l.bf16 %v12409_v17  ;;  %v5445_v9 = vsel %vm5235_vm7, %v5444_v13, %v5443_v27  ;;  %v8903_v17 = vld [vmem:[#allocation9 + $0x110] sm:$0xff]  }
 0x54f   :  { %v5492_v10 = vpack.c.bf16 %v5324_v59, %v5324_v59  ;;  %v5353_v45 = vsel %vm5247_vm11, %v5352_v32, %v5351_v4  ;;  %v5136_v11 = vsel %vm5110_vm5, %v8405_v41, %v8400_v0  ;;  %7858 = vmatprep.subr.bf16.mxu1 %v8902_v16  ;;  %v5473_v38 = vsel %vm5235_vm7, %v5472_v47, %v5471_v19  ;;  %v8419_v16 = vpop.permute.xlu0 %8418 }
 0x550   :  { %v5355_v56 = vsel %vm5250_vm12, %v5354_v25, %v5353_v45  ;;  %v5152_v54 = vsel %vm5110_vm5, %v8401_v2, %v8405_v41  ;;  %v5186_v24 = vmax.f32 %v11947_v3, %v5136_v11  ;;  %v5458_v20 = vrot.slane %v5175_v37, 6  ;;  %v8905_v37 = vld [vmem:[#allocation9 + $0x158] sm:$0xff]   ;;  %v8910_v25 = vld [vmem:[#allocation9 + $0x1e0] sm:$0xff]  }
 0x551   :  { %v5457_v13 = vsel %vm5232_vm6, %v12338_v57, %v5163_v52  ;;  %6581 = vmatprep.mubr.bf16.mxu0 %v5492_v10  ;;  %v5494_v27 = vpack.c.bf16 %v5355_v56, %v5355_v56  ;;  %v5188_v34 = vmax.f32 %v11936_v14, %v5152_v54  ;;  %7835 = vmatpush3.bf16.msra.mxu0 %v8899_v28  ;;  %v8416_v3 = vunpack.i.h.bf16 %v12419_v46  ;;  %v8912_v10 = vld [vmem:[#allocation9 + $0x1a0] sm:$0xff]  }
 0x552   :  { %v5447_v47 = vsel %vm5238_vm8, %v5446_v55, %v5445_v9  ;;  %v5448_v19 = vrot.slane %v5186_v24, 4  ;;  %v5154_v51 = vsel %vm5110_vm5, %v8410_v58, %v8411_v29  ;;  %7836 = vmatprep.subr.bf16.mxu0 %v8901_v33  ;;  %7859 = vmatpush3.bf16.msra.mxu1 %v8904_v5  ;;  %v5475_v57 = vsel %vm5238_vm8, %v5474_v1, %v5473_v38  ;;  %v8424_v55 = vpop.permute.xlu1 %8423  ;;  %v8907_v33 = vld [vmem:[#allocation9 + $0x118] sm:$0xff]   ;;  %v8909_v9 = vld [vmem:[#allocation9 + $0x160] sm:$0xff]  }
 0x553   :  { %6621 = vmatprep.mubr.bf16.mxu1 %v5494_v27  ;;  %v8406_v14 = vunpack.i.h.bf16 %v12390_v26  ;;  %v5476_v52 = vrot.slane %v5188_v34, 4  ;;  %v5194_v32 = vmax.f32 %v11974_v12, %v5154_v51  ;;  %7860 = vmatprep.subr.bf16.mxu1 %v8906_v53  ;;  %v5120_v39 = vsel %vm5110_vm5, %v8400_v0, %v8401_v2  ;;  %v8914_v53 = vld [vmem:[#allocation9 + $0x1e8] sm:$0xff]  }
 0x554   :  { %v12448_v41 = vsel %vm5241_vm9, %v5448_v19, %v5447_v47  ;;  %v8415_v28 = vunpack.i.l.bf16 %v12419_v46  ;;  %v8420_v59 = vunpack.i.l.bf16 %v8419_v16  ;;  %v8421_v0 = vunpack.i.h.bf16 %v8419_v16  ;;  %v13185_v27 = vld [vmem:[#allocation36_spill] sm:$0xff]  ;;  %v13186_v47 = vld [vmem:[#allocation69_spill] sm:$0xff] }
 0x555   :  { %v5477_v1 = vsel %vm5241_vm9, %v5476_v52, %v5475_v57  ;;  %v5122_v26 = vsel %vm5110_vm5, %v8406_v14, %v8410_v58  ;;  %v5138_v12 = vsel %vm5110_vm5, %v8411_v29, %v8406_v14  ;;  %v5478_v4 = vrot.slane %v5194_v32, 3  ;;  %7837 = vmatpush3.bf16.msra.mxu0 %v8903_v17  ;;  %v8911_v16 = vld [vmem:[#allocation9 + $0x120] sm:$0xff]   ;;  %v8918_v14 = vld [vmem:[#allocation9 + $0x1f0] sm:$0xff]  }
 0x556   :  { %v5124_v2 = vsel %vm5110_vm5, %v8415_v28, %v8416_v3  ;;  %v5156_v5 = vsel %vm5110_vm5, %v8416_v3, %v8420_v59  ;;  %7838 = vmatprep.subr.bf16.mxu0 %v8905_v37  ;;  %v8426_v46 = vunpack.i.h.bf16 %v8424_v55  ;;  %7861 = vmatpush3.bf16.msra.mxu1 %v8908_v40  ;;  %v5460_v58 = vrot.slane %v5181_v60, 5  ;;  %v13187_v37 = vld [vmem:[#allocation78_spill] sm:$0xff]  ;;  %v13188_v57 = vld [vmem:[#allocation75_spill] sm:$0xff] }
 0x557   :  { %v5479_v29 = vsel %vm5244_vm10, %v5478_v4, %v5477_v1  ;;  %v5140_v45 = vsel %vm5110_vm5, %v8420_v59, %v8415_v28  ;;  %v5200_v11 = vmax.f32 %v11986_v48, %v5156_v5  ;;  %7862 = vmatprep.subr.bf16.mxu1 %v8910_v25  ;;  %v5187_v38 = vmax.f32 %v11932_v7, %v5120_v39  ;;  %v13190_v28 = vld [vmem:[#allocation70_spill] sm:$0xff] }
 0x558   :  { %v5192_v56 = vmax.f32 %v11963_v31, %v5138_v12  ;;  %v5142_v54 = vsel %vm5110_vm5, %v8426_v46, %v8421_v0  ;;  %v8425_v24 = vunpack.i.l.bf16 %v8424_v55  ;;  %v5459_v6 = vsel %vm5235_vm7, %v5458_v20, %v5457_v13  ;;  %v8913_v20 = vld [vmem:[#allocation9 + $0x168] sm:$0xff]  }
 0x559   :  { %v5193_v60 = vmax.f32 %v13184_v30, %v5122_v26  ;;  %v5199_v34 = vmax.f32 %v13185_v27, %v5124_v2  ;;  %v5480_v17 = vrot.slane %v5200_v11, 2  ;;  %7839 = vmatpush3.bf16.msra.mxu0 %v8907_v33  ;;  %v5305_v48 = vrot.slane %v12234_v49, 5  ;;  %v8916_v13 = vld [vmem:[#allocation9 + $0x1a8] sm:$0xff]  }
 0x55a   :  { %v5198_v19 = vmax.f32 %v13186_v47, %v5140_v45  ;;  %v5126_v7 = vsel %vm5110_vm5, %v8421_v0, %v8425_v24  ;;  %v5158_v31 = vsel %vm5110_vm5, %v8425_v24, %v8426_v46  ;;  %7840 = vmatprep.subr.bf16.mxu0 %v8909_v9  ;;  %7863 = vmatpush3.bf16.msra.mxu1 %v8912_v10  ;;  %v5364_v51 = vrot.slane %v12240_v42, 7  ;;  %v8915_v26 = vld [vmem:[#allocation9 + $0x128] sm:$0xff]   ;;  %v8920_v0 = vld [vmem:[#allocation9 + $0x1b0] sm:$0xff]  }
 0x55b   :  { %v5481_v3 = vsel %vm5247_vm11, %v5480_v17, %v5479_v29  ;;  %v5204_v40 = vmax.f32 %v13187_v37, %v5142_v54  ;;  %v5206_v49 = vmax.f32 %v13188_v57, %v5158_v31  ;;  %7864 = vmatprep.subr.bf16.mxu1 %v8914_v53  ;;  %v13189_v52 = vrot.slane %v12308_v8, 5  ;;  %v8925_v57 = vld [vmem:[#allocation9 + $0x240] sm:$0xff]  }
 0x55c   :  { %v5461_v32 = vsel %vm5238_vm8, %v5460_v58, %v5459_v6  ;;  %v5462_v55 = vrot.slane %v5187_v38, 4  ;;  %v5450_v25 = vrot.slane %v5192_v56, 3  ;;  %v5464_v39 = vrot.slane %v5193_v60, 3  ;;  %v8922_v58 = vld [vmem:[#allocation9 + $0x1f8] sm:$0xff]  }
 0x55d   :  { %v12488_v21 = vsel %vm5250_vm12, %v13189_v52, %v12332_v50  ;;  %v5205_v59 = vmax.f32 %v13190_v28, %v5126_v7  ;;  %v5482_v1 = vrot.slane %v5206_v49, 1  ;;  %7841 = vmatpush3.bf16.msra.mxu0 %v8911_v16  ;;  %v13191_v12 = vrot.slane %v12085_v44, 4  ;;  %v8917_v50 = vld [vmem:[#allocation9 + $0x170] sm:$0xff]   ;;  %v8921_v60 = vld [vmem:[#allocation9 + $0x178] sm:$0xff]   ;;  %v8926_v16 = vld [vmem:[#allocation9 + $0x2c0] sm:$0xff]  }
 0x55e   :  { %v5466_v33 = vrot.slane %v5199_v34, 2  ;;  %v5452_v2 = vrot.slane %v5198_v19, 2  ;;  %7842 = vmatprep.subr.bf16.mxu0 %v8913_v20  ;;  %7865 = vmatpush3.bf16.msra.mxu1 %v8916_v13  ;;  %v5306_v5 = vsel %vm5244_vm10, %v5305_v48, %v12244_v18  ;;  %v5307_v46 = vrot.slane %v12265_v35, 4  ;;  %v13197_v48 = vld [vmem:[#allocation71_spill] sm:$0xff] }
 0x55f   :  { %v5405_v4 = vsel %vm5235_vm7, %v13191_v12, %v12223_v23  ;;  %v5454_v9 = vrot.slane %v5204_v40, 1  ;;  %v12500_v10 = vsel %vm5250_vm12, %v5482_v1, %v5481_v3  ;;  %7866 = vmatprep.subr.bf16.mxu1 %v8918_v14  ;;  %v5309_v29 = vrot.slane %v12289_v63, 3  ;;  %v13192_v23 = vld [vmem:[#allocation41_spill] sm:$0xff]  ;;  %v8928_v14 = vld [vmem:[#allocation9 + $0x280] sm:$0xff]  }
 0x560   :  { %v13193_v45 = vrot.slane %v12085_v44, 2  ;;  %v5382_v53 = vrot.slane %v12255_v15, 1  ;;  %v13194_v38 = vrot.slane %v12093_v22, 3  ;;  %v5410_v35 = vrot.slane %v12240_v42, 1  ;;  %v8919_v63 = vld [vmem:[#allocation9 + $0x130] sm:$0xff]   ;;  %v8924_v42 = vld [vmem:[#allocation9 + $0x1b8] sm:$0xff]  }
 0x561   :  { %v13195_v56 = vrot.slane %v12093_v22, 1  ;;  %v5468_v24 = vrot.slane %v5205_v59, 1  ;;  %7843 = vmatpush3.bf16.msra.mxu0 %v8915_v26  ;;  %v13196_v6 = vrot.slane %v12213_v61, 2  ;;  %v5366_v30 = vrot.slane %v12272_v36, 6  ;;  %v8927_v59 = vld [vmem:[#allocation9 + $0x200] sm:$0xff]   ;;  %v8929_v12 = vld [vmem:[#allocation9 + $0x248] sm:$0xff]  }
 0x562   :  { %v5360_v11 = vsel %vm5235_vm7, %v13193_v45, %v13192_v23  ;;  %v5407_v18 = vsel %vm5238_vm8, %v13194_v38, %v5405_v4  ;;  %7844 = vmatprep.subr.bf16.mxu0 %v8917_v50  ;;  %7867 = vmatpush3.bf16.msra.mxu1 %v8920_v0  ;;  %v5413_v22 = vrot.slane %v12292_v43, 7  ;;  %v5368_v34 = vrot.slane %v12292_v43, 5  ;;  %v8932_v4 = vld [vmem:[#allocation9 + $0x288] sm:$0xff]   ;;  %v8933_v50 = vld [vmem:[#allocation9 + $0x250] sm:$0xff]   ;;  %v8939_v23 = vld [vmem:[#allocation9 + $0x218] sm:$0xff]  }
 0x563   :  { %v5362_v54 = vsel %vm5238_vm8, %v13195_v56, %v5360_v11  ;;  %v5409_v44 = vsel %vm5241_vm9, %v13196_v6, %v5407_v18  ;;  %v5463_v17 = vsel %vm5241_vm9, %v5462_v55, %v5461_v32  ;;  %7868 = vmatprep.subr.bf16.mxu1 %v8922_v58  ;;  %v13198_v47 = vrot.slane %v12247_v62, 2  ;;  %v8923_v62 = vld [vmem:[#allocation9 + $0x138] sm:$0xff]   ;;  %v8936_v0 = vld [vmem:[#allocation9 + $0x290] sm:$0xff]   ;;  %v8941_v45 = vld [vmem:[#allocation9 + $0x260] sm:$0xff]  }
 0x564   :  { %v5363_v15 = vsel %vm5241_vm9, %v12213_v61, %v5362_v54  ;;  %v5385_v19 = vrot.slane %v12308_v8, 7  ;;  %v5465_v31 = vsel %vm5244_vm10, %v5464_v39, %v5463_v17  ;;  %v5411_v20 = vsel %vm5244_vm10, %v5410_v35, %v5409_v44  ;;  %v13199_v55 = vld [vmem:[#allocation46_spill] sm:$0xff]  ;;  %v8930_v39 = vld [vmem:[#allocation9 + $0x2c8] sm:$0xff]   ;;  %v8944_v11 = vld [vmem:[#allocation9 + $0x2a0] sm:$0xff]  }
 0x565   :  { %v5365_v27 = vsel %vm5244_vm10, %v5364_v51, %v5363_v15  ;;  %v5381_v61 = vsel %vm5241_vm9, %v13198_v47, %v13197_v48  ;;  %v5467_v43 = vsel %vm5247_vm11, %v5466_v33, %v5465_v31  ;;  %v5451_v51 = vsel %vm5244_vm10, %v5450_v25, %v12448_v41  ;;  %7845 = vmatpush3.bf16.msra.mxu0 %v8919_v63  ;;  %v8940_v58 = vld [vmem:[#allocation9 + $0x298] sm:$0xff]   ;;  %v8943_v38 = vld [vmem:[#allocation9 + $0x220] sm:$0xff]   ;;  %v8945_v18 = vld [vmem:[#allocation9 + $0x268] sm:$0xff]  }
 0x566   :  { %v5367_v7 = vsel %vm5247_vm11, %v5366_v30, %v5365_v27  ;;  %v5308_v3 = vsel %vm5247_vm11, %v5307_v46, %v5306_v5  ;;  %v5412_v8 = vsel %vm5247_vm11, %v12272_v36, %v5411_v20  ;;  %v12543_v37 = vsel %vm5250_vm12, %v5468_v24, %v5467_v43  ;;  %7846 = vmatprep.subr.bf16.mxu0 %v8921_v60  ;;  %v8938_v5 = vld [vmem:[#allocation9 + $0x2d8] sm:$0xff]   ;;  %v8935_v46 = vld [vmem:[#allocation9 + $0x210] sm:$0xff]   ;;  %v8948_v35 = vld [vmem:[#allocation9 + $0x2a8] sm:$0xff]  }
 0x567   :  { %v12534_v13 = vsel %vm5250_vm12, %v5368_v34, %v5367_v7  ;;  %v5453_v40 = vsel %vm5247_vm11, %v5452_v2, %v5451_v51  ;;  %7869 = vmatpush3.bf16.msra.mxu1 %v8924_v42  ;;  %v5383_v49 = vsel %vm5244_vm10, %v5382_v53, %v5381_v61  ;;  %v5414_v41 = vsel %vm5250_vm12, %v5413_v22, %v5412_v8  ;;  %v8931_v2 = vld [vmem:[#allocation9 + $0x208] sm:$0xff]   ;;  %v8950_v56 = vld [vmem:[#allocation9 + $0x2f0] sm:$0xff]   ;;  %v8954_v6 = vld [vmem:[#allocation9 + $0x2f8] sm:$0xff]  }
 0x568   :  { %v12549_v52 = vsel %vm5250_vm12, %v5454_v9, %v5453_v40  ;;  %v5493_v32 = vpack.c.bf16 %v12488_v21, %v12488_v21  ;;  %v5310_v36 = vsel %vm5250_vm12, %v5309_v29, %v5308_v3  ;;  %7898 = vmatprep.subr.bf16.mxu1 %v8926_v16  ;;  %v5384_v25 = vsel %vm5247_vm11, %v13199_v55, %v5383_v49  ;;  %v8934_v21 = vld [vmem:[#allocation9 + $0x2d0] sm:$0xff]   ;;  %v8937_v9 = vld [vmem:[#allocation9 + $0x258] sm:$0xff]   ;;  %v8942_v29 = vld [vmem:[#allocation9 + $0x2e0] sm:$0xff]  }
 0x569   :  { %v5386_v28 = vsel %vm5250_vm12, %v5385_v19, %v5384_v25  ;;  %7847 = vmatpush3.bf16.msra.mxu0 %v8923_v62  ;;  %v5498_v1 = vpack.c.bf16 %v5414_v41, %v5414_v41  ;;  %v5491_v26 = vpack.c.bf16 %v5310_v36, %v5310_v36  ;;  %v8946_v53 = vld [vmem:[#allocation9 + $0x2e8] sm:$0xff]   ;;  %v8949_v24 = vld [vmem:[#allocation9 + $0x270] sm:$0xff]   ;;  %v8953_v15 = vld [vmem:[#allocation9 + $0x278] sm:$0xff]   ;;  %v9192_v17 = vmov 0.0  }
 0x56a   :  { %6622 = vmatmul.mubr.bf16.vlgmr.msra.gmra.mrb[4].mxu1 %v5493_v32  ;;  %7876 = vmatprep.subr.bf16.mxu0 %v8925_v57  ;;  %v5496_v33 = vpack.c.bf16 %v5386_v28, %v5386_v28  ;;  %v8947_v54 = vld [vmem:[#allocation9 + $0x228] sm:$0xff]   ;;  %v8952_v63 = vld [vmem:[#allocation9 + $0x2b0] sm:$0xff]   ;;  %v8956_v30 = vld [vmem:[#allocation9 + $0x2b8] sm:$0xff]   ;;  %v5495_v48 = vpack.c.bf16 %v12534_v13, %v12534_v13  ;;  %v5500_v19 = vpack.c.bf16 %v12543_v37, %v12543_v37 }
 0x56b   :  { %7899 = vmatpush3.bf16.msra.mxu1 %v8928_v14  ;;  %6701 = vmatprep.mubr.bf16.mxu1 %v5498_v1  ;;  %v8951_v44 = vld [vmem:[#allocation9 + $0x230] sm:$0xff]   ;;  %v8955_v60 = vld [vmem:[#allocation9 + $0x238] sm:$0xff]   ;;  %v8957_v42 = vld [vmem:[#allocation9 + $0x340] sm:$0xff]   ;;  %v5499_v28 = vpack.c.bf16 %v12549_v52, %v12549_v52 }
 0x56c   :  { %7900 = vmatprep.subr.bf16.mxu1 %v8930_v39  ;;  %6582 = vmatmul.mubr.bf16.vlgmr.msra.gmra.mrb[164].mxu0 %v5491_v26  ;;  %v8959_v22 = vld [vmem:[#allocation9 + $0x380] sm:$0xff]   ;;  %v8960_v47 = vld [vmem:[#allocation9 + $0x348] sm:$0xff]   ;;  %v8963_v31 = vld [vmem:[#allocation9 + $0x350] sm:$0xff]   ;;  %v5501_v39 = vpack.c.bf16 %v12500_v10, %v12500_v10 }
 0x56d   :  { %7877 = vmatpush3.bf16.msra.mxu0 %v8927_v59  ;;  %6661 = vmatprep.mubr.bf16.mxu0 %v5496_v33  ;;  %v13200_v27 = vld [vmem:[#allocation20_spill] sm:$0xff]  ;;  %v8965_v20 = vld [vmem:[#allocation9 + $0x390] sm:$0xff]   ;;  %v8966_v43 = vld [vmem:[#allocation9 + $0x358] sm:$0xff]  }
 0x56e   :  { %7878 = vmatprep.subr.bf16.mxu0 %v8929_v12  ;;  %v5497_v34 = vpack.c.bf16 %v13200_v27, %v13200_v27  ;;  %v8958_v16 = vld [vmem:[#allocation9 + $0x300] sm:$0xff]   ;;  %v8962_v61 = vld [vmem:[#allocation9 + $0x388] sm:$0xff]   ;;  %v8964_v13 = vld [vmem:[#allocation9 + $0x310] sm:$0xff]  }
 0x56f   :  { %7901 = vmatpush3.bf16.msra.mxu1 %v8932_v4  ;;  %v8961_v7 = vld [vmem:[#allocation9 + $0x308] sm:$0xff]   ;;  %v8968_v51 = vld [vmem:[#allocation9 + $0x398] sm:$0xff]   ;;  %v8969_v3 = vld [vmem:[#allocation9 + $0x360] sm:$0xff]  }
 0x570   :  { %7902 = vmatprep.subr.bf16.mxu1 %v8934_v21  ;;  %v8967_v62 = vld [vmem:[#allocation9 + $0x318] sm:$0xff]   ;;  %v8971_v8 = vld [vmem:[#allocation9 + $0x3a0] sm:$0xff]   ;;  %v8972_v40 = vld [vmem:[#allocation9 + $0x368] sm:$0xff]  }
 0x571   :  { %7879 = vmatpush3.bf16.msra.mxu0 %v8931_v2  ;;  %v8970_v37 = vld [vmem:[#allocation9 + $0x320] sm:$0xff]   ;;  %v8974_v57 = vld [vmem:[#allocation9 + $0x3a8] sm:$0xff]   ;;  %v8975_v14 = vld [vmem:[#allocation9 + $0x370] sm:$0xff]  }
 0x572   :  { %7880 = vmatprep.subr.bf16.mxu0 %v8933_v50  ;;  %v8973_v49 = vld [vmem:[#allocation9 + $0x328] sm:$0xff]   ;;  %v8977_v41 = vld [vmem:[#allocation9 + $0x3b0] sm:$0xff]   ;;  %v8978_v36 = vld [vmem:[#allocation9 + $0x378] sm:$0xff]  }
 0x573   :  { %7903 = vmatpush3.bf16.msra.mxu1 %v8936_v0  ;;  %v8976_v32 = vld [vmem:[#allocation9 + $0x330] sm:$0xff]   ;;  %v8980_v55 = vld [vmem:[#allocation9 + $0x3b8] sm:$0xff]   ;;  %v8981_v59 = vld [vmem:[#allocation12] sm:$0xff]  }
 0x574   :  { %7904 = vmatprep.subr.bf16.mxu1 %v8938_v5  ;;  %v8979_v25 = vld [vmem:[#allocation9 + $0x338] sm:$0xff]   ;;  %v8982_v1 = vld [vmem:[#allocation12 + $0x8] sm:$0xff]   ;;  %v8985_v52 = vld [vmem:[#allocation12 + $0x20] sm:$0xff]  }
 0x575   :  { %7881 = vmatpush3.bf16.msra.mxu0 %v8935_v46  ;;  %v8983_v26 = vld [vmem:[#allocation12 + $0x10] sm:$0xff]   ;;  %v8984_v10 = vld [vmem:[#allocation12 + $0x18] sm:$0xff]   ;;  %v8986_v12 = vld [vmem:[#allocation12 + $0x28] sm:$0xff]  }
 0x576   :  { %7882 = vmatprep.subr.bf16.mxu0 %v8937_v9  ;;  %v8987_v4 = vld [vmem:[#allocation12 + $0x30] sm:$0xff]   ;;  %v8988_v33 = vld [vmem:[#allocation12 + $0x38] sm:$0xff]  }
 0x577   :  { %7905 = vmatpush3.bf16.msra.mxu1 %v8940_v58  ;;  %v7274_v9 = vld [vmem:[#allocation10] ss:$0 sm:$0xff] }
 0x578   :  { %7906 = vmatprep.subr.bf16.mxu1 %v8942_v29 }
 0x579   :  { %7883 = vmatpush3.bf16.msra.mxu0 %v8939_v23 }
 0x57a   :  { %7884 = vmatprep.subr.bf16.mxu0 %v8941_v45 }
 0x57b   :  { %7907 = vmatpush3.bf16.msra.mxu1 %v8944_v11 }
 0x57c   :  { %7908 = vmatprep.subr.bf16.mxu1 %v8946_v53 }
 0x57d   :  { %7885 = vmatpush3.bf16.msra.mxu0 %v8943_v38 }
 0x57e   :  { %7886 = vmatprep.subr.bf16.mxu0 %v8945_v18 }
 0x57f   :  { %7909 = vmatpush3.bf16.msra.mxu1 %v8948_v35 }
 0x580   :  { %7910 = vmatprep.subr.bf16.mxu1 %v8950_v56 }
 0x581   :  { %7887 = vmatpush3.bf16.msra.mxu0 %v8947_v54 }
 0x582   :  { %7888 = vmatprep.subr.bf16.mxu0 %v8949_v24 }
 0x583   :  { %7911 = vmatpush3.bf16.msra.mxu1 %v8952_v63 }
 0x584   :  { %7912 = vmatprep.subr.bf16.mxu1 %v8954_v6 }
 0x585   :  { %7889 = vmatpush3.bf16.msra.mxu0 %v8951_v44 }
 0x586   :  { %7890 = vmatprep.subr.bf16.mxu0 %v8953_v15 }
 0x587   :  { %7913 = vmatpush3.bf16.msra.mxu1 %v8956_v30 }
 0x588   :  { %7960 = vmatprep.subr.bf16.mxu1 %v9192_v17 }
 0x589   :  { %7891 = vmatpush3.bf16.msra.mxu0 %v8955_v60 }
 0x58a   :  { %6702 = vmatmul.mubr.bf16.vlgmr.msra.gmra.mrb[8].mxu1 %v5497_v34  ;;  %7920 = vmatprep.subr.bf16.mxu0 %v8957_v42 }
 0x58b   :  { %7961 = vmatpush3.bf16.msra.mxu1 %v8959_v22  ;;  %7976 = vmatprep.mubr.msk.bf16.mxu1 %vm9193_vm13, %v9192_v17 }
 0x58c   :  { %7962 = vmatprep.subr.bf16.mxu1 %v9192_v17  ;;  %6662 = vmatmul.mubr.bf16.vlgmr.msra.gmra.mrb[168].mxu0 %v5495_v48 }
 0x58d   :  { %7921 = vmatpush3.bf16.msra.mxu0 %v8958_v16  ;;  %6741 = vmatprep.mubr.bf16.mxu0 %v5500_v19 }
 0x58e   :  { %7922 = vmatprep.subr.bf16.mxu0 %v8960_v47 }
 0x58f   :  { %7963 = vmatpush3.bf16.msra.mxu1 %v8962_v61 }
 0x590   :  { %7964 = vmatprep.subr.bf16.mxu1 %v9192_v17 }
 0x591   :  { %7923 = vmatpush3.bf16.msra.mxu0 %v8961_v7 }
 0x592   :  { %7924 = vmatprep.subr.bf16.mxu0 %v8963_v31 }
 0x593   :  { %7965 = vmatpush3.bf16.msra.mxu1 %v8965_v20 }
 0x594   :  { %7966 = vmatprep.subr.bf16.mxu1 %v9192_v17 }
 0x595   :  { %7925 = vmatpush3.bf16.msra.mxu0 %v8964_v13 }
 0x596   :  { %7926 = vmatprep.subr.bf16.mxu0 %v8966_v43 }
 0x597   :  { %7967 = vmatpush3.bf16.msra.mxu1 %v8968_v51 }
 0x598   :  { %7968 = vmatprep.subr.bf16.mxu1 %v9192_v17 }
 0x599   :  { %7927 = vmatpush3.bf16.msra.mxu0 %v8967_v62 }
 0x59a   :  { %7928 = vmatprep.subr.bf16.mxu0 %v8969_v3 }
 0x59b   :  { %7969 = vmatpush3.bf16.msra.mxu1 %v8971_v8 }
 0x59c   :  { %7970 = vmatprep.subr.bf16.mxu1 %v9192_v17 }
 0x59d   :  { %7929 = vmatpush3.bf16.msra.mxu0 %v8970_v37 }
 0x59e   :  { %7930 = vmatprep.subr.bf16.mxu0 %v8972_v40 }
 0x59f   :  { %7971 = vmatpush3.bf16.msra.mxu1 %v8974_v57 }
 0x5a0   :  { %7972 = vmatprep.subr.bf16.mxu1 %v9192_v17 }
 0x5a1   :  { %7931 = vmatpush3.bf16.msra.mxu0 %v8973_v49 }
 0x5a2   :  { %7932 = vmatprep.subr.bf16.mxu0 %v8975_v14 }
 0x5a3   :  { %7973 = vmatpush3.bf16.msra.mxu1 %v8977_v41 }
 0x5a4   :  { %7974 = vmatprep.subr.bf16.mxu1 %v9192_v17 }
 0x5a5   :  { %7933 = vmatpush3.bf16.msra.mxu0 %v8976_v32  ;;  %v7395_v32 = vld [vmem:[#allocation13] ss:$0 sm:$0xff] }
 0x5a6   :  { %7934 = vmatprep.subr.bf16.mxu0 %v8978_v36 }
 0x5a7   :  { %7975 = vmatpush3.bf16.msra.mxu1 %v8980_v55 }
 0x5a9   :  { %7935 = vmatpush3.bf16.msra.mxu0 %v8979_v25 }
 0x5aa   :  { %7977 = vmatmul.mubr.bf16.vlgmr.msra.gmra.mrb[12].mxu1 %v5501_v39  ;;  %7980 = vmatprep.subr.bf16.mxu0 %v9192_v17 }
 0x5ac   :  { %6742 = vmatmul.mubr.bf16.vlgmr.msra.gmra.mrb[172].mxu0 %v5499_v28 }
 0x5ad   :  { %7996 = vmatprep.mubr.msk.bf16.mxu0 %vm9193_vm13, %v9192_v17  ;;  %7981 = vmatpush3.bf16.msra.mxu0 %v8981_v59 }
 0x5ae   :  { %7982 = vmatprep.subr.bf16.mxu0 %v9192_v17 }
 0x5b1   :  { %7983 = vmatpush3.bf16.msra.mxu0 %v8982_v1 }
 0x5b2   :  { %7984 = vmatprep.subr.bf16.mxu0 %v9192_v17 }
 0x5b5   :  { %7985 = vmatpush3.bf16.msra.mxu0 %v8983_v26 }
 0x5b6   :  { %7986 = vmatprep.subr.bf16.mxu0 %v9192_v17 }
 0x5b9   :  { %7987 = vmatpush3.bf16.msra.mxu0 %v8984_v10 }
 0x5ba   :  { %7988 = vmatprep.subr.bf16.mxu0 %v9192_v17 }
 0x5bd   :  { %7989 = vmatpush3.bf16.msra.mxu0 %v8985_v52 }
 0x5be   :  { %7990 = vmatprep.subr.bf16.mxu0 %v9192_v17 }
 0x5c1   :  { %7991 = vmatpush3.bf16.msra.mxu0 %v8986_v12 }
 0x5c2   :  { %7992 = vmatprep.subr.bf16.mxu0 %v9192_v17 }
 0x5c5   :  { %7993 = vmatpush3.bf16.msra.mxu0 %v8987_v4 }
 0x5c6   :  { %7994 = vmatprep.subr.bf16.mxu0 %v9192_v17 }
 0x5c9   :  { %7995 = vmatpush3.bf16.msra.mxu0 %v8988_v33 }
 0x61c   :  { %v7826_v21 = vpop.f32.mrb[0].mxu1 }
 0x61d   :  { %v7827_v2 = vpop.f32.mrb[1].mxu1 }
 0x61e   :  { %v7828_v50 = vadd.f32 %v7827_v2, %v7826_v21  ;;  %v7829_v0 = vpop.f32.mrb[2].mxu1 }
 0x61f   :  { %v7804_v5 = vpop.f32.mrb[160].mxu0  ;;  %v7830_v46 = vpop.f32.mrb[3].mxu1 }
 0x620   :  { %v7805_v58 = vpop.f32.mrb[161].mxu0 }
 0x621   :  { %v7806_v29 = vadd.f32 %v7805_v58, %v7804_v5  ;;  %v7807_v23 = vpop.f32.mrb[162].mxu0 }
 0x622   :  { %v7808_v45 = vpop.f32.mrb[163].mxu0 }
 0x623   :  { %v6504_v11 = vadd.f32 %v7806_v29, %v7274_v9 }
 0x625   :  { %v6544_v53 = vadd.f32 %v7828_v50, %v6504_v11 }
 0x63d   :  { %v7870_v38 = vpop.f32.mrb[4].mxu1 }
 0x63e   :  { %v7871_v18 = vpop.f32.mrb[5].mxu1 }
 0x63f   :  { %v7872_v35 = vadd.f32 %v7871_v18, %v7870_v38  ;;  %v7873_v56 = vpop.f32.mrb[6].mxu1  ;;  %v7848_v54 = vpop.f32.mrb[164].mxu0 }
 0x640   :  { %v7874_v24 = vpop.f32.mrb[7].mxu1  ;;  %v7849_v63 = vpop.f32.mrb[165].mxu0 }
 0x641   :  { %v7850_v6 = vadd.f32 %v7849_v63, %v7848_v54  ;;  %v7851_v44 = vpop.f32.mrb[166].mxu0 }
 0x642   :  { %v7852_v15 = vpop.f32.mrb[167].mxu0 }
 0x643   :  { %v6584_v30 = vadd.f32 %v7850_v6, %v6544_v53 }
 0x645   :  { %v6624_v60 = vadd.f32 %v7872_v35, %v6584_v30 }
 0x65d   :  { %v7914_v42 = vpop.f32.mrb[8].mxu1 }
 0x65e   :  { %v7915_v22 = vpop.f32.mrb[9].mxu1 }
 0x65f   :  { %v7916_v27 = vadd.f32 %v7915_v22, %v7914_v42  ;;  %v7917_v34 = vpop.f32.mrb[10].mxu1  ;;  %v7892_v17 = vpop.f32.mrb[168].mxu0 }
 0x660   :  { %v7918_v16 = vpop.f32.mrb[11].mxu1  ;;  %v7893_v48 = vpop.f32.mrb[169].mxu0 }
 0x661   :  { %v7894_v47 = vadd.f32 %v7893_v48, %v7892_v17  ;;  %v7895_v61 = vpop.f32.mrb[170].mxu0 }
 0x662   :  { %v7896_v19 = vpop.f32.mrb[171].mxu0 }
 0x663   :  { %v6664_v7 = vadd.f32 %v7894_v47, %v6624_v60 }
 0x665   :  { %v6704_v31 = vadd.f32 %v7916_v27, %v6664_v7 }
 0x67d   :  { %v6783_v20 = vpop.f32.mrb[12].mxu1 }
 0x67e   :  { %v7978_v13 = vpop.f32.mrb[13].mxu1 }
 0x67f   :  { %v6786_v43 = vpop.f32.mrb[14].mxu1  ;;  %v7936_v51 = vpop.f32.mrb[172].mxu0 }
 0x680   :  { %v7979_v62 = vpop.f32.mrb[15].mxu1  ;;  %v7937_v3 = vpop.f32.mrb[173].mxu0 }
 0x681   :  { %v7938_v8 = vadd.f32 %v7937_v3, %v7936_v51  ;;  %v7939_v37 = vpop.f32.mrb[174].mxu0 }
 0x682   :  { %v7940_v40 = vpop.f32.mrb[175].mxu0 }
 0x683   :  { %v6744_v57 = vadd.f32 %v7938_v8, %v6704_v31 }
 0x685   :  { %v6784_v49 = vadd.f32 %v6783_v20, %v6744_v57 }
 0x687   :  { %v6789_v14 = vmax.f32 %v6784_v49, 0.0 }
 0x689   :  { %v6790_v41 = vpack.c.bf16 %v6789_v14, %v6789_v14 }
 0x68b   :  { %7997 = vmatmul.mubr.bf16.vlgmr.msra.gmra.mrb[176].mxu0 %v6790_v41 }
 0x75e   :  { %v6896_v36 = vpop.f32.mrb[176].mxu0 }
 0x75f   :  { %v6897_v55 = vadd.f32 %v7395_v32, %v6896_v36  ;;  %v7998_v25 = vpop.f32.mrb[177].mxu0 }
 0x760   :  { %v6899_v39 = vpop.f32.mrb[178].mxu0 }
 0x761   :  { %6902 = vst [vmem:[%s12599_s9] sm:$0xff] %v6897_v55  ;;  %v7999_v28 = vpop.f32.mrb[179].mxu0 }
 0x762   :  { %6907 = vsyncpa [#allocation3], 1 }
 0x763   :  { %6908 = vsyncpa [#allocation5], 1 }
 0x764   :  { %6909 = vsyncpa [#allocation8], 1 }
 0x765   :  { %6910 = vsyncpa [#allocation11], 1 }
 0x766   :  { %6911 = vsyncpa [#allocation14], 1 }

</bundles_post_ra>
